<compile_context>
chip_gen: v7x
topology: tpu7x:2x2x1
jax: 0.10.0
libtpu: 0.0.40
codegen_flags: <defaults>
</compile_context>

<pallas_src>
import jax
import jax.numpy as jnp
from jax import lax
from jax.experimental import pallas as pl
from jax.experimental.pallas import tpu as pltpu

NUM_FILTERS = 16
D_OUT = 12          # filter output rows; 12*12 = 144 matches fc_w1 (144, 10)
NUM_CLASSES = 10


def _round_up(x, m):
    return ((x + m - 1) // m) * m


def _cdiv(a, b):
    return -(-a // b)


def _lane_tile(B):
    """Batch tile on the 128-lane axis.  cdiv grid bounds padding to < one tile;
    once B > TB there are >=2 grid steps so both v7x TensorCores get work."""
    if B <= 256:
        TB = 128
    elif B <= 2048:
        TB = 256
    else:
        TB = 512
    steps = _cdiv(B, TB)
    return TB, steps, steps * TB


# ---------------- Kernel A: Y = W_all @ X   (lane-dense, blocked on B*Q) --------
def _proj_filters_kernel(w_ref, x_ref, o_ref):
    # w_ref: (F*d, D_in)   x_ref: (D_in, TN)   o_ref: (F*d, TN), TN % 128 == 0
    o_ref[...] = jnp.dot(w_ref[...], x_ref[...],
                         preferred_element_type=jnp.float32)


def proj_filters(w_all_2d, x, use_bf16=False):
    """x: (B, D_in, Q) -> (B, F*d, Q) with a single lane-dense matmul."""
    B, D_in, Q = x.shape
    FD = w_all_2d.shape[0]
    N = B * Q
    # Put B*Q on the lane axis (unmasked 128-wide stores, decent MXU N dim).
    xt = jnp.transpose(x, (1, 0, 2)).reshape(D_in, N)        # (D_in, B*Q)
    # HBM-bound: big lane tiles (cap 4096 ~= 6.8 MB double-buffered VMEM, fits
    # every generation's scoped default); cdiv grid keeps padding < one tile.
    TN = min(_round_up(N, 128), 4096)
    steps = _cdiv(N, TN)
    N_pad = steps * TN
    if N_pad != N:
        xt = jnp.pad(xt, ((0, 0), (0, N_pad - N)))
    w = w_all_2d
    if use_bf16:
        # Optional HBM-traffic halving; diverges from torch.FloatTensor numerics.
        w = w.astype(jnp.bfloat16)
        xt = xt.astype(jnp.bfloat16)

    y = pl.pallas_call(
        _proj_filters_kernel,
        out_shape=jax.ShapeDtypeStruct((FD, N_pad), jnp.float32),
        grid=(steps,),
        in_specs=[
            pl.BlockSpec((FD, D_in), lambda n: (0, 0)),      # weights resident
            pl.BlockSpec((D_in, TN), lambda n: (0, n)),
        ],
        out_specs=pl.BlockSpec((FD, TN), lambda n: (0, n)),
        compiler_params=pltpu.CompilerParams(dimension_semantics=("parallel",)),
    )(w, xt)

    y = y[:, :N].reshape(FD, B, Q)                           # (F*d, B, Q)
    return jnp.transpose(y, (1, 0, 2))                       # (B, F*d, Q)


# ------ Kernel B: X4[b] = Qcat[b] Qcat[b]^T, batch on lanes (VPU gram) ---------
def _projmap_pool_kernel(q_ref, o_ref):
    # q_ref: (d, K, TB)   o_ref: (d*d, TB)
    # o[i*d+j, :] = sum_k q[i, k, :] * q[j, k, :]   (symmetric: compute j >= i)
    d = q_ref.shape[0]
    for i in range(d):
        qi = q_ref[i]                                        # (K, TB)
        for j in range(i, d):
            r = jnp.sum(qi * q_ref[j], axis=0, keepdims=True)   # (1, TB)
            o_ref[pl.ds(i * d + j, 1), :] = r
            if j != i:
                o_ref[pl.ds(j * d + i, 1), :] = r


def projmap_pool(q_all):
    """q_all: (B, F, d, Q) -> (B, d, d) = sum_f Q_f Q_f^T (K = F*Q folded)."""
    B, F_, d, Q = q_all.shape
    K = F_ * Q
    qT = jnp.transpose(q_all, (2, 1, 3, 0)).reshape(d, K, B)   # (d, F*Q, B)
    TB, steps, B_pad = _lane_tile(B)
    if B_pad != B:
        qT = jnp.pad(qT, ((0, 0), (0, 0), (0, B_pad - B)))

    out = pl.pallas_call(
        _projmap_pool_kernel,
        out_shape=jax.ShapeDtypeStruct((d * d, B_pad), jnp.float32),
        grid=(steps,),
        in_specs=[pl.BlockSpec((d, K, TB), lambda i: (0, 0, i))],
        out_specs=pl.BlockSpec((d * d, TB), lambda i: (0, i)),
        compiler_params=pltpu.CompilerParams(dimension_semantics=("parallel",)),
    )(qT)
    x4 = out[:, :B].reshape(d, d, B)
    return jnp.transpose(x4, (2, 0, 1))                      # (B, d, d) for eigh


# ---- Fused Kernel C+D: X6 gram (VPU) + FC + log_softmax, batch on lanes -------
def _projmap_fc_kernel(u_ref, wT_ref, bT_ref, o_ref, fc_ref):
    # u_ref: (d, Q, TB)  wT_ref: (C, d*d)  bT_ref: (C, 1)
    # o_ref: (C, TB)     fc_ref: (d*d, TB) VMEM scratch (flattened X6^T)
    d = u_ref.shape[0]
    for i in range(d):
        ui = u_ref[i]                                        # (Q, TB)
        for j in range(i, d):
            r = jnp.sum(ui * u_ref[j], axis=0, keepdims=True)   # (1, TB)
            fc_ref[pl.ds(i * d + j, 1), :] = r
            if j != i:
                fc_ref[pl.ds(j * d + i, 1), :] = r
    # logits^T = W^T (C, d*d) @ FC^T (d*d, TB) + b^T   -> lane-dense (C, TB)
    logits = jnp.dot(wT_ref[...], fc_ref[...],
                     preferred_element_type=jnp.float32) + bT_ref[...]
    m = jnp.max(logits, axis=0, keepdims=True)
    z = logits - m
    lse = jnp.log(jnp.sum(jnp.exp(z), axis=0, keepdims=True))
    o_ref[...] = z - lse


def projmap_fc_logsoftmax(x5, fc_w1, fc_b1):
    """x5: (B, d, Q) -> log_softmax(flatten(X5 X5^T) @ fc_w1 + fc_b1): (B, C)."""
    B, d, Q = x5.shape
    C = fc_w1.shape[1]
    uT = jnp.transpose(x5, (1, 2, 0))                        # (d, Q, B)
    wT = jnp.transpose(fc_w1)                                # (C, d*d)
    bT = jnp.reshape(fc_b1, (1, C)).T                        # (C, 1)
    TB, steps, B_pad = _lane_tile(B)
    if B_pad != B:
        uT = jnp.pad(uT, ((0, 0), (0, 0), (0, B_pad - B)))

    out = pl.pallas_call(
        _projmap_fc_kernel,
        out_shape=jax.ShapeDtypeStruct((C, B_pad), jnp.float32),
        grid=(steps,),
        in_specs=[
            pl.BlockSpec((d, Q, TB), lambda i: (0, 0, i)),
            pl.BlockSpec((C, d * d), lambda i: (0, 0)),
            pl.BlockSpec((C, 1), lambda i: (0, 0)),
        ],
        out_specs=pl.BlockSpec((C, TB), lambda i: (0, i)),
        scratch_shapes=[pltpu.VMEM((d * d, TB), jnp.float32)],
        compiler_params=pltpu.CompilerParams(dimension_semantics=("parallel",)),
    )(uT, wT, bT)
    return jnp.transpose(out[:, :B])                         # (B, C)


# ------------------------------- Full forward ----------------------------------
def grnet_forward(x, params, use_bf16_proj=False):
    filters = params["filters"]                              # (F, d, D_in)
    F_, d, D_in = filters.shape
    B, _, Q = x.shape

    # X1: all filter projections in a single lane-dense matmul.
    x1 = proj_filters(filters.reshape(F_ * d, D_in), x, use_bf16_proj)  # (B, F*d, Q)
    x1 = x1.reshape(B, F_, d, Q)

    # TODO(synk): QR re-orthonormalization (utils.call_reorthmap) has no Pallas
    # equivalent; computed with jnp.linalg.qr on the JAX side.
    q_all, _ = jnp.linalg.qr(x1)                              # (B, F, d, Q)

    x4 = projmap_pool(q_all)                                  # (B, d, d)

    # TODO(synk): symmetric eigendecomposition (utils.call_orthmap) has no Pallas
    # equivalent; computed with jnp.linalg.eigh on the JAX side.
    _, evecs = jnp.linalg.eigh(x4)
    x5 = evecs[..., -Q:]                                      # top-Q eigvecs (B, d, Q)

    # X6 = X5 X5^T, flatten, FC, log_softmax — all fused in one pallas_call.
    return projmap_fc_logsoftmax(x5, params["fc_w1"], params["fc_b1"])  # (B, C)


def init_params(key, d_in):
    k1, k2, k3 = jax.random.split(key, 3)
    return {
        "filters": jax.random.normal(k1, (NUM_FILTERS, D_OUT, d_in), jnp.float32),
        "fc_w1": jax.random.normal(k2, (D_OUT * D_OUT, NUM_CLASSES), jnp.float32),
        "fc_b1": jax.random.normal(k3, (1, NUM_CLASSES), jnp.float32),
    }


if __name__ == "__main__":
    B, D_IN, Q = 2, 16, 4
    key = jax.random.PRNGKey(0)
    kp, kx = jax.random.split(key)
    params = init_params(kp, D_IN)
    x = jax.random.normal(kx, (B, D_IN, Q), jnp.float32)

    fwd = jax.jit(grnet_forward)
    out = jax.block_until_ready(fwd(x, params))
    assert out.shape == (B, NUM_CLASSES)
    assert out.dtype == jnp.float32
    print("KERNEL_OK")
</pallas_src>

<mosaic_0001>
module attributes {stable_mosaic.version = 11 : i64} {
  func.func @_proj_filters_kernel(%arg0: i32, %arg1: memref<192x16xf32, #tpu.memory_space<vmem>>, %arg2: memref<16x128xf32, #tpu.memory_space<vmem>>, %arg3: memref<192x128xf32, #tpu.memory_space<vmem>>) attributes {dimension_semantics = [#tpu.dimension_semantics<parallel>], iteration_bounds = array<i64: 1>, scalar_prefetch = 0 : i64, scratch_operands = 0 : i64, tpu.core_type = #tpu.core_type<tc>, window_params = [{pipeline_mode = #tpu.pipeline_mode<synchronous>, transform_indices = @transform_0, window_bounds = array<i64: 192, 16>}, {transform_indices = @transform_1, window_bounds = array<i64: 16, 128>}, {transform_indices = @transform_2, window_bounds = array<i64: 192, 128>}]} {
    %c0 = arith.constant 0 : index
    %c0_0 = arith.constant 0 : index
    %0 = vector.load %arg1[%c0, %c0_0] : memref<192x16xf32, #tpu.memory_space<vmem>>, vector<192x16xf32>
    %c0_1 = arith.constant 0 : index
    %c0_2 = arith.constant 0 : index
    %1 = vector.load %arg2[%c0_1, %c0_2] : memref<16x128xf32, #tpu.memory_space<vmem>>, vector<16x128xf32>
    %cst = arith.constant dense<0.000000e+00> : vector<192x128xf32>
    %2 = tpu.matmul %0, %1, %cst {dimension_numbers = #tpu.dot_dimension_numbers<[1], [0], [0], [1], [0, 0, 1, 1], [], []>} : vector<192x16xf32>, vector<16x128xf32>, vector<192x128xf32> -> vector<192x128xf32>
    %c0_3 = arith.constant 0 : index
    %c0_4 = arith.constant 0 : index
    %3 = vector.load %arg3[%c0_3, %c0_4] : memref<192x128xf32, #tpu.memory_space<vmem>>, vector<192x128xf32>
    tpu.vector_store %arg3[%c0_3, %c0_4], %2 {strides = array<i32>} : memref<192x128xf32, #tpu.memory_space<vmem>>, vector<192x128xf32>,
    return
  }
  func.func @transform_0(%arg0: i32) -> (i32, i32) {
    %c0_i32 = arith.constant 0 : i32
    %c0_i32_0 = arith.constant 0 : i32
    %c0_i32_1 = arith.constant 0 : i32
    return %c0_i32, %c0_i32_0 : i32, i32
  }
  func.func @transform_1(%arg0: i32) -> (i32, i32) {
    %c0_i32 = arith.constant 0 : i32
    %c0_i32_0 = arith.constant 0 : i32
    return %c0_i32, %arg0 : i32, i32
  }
  func.func @transform_2(%arg0: i32) -> (i32, i32) {
    %c0_i32 = arith.constant 0 : i32
    %c0_i32_0 = arith.constant 0 : i32
    return %c0_i32, %arg0 : i32, i32
  }
}

module attributes {stable_mosaic.version = 11 : i64} {
  func.func @_projmap_pool_kernel(%arg0: i32, %arg1: memref<12x64x128xf32, #tpu.memory_space<vmem>>, %arg2: memref<144x128xf32, #tpu.memory_space<vmem>>) attributes {dimension_semantics = [#tpu.dimension_semantics<parallel>], iteration_bounds = array<i64: 1>, scalar_prefetch = 0 : i64, scratch_operands = 0 : i64, tpu.core_type = #tpu.core_type<tc>, window_params = [{transform_indices = @transform_0, window_bounds = array<i64: 12, 64, 128>}, {transform_indices = @transform_1, window_bounds = array<i64: 144, 128>}]} {
    %c0 = arith.constant 0 : index
    %c0_0 = arith.constant 0 : index
    %c0_1 = arith.constant 0 : index
    %0 = vector.load %arg1[%c0, %c0_0, %c0_1] : memref<12x64x128xf32, #tpu.memory_space<vmem>>, vector<1x64x128xf32>
    %1 = vector.shape_cast %0 : vector<1x64x128xf32> to vector<64x128xf32>
    %c0_2 = arith.constant 0 : index
    %c0_3 = arith.constant 0 : index
    %c0_4 = arith.constant 0 : index
    %2 = vector.load %arg1[%c0_2, %c0_3, %c0_4] : memref<12x64x128xf32, #tpu.memory_space<vmem>>, vector<1x64x128xf32>
    %3 = vector.shape_cast %2 : vector<1x64x128xf32> to vector<64x128xf32>
    %4 = arith.mulf %1, %3 : vector<64x128xf32>
    %cst = arith.constant dense<0.000000e+00> : vector<128xf32>
    %5 = vector.multi_reduction <add>, %4, %cst [0] : vector<64x128xf32> to vector<128xf32>
    %6 = vector.shape_cast %5 : vector<128xf32> to vector<1x128xf32>
    %c0_5 = arith.constant 0 : index
    %c0_6 = arith.constant 0 : index
    %7 = vector.load %arg2[%c0_5, %c0_6] : memref<144x128xf32, #tpu.memory_space<vmem>>, vector<1x128xf32>
    tpu.vector_store %arg2[%c0_5, %c0_6], %6 {strides = array<i32>} : memref<144x128xf32, #tpu.memory_space<vmem>>, vector<1x128xf32>,
    %c1 = arith.constant 1 : index
    %c0_7 = arith.constant 0 : index
    %c0_8 = arith.constant 0 : index
    %8 = vector.load %arg1[%c1, %c0_7, %c0_8] : memref<12x64x128xf32, #tpu.memory_space<vmem>>, vector<1x64x128xf32>
    %9 = vector.shape_cast %8 : vector<1x64x128xf32> to vector<64x128xf32>
    %10 = arith.mulf %1, %9 : vector<64x128xf32>
    %cst_9 = arith.constant dense<0.000000e+00> : vector<128xf32>
    %11 = vector.multi_reduction <add>, %10, %cst_9 [0] : vector<64x128xf32> to vector<128xf32>
    %12 = vector.shape_cast %11 : vector<128xf32> to vector<1x128xf32>
    %c1_10 = arith.constant 1 : index
    %c0_11 = arith.constant 0 : index
    %13 = vector.load %arg2[%c1_10, %c0_11] : memref<144x128xf32, #tpu.memory_space<vmem>>, vector<1x128xf32>
    tpu.vector_store %arg2[%c1_10, %c0_11], %12 {strides = array<i32>} : memref<144x128xf32, #tpu.memory_space<vmem>>, vector<1x128xf32>,
    %c12 = arith.constant 12 : index
    %c0_12 = arith.constant 0 : index
    %14 = vector.load %arg2[%c12, %c0_12] : memref<144x128xf32, #tpu.memory_space<vmem>>, vector<1x128xf32>
    tpu.vector_store %arg2[%c12, %c0_12], %12 {strides = array<i32>} : memref<144x128xf32, #tpu.memory_space<vmem>>, vector<1x128xf32>,
    %c2 = arith.constant 2 : index
    %c0_13 = arith.constant 0 : index
    %c0_14 = arith.constant 0 : index
    %15 = vector.load %arg1[%c2, %c0_13, %c0_14] : memref<12x64x128xf32, #tpu.memory_space<vmem>>, vector<1x64x128xf32>
    %16 = vector.shape_cast %15 : vector<1x64x128xf32> to vector<64x128xf32>
    %17 = arith.mulf %1, %16 : vector<64x128xf32>
    %cst_15 = arith.constant dense<0.000000e+00> : vector<128xf32>
    %18 = vector.multi_reduction <add>, %17, %cst_15 [0] : vector<64x128xf32> to vector<128xf32>
    %19 = vector.shape_cast %18 : vector<128xf32> to vector<1x128xf32>
    %c2_16 = arith.constant 2 : index
    %c0_17 = arith.constant 0 : index
    %20 = vector.load %arg2[%c2_16, %c0_17] : memref<144x128xf32, #tpu.memory_space<vmem>>, vector<1x128xf32>
    tpu.vector_store %arg2[%c2_16, %c0_17], %19 {strides = array<i32>} : memref<144x128xf32, #tpu.memory_space<vmem>>, vector<1x128xf32>,
    %c24 = arith.constant 24 : index
    %c0_18 = arith.constant 0 : index
    %21 = vector.load %arg2[%c24, %c0_18] : memref<144x128xf32, #tpu.memory_space<vmem>>, vector<1x128xf32>
    tpu.vector_store %arg2[%c24, %c0_18], %19 {strides = array<i32>} : memref<144x128xf32, #tpu.memory_space<vmem>>, vector<1x128xf32>,
    %c3 = arith.constant 3 : index
    %c0_19 = arith.constant 0 : index
    %c0_20 = arith.constant 0 : index
    %22 = vector.load %arg1[%c3, %c0_19, %c0_20] : memref<12x64x128xf32, #tpu.memory_space<vmem>>, vector<1x64x128xf32>
    %23 = vector.shape_cast %22 : vector<1x64x128xf32> to vector<64x128xf32>
    %24 = arith.mulf %1, %23 : vector<64x128xf32>
    %cst_21 = arith.constant dense<0.000000e+00> : vector<128xf32>
    %25 = vector.multi_reduction <add>, %24, %cst_21 [0] : vector<64x128xf32> to vector<128xf32>
    %26 = vector.shape_cast %25 : vector<128xf32> to vector<1x128xf32>
    %c3_22 = arith.constant 3 : index
    %c0_23 = arith.constant 0 : index
    %27 = vector.load %arg2[%c3_22, %c0_23] : memref<144x128xf32, #tpu.memory_space<vmem>>, vector<1x128xf32>
    tpu.vector_store %arg2[%c3_22, %c0_23], %26 {strides = array<i32>} : memref<144x128xf32, #tpu.memory_space<vmem>>, vector<1x128xf32>,
    %c36 = arith.constant 36 : index
    %c0_24 = arith.constant 0 : index
    %28 = vector.load %arg2[%c36, %c0_24] : memref<144x128xf32, #tpu.memory_space<vmem>>, vector<1x128xf32>
    tpu.vector_store %arg2[%c36, %c0_24], %26 {strides = array<i32>} : memref<144x128xf32, #tpu.memory_space<vmem>>, vector<1x128xf32>,
    %c4 = arith.constant 4 : index
    %c0_25 = arith.constant 0 : index
    %c0_26 = arith.constant 0 : index
    %29 = vector.load %arg1[%c4, %c0_25, %c0_26] : memref<12x64x128xf32, #tpu.memory_space<vmem>>, vector<1x64x128xf32>
    %30 = vector.shape_cast %29 : vector<1x64x128xf32> to vector<64x128xf32>
    %31 = arith.mulf %1, %30 : vector<64x128xf32>
    %cst_27 = arith.constant dense<0.000000e+00> : vector<128xf32>
    %32 = vector.multi_reduction <add>, %31, %cst_27 [0] : vector<64x128xf32> to vector<128xf32>
    %33 = vector.shape_cast %32 : vector<128xf32> to vector<1x128xf32>
    %c4_28 = arith.constant 4 : index
    %c0_29 = arith.constant 0 : index
    %34 = vector.load %arg2[%c4_28, %c0_29] : memref<144x128xf32, #tpu.memory_space<vmem>>, vector<1x128xf32>
    tpu.vector_store %arg2[%c4_28, %c0_29], %33 {strides = array<i32>} : memref<144x128xf32, #tpu.memory_space<vmem>>, vector<1x128xf32>,
    %c48 = arith.constant 48 : index
    %c0_30 = arith.constant 0 : index
    %35 = vector.load %arg2[%c48, %c0_30] : memref<144x128xf32, #tpu.memory_space<vmem>>, vector<1x128xf32>
    tpu.vector_store %arg2[%c48, %c0_30], %33 {strides = array<i32>} : memref<144x128xf32, #tpu.memory_space<vmem>>, vector<1x128xf32>,
    %c5 = arith.constant 5 : index
    %c0_31 = arith.constant 0 : index
    %c0_32 = arith.constant 0 : index
    %36 = vector.load %arg1[%c5, %c0_31, %c0_32] : memref<12x64x128xf32, #tpu.memory_space<vmem>>, vector<1x64x128xf32>
    %37 = vector.shape_cast %36 : vector<1x64x128xf32> to vector<64x128xf32>
    %38 = arith.mulf %1, %37 : vector<64x128xf32>
    %cst_33 = arith.constant dense<0.000000e+00> : vector<128xf32>
    %39 = vector.multi_reduction <add>, %38, %cst_33 [0] : vector<64x128xf32> to vector<128xf32>
    %40 = vector.shape_cast %39 : vector<128xf32> to vector<1x128xf32>
    %c5_34 = arith.constant 5 : index
    %c0_35 = arith.constant 0 : index
    %41 = vector.load %arg2[%c5_34, %c0_35] : memref<144x128xf32, #tpu.memory_space<vmem>>, vector<1x128xf32>
    tpu.vector_store %arg2[%c5_34, %c0_35], %40 {strides = array<i32>} : memref<144x128xf32, #tpu.memory_space<vmem>>, vector<1x128xf32>,
    %c60 = arith.constant 60 : index
    %c0_36 = arith.constant 0 : index
    %42 = vector.load %arg2[%c60, %c0_36] : memref<144x128xf32, #tpu.memory_space<vmem>>, vector<1x128xf32>
    tpu.vector_store %arg2[%c60, %c0_36], %40 {strides = array<i32>} : memref<144x128xf32, #tpu.memory_space<vmem>>, vector<1x128xf32>,
    %c6 = arith.constant 6 : index
    %c0_37 = arith.constant 0 : index
    %c0_38 = arith.constant 0 : index
    %43 = vector.load %arg1[%c6, %c0_37, %c0_38] : memref<12x64x128xf32, #tpu.memory_space<vmem>>, vector<1x64x128xf32>
    %44 = vector.shape_cast %43 : vector<1x64x128xf32> to vector<64x128xf32>
    %45 = arith.mulf %1, %44 : vector<64x128xf32>
    %cst_39 = arith.constant dense<0.000000e+00> : vector<128xf32>
    %46 = vector.multi_reduction <add>, %45, %cst_39 [0] : vector<64x128xf32> to vector<128xf32>
    %47 = vector.shape_cast %46 : vector<128xf32> to vector<1x128xf32>
    %c6_40 = arith.constant 6 : index
    %c0_41 = arith.constant 0 : index
    %48 = vector.load %arg2[%c6_40, %c0_41] : memref<144x128xf32, #tpu.memory_space<vmem>>, vector<1x128xf32>
    tpu.vector_store %arg2[%c6_40, %c0_41], %47 {strides = array<i32>} : memref<144x128xf32, #tpu.memory_space<vmem>>, vector<1x128xf32>,
    %c72 = arith.constant 72 : index
    %c0_42 = arith.constant 0 : index
    %49 = vector.load %arg2[%c72, %c0_42] : memref<144x128xf32, #tpu.memory_space<vmem>>, vector<1x128xf32>
    tpu.vector_store %arg2[%c72, %c0_42], %47 {strides = array<i32>} : memref<144x128xf32, #tpu.memory_space<vmem>>, vector<1x128xf32>,
    %c7 = arith.constant 7 : index
    %c0_43 = arith.constant 0 : index
    %c0_44 = arith.constant 0 : index
    %50 = vector.load %arg1[%c7, %c0_43, %c0_44] : memref<12x64x128xf32, #tpu.memory_space<vmem>>, vector<1x64x128xf32>
    %51 = vector.shape_cast %50 : vector<1x64x128xf32> to vector<64x128xf32>
    %52 = arith.mulf %1, %51 : vector<64x128xf32>
    %cst_45 = arith.constant dense<0.000000e+00> : vector<128xf32>
    %53 = vector.multi_reduction <add>, %52, %cst_45 [0] : vector<64x128xf32> to vector<128xf32>
    %54 = vector.shape_cast %53 : vector<128xf32> to vector<1x128xf32>
    %c7_46 = arith.constant 7 : index
    %c0_47 = arith.constant 0 : index
    %55 = vector.load %arg2[%c7_46, %c0_47] : memref<144x128xf32, #tpu.memory_space<vmem>>, vector<1x128xf32>
    tpu.vector_store %arg2[%c7_46, %c0_47], %54 {strides = array<i32>} : memref<144x128xf32, #tpu.memory_space<vmem>>, vector<1x128xf32>,
    %c84 = arith.constant 84 : index
    %c0_48 = arith.constant 0 : index
    %56 = vector.load %arg2[%c84, %c0_48] : memref<144x128xf32, #tpu.memory_space<vmem>>, vector<1x128xf32>
    tpu.vector_store %arg2[%c84, %c0_48], %54 {strides = array<i32>} : memref<144x128xf32, #tpu.memory_space<vmem>>, vector<1x128xf32>,
    %c8 = arith.constant 8 : index
    %c0_49 = arith.constant 0 : index
    %c0_50 = arith.constant 0 : index
    %57 = vector.load %arg1[%c8, %c0_49, %c0_50] : memref<12x64x128xf32, #tpu.memory_space<vmem>>, vector<1x64x128xf32>
    %58 = vector.shape_cast %57 : vector<1x64x128xf32> to vector<64x128xf32>
    %59 = arith.mulf %1, %58 : vector<64x128xf32>
    %cst_51 = arith.constant dense<0.000000e+00> : vector<128xf32>
    %60 = vector.multi_reduction <add>, %59, %cst_51 [0] : vector<64x128xf32> to vector<128xf32>
    %61 = vector.shape_cast %60 : vector<128xf32> to vector<1x128xf32>
    %c8_52 = arith.constant 8 : index
    %c0_53 = arith.constant 0 : index
    %62 = vector.load %arg2[%c8_52, %c0_53] : memref<144x128xf32, #tpu.memory_space<vmem>>, vector<1x128xf32>
    tpu.vector_store %arg2[%c8_52, %c0_53], %61 {strides = array<i32>} : memref<144x128xf32, #tpu.memory_space<vmem>>, vector<1x128xf32>,
    %c96 = arith.constant 96 : index
    %c0_54 = arith.constant 0 : index
    %63 = vector.load %arg2[%c96, %c0_54] : memref<144x128xf32, #tpu.memory_space<vmem>>, vector<1x128xf32>
    tpu.vector_store %arg2[%c96, %c0_54], %61 {strides = array<i32>} : memref<144x128xf32, #tpu.memory_space<vmem>>, vector<1x128xf32>,
    %c9 = arith.constant 9 : index
    %c0_55 = arith.constant 0 : index
    %c0_56 = arith.constant 0 : index
    %64 = vector.load %arg1[%c9, %c0_55, %c0_56] : memref<12x64x128xf32, #tpu.memory_space<vmem>>, vector<1x64x128xf32>
    %65 = vector.shape_cast %64 : vector<1x64x128xf32> to vector<64x128xf32>
    %66 = arith.mulf %1, %65 : vector<64x128xf32>
    %cst_57 = arith.constant dense<0.000000e+00> : vector<128xf32>
    %67 = vector.multi_reduction <add>, %66, %cst_57 [0] : vector<64x128xf32> to vector<128xf32>
    %68 = vector.shape_cast %67 : vector<128xf32> to vector<1x128xf32>
    %c9_58 = arith.constant 9 : index
    %c0_59 = arith.constant 0 : index
    %69 = vector.load %arg2[%c9_58, %c0_59] : memref<144x128xf32, #tpu.memory_space<vmem>>, vector<1x128xf32>
    tpu.vector_store %arg2[%c9_58, %c0_59], %68 {strides = array<i32>} : memref<144x128xf32, #tpu.memory_space<vmem>>, vector<1x128xf32>,
    %c108 = arith.constant 108 : index
    %c0_60 = arith.constant 0 : index
    %70 = vector.load %arg2[%c108, %c0_60] : memref<144x128xf32, #tpu.memory_space<vmem>>, vector<1x128xf32>
    tpu.vector_store %arg2[%c108, %c0_60], %68 {strides = array<i32>} : memref<144x128xf32, #tpu.memory_space<vmem>>, vector<1x128xf32>,
    %c10 = arith.constant 10 : index
    %c0_61 = arith.constant 0 : index
    %c0_62 = arith.constant 0 : index
    %71 = vector.load %arg1[%c10, %c0_61, %c0_62] : memref<12x64x128xf32, #tpu.memory_space<vmem>>, vector<1x64x128xf32>
    %72 = vector.shape_cast %71 : vector<1x64x128xf32> to vector<64x128xf32>
    %73 = arith.mulf %1, %72 : vector<64x128xf32>
    %cst_63 = arith.constant dense<0.000000e+00> : vector<128xf32>
    %74 = vector.multi_reduction <add>, %73, %cst_63 [0] : vector<64x128xf32> to vector<128xf32>
    %75 = vector.shape_cast %74 : vector<128xf32> to vector<1x128xf32>
    %c10_64 = arith.constant 10 : index
    %c0_65 = arith.constant 0 : index
    %76 = vector.load %arg2[%c10_64, %c0_65] : memref<144x128xf32, #tpu.memory_space<vmem>>, vector<1x128xf32>
    tpu.vector_store %arg2[%c10_64, %c0_65], %75 {strides = array<i32>} : memref<144x128xf32, #tpu.memory_space<vmem>>, vector<1x128xf32>,
    %c120 = arith.constant 120 : index
    %c0_66 = arith.constant 0 : index
    %77 = vector.load %arg2[%c120, %c0_66] : memref<144x128xf32, #tpu.memory_space<vmem>>, vector<1x128xf32>
    tpu.vector_store %arg2[%c120, %c0_66], %75 {strides = array<i32>} : memref<144x128xf32, #tpu.memory_space<vmem>>, vector<1x128xf32>,
    %c11 = arith.constant 11 : index
    %c0_67 = arith.constant 0 : index
    %c0_68 = arith.constant 0 : index
    %78 = vector.load %arg1[%c11, %c0_67, %c0_68] : memref<12x64x128xf32, #tpu.memory_space<vmem>>, vector<1x64x128xf32>
    %79 = vector.shape_cast %78 : vector<1x64x128xf32> to vector<64x128xf32>
    %80 = arith.mulf %1, %79 : vector<64x128xf32>
    %cst_69 = arith.constant dense<0.000000e+00> : vector<128xf32>
    %81 = vector.multi_reduction <add>, %80, %cst_69 [0] : vector<64x128xf32> to vector<128xf32>
    %82 = vector.shape_cast %81 : vector<128xf32> to vector<1x128xf32>
    %c11_70 = arith.constant 11 : index
    %c0_71 = arith.constant 0 : index
    %83 = vector.load %arg2[%c11_70, %c0_71] : memref<144x128xf32, #tpu.memory_space<vmem>>, vector<1x128xf32>
    tpu.vector_store %arg2[%c11_70, %c0_71], %82 {strides = array<i32>} : memref<144x128xf32, #tpu.memory_space<vmem>>, vector<1x128xf32>,
    %c132 = arith.constant 132 : index
    %c0_72 = arith.constant 0 : index
    %84 = vector.load %arg2[%c132, %c0_72] : memref<144x128xf32, #tpu.memory_space<vmem>>, vector<1x128xf32>
    tpu.vector_store %arg2[%c132, %c0_72], %82 {strides = array<i32>} : memref<144x128xf32, #tpu.memory_space<vmem>>, vector<1x128xf32>,
    %c1_73 = arith.constant 1 : index
    %c0_74 = arith.constant 0 : index
    %c0_75 = arith.constant 0 : index
    %85 = vector.load %arg1[%c1_73, %c0_74, %c0_75] : memref<12x64x128xf32, #tpu.memory_space<vmem>>, vector<1x64x128xf32>
    %86 = vector.shape_cast %85 : vector<1x64x128xf32> to vector<64x128xf32>
    %c1_76 = arith.constant 1 : index
    %c0_77 = arith.constant 0 : index
    %c0_78 = arith.constant 0 : index
    %87 = vector.load %arg1[%c1_76, %c0_77, %c0_78] : memref<12x64x128xf32, #tpu.memory_space<vmem>>, vector<1x64x128xf32>
    %88 = vector.shape_cast %87 : vector<1x64x128xf32> to vector<64x128xf32>
    %89 = arith.mulf %86, %88 : vector<64x128xf32>
    %cst_79 = arith.constant dense<0.000000e+00> : vector<128xf32>
    %90 = vector.multi_reduction <add>, %89, %cst_79 [0] : vector<64x128xf32> to vector<128xf32>
    %91 = vector.shape_cast %90 : vector<128xf32> to vector<1x128xf32>
    %c13 = arith.constant 13 : index
    %c0_80 = arith.constant 0 : index
    %92 = vector.load %arg2[%c13, %c0_80] : memref<144x128xf32, #tpu.memory_space<vmem>>, vector<1x128xf32>
    tpu.vector_store %arg2[%c13, %c0_80], %91 {strides = array<i32>} : memref<144x128xf32, #tpu.memory_space<vmem>>, vector<1x128xf32>,
    %c2_81 = arith.constant 2 : index
    %c0_82 = arith.constant 0 : index
    %c0_83 = arith.constant 0 : index
    %93 = vector.load %arg1[%c2_81, %c0_82, %c0_83] : memref<12x64x128xf32, #tpu.memory_space<vmem>>, vector<1x64x128xf32>
    %94 = vector.shape_cast %93 : vector<1x64x128xf32> to vector<64x128xf32>
    %95 = arith.mulf %86, %94 : vector<64x128xf32>
    %cst_84 = arith.constant dense<0.000000e+00> : vector<128xf32>
    %96 = vector.multi_reduction <add>, %95, %cst_84 [0] : vector<64x128xf32> to vector<128xf32>
    %97 = vector.shape_cast %96 : vector<128xf32> to vector<1x128xf32>
    %c14 = arith.constant 14 : index
    %c0_85 = arith.constant 0 : index
    %98 = vector.load %arg2[%c14, %c0_85] : memref<144x128xf32, #tpu.memory_space<vmem>>, vector<1x128xf32>
    tpu.vector_store %arg2[%c14, %c0_85], %97 {strides = array<i32>} : memref<144x128xf32, #tpu.memory_space<vmem>>, vector<1x128xf32>,
    %c25 = arith.constant 25 : index
    %c0_86 = arith.constant 0 : index
    %99 = vector.load %arg2[%c25, %c0_86] : memref<144x128xf32, #tpu.memory_space<vmem>>, vector<1x128xf32>
    tpu.vector_store %arg2[%c25, %c0_86], %97 {strides = array<i32>} : memref<144x128xf32, #tpu.memory_space<vmem>>, vector<1x128xf32>,
    %c3_87 = arith.constant 3 : index
    %c0_88 = arith.constant 0 : index
    %c0_89 = arith.constant 0 : index
    %100 = vector.load %arg1[%c3_87, %c0_88, %c0_89] : memref<12x64x128xf32, #tpu.memory_space<vmem>>, vector<1x64x128xf32>
    %101 = vector.shape_cast %100 : vector<1x64x128xf32> to vector<64x128xf32>
    %102 = arith.mulf %86, %101 : vector<64x128xf32>
    %cst_90 = arith.constant dense<0.000000e+00> : vector<128xf32>
    %103 = vector.multi_reduction <add>, %102, %cst_90 [0] : vector<64x128xf32> to vector<128xf32>
    %104 = vector.shape_cast %103 : vector<128xf32> to vector<1x128xf32>
    %c15 = arith.constant 15 : index
    %c0_91 = arith.constant 0 : index
    %105 = vector.load %arg2[%c15, %c0_91] : memref<144x128xf32, #tpu.memory_space<vmem>>, vector<1x128xf32>
    tpu.vector_store %arg2[%c15, %c0_91], %104 {strides = array<i32>} : memref<144x128xf32, #tpu.memory_space<vmem>>, vector<1x128xf32>,
    %c37 = arith.constant 37 : index
    %c0_92 = arith.constant 0 : index
    %106 = vector.load %arg2[%c37, %c0_92] : memref<144x128xf32, #tpu.memory_space<vmem>>, vector<1x128xf32>
    tpu.vector_store %arg2[%c37, %c0_92], %104 {strides = array<i32>} : memref<144x128xf32, #tpu.memory_space<vmem>>, vector<1x128xf32>,
    %c4_93 = arith.constant 4 : index
    %c0_94 = arith.constant 0 : index
    %c0_95 = arith.constant 0 : index
    %107 = vector.load %arg1[%c4_93, %c0_94, %c0_95] : memref<12x64x128xf32, #tpu.memory_space<vmem>>, vector<1x64x128xf32>
    %108 = vector.shape_cast %107 : vector<1x64x128xf32> to vector<64x128xf32>
    %109 = arith.mulf %86, %108 : vector<64x128xf32>
    %cst_96 = arith.constant dense<0.000000e+00> : vector<128xf32>
    %110 = vector.multi_reduction <add>, %109, %cst_96 [0] : vector<64x128xf32> to vector<128xf32>
    %111 = vector.shape_cast %110 : vector<128xf32> to vector<1x128xf32>
    %c16 = arith.constant 16 : index
    %c0_97 = arith.constant 0 : index
    %112 = vector.load %arg2[%c16, %c0_97] : memref<144x128xf32, #tpu.memory_space<vmem>>, vector<1x128xf32>
    tpu.vector_store %arg2[%c16, %c0_97], %111 {strides = array<i32>} : memref<144x128xf32, #tpu.memory_space<vmem>>, vector<1x128xf32>,
    %c49 = arith.constant 49 : index
    %c0_98 = arith.constant 0 : index
    %113 = vector.load %arg2[%c49, %c0_98] : memref<144x128xf32, #tpu.memory_space<vmem>>, vector<1x128xf32>
    tpu.vector_store %arg2[%c49, %c0_98], %111 {strides = array<i32>} : memref<144x128xf32, #tpu.memory_space<vmem>>, vector<1x128xf32>,
    %c5_99 = arith.constant 5 : index
    %c0_100 = arith.constant 0 : index
    %c0_101 = arith.constant 0 : index
    %114 = vector.load %arg1[%c5_99, %c0_100, %c0_101] : memref<12x64x128xf32, #tpu.memory_space<vmem>>, vector<1x64x128xf32>
    %115 = vector.shape_cast %114 : vector<1x64x128xf32> to vector<64x128xf32>
    %116 = arith.mulf %86, %115 : vector<64x128xf32>
    %cst_102 = arith.constant dense<0.000000e+00> : vector<128xf32>
    %117 = vector.multi_reduction <add>, %116, %cst_102 [0] : vector<64x128xf32> to vector<128xf32>
    %118 = vector.shape_cast %117 : vector<128xf32> to vector<1x128xf32>
    %c17 = arith.constant 17 : index
    %c0_103 = arith.constant 0 : index
    %119 = vector.load %arg2[%c17, %c0_103] : memref<144x128xf32, #tpu.memory_space<vmem>>, vector<1x128xf32>
    tpu.vector_store %arg2[%c17, %c0_103], %118 {strides = array<i32>} : memref<144x128xf32, #tpu.memory_space<vmem>>, vector<1x128xf32>,
    %c61 = arith.constant 61 : index
    %c0_104 = arith.constant 0 : index
    %120 = vector.load %arg2[%c61, %c0_104] : memref<144x128xf32, #tpu.memory_space<vmem>>, vector<1x128xf32>
    tpu.vector_store %arg2[%c61, %c0_104], %118 {strides = array<i32>} : memref<144x128xf32, #tpu.memory_space<vmem>>, vector<1x128xf32>,
    %c6_105 = arith.constant 6 : index
    %c0_106 = arith.constant 0 : index
    %c0_107 = arith.constant 0 : index
    %121 = vector.load %arg1[%c6_105, %c0_106, %c0_107] : memref<12x64x128xf32, #tpu.memory_space<vmem>>, vector<1x64x128xf32>
    %122 = vector.shape_cast %121 : vector<1x64x128xf32> to vector<64x128xf32>
    %123 = arith.mulf %86, %122 : vector<64x128xf32>
    %cst_108 = arith.constant dense<0.000000e+00> : vector<128xf32>
    %124 = vector.multi_reduction <add>, %123, %cst_108 [0] : vector<64x128xf32> to vector<128xf32>
    %125 = vector.shape_cast %124 : vector<128xf32> to vector<1x128xf32>
    %c18 = arith.constant 18 : index
    %c0_109 = arith.constant 0 : index
    %126 = vector.load %arg2[%c18, %c0_109] : memref<144x128xf32, #tpu.memory_space<vmem>>, vector<1x128xf32>
    tpu.vector_store %arg2[%c18, %c0_109], %125 {strides = array<i32>} : memref<144x128xf32, #tpu.memory_space<vmem>>, vector<1x128xf32>,
    %c73 = arith.constant 73 : index
    %c0_110 = arith.constant 0 : index
    %127 = vector.load %arg2[%c73, %c0_110] : memref<144x128xf32, #tpu.memory_space<vmem>>, vector<1x128xf32>
    tpu.vector_store %arg2[%c73, %c0_110], %125 {strides = array<i32>} : memref<144x128xf32, #tpu.memory_space<vmem>>, vector<1x128xf32>,
    %c7_111 = arith.constant 7 : index
    %c0_112 = arith.constant 0 : index
    %c0_113 = arith.constant 0 : index
    %128 = vector.load %arg1[%c7_111, %c0_112, %c0_113] : memref<12x64x128xf32, #tpu.memory_space<vmem>>, vector<1x64x128xf32>
    %129 = vector.shape_cast %128 : vector<1x64x128xf32> to vector<64x128xf32>
    %130 = arith.mulf %86, %129 : vector<64x128xf32>
    %cst_114 = arith.constant dense<0.000000e+00> : vector<128xf32>
    %131 = vector.multi_reduction <add>, %130, %cst_114 [0] : vector<64x128xf32> to vector<128xf32>
    %132 = vector.shape_cast %131 : vector<128xf32> to vector<1x128xf32>
    %c19 = arith.constant 19 : index
    %c0_115 = arith.constant 0 : index
    %133 = vector.load %arg2[%c19, %c0_115] : memref<144x128xf32, #tpu.memory_space<vmem>>, vector<1x128xf32>
    tpu.vector_store %arg2[%c19, %c0_115], %132 {strides = array<i32>} : memref<144x128xf32, #tpu.memory_space<vmem>>, vector<1x128xf32>,
    %c85 = arith.constant 85 : index
    %c0_116 = arith.constant 0 : index
    %134 = vector.load %arg2[%c85, %c0_116] : memref<144x128xf32, #tpu.memory_space<vmem>>, vector<1x128xf32>
    tpu.vector_store %arg2[%c85, %c0_116], %132 {strides = array<i32>} : memref<144x128xf32, #tpu.memory_space<vmem>>, vector<1x128xf32>,
    %c8_117 = arith.constant 8 : index
    %c0_118 = arith.constant 0 : index
    %c0_119 = arith.constant 0 : index
    %135 = vector.load %arg1[%c8_117, %c0_118, %c0_119] : memref<12x64x128xf32, #tpu.memory_space<vmem>>, vector<1x64x128xf32>
    %136 = vector.shape_cast %135 : vector<1x64x128xf32> to vector<64x128xf32>
    %137 = arith.mulf %86, %136 : vector<64x128xf32>
    %cst_120 = arith.constant dense<0.000000e+00> : vector<128xf32>
    %138 = vector.multi_reduction <add>, %137, %cst_120 [0] : vector<64x128xf32> to vector<128xf32>
    %139 = vector.shape_cast %138 : vector<128xf32> to vector<1x128xf32>
    %c20 = arith.constant 20 : index
    %c0_121 = arith.constant 0 : index
    %140 = vector.load %arg2[%c20, %c0_121] : memref<144x128xf32, #tpu.memory_space<vmem>>, vector<1x128xf32>
    tpu.vector_store %arg2[%c20, %c0_121], %139 {strides = array<i32>} : memref<144x128xf32, #tpu.memory_space<vmem>>, vector<1x128xf32>,
    %c97 = arith.constant 97 : index
    %c0_122 = arith.constant 0 : index
    %141 = vector.load %arg2[%c97, %c0_122] : memref<144x128xf32, #tpu.memory_space<vmem>>, vector<1x128xf32>
    tpu.vector_store %arg2[%c97, %c0_122], %139 {strides = array<i32>} : memref<144x128xf32, #tpu.memory_space<vmem>>, vector<1x128xf32>,
    %c9_123 = arith.constant 9 : index
    %c0_124 = arith.constant 0 : index
    %c0_125 = arith.constant 0 : index
    %142 = vector.load %arg1[%c9_123, %c0_124, %c0_125] : memref<12x64x128xf32, #tpu.memory_space<vmem>>, vector<1x64x128xf32>
    %143 = vector.shape_cast %142 : vector<1x64x128xf32> to vector<64x128xf32>
    %144 = arith.mulf %86, %143 : vector<64x128xf32>
    %cst_126 = arith.constant dense<0.000000e+00> : vector<128xf32>
    %145 = vector.multi_reduction <add>, %144, %cst_126 [0] : vector<64x128xf32> to vector<128xf32>
    %146 = vector.shape_cast %145 : vector<128xf32> to vector<1x128xf32>
    %c21 = arith.constant 21 : index
    %c0_127 = arith.constant 0 : index
    %147 = vector.load %arg2[%c21, %c0_127] : memref<144x128xf32, #tpu.memory_space<vmem>>, vector<1x128xf32>
    tpu.vector_store %arg2[%c21, %c0_127], %146 {strides = array<i32>} : memref<144x128xf32, #tpu.memory_space<vmem>>, vector<1x128xf32>,
    %c109 = arith.constant 109 : index
    %c0_128 = arith.constant 0 : index
    %148 = vector.load %arg2[%c109, %c0_128] : memref<144x128xf32, #tpu.memory_space<vmem>>, vector<1x128xf32>
    tpu.vector_store %arg2[%c109, %c0_128], %146 {strides = array<i32>} : memref<144x128xf32, #tpu.memory_space<vmem>>, vector<1x128xf32>,
    %c10_129 = arith.constant 10 : index
    %c0_130 = arith.constant 0 : index
    %c0_131 = arith.constant 0 : index
    %149 = vector.load %arg1[%c10_129, %c0_130, %c0_131] : memref<12x64x128xf32, #tpu.memory_space<vmem>>, vector<1x64x128xf32>
    %150 = vector.shape_cast %149 : vector<1x64x128xf32> to vector<64x128xf32>
    %151 = arith.mulf %86, %150 : vector<64x128xf32>
    %cst_132 = arith.constant dense<0.000000e+00> : vector<128xf32>
    %152 = vector.multi_reduction <add>, %151, %cst_132 [0] : vector<64x128xf32> to vector<128xf32>
    %153 = vector.shape_cast %152 : vector<128xf32> to vector<1x128xf32>
    %c22 = arith.constant 22 : index
    %c0_133 = arith.constant 0 : index
    %154 = vector.load %arg2[%c22, %c0_133] : memref<144x128xf32, #tpu.memory_space<vmem>>, vector<1x128xf32>
    tpu.vector_store %arg2[%c22, %c0_133], %153 {strides = array<i32>} : memref<144x128xf32, #tpu.memory_space<vmem>>, vector<1x128xf32>,
    %c121 = arith.constant 121 : index
    %c0_134 = arith.constant 0 : index
    %155 = vector.load %arg2[%c121, %c0_134] : memref<144x128xf32, #tpu.memory_space<vmem>>, vector<1x128xf32>
    tpu.vector_store %arg2[%c121, %c0_134], %153 {strides = array<i32>} : memref<144x128xf32, #tpu.memory_space<vmem>>, vector<1x128xf32>,
    %c11_135 = arith.constant 11 : index
    %c0_136 = arith.constant 0 : index
    %c0_137 = arith.constant 0 : index
    %156 = vector.load %arg1[%c11_135, %c0_136, %c0_137] : memref<12x64x128xf32, #tpu.memory_space<vmem>>, vector<1x64x128xf32>
    %157 = vector.shape_cast %156 : vector<1x64x128xf32> to vector<64x128xf32>
    %158 = arith.mulf %86, %157 : vector<64x128xf32>
    %cst_138 = arith.constant dense<0.000000e+00> : vector<128xf32>
    %159 = vector.multi_reduction <add>, %158, %cst_138 [0] : vector<64x128xf32> to vector<128xf32>
    %160 = vector.shape_cast %159 : vector<128xf32> to vector<1x128xf32>
    %c23 = arith.constant 23 : index
    %c0_139 = arith.constant 0 : index
    %161 = vector.load %arg2[%c23, %c0_139] : memref<144x128xf32, #tpu.memory_space<vmem>>, vector<1x128xf32>
    tpu.vector_store %arg2[%c23, %c0_139], %160 {strides = array<i32>} : memref<144x128xf32, #tpu.memory_space<vmem>>, vector<1x128xf32>,
    %c133 = arith.constant 133 : index
    %c0_140 = arith.constant 0 : index
    %162 = vector.load %arg2[%c133, %c0_140] : memref<144x128xf32, #tpu.memory_space<vmem>>, vector<1x128xf32>
    tpu.vector_store %arg2[%c133, %c0_140], %160 {strides = array<i32>} : memref<144x128xf32, #tpu.memory_space<vmem>>, vector<1x128xf32>,
    %c2_141 = arith.constant 2 : index
    %c0_142 = arith.constant 0 : index
    %c0_143 = arith.constant 0 : index
    %163 = vector.load %arg1[%c2_141, %c0_142, %c0_143] : memref<12x64x128xf32, #tpu.memory_space<vmem>>, vector<1x64x128xf32>
    %164 = vector.shape_cast %163 : vector<1x64x128xf32> to vector<64x128xf32>
    %c2_144 = arith.constant 2 : index
    %c0_145 = arith.constant 0 : index
    %c0_146 = arith.constant 0 : index
    %165 = vector.load %arg1[%c2_144, %c0_145, %c0_146] : memref<12x64x128xf32, #tpu.memory_space<vmem>>, vector<1x64x128xf32>
    %166 = vector.shape_cast %165 : vector<1x64x128xf32> to vector<64x128xf32>
    %167 = arith.mulf %164, %166 : vector<64x128xf32>
    %cst_147 = arith.constant dense<0.000000e+00> : vector<128xf32>
    %168 = vector.multi_reduction <add>, %167, %cst_147 [0] : vector<64x128xf32> to vector<128xf32>
    %169 = vector.shape_cast %168 : vector<128xf32> to vector<1x128xf32>
    %c26 = arith.constant 26 : index
    %c0_148 = arith.constant 0 : index
    %170 = vector.load %arg2[%c26, %c0_148] : memref<144x128xf32, #tpu.memory_space<vmem>>, vector<1x128xf32>
    tpu.vector_store %arg2[%c26, %c0_148], %169 {strides = array<i32>} : memref<144x128xf32, #tpu.memory_space<vmem>>, vector<1x128xf32>,
    %c3_149 = arith.constant 3 : index
    %c0_150 = arith.constant 0 : index
    %c0_151 = arith.constant 0 : index
    %171 = vector.load %arg1[%c3_149, %c0_150, %c0_151] : memref<12x64x128xf32, #tpu.memory_space<vmem>>, vector<1x64x128xf32>
    %172 = vector.shape_cast %171 : vector<1x64x128xf32> to vector<64x128xf32>
    %173 = arith.mulf %164, %172 : vector<64x128xf32>
    %cst_152 = arith.constant dense<0.000000e+00> : vector<128xf32>
    %174 = vector.multi_reduction <add>, %173, %cst_152 [0] : vector<64x128xf32> to vector<128xf32>
    %175 = vector.shape_cast %174 : vector<128xf32> to vector<1x128xf32>
    %c27 = arith.constant 27 : index
    %c0_153 = arith.constant 0 : index
    %176 = vector.load %arg2[%c27, %c0_153] : memref<144x128xf32, #tpu.memory_space<vmem>>, vector<1x128xf32>
    tpu.vector_store %arg2[%c27, %c0_153], %175 {strides = array<i32>} : memref<144x128xf32, #tpu.memory_space<vmem>>, vector<1x128xf32>,
    %c38 = arith.constant 38 : index
    %c0_154 = arith.constant 0 : index
    %177 = vector.load %arg2[%c38, %c0_154] : memref<144x128xf32, #tpu.memory_space<vmem>>, vector<1x128xf32>
    tpu.vector_store %arg2[%c38, %c0_154], %175 {strides = array<i32>} : memref<144x128xf32, #tpu.memory_space<vmem>>, vector<1x128xf32>,
    %c4_155 = arith.constant 4 : index
    %c0_156 = arith.constant 0 : index
    %c0_157 = arith.constant 0 : index
    %178 = vector.load %arg1[%c4_155, %c0_156, %c0_157] : memref<12x64x128xf32, #tpu.memory_space<vmem>>, vector<1x64x128xf32>
    %179 = vector.shape_cast %178 : vector<1x64x128xf32> to vector<64x128xf32>
    %180 = arith.mulf %164, %179 : vector<64x128xf32>
    %cst_158 = arith.constant dense<0.000000e+00> : vector<128xf32>
    %181 = vector.multi_reduction <add>, %180, %cst_158 [0] : vector<64x128xf32> to vector<128xf32>
    %182 = vector.shape_cast %181 : vector<128xf32> to vector<1x128xf32>
    %c28 = arith.constant 28 : index
    %c0_159 = arith.constant 0 : index
    %183 = vector.load %arg2[%c28, %c0_159] : memref<144x128xf32, #tpu.memory_space<vmem>>, vector<1x128xf32>
    tpu.vector_store %arg2[%c28, %c0_159], %182 {strides = array<i32>} : memref<144x128xf32, #tpu.memory_space<vmem>>, vector<1x128xf32>,
    %c50 = arith.constant 50 : index
    %c0_160 = arith.constant 0 : index
    %184 = vector.load %arg2[%c50, %c0_160] : memref<144x128xf32, #tpu.memory_space<vmem>>, vector<1x128xf32>
    tpu.vector_store %arg2[%c50, %c0_160], %182 {strides = array<i32>} : memref<144x128xf32, #tpu.memory_space<vmem>>, vector<1x128xf32>,
    %c5_161 = arith.constant 5 : index
    %c0_162 = arith.constant 0 : index
    %c0_163 = arith.constant 0 : index
    %185 = vector.load %arg1[%c5_161, %c0_162, %c0_163] : memref<12x64x128xf32, #tpu.memory_space<vmem>>, vector<1x64x128xf32>
    %186 = vector.shape_cast %185 : vector<1x64x128xf32> to vector<64x128xf32>
    %187 = arith.mulf %164, %186 : vector<64x128xf32>
    %cst_164 = arith.constant dense<0.000000e+00> : vector<128xf32>
    %188 = vector.multi_reduction <add>, %187, %cst_164 [0] : vector<64x128xf32> to vector<128xf32>
    %189 = vector.shape_cast %188 : vector<128xf32> to vector<1x128xf32>
    %c29 = arith.constant 29 : index
    %c0_165 = arith.constant 0 : index
    %190 = vector.load %arg2[%c29, %c0_165] : memref<144x128xf32, #tpu.memory_space<vmem>>, vector<1x128xf32>
    tpu.vector_store %arg2[%c29, %c0_165], %189 {strides = array<i32>} : memref<144x128xf32, #tpu.memory_space<vmem>>, vector<1x128xf32>,
    %c62 = arith.constant 62 : index
    %c0_166 = arith.constant 0 : index
    %191 = vector.load %arg2[%c62, %c0_166] : memref<144x128xf32, #tpu.memory_space<vmem>>, vector<1x128xf32>
    tpu.vector_store %arg2[%c62, %c0_166], %189 {strides = array<i32>} : memref<144x128xf32, #tpu.memory_space<vmem>>, vector<1x128xf32>,
    %c6_167 = arith.constant 6 : index
    %c0_168 = arith.constant 0 : index
    %c0_169 = arith.constant 0 : index
    %192 = vector.load %arg1[%c6_167, %c0_168, %c0_169] : memref<12x64x128xf32, #tpu.memory_space<vmem>>, vector<1x64x128xf32>
    %193 = vector.shape_cast %192 : vector<1x64x128xf32> to vector<64x128xf32>
    %194 = arith.mulf %164, %193 : vector<64x128xf32>
    %cst_170 = arith.constant dense<0.000000e+00> : vector<128xf32>
    %195 = vector.multi_reduction <add>, %194, %cst_170 [0] : vector<64x128xf32> to vector<128xf32>
    %196 = vector.shape_cast %195 : vector<128xf32> to vector<1x128xf32>
    %c30 = arith.constant 30 : index
    %c0_171 = arith.constant 0 : index
    %197 = vector.load %arg2[%c30, %c0_171] : memref<144x128xf32, #tpu.memory_space<vmem>>, vector<1x128xf32>
    tpu.vector_store %arg2[%c30, %c0_171], %196 {strides = array<i32>} : memref<144x128xf32, #tpu.memory_space<vmem>>, vector<1x128xf32>,
    %c74 = arith.constant 74 : index
    %c0_172 = arith.constant 0 : index
    %198 = vector.load %arg2[%c74, %c0_172] : memref<144x128xf32, #tpu.memory_space<vmem>>, vector<1x128xf32>
    tpu.vector_store %arg2[%c74, %c0_172], %196 {strides = array<i32>} : memref<144x128xf32, #tpu.memory_space<vmem>>, vector<1x128xf32>,
    %c7_173 = arith.constant 7 : index
    %c0_174 = arith.constant 0 : index
    %c0_175 = arith.constant 0 : index
    %199 = vector.load %arg1[%c7_173, %c0_174, %c0_175] : memref<12x64x128xf32, #tpu.memory_space<vmem>>, vector<1x64x128xf32>
    %200 = vector.shape_cast %199 : vector<1x64x128xf32> to vector<64x128xf32>
    %201 = arith.mulf %164, %200 : vector<64x128xf32>
    %cst_176 = arith.constant dense<0.000000e+00> : vector<128xf32>
    %202 = vector.multi_reduction <add>, %201, %cst_176 [0] : vector<64x128xf32> to vector<128xf32>
    %203 = vector.shape_cast %202 : vector<128xf32> to vector<1x128xf32>
    %c31 = arith.constant 31 : index
    %c0_177 = arith.constant 0 : index
    %204 = vector.load %arg2[%c31, %c0_177] : memref<144x128xf32, #tpu.memory_space<vmem>>, vector<1x128xf32>
    tpu.vector_store %arg2[%c31, %c0_177], %203 {strides = array<i32>} : memref<144x128xf32, #tpu.memory_space<vmem>>, vector<1x128xf32>,
    %c86 = arith.constant 86 : index
    %c0_178 = arith.constant 0 : index
    %205 = vector.load %arg2[%c86, %c0_178] : memref<144x128xf32, #tpu.memory_space<vmem>>, vector<1x128xf32>
    tpu.vector_store %arg2[%c86, %c0_178], %203 {strides = array<i32>} : memref<144x128xf32, #tpu.memory_space<vmem>>, vector<1x128xf32>,
    %c8_179 = arith.constant 8 : index
    %c0_180 = arith.constant 0 : index
    %c0_181 = arith.constant 0 : index
    %206 = vector.load %arg1[%c8_179, %c0_180, %c0_181] : memref<12x64x128xf32, #tpu.memory_space<vmem>>, vector<1x64x128xf32>
    %207 = vector.shape_cast %206 : vector<1x64x128xf32> to vector<64x128xf32>
    %208 = arith.mulf %164, %207 : vector<64x128xf32>
    %cst_182 = arith.constant dense<0.000000e+00> : vector<128xf32>
    %209 = vector.multi_reduction <add>, %208, %cst_182 [0] : vector<64x128xf32> to vector<128xf32>
    %210 = vector.shape_cast %209 : vector<128xf32> to vector<1x128xf32>
    %c32 = arith.constant 32 : index
    %c0_183 = arith.constant 0 : index
    %211 = vector.load %arg2[%c32, %c0_183] : memref<144x128xf32, #tpu.memory_space<vmem>>, vector<1x128xf32>
    tpu.vector_store %arg2[%c32, %c0_183], %210 {strides = array<i32>} : memref<144x128xf32, #tpu.memory_space<vmem>>, vector<1x128xf32>,
    %c98 = arith.constant 98 : index
    %c0_184 = arith.constant 0 : index
    %212 = vector.load %arg2[%c98, %c0_184] : memref<144x128xf32, #tpu.memory_space<vmem>>, vector<1x128xf32>
    tpu.vector_store %arg2[%c98, %c0_184], %210 {strides = array<i32>} : memref<144x128xf32, #tpu.memory_space<vmem>>, vector<1x128xf32>,
    %c9_185 = arith.constant 9 : index
    %c0_186 = arith.constant 0 : index
    %c0_187 = arith.constant 0 : index
    %213 = vector.load %arg1[%c9_185, %c0_186, %c0_187] : memref<12x64x128xf32, #tpu.memory_space<vmem>>, vector<1x64x128xf32>
    %214 = vector.shape_cast %213 : vector<1x64x128xf32> to vector<64x128xf32>
    %215 = arith.mulf %164, %214 : vector<64x128xf32>
    %cst_188 = arith.constant dense<0.000000e+00> : vector<128xf32>
    %216 = vector.multi_reduction <add>, %215, %cst_188 [0] : vector<64x128xf32> to vector<128xf32>
    %217 = vector.shape_cast %216 : vector<128xf32> to vector<1x128xf32>
    %c33 = arith.constant 33 : index
    %c0_189 = arith.constant 0 : index
    %218 = vector.load %arg2[%c33, %c0_189] : memref<144x128xf32, #tpu.memory_space<vmem>>, vector<1x128xf32>
    tpu.vector_store %arg2[%c33, %c0_189], %217 {strides = array<i32>} : memref<144x128xf32, #tpu.memory_space<vmem>>, vector<1x128xf32>,
    %c110 = arith.constant 110 : index
    %c0_190 = arith.constant 0 : index
    %219 = vector.load %arg2[%c110, %c0_190] : memref<144x128xf32, #tpu.memory_space<vmem>>, vector<1x128xf32>
    tpu.vector_store %arg2[%c110, %c0_190], %217 {strides = array<i32>} : memref<144x128xf32, #tpu.memory_space<vmem>>, vector<1x128xf32>,
    %c10_191 = arith.constant 10 : index
    %c0_192 = arith.constant 0 : index
    %c0_193 = arith.constant 0 : index
    %220 = vector.load %arg1[%c10_191, %c0_192, %c0_193] : memref<12x64x128xf32, #tpu.memory_space<vmem>>, vector<1x64x128xf32>
    %221 = vector.shape_cast %220 : vector<1x64x128xf32> to vector<64x128xf32>
    %222 = arith.mulf %164, %221 : vector<64x128xf32>
    %cst_194 = arith.constant dense<0.000000e+00> : vector<128xf32>
    %223 = vector.multi_reduction <add>, %222, %cst_194 [0] : vector<64x128xf32> to vector<128xf32>
    %224 = vector.shape_cast %223 : vector<128xf32> to vector<1x128xf32>
    %c34 = arith.constant 34 : index
    %c0_195 = arith.constant 0 : index
    %225 = vector.load %arg2[%c34, %c0_195] : memref<144x128xf32, #tpu.memory_space<vmem>>, vector<1x128xf32>
    tpu.vector_store %arg2[%c34, %c0_195], %224 {strides = array<i32>} : memref<144x128xf32, #tpu.memory_space<vmem>>, vector<1x128xf32>,
    %c122 = arith.constant 122 : index
    %c0_196 = arith.constant 0 : index
    %226 = vector.load %arg2[%c122, %c0_196] : memref<144x128xf32, #tpu.memory_space<vmem>>, vector<1x128xf32>
    tpu.vector_store %arg2[%c122, %c0_196], %224 {strides = array<i32>} : memref<144x128xf32, #tpu.memory_space<vmem>>, vector<1x128xf32>,
    %c11_197 = arith.constant 11 : index
    %c0_198 = arith.constant 0 : index
    %c0_199 = arith.constant 0 : index
    %227 = vector.load %arg1[%c11_197, %c0_198, %c0_199] : memref<12x64x128xf32, #tpu.memory_space<vmem>>, vector<1x64x128xf32>
    %228 = vector.shape_cast %227 : vector<1x64x128xf32> to vector<64x128xf32>
    %229 = arith.mulf %164, %228 : vector<64x128xf32>
    %cst_200 = arith.constant dense<0.000000e+00> : vector<128xf32>
    %230 = vector.multi_reduction <add>, %229, %cst_200 [0] : vector<64x128xf32> to vector<128xf32>
    %231 = vector.shape_cast %230 : vector<128xf32> to vector<1x128xf32>
    %c35 = arith.constant 35 : index
    %c0_201 = arith.constant 0 : index
    %232 = vector.load %arg2[%c35, %c0_201] : memref<144x128xf32, #tpu.memory_space<vmem>>, vector<1x128xf32>
    tpu.vector_store %arg2[%c35, %c0_201], %231 {strides = array<i32>} : memref<144x128xf32, #tpu.memory_space<vmem>>, vector<1x128xf32>,
    %c134 = arith.constant 134 : index
    %c0_202 = arith.constant 0 : index
    %233 = vector.load %arg2[%c134, %c0_202] : memref<144x128xf32, #tpu.memory_space<vmem>>, vector<1x128xf32>
    tpu.vector_store %arg2[%c134, %c0_202], %231 {strides = array<i32>} : memref<144x128xf32, #tpu.memory_space<vmem>>, vector<1x128xf32>,
    %c3_203 = arith.constant 3 : index
    %c0_204 = arith.constant 0 : index
    %c0_205 = arith.constant 0 : index
    %234 = vector.load %arg1[%c3_203, %c0_204, %c0_205] : memref<12x64x128xf32, #tpu.memory_space<vmem>>, vector<1x64x128xf32>
    %235 = vector.shape_cast %234 : vector<1x64x128xf32> to vector<64x128xf32>
    %c3_206 = arith.constant 3 : index
    %c0_207 = arith.constant 0 : index
    %c0_208 = arith.constant 0 : index
    %236 = vector.load %arg1[%c3_206, %c0_207, %c0_208] : memref<12x64x128xf32, #tpu.memory_space<vmem>>, vector<1x64x128xf32>
    %237 = vector.shape_cast %236 : vector<1x64x128xf32> to vector<64x128xf32>
    %238 = arith.mulf %235, %237 : vector<64x128xf32>
    %cst_209 = arith.constant dense<0.000000e+00> : vector<128xf32>
    %239 = vector.multi_reduction <add>, %238, %cst_209 [0] : vector<64x128xf32> to vector<128xf32>
    %240 = vector.shape_cast %239 : vector<128xf32> to vector<1x128xf32>
    %c39 = arith.constant 39 : index
    %c0_210 = arith.constant 0 : index
    %241 = vector.load %arg2[%c39, %c0_210] : memref<144x128xf32, #tpu.memory_space<vmem>>, vector<1x128xf32>
    tpu.vector_store %arg2[%c39, %c0_210], %240 {strides = array<i32>} : memref<144x128xf32, #tpu.memory_space<vmem>>, vector<1x128xf32>,
    %c4_211 = arith.constant 4 : index
    %c0_212 = arith.constant 0 : index
    %c0_213 = arith.constant 0 : index
    %242 = vector.load %arg1[%c4_211, %c0_212, %c0_213] : memref<12x64x128xf32, #tpu.memory_space<vmem>>, vector<1x64x128xf32>
    %243 = vector.shape_cast %242 : vector<1x64x128xf32> to vector<64x128xf32>
    %244 = arith.mulf %235, %243 : vector<64x128xf32>
    %cst_214 = arith.constant dense<0.000000e+00> : vector<128xf32>
    %245 = vector.multi_reduction <add>, %244, %cst_214 [0] : vector<64x128xf32> to vector<128xf32>
    %246 = vector.shape_cast %245 : vector<128xf32> to vector<1x128xf32>
    %c40 = arith.constant 40 : index
    %c0_215 = arith.constant 0 : index
    %247 = vector.load %arg2[%c40, %c0_215] : memref<144x128xf32, #tpu.memory_space<vmem>>, vector<1x128xf32>
    tpu.vector_store %arg2[%c40, %c0_215], %246 {strides = array<i32>} : memref<144x128xf32, #tpu.memory_space<vmem>>, vector<1x128xf32>,
    %c51 = arith.constant 51 : index
    %c0_216 = arith.constant 0 : index
    %248 = vector.load %arg2[%c51, %c0_216] : memref<144x128xf32, #tpu.memory_space<vmem>>, vector<1x128xf32>
    tpu.vector_store %arg2[%c51, %c0_216], %246 {strides = array<i32>} : memref<144x128xf32, #tpu.memory_space<vmem>>, vector<1x128xf32>,
    %c5_217 = arith.constant 5 : index
    %c0_218 = arith.constant 0 : index
    %c0_219 = arith.constant 0 : index
    %249 = vector.load %arg1[%c5_217, %c0_218, %c0_219] : memref<12x64x128xf32, #tpu.memory_space<vmem>>, vector<1x64x128xf32>
    %250 = vector.shape_cast %249 : vector<1x64x128xf32> to vector<64x128xf32>
    %251 = arith.mulf %235, %250 : vector<64x128xf32>
    %cst_220 = arith.constant dense<0.000000e+00> : vector<128xf32>
    %252 = vector.multi_reduction <add>, %251, %cst_220 [0] : vector<64x128xf32> to vector<128xf32>
    %253 = vector.shape_cast %252 : vector<128xf32> to vector<1x128xf32>
    %c41 = arith.constant 41 : index
    %c0_221 = arith.constant 0 : index
    %254 = vector.load %arg2[%c41, %c0_221] : memref<144x128xf32, #tpu.memory_space<vmem>>, vector<1x128xf32>
    tpu.vector_store %arg2[%c41, %c0_221], %253 {strides = array<i32>} : memref<144x128xf32, #tpu.memory_space<vmem>>, vector<1x128xf32>,
    %c63 = arith.constant 63 : index
    %c0_222 = arith.constant 0 : index
    %255 = vector.load %arg2[%c63, %c0_222] : memref<144x128xf32, #tpu.memory_space<vmem>>, vector<1x128xf32>
    tpu.vector_store %arg2[%c63, %c0_222], %253 {strides = array<i32>} : memref<144x128xf32, #tpu.memory_space<vmem>>, vector<1x128xf32>,
    %c6_223 = arith.constant 6 : index
    %c0_224 = arith.constant 0 : index
    %c0_225 = arith.constant 0 : index
    %256 = vector.load %arg1[%c6_223, %c0_224, %c0_225] : memref<12x64x128xf32, #tpu.memory_space<vmem>>, vector<1x64x128xf32>
    %257 = vector.shape_cast %256 : vector<1x64x128xf32> to vector<64x128xf32>
    %258 = arith.mulf %235, %257 : vector<64x128xf32>
    %cst_226 = arith.constant dense<0.000000e+00> : vector<128xf32>
    %259 = vector.multi_reduction <add>, %258, %cst_226 [0] : vector<64x128xf32> to vector<128xf32>
    %260 = vector.shape_cast %259 : vector<128xf32> to vector<1x128xf32>
    %c42 = arith.constant 42 : index
    %c0_227 = arith.constant 0 : index
    %261 = vector.load %arg2[%c42, %c0_227] : memref<144x128xf32, #tpu.memory_space<vmem>>, vector<1x128xf32>
    tpu.vector_store %arg2[%c42, %c0_227], %260 {strides = array<i32>} : memref<144x128xf32, #tpu.memory_space<vmem>>, vector<1x128xf32>,
    %c75 = arith.constant 75 : index
    %c0_228 = arith.constant 0 : index
    %262 = vector.load %arg2[%c75, %c0_228] : memref<144x128xf32, #tpu.memory_space<vmem>>, vector<1x128xf32>
    tpu.vector_store %arg2[%c75, %c0_228], %260 {strides = array<i32>} : memref<144x128xf32, #tpu.memory_space<vmem>>, vector<1x128xf32>,
    %c7_229 = arith.constant 7 : index
    %c0_230 = arith.constant 0 : index
    %c0_231 = arith.constant 0 : index
    %263 = vector.load %arg1[%c7_229, %c0_230, %c0_231] : memref<12x64x128xf32, #tpu.memory_space<vmem>>, vector<1x64x128xf32>
    %264 = vector.shape_cast %263 : vector<1x64x128xf32> to vector<64x128xf32>
    %265 = arith.mulf %235, %264 : vector<64x128xf32>
    %cst_232 = arith.constant dense<0.000000e+00> : vector<128xf32>
    %266 = vector.multi_reduction <add>, %265, %cst_232 [0] : vector<64x128xf32> to vector<128xf32>
    %267 = vector.shape_cast %266 : vector<128xf32> to vector<1x128xf32>
    %c43 = arith.constant 43 : index
    %c0_233 = arith.constant 0 : index
    %268 = vector.load %arg2[%c43, %c0_233] : memref<144x128xf32, #tpu.memory_space<vmem>>, vector<1x128xf32>
    tpu.vector_store %arg2[%c43, %c0_233], %267 {strides = array<i32>} : memref<144x128xf32, #tpu.memory_space<vmem>>, vector<1x128xf32>,
    %c87 = arith.constant 87 : index
    %c0_234 = arith.constant 0 : index
    %269 = vector.load %arg2[%c87, %c0_234] : memref<144x128xf32, #tpu.memory_space<vmem>>, vector<1x128xf32>
    tpu.vector_store %arg2[%c87, %c0_234], %267 {strides = array<i32>} : memref<144x128xf32, #tpu.memory_space<vmem>>, vector<1x128xf32>,
    %c8_235 = arith.constant 8 : index
    %c0_236 = arith.constant 0 : index
    %c0_237 = arith.constant 0 : index
    %270 = vector.load %arg1[%c8_235, %c0_236, %c0_237] : memref<12x64x128xf32, #tpu.memory_space<vmem>>, vector<1x64x128xf32>
    %271 = vector.shape_cast %270 : vector<1x64x128xf32> to vector<64x128xf32>
    %272 = arith.mulf %235, %271 : vector<64x128xf32>
    %cst_238 = arith.constant dense<0.000000e+00> : vector<128xf32>
    %273 = vector.multi_reduction <add>, %272, %cst_238 [0] : vector<64x128xf32> to vector<128xf32>
    %274 = vector.shape_cast %273 : vector<128xf32> to vector<1x128xf32>
    %c44 = arith.constant 44 : index
    %c0_239 = arith.constant 0 : index
    %275 = vector.load %arg2[%c44, %c0_239] : memref<144x128xf32, #tpu.memory_space<vmem>>, vector<1x128xf32>
    tpu.vector_store %arg2[%c44, %c0_239], %274 {strides = array<i32>} : memref<144x128xf32, #tpu.memory_space<vmem>>, vector<1x128xf32>,
    %c99 = arith.constant 99 : index
    %c0_240 = arith.constant 0 : index
    %276 = vector.load %arg2[%c99, %c0_240] : memref<144x128xf32, #tpu.memory_space<vmem>>, vector<1x128xf32>
    tpu.vector_store %arg2[%c99, %c0_240], %274 {strides = array<i32>} : memref<144x128xf32, #tpu.memory_space<vmem>>, vector<1x128xf32>,
    %c9_241 = arith.constant 9 : index
    %c0_242 = arith.constant 0 : index
    %c0_243 = arith.constant 0 : index
    %277 = vector.load %arg1[%c9_241, %c0_242, %c0_243] : memref<12x64x128xf32, #tpu.memory_space<vmem>>, vector<1x64x128xf32>
    %278 = vector.shape_cast %277 : vector<1x64x128xf32> to vector<64x128xf32>
    %279 = arith.mulf %235, %278 : vector<64x128xf32>
    %cst_244 = arith.constant dense<0.000000e+00> : vector<128xf32>
    %280 = vector.multi_reduction <add>, %279, %cst_244 [0] : vector<64x128xf32> to vector<128xf32>
    %281 = vector.shape_cast %280 : vector<128xf32> to vector<1x128xf32>
    %c45 = arith.constant 45 : index
    %c0_245 = arith.constant 0 : index
    %282 = vector.load %arg2[%c45, %c0_245] : memref<144x128xf32, #tpu.memory_space<vmem>>, vector<1x128xf32>
    tpu.vector_store %arg2[%c45, %c0_245], %281 {strides = array<i32>} : memref<144x128xf32, #tpu.memory_space<vmem>>, vector<1x128xf32>,
    %c111 = arith.constant 111 : index
    %c0_246 = arith.constant 0 : index
    %283 = vector.load %arg2[%c111, %c0_246] : memref<144x128xf32, #tpu.memory_space<vmem>>, vector<1x128xf32>
    tpu.vector_store %arg2[%c111, %c0_246], %281 {strides = array<i32>} : memref<144x128xf32, #tpu.memory_space<vmem>>, vector<1x128xf32>,
    %c10_247 = arith.constant 10 : index
    %c0_248 = arith.constant 0 : index
    %c0_249 = arith.constant 0 : index
    %284 = vector.load %arg1[%c10_247, %c0_248, %c0_249] : memref<12x64x128xf32, #tpu.memory_space<vmem>>, vector<1x64x128xf32>
    %285 = vector.shape_cast %284 : vector<1x64x128xf32> to vector<64x128xf32>
    %286 = arith.mulf %235, %285 : vector<64x128xf32>
    %cst_250 = arith.constant dense<0.000000e+00> : vector<128xf32>
    %287 = vector.multi_reduction <add>, %286, %cst_250 [0] : vector<64x128xf32> to vector<128xf32>
    %288 = vector.shape_cast %287 : vector<128xf32> to vector<1x128xf32>
    %c46 = arith.constant 46 : index
    %c0_251 = arith.constant 0 : index
    %289 = vector.load %arg2[%c46, %c0_251] : memref<144x128xf32, #tpu.memory_space<vmem>>, vector<1x128xf32>
    tpu.vector_store %arg2[%c46, %c0_251], %288 {strides = array<i32>} : memref<144x128xf32, #tpu.memory_space<vmem>>, vector<1x128xf32>,
    %c123 = arith.constant 123 : index
    %c0_252 = arith.constant 0 : index
    %290 = vector.load %arg2[%c123, %c0_252] : memref<144x128xf32, #tpu.memory_space<vmem>>, vector<1x128xf32>
    tpu.vector_store %arg2[%c123, %c0_252], %288 {strides = array<i32>} : memref<144x128xf32, #tpu.memory_space<vmem>>, vector<1x128xf32>,
    %c11_253 = arith.constant 11 : index
    %c0_254 = arith.constant 0 : index
    %c0_255 = arith.constant 0 : index
    %291 = vector.load %arg1[%c11_253, %c0_254, %c0_255] : memref<12x64x128xf32, #tpu.memory_space<vmem>>, vector<1x64x128xf32>
    %292 = vector.shape_cast %291 : vector<1x64x128xf32> to vector<64x128xf32>
    %293 = arith.mulf %235, %292 : vector<64x128xf32>
    %cst_256 = arith.constant dense<0.000000e+00> : vector<128xf32>
    %294 = vector.multi_reduction <add>, %293, %cst_256 [0] : vector<64x128xf32> to vector<128xf32>
    %295 = vector.shape_cast %294 : vector<128xf32> to vector<1x128xf32>
    %c47 = arith.constant 47 : index
    %c0_257 = arith.constant 0 : index
    %296 = vector.load %arg2[%c47, %c0_257] : memref<144x128xf32, #tpu.memory_space<vmem>>, vector<1x128xf32>
    tpu.vector_store %arg2[%c47, %c0_257], %295 {strides = array<i32>} : memref<144x128xf32, #tpu.memory_space<vmem>>, vector<1x128xf32>,
    %c135 = arith.constant 135 : index
    %c0_258 = arith.constant 0 : index
    %297 = vector.load %arg2[%c135, %c0_258] : memref<144x128xf32, #tpu.memory_space<vmem>>, vector<1x128xf32>
    tpu.vector_store %arg2[%c135, %c0_258], %295 {strides = array<i32>} : memref<144x128xf32, #tpu.memory_space<vmem>>, vector<1x128xf32>,
    %c4_259 = arith.constant 4 : index
    %c0_260 = arith.constant 0 : index
    %c0_261 = arith.constant 0 : index
    %298 = vector.load %arg1[%c4_259, %c0_260, %c0_261] : memref<12x64x128xf32, #tpu.memory_space<vmem>>, vector<1x64x128xf32>
    %299 = vector.shape_cast %298 : vector<1x64x128xf32> to vector<64x128xf32>
    %c4_262 = arith.constant 4 : index
    %c0_263 = arith.constant 0 : index
    %c0_264 = arith.constant 0 : index
    %300 = vector.load %arg1[%c4_262, %c0_263, %c0_264] : memref<12x64x128xf32, #tpu.memory_space<vmem>>, vector<1x64x128xf32>
    %301 = vector.shape_cast %300 : vector<1x64x128xf32> to vector<64x128xf32>
    %302 = arith.mulf %299, %301 : vector<64x128xf32>
    %cst_265 = arith.constant dense<0.000000e+00> : vector<128xf32>
    %303 = vector.multi_reduction <add>, %302, %cst_265 [0] : vector<64x128xf32> to vector<128xf32>
    %304 = vector.shape_cast %303 : vector<128xf32> to vector<1x128xf32>
    %c52 = arith.constant 52 : index
    %c0_266 = arith.constant 0 : index
    %305 = vector.load %arg2[%c52, %c0_266] : memref<144x128xf32, #tpu.memory_space<vmem>>, vector<1x128xf32>
    tpu.vector_store %arg2[%c52, %c0_266], %304 {strides = array<i32>} : memref<144x128xf32, #tpu.memory_space<vmem>>, vector<1x128xf32>,
    %c5_267 = arith.constant 5 : index
    %c0_268 = arith.constant 0 : index
    %c0_269 = arith.constant 0 : index
    %306 = vector.load %arg1[%c5_267, %c0_268, %c0_269] : memref<12x64x128xf32, #tpu.memory_space<vmem>>, vector<1x64x128xf32>
    %307 = vector.shape_cast %306 : vector<1x64x128xf32> to vector<64x128xf32>
    %308 = arith.mulf %299, %307 : vector<64x128xf32>
    %cst_270 = arith.constant dense<0.000000e+00> : vector<128xf32>
    %309 = vector.multi_reduction <add>, %308, %cst_270 [0] : vector<64x128xf32> to vector<128xf32>
    %310 = vector.shape_cast %309 : vector<128xf32> to vector<1x128xf32>
    %c53 = arith.constant 53 : index
    %c0_271 = arith.constant 0 : index
    %311 = vector.load %arg2[%c53, %c0_271] : memref<144x128xf32, #tpu.memory_space<vmem>>, vector<1x128xf32>
    tpu.vector_store %arg2[%c53, %c0_271], %310 {strides = array<i32>} : memref<144x128xf32, #tpu.memory_space<vmem>>, vector<1x128xf32>,
    %c64 = arith.constant 64 : index
    %c0_272 = arith.constant 0 : index
    %312 = vector.load %arg2[%c64, %c0_272] : memref<144x128xf32, #tpu.memory_space<vmem>>, vector<1x128xf32>
    tpu.vector_store %arg2[%c64, %c0_272], %310 {strides = array<i32>} : memref<144x128xf32, #tpu.memory_space<vmem>>, vector<1x128xf32>,
    %c6_273 = arith.constant 6 : index
    %c0_274 = arith.constant 0 : index
    %c0_275 = arith.constant 0 : index
    %313 = vector.load %arg1[%c6_273, %c0_274, %c0_275] : memref<12x64x128xf32, #tpu.memory_space<vmem>>, vector<1x64x128xf32>
    %314 = vector.shape_cast %313 : vector<1x64x128xf32> to vector<64x128xf32>
    %315 = arith.mulf %299, %314 : vector<64x128xf32>
    %cst_276 = arith.constant dense<0.000000e+00> : vector<128xf32>
    %316 = vector.multi_reduction <add>, %315, %cst_276 [0] : vector<64x128xf32> to vector<128xf32>
    %317 = vector.shape_cast %316 : vector<128xf32> to vector<1x128xf32>
    %c54 = arith.constant 54 : index
    %c0_277 = arith.constant 0 : index
    %318 = vector.load %arg2[%c54, %c0_277] : memref<144x128xf32, #tpu.memory_space<vmem>>, vector<1x128xf32>
    tpu.vector_store %arg2[%c54, %c0_277], %317 {strides = array<i32>} : memref<144x128xf32, #tpu.memory_space<vmem>>, vector<1x128xf32>,
    %c76 = arith.constant 76 : index
    %c0_278 = arith.constant 0 : index
    %319 = vector.load %arg2[%c76, %c0_278] : memref<144x128xf32, #tpu.memory_space<vmem>>, vector<1x128xf32>
    tpu.vector_store %arg2[%c76, %c0_278], %317 {strides = array<i32>} : memref<144x128xf32, #tpu.memory_space<vmem>>, vector<1x128xf32>,
    %c7_279 = arith.constant 7 : index
    %c0_280 = arith.constant 0 : index
    %c0_281 = arith.constant 0 : index
    %320 = vector.load %arg1[%c7_279, %c0_280, %c0_281] : memref<12x64x128xf32, #tpu.memory_space<vmem>>, vector<1x64x128xf32>
    %321 = vector.shape_cast %320 : vector<1x64x128xf32> to vector<64x128xf32>
    %322 = arith.mulf %299, %321 : vector<64x128xf32>
    %cst_282 = arith.constant dense<0.000000e+00> : vector<128xf32>
    %323 = vector.multi_reduction <add>, %322, %cst_282 [0] : vector<64x128xf32> to vector<128xf32>
    %324 = vector.shape_cast %323 : vector<128xf32> to vector<1x128xf32>
    %c55 = arith.constant 55 : index
    %c0_283 = arith.constant 0 : index
    %325 = vector.load %arg2[%c55, %c0_283] : memref<144x128xf32, #tpu.memory_space<vmem>>, vector<1x128xf32>
    tpu.vector_store %arg2[%c55, %c0_283], %324 {strides = array<i32>} : memref<144x128xf32, #tpu.memory_space<vmem>>, vector<1x128xf32>,
    %c88 = arith.constant 88 : index
    %c0_284 = arith.constant 0 : index
    %326 = vector.load %arg2[%c88, %c0_284] : memref<144x128xf32, #tpu.memory_space<vmem>>, vector<1x128xf32>
    tpu.vector_store %arg2[%c88, %c0_284], %324 {strides = array<i32>} : memref<144x128xf32, #tpu.memory_space<vmem>>, vector<1x128xf32>,
    %c8_285 = arith.constant 8 : index
    %c0_286 = arith.constant 0 : index
    %c0_287 = arith.constant 0 : index
    %327 = vector.load %arg1[%c8_285, %c0_286, %c0_287] : memref<12x64x128xf32, #tpu.memory_space<vmem>>, vector<1x64x128xf32>
    %328 = vector.shape_cast %327 : vector<1x64x128xf32> to vector<64x128xf32>
    %329 = arith.mulf %299, %328 : vector<64x128xf32>
    %cst_288 = arith.constant dense<0.000000e+00> : vector<128xf32>
    %330 = vector.multi_reduction <add>, %329, %cst_288 [0] : vector<64x128xf32> to vector<128xf32>
    %331 = vector.shape_cast %330 : vector<128xf32> to vector<1x128xf32>
    %c56 = arith.constant 56 : index
    %c0_289 = arith.constant 0 : index
    %332 = vector.load %arg2[%c56, %c0_289] : memref<144x128xf32, #tpu.memory_space<vmem>>, vector<1x128xf32>
    tpu.vector_store %arg2[%c56, %c0_289], %331 {strides = array<i32>} : memref<144x128xf32, #tpu.memory_space<vmem>>, vector<1x128xf32>,
    %c100 = arith.constant 100 : index
    %c0_290 = arith.constant 0 : index
    %333 = vector.load %arg2[%c100, %c0_290] : memref<144x128xf32, #tpu.memory_space<vmem>>, vector<1x128xf32>
    tpu.vector_store %arg2[%c100, %c0_290], %331 {strides = array<i32>} : memref<144x128xf32, #tpu.memory_space<vmem>>, vector<1x128xf32>,
    %c9_291 = arith.constant 9 : index
    %c0_292 = arith.constant 0 : index
    %c0_293 = arith.constant 0 : index
    %334 = vector.load %arg1[%c9_291, %c0_292, %c0_293] : memref<12x64x128xf32, #tpu.memory_space<vmem>>, vector<1x64x128xf32>
    %335 = vector.shape_cast %334 : vector<1x64x128xf32> to vector<64x128xf32>
    %336 = arith.mulf %299, %335 : vector<64x128xf32>
    %cst_294 = arith.constant dense<0.000000e+00> : vector<128xf32>
    %337 = vector.multi_reduction <add>, %336, %cst_294 [0] : vector<64x128xf32> to vector<128xf32>
    %338 = vector.shape_cast %337 : vector<128xf32> to vector<1x128xf32>
    %c57 = arith.constant 57 : index
    %c0_295 = arith.constant 0 : index
    %339 = vector.load %arg2[%c57, %c0_295] : memref<144x128xf32, #tpu.memory_space<vmem>>, vector<1x128xf32>
    tpu.vector_store %arg2[%c57, %c0_295], %338 {strides = array<i32>} : memref<144x128xf32, #tpu.memory_space<vmem>>, vector<1x128xf32>,
    %c112 = arith.constant 112 : index
    %c0_296 = arith.constant 0 : index
    %340 = vector.load %arg2[%c112, %c0_296] : memref<144x128xf32, #tpu.memory_space<vmem>>, vector<1x128xf32>
    tpu.vector_store %arg2[%c112, %c0_296], %338 {strides = array<i32>} : memref<144x128xf32, #tpu.memory_space<vmem>>, vector<1x128xf32>,
    %c10_297 = arith.constant 10 : index
    %c0_298 = arith.constant 0 : index
    %c0_299 = arith.constant 0 : index
    %341 = vector.load %arg1[%c10_297, %c0_298, %c0_299] : memref<12x64x128xf32, #tpu.memory_space<vmem>>, vector<1x64x128xf32>
    %342 = vector.shape_cast %341 : vector<1x64x128xf32> to vector<64x128xf32>
    %343 = arith.mulf %299, %342 : vector<64x128xf32>
    %cst_300 = arith.constant dense<0.000000e+00> : vector<128xf32>
    %344 = vector.multi_reduction <add>, %343, %cst_300 [0] : vector<64x128xf32> to vector<128xf32>
    %345 = vector.shape_cast %344 : vector<128xf32> to vector<1x128xf32>
    %c58 = arith.constant 58 : index
    %c0_301 = arith.constant 0 : index
    %346 = vector.load %arg2[%c58, %c0_301] : memref<144x128xf32, #tpu.memory_space<vmem>>, vector<1x128xf32>
    tpu.vector_store %arg2[%c58, %c0_301], %345 {strides = array<i32>} : memref<144x128xf32, #tpu.memory_space<vmem>>, vector<1x128xf32>,
    %c124 = arith.constant 124 : index
    %c0_302 = arith.constant 0 : index
    %347 = vector.load %arg2[%c124, %c0_302] : memref<144x128xf32, #tpu.memory_space<vmem>>, vector<1x128xf32>
    tpu.vector_store %arg2[%c124, %c0_302], %345 {strides = array<i32>} : memref<144x128xf32, #tpu.memory_space<vmem>>, vector<1x128xf32>,
    %c11_303 = arith.constant 11 : index
    %c0_304 = arith.constant 0 : index
    %c0_305 = arith.constant 0 : index
    %348 = vector.load %arg1[%c11_303, %c0_304, %c0_305] : memref<12x64x128xf32, #tpu.memory_space<vmem>>, vector<1x64x128xf32>
    %349 = vector.shape_cast %348 : vector<1x64x128xf32> to vector<64x128xf32>
    %350 = arith.mulf %299, %349 : vector<64x128xf32>
    %cst_306 = arith.constant dense<0.000000e+00> : vector<128xf32>
    %351 = vector.multi_reduction <add>, %350, %cst_306 [0] : vector<64x128xf32> to vector<128xf32>
    %352 = vector.shape_cast %351 : vector<128xf32> to vector<1x128xf32>
    %c59 = arith.constant 59 : index
    %c0_307 = arith.constant 0 : index
    %353 = vector.load %arg2[%c59, %c0_307] : memref<144x128xf32, #tpu.memory_space<vmem>>, vector<1x128xf32>
    tpu.vector_store %arg2[%c59, %c0_307], %352 {strides = array<i32>} : memref<144x128xf32, #tpu.memory_space<vmem>>, vector<1x128xf32>,
    %c136 = arith.constant 136 : index
    %c0_308 = arith.constant 0 : index
    %354 = vector.load %arg2[%c136, %c0_308] : memref<144x128xf32, #tpu.memory_space<vmem>>, vector<1x128xf32>
    tpu.vector_store %arg2[%c136, %c0_308], %352 {strides = array<i32>} : memref<144x128xf32, #tpu.memory_space<vmem>>, vector<1x128xf32>,
    %c5_309 = arith.constant 5 : index
    %c0_310 = arith.constant 0 : index
    %c0_311 = arith.constant 0 : index
    %355 = vector.load %arg1[%c5_309, %c0_310, %c0_311] : memref<12x64x128xf32, #tpu.memory_space<vmem>>, vector<1x64x128xf32>
    %356 = vector.shape_cast %355 : vector<1x64x128xf32> to vector<64x128xf32>
    %c5_312 = arith.constant 5 : index
    %c0_313 = arith.constant 0 : index
    %c0_314 = arith.constant 0 : index
    %357 = vector.load %arg1[%c5_312, %c0_313, %c0_314] : memref<12x64x128xf32, #tpu.memory_space<vmem>>, vector<1x64x128xf32>
    %358 = vector.shape_cast %357 : vector<1x64x128xf32> to vector<64x128xf32>
    %359 = arith.mulf %356, %358 : vector<64x128xf32>
    %cst_315 = arith.constant dense<0.000000e+00> : vector<128xf32>
    %360 = vector.multi_reduction <add>, %359, %cst_315 [0] : vector<64x128xf32> to vector<128xf32>
    %361 = vector.shape_cast %360 : vector<128xf32> to vector<1x128xf32>
    %c65 = arith.constant 65 : index
    %c0_316 = arith.constant 0 : index
    %362 = vector.load %arg2[%c65, %c0_316] : memref<144x128xf32, #tpu.memory_space<vmem>>, vector<1x128xf32>
    tpu.vector_store %arg2[%c65, %c0_316], %361 {strides = array<i32>} : memref<144x128xf32, #tpu.memory_space<vmem>>, vector<1x128xf32>,
    %c6_317 = arith.constant 6 : index
    %c0_318 = arith.constant 0 : index
    %c0_319 = arith.constant 0 : index
    %363 = vector.load %arg1[%c6_317, %c0_318, %c0_319] : memref<12x64x128xf32, #tpu.memory_space<vmem>>, vector<1x64x128xf32>
    %364 = vector.shape_cast %363 : vector<1x64x128xf32> to vector<64x128xf32>
    %365 = arith.mulf %356, %364 : vector<64x128xf32>
    %cst_320 = arith.constant dense<0.000000e+00> : vector<128xf32>
    %366 = vector.multi_reduction <add>, %365, %cst_320 [0] : vector<64x128xf32> to vector<128xf32>
    %367 = vector.shape_cast %366 : vector<128xf32> to vector<1x128xf32>
    %c66 = arith.constant 66 : index
    %c0_321 = arith.constant 0 : index
    %368 = vector.load %arg2[%c66, %c0_321] : memref<144x128xf32, #tpu.memory_space<vmem>>, vector<1x128xf32>
    tpu.vector_store %arg2[%c66, %c0_321], %367 {strides = array<i32>} : memref<144x128xf32, #tpu.memory_space<vmem>>, vector<1x128xf32>,
    %c77 = arith.constant 77 : index
    %c0_322 = arith.constant 0 : index
    %369 = vector.load %arg2[%c77, %c0_322] : memref<144x128xf32, #tpu.memory_space<vmem>>, vector<1x128xf32>
    tpu.vector_store %arg2[%c77, %c0_322], %367 {strides = array<i32>} : memref<144x128xf32, #tpu.memory_space<vmem>>, vector<1x128xf32>,
    %c7_323 = arith.constant 7 : index
    %c0_324 = arith.constant 0 : index
    %c0_325 = arith.constant 0 : index
    %370 = vector.load %arg1[%c7_323, %c0_324, %c0_325] : memref<12x64x128xf32, #tpu.memory_space<vmem>>, vector<1x64x128xf32>
    %371 = vector.shape_cast %370 : vector<1x64x128xf32> to vector<64x128xf32>
    %372 = arith.mulf %356, %371 : vector<64x128xf32>
    %cst_326 = arith.constant dense<0.000000e+00> : vector<128xf32>
    %373 = vector.multi_reduction <add>, %372, %cst_326 [0] : vector<64x128xf32> to vector<128xf32>
    %374 = vector.shape_cast %373 : vector<128xf32> to vector<1x128xf32>
    %c67 = arith.constant 67 : index
    %c0_327 = arith.constant 0 : index
    %375 = vector.load %arg2[%c67, %c0_327] : memref<144x128xf32, #tpu.memory_space<vmem>>, vector<1x128xf32>
    tpu.vector_store %arg2[%c67, %c0_327], %374 {strides = array<i32>} : memref<144x128xf32, #tpu.memory_space<vmem>>, vector<1x128xf32>,
    %c89 = arith.constant 89 : index
    %c0_328 = arith.constant 0 : index
    %376 = vector.load %arg2[%c89, %c0_328] : memref<144x128xf32, #tpu.memory_space<vmem>>, vector<1x128xf32>
    tpu.vector_store %arg2[%c89, %c0_328], %374 {strides = array<i32>} : memref<144x128xf32, #tpu.memory_space<vmem>>, vector<1x128xf32>,
    %c8_329 = arith.constant 8 : index
    %c0_330 = arith.constant 0 : index
    %c0_331 = arith.constant 0 : index
    %377 = vector.load %arg1[%c8_329, %c0_330, %c0_331] : memref<12x64x128xf32, #tpu.memory_space<vmem>>, vector<1x64x128xf32>
    %378 = vector.shape_cast %377 : vector<1x64x128xf32> to vector<64x128xf32>
    %379 = arith.mulf %356, %378 : vector<64x128xf32>
    %cst_332 = arith.constant dense<0.000000e+00> : vector<128xf32>
    %380 = vector.multi_reduction <add>, %379, %cst_332 [0] : vector<64x128xf32> to vector<128xf32>
    %381 = vector.shape_cast %380 : vector<128xf32> to vector<1x128xf32>
    %c68 = arith.constant 68 : index
    %c0_333 = arith.constant 0 : index
    %382 = vector.load %arg2[%c68, %c0_333] : memref<144x128xf32, #tpu.memory_space<vmem>>, vector<1x128xf32>
    tpu.vector_store %arg2[%c68, %c0_333], %381 {strides = array<i32>} : memref<144x128xf32, #tpu.memory_space<vmem>>, vector<1x128xf32>,
    %c101 = arith.constant 101 : index
    %c0_334 = arith.constant 0 : index
    %383 = vector.load %arg2[%c101, %c0_334] : memref<144x128xf32, #tpu.memory_space<vmem>>, vector<1x128xf32>
    tpu.vector_store %arg2[%c101, %c0_334], %381 {strides = array<i32>} : memref<144x128xf32, #tpu.memory_space<vmem>>, vector<1x128xf32>,
    %c9_335 = arith.constant 9 : index
    %c0_336 = arith.constant 0 : index
    %c0_337 = arith.constant 0 : index
    %384 = vector.load %arg1[%c9_335, %c0_336, %c0_337] : memref<12x64x128xf32, #tpu.memory_space<vmem>>, vector<1x64x128xf32>
    %385 = vector.shape_cast %384 : vector<1x64x128xf32> to vector<64x128xf32>
    %386 = arith.mulf %356, %385 : vector<64x128xf32>
    %cst_338 = arith.constant dense<0.000000e+00> : vector<128xf32>
    %387 = vector.multi_reduction <add>, %386, %cst_338 [0] : vector<64x128xf32> to vector<128xf32>
    %388 = vector.shape_cast %387 : vector<128xf32> to vector<1x128xf32>
    %c69 = arith.constant 69 : index
    %c0_339 = arith.constant 0 : index
    %389 = vector.load %arg2[%c69, %c0_339] : memref<144x128xf32, #tpu.memory_space<vmem>>, vector<1x128xf32>
    tpu.vector_store %arg2[%c69, %c0_339], %388 {strides = array<i32>} : memref<144x128xf32, #tpu.memory_space<vmem>>, vector<1x128xf32>,
    %c113 = arith.constant 113 : index
    %c0_340 = arith.constant 0 : index
    %390 = vector.load %arg2[%c113, %c0_340] : memref<144x128xf32, #tpu.memory_space<vmem>>, vector<1x128xf32>
    tpu.vector_store %arg2[%c113, %c0_340], %388 {strides = array<i32>} : memref<144x128xf32, #tpu.memory_space<vmem>>, vector<1x128xf32>,
    %c10_341 = arith.constant 10 : index
    %c0_342 = arith.constant 0 : index
    %c0_343 = arith.constant 0 : index
    %391 = vector.load %arg1[%c10_341, %c0_342, %c0_343] : memref<12x64x128xf32, #tpu.memory_space<vmem>>, vector<1x64x128xf32>
    %392 = vector.shape_cast %391 : vector<1x64x128xf32> to vector<64x128xf32>
    %393 = arith.mulf %356, %392 : vector<64x128xf32>
    %cst_344 = arith.constant dense<0.000000e+00> : vector<128xf32>
    %394 = vector.multi_reduction <add>, %393, %cst_344 [0] : vector<64x128xf32> to vector<128xf32>
    %395 = vector.shape_cast %394 : vector<128xf32> to vector<1x128xf32>
    %c70 = arith.constant 70 : index
    %c0_345 = arith.constant 0 : index
    %396 = vector.load %arg2[%c70, %c0_345] : memref<144x128xf32, #tpu.memory_space<vmem>>, vector<1x128xf32>
    tpu.vector_store %arg2[%c70, %c0_345], %395 {strides = array<i32>} : memref<144x128xf32, #tpu.memory_space<vmem>>, vector<1x128xf32>,
    %c125 = arith.constant 125 : index
    %c0_346 = arith.constant 0 : index
    %397 = vector.load %arg2[%c125, %c0_346] : memref<144x128xf32, #tpu.memory_space<vmem>>, vector<1x128xf32>
    tpu.vector_store %arg2[%c125, %c0_346], %395 {strides = array<i32>} : memref<144x128xf32, #tpu.memory_space<vmem>>, vector<1x128xf32>,
    %c11_347 = arith.constant 11 : index
    %c0_348 = arith.constant 0 : index
    %c0_349 = arith.constant 0 : index
    %398 = vector.load %arg1[%c11_347, %c0_348, %c0_349] : memref<12x64x128xf32, #tpu.memory_space<vmem>>, vector<1x64x128xf32>
    %399 = vector.shape_cast %398 : vector<1x64x128xf32> to vector<64x128xf32>
    %400 = arith.mulf %356, %399 : vector<64x128xf32>
    %cst_350 = arith.constant dense<0.000000e+00> : vector<128xf32>
    %401 = vector.multi_reduction <add>, %400, %cst_350 [0] : vector<64x128xf32> to vector<128xf32>
    %402 = vector.shape_cast %401 : vector<128xf32> to vector<1x128xf32>
    %c71 = arith.constant 71 : index
    %c0_351 = arith.constant 0 : index
    %403 = vector.load %arg2[%c71, %c0_351] : memref<144x128xf32, #tpu.memory_space<vmem>>, vector<1x128xf32>
    tpu.vector_store %arg2[%c71, %c0_351], %402 {strides = array<i32>} : memref<144x128xf32, #tpu.memory_space<vmem>>, vector<1x128xf32>,
    %c137 = arith.constant 137 : index
    %c0_352 = arith.constant 0 : index
    %404 = vector.load %arg2[%c137, %c0_352] : memref<144x128xf32, #tpu.memory_space<vmem>>, vector<1x128xf32>
    tpu.vector_store %arg2[%c137, %c0_352], %402 {strides = array<i32>} : memref<144x128xf32, #tpu.memory_space<vmem>>, vector<1x128xf32>,
    %c6_353 = arith.constant 6 : index
    %c0_354 = arith.constant 0 : index
    %c0_355 = arith.constant 0 : index
    %405 = vector.load %arg1[%c6_353, %c0_354, %c0_355] : memref<12x64x128xf32, #tpu.memory_space<vmem>>, vector<1x64x128xf32>
    %406 = vector.shape_cast %405 : vector<1x64x128xf32> to vector<64x128xf32>
    %c6_356 = arith.constant 6 : index
    %c0_357 = arith.constant 0 : index
    %c0_358 = arith.constant 0 : index
    %407 = vector.load %arg1[%c6_356, %c0_357, %c0_358] : memref<12x64x128xf32, #tpu.memory_space<vmem>>, vector<1x64x128xf32>
    %408 = vector.shape_cast %407 : vector<1x64x128xf32> to vector<64x128xf32>
    %409 = arith.mulf %406, %408 : vector<64x128xf32>
    %cst_359 = arith.constant dense<0.000000e+00> : vector<128xf32>
    %410 = vector.multi_reduction <add>, %409, %cst_359 [0] : vector<64x128xf32> to vector<128xf32>
    %411 = vector.shape_cast %410 : vector<128xf32> to vector<1x128xf32>
    %c78 = arith.constant 78 : index
    %c0_360 = arith.constant 0 : index
    %412 = vector.load %arg2[%c78, %c0_360] : memref<144x128xf32, #tpu.memory_space<vmem>>, vector<1x128xf32>
    tpu.vector_store %arg2[%c78, %c0_360], %411 {strides = array<i32>} : memref<144x128xf32, #tpu.memory_space<vmem>>, vector<1x128xf32>,
    %c7_361 = arith.constant 7 : index
    %c0_362 = arith.constant 0 : index
    %c0_363 = arith.constant 0 : index
    %413 = vector.load %arg1[%c7_361, %c0_362, %c0_363] : memref<12x64x128xf32, #tpu.memory_space<vmem>>, vector<1x64x128xf32>
    %414 = vector.shape_cast %413 : vector<1x64x128xf32> to vector<64x128xf32>
    %415 = arith.mulf %406, %414 : vector<64x128xf32>
    %cst_364 = arith.constant dense<0.000000e+00> : vector<128xf32>
    %416 = vector.multi_reduction <add>, %415, %cst_364 [0] : vector<64x128xf32> to vector<128xf32>
    %417 = vector.shape_cast %416 : vector<128xf32> to vector<1x128xf32>
    %c79 = arith.constant 79 : index
    %c0_365 = arith.constant 0 : index
    %418 = vector.load %arg2[%c79, %c0_365] : memref<144x128xf32, #tpu.memory_space<vmem>>, vector<1x128xf32>
    tpu.vector_store %arg2[%c79, %c0_365], %417 {strides = array<i32>} : memref<144x128xf32, #tpu.memory_space<vmem>>, vector<1x128xf32>,
    %c90 = arith.constant 90 : index
    %c0_366 = arith.constant 0 : index
    %419 = vector.load %arg2[%c90, %c0_366] : memref<144x128xf32, #tpu.memory_space<vmem>>, vector<1x128xf32>
    tpu.vector_store %arg2[%c90, %c0_366], %417 {strides = array<i32>} : memref<144x128xf32, #tpu.memory_space<vmem>>, vector<1x128xf32>,
    %c8_367 = arith.constant 8 : index
    %c0_368 = arith.constant 0 : index
    %c0_369 = arith.constant 0 : index
    %420 = vector.load %arg1[%c8_367, %c0_368, %c0_369] : memref<12x64x128xf32, #tpu.memory_space<vmem>>, vector<1x64x128xf32>
    %421 = vector.shape_cast %420 : vector<1x64x128xf32> to vector<64x128xf32>
    %422 = arith.mulf %406, %421 : vector<64x128xf32>
    %cst_370 = arith.constant dense<0.000000e+00> : vector<128xf32>
    %423 = vector.multi_reduction <add>, %422, %cst_370 [0] : vector<64x128xf32> to vector<128xf32>
    %424 = vector.shape_cast %423 : vector<128xf32> to vector<1x128xf32>
    %c80 = arith.constant 80 : index
    %c0_371 = arith.constant 0 : index
    %425 = vector.load %arg2[%c80, %c0_371] : memref<144x128xf32, #tpu.memory_space<vmem>>, vector<1x128xf32>
    tpu.vector_store %arg2[%c80, %c0_371], %424 {strides = array<i32>} : memref<144x128xf32, #tpu.memory_space<vmem>>, vector<1x128xf32>,
    %c102 = arith.constant 102 : index
    %c0_372 = arith.constant 0 : index
    %426 = vector.load %arg2[%c102, %c0_372] : memref<144x128xf32, #tpu.memory_space<vmem>>, vector<1x128xf32>
    tpu.vector_store %arg2[%c102, %c0_372], %424 {strides = array<i32>} : memref<144x128xf32, #tpu.memory_space<vmem>>, vector<1x128xf32>,
    %c9_373 = arith.constant 9 : index
    %c0_374 = arith.constant 0 : index
    %c0_375 = arith.constant 0 : index
    %427 = vector.load %arg1[%c9_373, %c0_374, %c0_375] : memref<12x64x128xf32, #tpu.memory_space<vmem>>, vector<1x64x128xf32>
    %428 = vector.shape_cast %427 : vector<1x64x128xf32> to vector<64x128xf32>
    %429 = arith.mulf %406, %428 : vector<64x128xf32>
    %cst_376 = arith.constant dense<0.000000e+00> : vector<128xf32>
    %430 = vector.multi_reduction <add>, %429, %cst_376 [0] : vector<64x128xf32> to vector<128xf32>
    %431 = vector.shape_cast %430 : vector<128xf32> to vector<1x128xf32>
    %c81 = arith.constant 81 : index
    %c0_377 = arith.constant 0 : index
    %432 = vector.load %arg2[%c81, %c0_377] : memref<144x128xf32, #tpu.memory_space<vmem>>, vector<1x128xf32>
    tpu.vector_store %arg2[%c81, %c0_377], %431 {strides = array<i32>} : memref<144x128xf32, #tpu.memory_space<vmem>>, vector<1x128xf32>,
    %c114 = arith.constant 114 : index
    %c0_378 = arith.constant 0 : index
    %433 = vector.load %arg2[%c114, %c0_378] : memref<144x128xf32, #tpu.memory_space<vmem>>, vector<1x128xf32>
    tpu.vector_store %arg2[%c114, %c0_378], %431 {strides = array<i32>} : memref<144x128xf32, #tpu.memory_space<vmem>>, vector<1x128xf32>,
    %c10_379 = arith.constant 10 : index
    %c0_380 = arith.constant 0 : index
    %c0_381 = arith.constant 0 : index
    %434 = vector.load %arg1[%c10_379, %c0_380, %c0_381] : memref<12x64x128xf32, #tpu.memory_space<vmem>>, vector<1x64x128xf32>
    %435 = vector.shape_cast %434 : vector<1x64x128xf32> to vector<64x128xf32>
    %436 = arith.mulf %406, %435 : vector<64x128xf32>
    %cst_382 = arith.constant dense<0.000000e+00> : vector<128xf32>
    %437 = vector.multi_reduction <add>, %436, %cst_382 [0] : vector<64x128xf32> to vector<128xf32>
    %438 = vector.shape_cast %437 : vector<128xf32> to vector<1x128xf32>
    %c82 = arith.constant 82 : index
    %c0_383 = arith.constant 0 : index
    %439 = vector.load %arg2[%c82, %c0_383] : memref<144x128xf32, #tpu.memory_space<vmem>>, vector<1x128xf32>
    tpu.vector_store %arg2[%c82, %c0_383], %438 {strides = array<i32>} : memref<144x128xf32, #tpu.memory_space<vmem>>, vector<1x128xf32>,
    %c126 = arith.constant 126 : index
    %c0_384 = arith.constant 0 : index
    %440 = vector.load %arg2[%c126, %c0_384] : memref<144x128xf32, #tpu.memory_space<vmem>>, vector<1x128xf32>
    tpu.vector_store %arg2[%c126, %c0_384], %438 {strides = array<i32>} : memref<144x128xf32, #tpu.memory_space<vmem>>, vector<1x128xf32>,
    %c11_385 = arith.constant 11 : index
    %c0_386 = arith.constant 0 : index
    %c0_387 = arith.constant 0 : index
    %441 = vector.load %arg1[%c11_385, %c0_386, %c0_387] : memref<12x64x128xf32, #tpu.memory_space<vmem>>, vector<1x64x128xf32>
    %442 = vector.shape_cast %441 : vector<1x64x128xf32> to vector<64x128xf32>
    %443 = arith.mulf %406, %442 : vector<64x128xf32>
    %cst_388 = arith.constant dense<0.000000e+00> : vector<128xf32>
    %444 = vector.multi_reduction <add>, %443, %cst_388 [0] : vector<64x128xf32> to vector<128xf32>
    %445 = vector.shape_cast %444 : vector<128xf32> to vector<1x128xf32>
    %c83 = arith.constant 83 : index
    %c0_389 = arith.constant 0 : index
    %446 = vector.load %arg2[%c83, %c0_389] : memref<144x128xf32, #tpu.memory_space<vmem>>, vector<1x128xf32>
    tpu.vector_store %arg2[%c83, %c0_389], %445 {strides = array<i32>} : memref<144x128xf32, #tpu.memory_space<vmem>>, vector<1x128xf32>,
    %c138 = arith.constant 138 : index
    %c0_390 = arith.constant 0 : index
    %447 = vector.load %arg2[%c138, %c0_390] : memref<144x128xf32, #tpu.memory_space<vmem>>, vector<1x128xf32>
    tpu.vector_store %arg2[%c138, %c0_390], %445 {strides = array<i32>} : memref<144x128xf32, #tpu.memory_space<vmem>>, vector<1x128xf32>,
    %c7_391 = arith.constant 7 : index
    %c0_392 = arith.constant 0 : index
    %c0_393 = arith.constant 0 : index
    %448 = vector.load %arg1[%c7_391, %c0_392, %c0_393] : memref<12x64x128xf32, #tpu.memory_space<vmem>>, vector<1x64x128xf32>
    %449 = vector.shape_cast %448 : vector<1x64x128xf32> to vector<64x128xf32>
    %c7_394 = arith.constant 7 : index
    %c0_395 = arith.constant 0 : index
    %c0_396 = arith.constant 0 : index
    %450 = vector.load %arg1[%c7_394, %c0_395, %c0_396] : memref<12x64x128xf32, #tpu.memory_space<vmem>>, vector<1x64x128xf32>
    %451 = vector.shape_cast %450 : vector<1x64x128xf32> to vector<64x128xf32>
    %452 = arith.mulf %449, %451 : vector<64x128xf32>
    %cst_397 = arith.constant dense<0.000000e+00> : vector<128xf32>
    %453 = vector.multi_reduction <add>, %452, %cst_397 [0] : vector<64x128xf32> to vector<128xf32>
    %454 = vector.shape_cast %453 : vector<128xf32> to vector<1x128xf32>
    %c91 = arith.constant 91 : index
    %c0_398 = arith.constant 0 : index
    %455 = vector.load %arg2[%c91, %c0_398] : memref<144x128xf32, #tpu.memory_space<vmem>>, vector<1x128xf32>
    tpu.vector_store %arg2[%c91, %c0_398], %454 {strides = array<i32>} : memref<144x128xf32, #tpu.memory_space<vmem>>, vector<1x128xf32>,
    %c8_399 = arith.constant 8 : index
    %c0_400 = arith.constant 0 : index
    %c0_401 = arith.constant 0 : index
    %456 = vector.load %arg1[%c8_399, %c0_400, %c0_401] : memref<12x64x128xf32, #tpu.memory_space<vmem>>, vector<1x64x128xf32>
    %457 = vector.shape_cast %456 : vector<1x64x128xf32> to vector<64x128xf32>
    %458 = arith.mulf %449, %457 : vector<64x128xf32>
    %cst_402 = arith.constant dense<0.000000e+00> : vector<128xf32>
    %459 = vector.multi_reduction <add>, %458, %cst_402 [0] : vector<64x128xf32> to vector<128xf32>
    %460 = vector.shape_cast %459 : vector<128xf32> to vector<1x128xf32>
    %c92 = arith.constant 92 : index
    %c0_403 = arith.constant 0 : index
    %461 = vector.load %arg2[%c92, %c0_403] : memref<144x128xf32, #tpu.memory_space<vmem>>, vector<1x128xf32>
    tpu.vector_store %arg2[%c92, %c0_403], %460 {strides = array<i32>} : memref<144x128xf32, #tpu.memory_space<vmem>>, vector<1x128xf32>,
    %c103 = arith.constant 103 : index
    %c0_404 = arith.constant 0 : index
    %462 = vector.load %arg2[%c103, %c0_404] : memref<144x128xf32, #tpu.memory_space<vmem>>, vector<1x128xf32>
    tpu.vector_store %arg2[%c103, %c0_404], %460 {strides = array<i32>} : memref<144x128xf32, #tpu.memory_space<vmem>>, vector<1x128xf32>,
    %c9_405 = arith.constant 9 : index
    %c0_406 = arith.constant 0 : index
    %c0_407 = arith.constant 0 : index
    %463 = vector.load %arg1[%c9_405, %c0_406, %c0_407] : memref<12x64x128xf32, #tpu.memory_space<vmem>>, vector<1x64x128xf32>
    %464 = vector.shape_cast %463 : vector<1x64x128xf32> to vector<64x128xf32>
    %465 = arith.mulf %449, %464 : vector<64x128xf32>
    %cst_408 = arith.constant dense<0.000000e+00> : vector<128xf32>
    %466 = vector.multi_reduction <add>, %465, %cst_408 [0] : vector<64x128xf32> to vector<128xf32>
    %467 = vector.shape_cast %466 : vector<128xf32> to vector<1x128xf32>
    %c93 = arith.constant 93 : index
    %c0_409 = arith.constant 0 : index
    %468 = vector.load %arg2[%c93, %c0_409] : memref<144x128xf32, #tpu.memory_space<vmem>>, vector<1x128xf32>
    tpu.vector_store %arg2[%c93, %c0_409], %467 {strides = array<i32>} : memref<144x128xf32, #tpu.memory_space<vmem>>, vector<1x128xf32>,
    %c115 = arith.constant 115 : index
    %c0_410 = arith.constant 0 : index
    %469 = vector.load %arg2[%c115, %c0_410] : memref<144x128xf32, #tpu.memory_space<vmem>>, vector<1x128xf32>
    tpu.vector_store %arg2[%c115, %c0_410], %467 {strides = array<i32>} : memref<144x128xf32, #tpu.memory_space<vmem>>, vector<1x128xf32>,
    %c10_411 = arith.constant 10 : index
    %c0_412 = arith.constant 0 : index
    %c0_413 = arith.constant 0 : index
    %470 = vector.load %arg1[%c10_411, %c0_412, %c0_413] : memref<12x64x128xf32, #tpu.memory_space<vmem>>, vector<1x64x128xf32>
    %471 = vector.shape_cast %470 : vector<1x64x128xf32> to vector<64x128xf32>
    %472 = arith.mulf %449, %471 : vector<64x128xf32>
    %cst_414 = arith.constant dense<0.000000e+00> : vector<128xf32>
    %473 = vector.multi_reduction <add>, %472, %cst_414 [0] : vector<64x128xf32> to vector<128xf32>
    %474 = vector.shape_cast %473 : vector<128xf32> to vector<1x128xf32>
    %c94 = arith.constant 94 : index
    %c0_415 = arith.constant 0 : index
    %475 = vector.load %arg2[%c94, %c0_415] : memref<144x128xf32, #tpu.memory_space<vmem>>, vector<1x128xf32>
    tpu.vector_store %arg2[%c94, %c0_415], %474 {strides = array<i32>} : memref<144x128xf32, #tpu.memory_space<vmem>>, vector<1x128xf32>,
    %c127 = arith.constant 127 : index
    %c0_416 = arith.constant 0 : index
    %476 = vector.load %arg2[%c127, %c0_416] : memref<144x128xf32, #tpu.memory_space<vmem>>, vector<1x128xf32>
    tpu.vector_store %arg2[%c127, %c0_416], %474 {strides = array<i32>} : memref<144x128xf32, #tpu.memory_space<vmem>>, vector<1x128xf32>,
    %c11_417 = arith.constant 11 : index
    %c0_418 = arith.constant 0 : index
    %c0_419 = arith.constant 0 : index
    %477 = vector.load %arg1[%c11_417, %c0_418, %c0_419] : memref<12x64x128xf32, #tpu.memory_space<vmem>>, vector<1x64x128xf32>
    %478 = vector.shape_cast %477 : vector<1x64x128xf32> to vector<64x128xf32>
    %479 = arith.mulf %449, %478 : vector<64x128xf32>
    %cst_420 = arith.constant dense<0.000000e+00> : vector<128xf32>
    %480 = vector.multi_reduction <add>, %479, %cst_420 [0] : vector<64x128xf32> to vector<128xf32>
    %481 = vector.shape_cast %480 : vector<128xf32> to vector<1x128xf32>
    %c95 = arith.constant 95 : index
    %c0_421 = arith.constant 0 : index
    %482 = vector.load %arg2[%c95, %c0_421] : memref<144x128xf32, #tpu.memory_space<vmem>>, vector<1x128xf32>
    tpu.vector_store %arg2[%c95, %c0_421], %481 {strides = array<i32>} : memref<144x128xf32, #tpu.memory_space<vmem>>, vector<1x128xf32>,
    %c139 = arith.constant 139 : index
    %c0_422 = arith.constant 0 : index
    %483 = vector.load %arg2[%c139, %c0_422] : memref<144x128xf32, #tpu.memory_space<vmem>>, vector<1x128xf32>
    tpu.vector_store %arg2[%c139, %c0_422], %481 {strides = array<i32>} : memref<144x128xf32, #tpu.memory_space<vmem>>, vector<1x128xf32>,
    %c8_423 = arith.constant 8 : index
    %c0_424 = arith.constant 0 : index
    %c0_425 = arith.constant 0 : index
    %484 = vector.load %arg1[%c8_423, %c0_424, %c0_425] : memref<12x64x128xf32, #tpu.memory_space<vmem>>, vector<1x64x128xf32>
    %485 = vector.shape_cast %484 : vector<1x64x128xf32> to vector<64x128xf32>
    %c8_426 = arith.constant 8 : index
    %c0_427 = arith.constant 0 : index
    %c0_428 = arith.constant 0 : index
    %486 = vector.load %arg1[%c8_426, %c0_427, %c0_428] : memref<12x64x128xf32, #tpu.memory_space<vmem>>, vector<1x64x128xf32>
    %487 = vector.shape_cast %486 : vector<1x64x128xf32> to vector<64x128xf32>
    %488 = arith.mulf %485, %487 : vector<64x128xf32>
    %cst_429 = arith.constant dense<0.000000e+00> : vector<128xf32>
    %489 = vector.multi_reduction <add>, %488, %cst_429 [0] : vector<64x128xf32> to vector<128xf32>
    %490 = vector.shape_cast %489 : vector<128xf32> to vector<1x128xf32>
    %c104 = arith.constant 104 : index
    %c0_430 = arith.constant 0 : index
    %491 = vector.load %arg2[%c104, %c0_430] : memref<144x128xf32, #tpu.memory_space<vmem>>, vector<1x128xf32>
    tpu.vector_store %arg2[%c104, %c0_430], %490 {strides = array<i32>} : memref<144x128xf32, #tpu.memory_space<vmem>>, vector<1x128xf32>,
    %c9_431 = arith.constant 9 : index
    %c0_432 = arith.constant 0 : index
    %c0_433 = arith.constant 0 : index
    %492 = vector.load %arg1[%c9_431, %c0_432, %c0_433] : memref<12x64x128xf32, #tpu.memory_space<vmem>>, vector<1x64x128xf32>
    %493 = vector.shape_cast %492 : vector<1x64x128xf32> to vector<64x128xf32>
    %494 = arith.mulf %485, %493 : vector<64x128xf32>
    %cst_434 = arith.constant dense<0.000000e+00> : vector<128xf32>
    %495 = vector.multi_reduction <add>, %494, %cst_434 [0] : vector<64x128xf32> to vector<128xf32>
    %496 = vector.shape_cast %495 : vector<128xf32> to vector<1x128xf32>
    %c105 = arith.constant 105 : index
    %c0_435 = arith.constant 0 : index
    %497 = vector.load %arg2[%c105, %c0_435] : memref<144x128xf32, #tpu.memory_space<vmem>>, vector<1x128xf32>
    tpu.vector_store %arg2[%c105, %c0_435], %496 {strides = array<i32>} : memref<144x128xf32, #tpu.memory_space<vmem>>, vector<1x128xf32>,
    %c116 = arith.constant 116 : index
    %c0_436 = arith.constant 0 : index
    %498 = vector.load %arg2[%c116, %c0_436] : memref<144x128xf32, #tpu.memory_space<vmem>>, vector<1x128xf32>
    tpu.vector_store %arg2[%c116, %c0_436], %496 {strides = array<i32>} : memref<144x128xf32, #tpu.memory_space<vmem>>, vector<1x128xf32>,
    %c10_437 = arith.constant 10 : index
    %c0_438 = arith.constant 0 : index
    %c0_439 = arith.constant 0 : index
    %499 = vector.load %arg1[%c10_437, %c0_438, %c0_439] : memref<12x64x128xf32, #tpu.memory_space<vmem>>, vector<1x64x128xf32>
    %500 = vector.shape_cast %499 : vector<1x64x128xf32> to vector<64x128xf32>
    %501 = arith.mulf %485, %500 : vector<64x128xf32>
    %cst_440 = arith.constant dense<0.000000e+00> : vector<128xf32>
    %502 = vector.multi_reduction <add>, %501, %cst_440 [0] : vector<64x128xf32> to vector<128xf32>
    %503 = vector.shape_cast %502 : vector<128xf32> to vector<1x128xf32>
    %c106 = arith.constant 106 : index
    %c0_441 = arith.constant 0 : index
    %504 = vector.load %arg2[%c106, %c0_441] : memref<144x128xf32, #tpu.memory_space<vmem>>, vector<1x128xf32>
    tpu.vector_store %arg2[%c106, %c0_441], %503 {strides = array<i32>} : memref<144x128xf32, #tpu.memory_space<vmem>>, vector<1x128xf32>,
    %c128 = arith.constant 128 : index
    %c0_442 = arith.constant 0 : index
    %505 = vector.load %arg2[%c128, %c0_442] : memref<144x128xf32, #tpu.memory_space<vmem>>, vector<1x128xf32>
    tpu.vector_store %arg2[%c128, %c0_442], %503 {strides = array<i32>} : memref<144x128xf32, #tpu.memory_space<vmem>>, vector<1x128xf32>,
    %c11_443 = arith.constant 11 : index
    %c0_444 = arith.constant 0 : index
    %c0_445 = arith.constant 0 : index
    %506 = vector.load %arg1[%c11_443, %c0_444, %c0_445] : memref<12x64x128xf32, #tpu.memory_space<vmem>>, vector<1x64x128xf32>
    %507 = vector.shape_cast %506 : vector<1x64x128xf32> to vector<64x128xf32>
    %508 = arith.mulf %485, %507 : vector<64x128xf32>
    %cst_446 = arith.constant dense<0.000000e+00> : vector<128xf32>
    %509 = vector.multi_reduction <add>, %508, %cst_446 [0] : vector<64x128xf32> to vector<128xf32>
    %510 = vector.shape_cast %509 : vector<128xf32> to vector<1x128xf32>
    %c107 = arith.constant 107 : index
    %c0_447 = arith.constant 0 : index
    %511 = vector.load %arg2[%c107, %c0_447] : memref<144x128xf32, #tpu.memory_space<vmem>>, vector<1x128xf32>
    tpu.vector_store %arg2[%c107, %c0_447], %510 {strides = array<i32>} : memref<144x128xf32, #tpu.memory_space<vmem>>, vector<1x128xf32>,
    %c140 = arith.constant 140 : index
    %c0_448 = arith.constant 0 : index
    %512 = vector.load %arg2[%c140, %c0_448] : memref<144x128xf32, #tpu.memory_space<vmem>>, vector<1x128xf32>
    tpu.vector_store %arg2[%c140, %c0_448], %510 {strides = array<i32>} : memref<144x128xf32, #tpu.memory_space<vmem>>, vector<1x128xf32>,
    %c9_449 = arith.constant 9 : index
    %c0_450 = arith.constant 0 : index
    %c0_451 = arith.constant 0 : index
    %513 = vector.load %arg1[%c9_449, %c0_450, %c0_451] : memref<12x64x128xf32, #tpu.memory_space<vmem>>, vector<1x64x128xf32>
    %514 = vector.shape_cast %513 : vector<1x64x128xf32> to vector<64x128xf32>
    %c9_452 = arith.constant 9 : index
    %c0_453 = arith.constant 0 : index
    %c0_454 = arith.constant 0 : index
    %515 = vector.load %arg1[%c9_452, %c0_453, %c0_454] : memref<12x64x128xf32, #tpu.memory_space<vmem>>, vector<1x64x128xf32>
    %516 = vector.shape_cast %515 : vector<1x64x128xf32> to vector<64x128xf32>
    %517 = arith.mulf %514, %516 : vector<64x128xf32>
    %cst_455 = arith.constant dense<0.000000e+00> : vector<128xf32>
    %518 = vector.multi_reduction <add>, %517, %cst_455 [0] : vector<64x128xf32> to vector<128xf32>
    %519 = vector.shape_cast %518 : vector<128xf32> to vector<1x128xf32>
    %c117 = arith.constant 117 : index
    %c0_456 = arith.constant 0 : index
    %520 = vector.load %arg2[%c117, %c0_456] : memref<144x128xf32, #tpu.memory_space<vmem>>, vector<1x128xf32>
    tpu.vector_store %arg2[%c117, %c0_456], %519 {strides = array<i32>} : memref<144x128xf32, #tpu.memory_space<vmem>>, vector<1x128xf32>,
    %c10_457 = arith.constant 10 : index
    %c0_458 = arith.constant 0 : index
    %c0_459 = arith.constant 0 : index
    %521 = vector.load %arg1[%c10_457, %c0_458, %c0_459] : memref<12x64x128xf32, #tpu.memory_space<vmem>>, vector<1x64x128xf32>
    %522 = vector.shape_cast %521 : vector<1x64x128xf32> to vector<64x128xf32>
    %523 = arith.mulf %514, %522 : vector<64x128xf32>
    %cst_460 = arith.constant dense<0.000000e+00> : vector<128xf32>
    %524 = vector.multi_reduction <add>, %523, %cst_460 [0] : vector<64x128xf32> to vector<128xf32>
    %525 = vector.shape_cast %524 : vector<128xf32> to vector<1x128xf32>
    %c118 = arith.constant 118 : index
    %c0_461 = arith.constant 0 : index
    %526 = vector.load %arg2[%c118, %c0_461] : memref<144x128xf32, #tpu.memory_space<vmem>>, vector<1x128xf32>
    tpu.vector_store %arg2[%c118, %c0_461], %525 {strides = array<i32>} : memref<144x128xf32, #tpu.memory_space<vmem>>, vector<1x128xf32>,
    %c129 = arith.constant 129 : index
    %c0_462 = arith.constant 0 : index
    %527 = vector.load %arg2[%c129, %c0_462] : memref<144x128xf32, #tpu.memory_space<vmem>>, vector<1x128xf32>
    tpu.vector_store %arg2[%c129, %c0_462], %525 {strides = array<i32>} : memref<144x128xf32, #tpu.memory_space<vmem>>, vector<1x128xf32>,
    %c11_463 = arith.constant 11 : index
    %c0_464 = arith.constant 0 : index
    %c0_465 = arith.constant 0 : index
    %528 = vector.load %arg1[%c11_463, %c0_464, %c0_465] : memref<12x64x128xf32, #tpu.memory_space<vmem>>, vector<1x64x128xf32>
    %529 = vector.shape_cast %528 : vector<1x64x128xf32> to vector<64x128xf32>
    %530 = arith.mulf %514, %529 : vector<64x128xf32>
    %cst_466 = arith.constant dense<0.000000e+00> : vector<128xf32>
    %531 = vector.multi_reduction <add>, %530, %cst_466 [0] : vector<64x128xf32> to vector<128xf32>
    %532 = vector.shape_cast %531 : vector<128xf32> to vector<1x128xf32>
    %c119 = arith.constant 119 : index
    %c0_467 = arith.constant 0 : index
    %533 = vector.load %arg2[%c119, %c0_467] : memref<144x128xf32, #tpu.memory_space<vmem>>, vector<1x128xf32>
    tpu.vector_store %arg2[%c119, %c0_467], %532 {strides = array<i32>} : memref<144x128xf32, #tpu.memory_space<vmem>>, vector<1x128xf32>,
    %c141 = arith.constant 141 : index
    %c0_468 = arith.constant 0 : index
    %534 = vector.load %arg2[%c141, %c0_468] : memref<144x128xf32, #tpu.memory_space<vmem>>, vector<1x128xf32>
    tpu.vector_store %arg2[%c141, %c0_468], %532 {strides = array<i32>} : memref<144x128xf32, #tpu.memory_space<vmem>>, vector<1x128xf32>,
    %c10_469 = arith.constant 10 : index
    %c0_470 = arith.constant 0 : index
    %c0_471 = arith.constant 0 : index
    %535 = vector.load %arg1[%c10_469, %c0_470, %c0_471] : memref<12x64x128xf32, #tpu.memory_space<vmem>>, vector<1x64x128xf32>
    %536 = vector.shape_cast %535 : vector<1x64x128xf32> to vector<64x128xf32>
    %c10_472 = arith.constant 10 : index
    %c0_473 = arith.constant 0 : index
    %c0_474 = arith.constant 0 : index
    %537 = vector.load %arg1[%c10_472, %c0_473, %c0_474] : memref<12x64x128xf32, #tpu.memory_space<vmem>>, vector<1x64x128xf32>
    %538 = vector.shape_cast %537 : vector<1x64x128xf32> to vector<64x128xf32>
    %539 = arith.mulf %536, %538 : vector<64x128xf32>
    %cst_475 = arith.constant dense<0.000000e+00> : vector<128xf32>
    %540 = vector.multi_reduction <add>, %539, %cst_475 [0] : vector<64x128xf32> to vector<128xf32>
    %541 = vector.shape_cast %540 : vector<128xf32> to vector<1x128xf32>
    %c130 = arith.constant 130 : index
    %c0_476 = arith.constant 0 : index
    %542 = vector.load %arg2[%c130, %c0_476] : memref<144x128xf32, #tpu.memory_space<vmem>>, vector<1x128xf32>
    tpu.vector_store %arg2[%c130, %c0_476], %541 {strides = array<i32>} : memref<144x128xf32, #tpu.memory_space<vmem>>, vector<1x128xf32>,
    %c11_477 = arith.constant 11 : index
    %c0_478 = arith.constant 0 : index
    %c0_479 = arith.constant 0 : index
    %543 = vector.load %arg1[%c11_477, %c0_478, %c0_479] : memref<12x64x128xf32, #tpu.memory_space<vmem>>, vector<1x64x128xf32>
    %544 = vector.shape_cast %543 : vector<1x64x128xf32> to vector<64x128xf32>
    %545 = arith.mulf %536, %544 : vector<64x128xf32>
    %cst_480 = arith.constant dense<0.000000e+00> : vector<128xf32>
    %546 = vector.multi_reduction <add>, %545, %cst_480 [0] : vector<64x128xf32> to vector<128xf32>
    %547 = vector.shape_cast %546 : vector<128xf32> to vector<1x128xf32>
    %c131 = arith.constant 131 : index
    %c0_481 = arith.constant 0 : index
    %548 = vector.load %arg2[%c131, %c0_481] : memref<144x128xf32, #tpu.memory_space<vmem>>, vector<1x128xf32>
    tpu.vector_store %arg2[%c131, %c0_481], %547 {strides = array<i32>} : memref<144x128xf32, #tpu.memory_space<vmem>>, vector<1x128xf32>,
    %c142 = arith.constant 142 : index
    %c0_482 = arith.constant 0 : index
    %549 = vector.load %arg2[%c142, %c0_482] : memref<144x128xf32, #tpu.memory_space<vmem>>, vector<1x128xf32>
    tpu.vector_store %arg2[%c142, %c0_482], %547 {strides = array<i32>} : memref<144x128xf32, #tpu.memory_space<vmem>>, vector<1x128xf32>,
    %c11_483 = arith.constant 11 : index
    %c0_484 = arith.constant 0 : index
    %c0_485 = arith.constant 0 : index
    %550 = vector.load %arg1[%c11_483, %c0_484, %c0_485] : memref<12x64x128xf32, #tpu.memory_space<vmem>>, vector<1x64x128xf32>
    %551 = vector.shape_cast %550 : vector<1x64x128xf32> to vector<64x128xf32>
    %c11_486 = arith.constant 11 : index
    %c0_487 = arith.constant 0 : index
    %c0_488 = arith.constant 0 : index
    %552 = vector.load %arg1[%c11_486, %c0_487, %c0_488] : memref<12x64x128xf32, #tpu.memory_space<vmem>>, vector<1x64x128xf32>
    %553 = vector.shape_cast %552 : vector<1x64x128xf32> to vector<64x128xf32>
    %554 = arith.mulf %551, %553 : vector<64x128xf32>
    %cst_489 = arith.constant dense<0.000000e+00> : vector<128xf32>
    %555 = vector.multi_reduction <add>, %554, %cst_489 [0] : vector<64x128xf32> to vector<128xf32>
    %556 = vector.shape_cast %555 : vector<128xf32> to vector<1x128xf32>
    %c143 = arith.constant 143 : index
    %c0_490 = arith.constant 0 : index
    %557 = vector.load %arg2[%c143, %c0_490] : memref<144x128xf32, #tpu.memory_space<vmem>>, vector<1x128xf32>
    tpu.vector_store %arg2[%c143, %c0_490], %556 {strides = array<i32>} : memref<144x128xf32, #tpu.memory_space<vmem>>, vector<1x128xf32>,
    return
  }
  func.func @transform_0(%arg0: i32) -> (i32, i32, i32) {
    %c0_i32 = arith.constant 0 : i32
    %c0_i32_0 = arith.constant 0 : i32
    %c0_i32_1 = arith.constant 0 : i32
    return %c0_i32, %c0_i32_0, %arg0 : i32, i32, i32
  }
  func.func @transform_1(%arg0: i32) -> (i32, i32) {
    %c0_i32 = arith.constant 0 : i32
    %c0_i32_0 = arith.constant 0 : i32
    return %c0_i32, %arg0 : i32, i32
  }
}

module attributes {stable_mosaic.version = 11 : i64} {
  func.func @_projmap_fc_kernel(%arg0: i32, %arg1: memref<12x4x128xf32, #tpu.memory_space<vmem>>, %arg2: memref<10x144xf32, #tpu.memory_space<vmem>>, %arg3: memref<10x1xf32, #tpu.memory_space<vmem>>, %arg4: memref<10x128xf32, #tpu.memory_space<vmem>>, %arg5: memref<144x128xf32, #tpu.memory_space<vmem>>) attributes {dimension_semantics = [#tpu.dimension_semantics<parallel>], iteration_bounds = array<i64: 1>, scalar_prefetch = 0 : i64, scratch_operands = 1 : i64, tpu.core_type = #tpu.core_type<tc>, window_params = [{transform_indices = @transform_0, window_bounds = array<i64: 12, 4, 128>}, {pipeline_mode = #tpu.pipeline_mode<synchronous>, transform_indices = @transform_1, window_bounds = array<i64: 10, 144>}, {pipeline_mode = #tpu.pipeline_mode<synchronous>, transform_indices = @transform_2, window_bounds = array<i64: 10, 1>}, {transform_indices = @transform_3, window_bounds = array<i64: 10, 128>}]} {
    %c0 = arith.constant 0 : index
    %c0_0 = arith.constant 0 : index
    %c0_1 = arith.constant 0 : index
    %0 = vector.load %arg1[%c0, %c0_0, %c0_1] : memref<12x4x128xf32, #tpu.memory_space<vmem>>, vector<1x4x128xf32>
    %1 = vector.shape_cast %0 : vector<1x4x128xf32> to vector<4x128xf32>
    %c0_2 = arith.constant 0 : index
    %c0_3 = arith.constant 0 : index
    %c0_4 = arith.constant 0 : index
    %2 = vector.load %arg1[%c0_2, %c0_3, %c0_4] : memref<12x4x128xf32, #tpu.memory_space<vmem>>, vector<1x4x128xf32>
    %3 = vector.shape_cast %2 : vector<1x4x128xf32> to vector<4x128xf32>
    %4 = arith.mulf %1, %3 : vector<4x128xf32>
    %cst = arith.constant dense<0.000000e+00> : vector<128xf32>
    %5 = vector.multi_reduction <add>, %4, %cst [0] : vector<4x128xf32> to vector<128xf32>
    %6 = vector.shape_cast %5 : vector<128xf32> to vector<1x128xf32>
    %c0_5 = arith.constant 0 : index
    %c0_6 = arith.constant 0 : index
    %7 = vector.load %arg5[%c0_5, %c0_6] : memref<144x128xf32, #tpu.memory_space<vmem>>, vector<1x128xf32>
    tpu.vector_store %arg5[%c0_5, %c0_6], %6 {strides = array<i32>} : memref<144x128xf32, #tpu.memory_space<vmem>>, vector<1x128xf32>,
    %c1 = arith.constant 1 : index
    %c0_7 = arith.constant 0 : index
    %c0_8 = arith.constant 0 : index
    %8 = vector.load %arg1[%c1, %c0_7, %c0_8] : memref<12x4x128xf32, #tpu.memory_space<vmem>>, vector<1x4x128xf32>
    %9 = vector.shape_cast %8 : vector<1x4x128xf32> to vector<4x128xf32>
    %10 = arith.mulf %1, %9 : vector<4x128xf32>
    %cst_9 = arith.constant dense<0.000000e+00> : vector<128xf32>
    %11 = vector.multi_reduction <add>, %10, %cst_9 [0] : vector<4x128xf32> to vector<128xf32>
    %12 = vector.shape_cast %11 : vector<128xf32> to vector<1x128xf32>
    %c1_10 = arith.constant 1 : index
    %c0_11 = arith.constant 0 : index
    %13 = vector.load %arg5[%c1_10, %c0_11] : memref<144x128xf32, #tpu.memory_space<vmem>>, vector<1x128xf32>
    tpu.vector_store %arg5[%c1_10, %c0_11], %12 {strides = array<i32>} : memref<144x128xf32, #tpu.memory_space<vmem>>, vector<1x128xf32>,
    %c12 = arith.constant 12 : index
    %c0_12 = arith.constant 0 : index
    %14 = vector.load %arg5[%c12, %c0_12] : memref<144x128xf32, #tpu.memory_space<vmem>>, vector<1x128xf32>
    tpu.vector_store %arg5[%c12, %c0_12], %12 {strides = array<i32>} : memref<144x128xf32, #tpu.memory_space<vmem>>, vector<1x128xf32>,
    %c2 = arith.constant 2 : index
    %c0_13 = arith.constant 0 : index
    %c0_14 = arith.constant 0 : index
    %15 = vector.load %arg1[%c2, %c0_13, %c0_14] : memref<12x4x128xf32, #tpu.memory_space<vmem>>, vector<1x4x128xf32>
    %16 = vector.shape_cast %15 : vector<1x4x128xf32> to vector<4x128xf32>
    %17 = arith.mulf %1, %16 : vector<4x128xf32>
    %cst_15 = arith.constant dense<0.000000e+00> : vector<128xf32>
    %18 = vector.multi_reduction <add>, %17, %cst_15 [0] : vector<4x128xf32> to vector<128xf32>
    %19 = vector.shape_cast %18 : vector<128xf32> to vector<1x128xf32>
    %c2_16 = arith.constant 2 : index
    %c0_17 = arith.constant 0 : index
    %20 = vector.load %arg5[%c2_16, %c0_17] : memref<144x128xf32, #tpu.memory_space<vmem>>, vector<1x128xf32>
    tpu.vector_store %arg5[%c2_16, %c0_17], %19 {strides = array<i32>} : memref<144x128xf32, #tpu.memory_space<vmem>>, vector<1x128xf32>,
    %c24 = arith.constant 24 : index
    %c0_18 = arith.constant 0 : index
    %21 = vector.load %arg5[%c24, %c0_18] : memref<144x128xf32, #tpu.memory_space<vmem>>, vector<1x128xf32>
    tpu.vector_store %arg5[%c24, %c0_18], %19 {strides = array<i32>} : memref<144x128xf32, #tpu.memory_space<vmem>>, vector<1x128xf32>,
    %c3 = arith.constant 3 : index
    %c0_19 = arith.constant 0 : index
    %c0_20 = arith.constant 0 : index
    %22 = vector.load %arg1[%c3, %c0_19, %c0_20] : memref<12x4x128xf32, #tpu.memory_space<vmem>>, vector<1x4x128xf32>
    %23 = vector.shape_cast %22 : vector<1x4x128xf32> to vector<4x128xf32>
    %24 = arith.mulf %1, %23 : vector<4x128xf32>
    %cst_21 = arith.constant dense<0.000000e+00> : vector<128xf32>
    %25 = vector.multi_reduction <add>, %24, %cst_21 [0] : vector<4x128xf32> to vector<128xf32>
    %26 = vector.shape_cast %25 : vector<128xf32> to vector<1x128xf32>
    %c3_22 = arith.constant 3 : index
    %c0_23 = arith.constant 0 : index
    %27 = vector.load %arg5[%c3_22, %c0_23] : memref<144x128xf32, #tpu.memory_space<vmem>>, vector<1x128xf32>
    tpu.vector_store %arg5[%c3_22, %c0_23], %26 {strides = array<i32>} : memref<144x128xf32, #tpu.memory_space<vmem>>, vector<1x128xf32>,
    %c36 = arith.constant 36 : index
    %c0_24 = arith.constant 0 : index
    %28 = vector.load %arg5[%c36, %c0_24] : memref<144x128xf32, #tpu.memory_space<vmem>>, vector<1x128xf32>
    tpu.vector_store %arg5[%c36, %c0_24], %26 {strides = array<i32>} : memref<144x128xf32, #tpu.memory_space<vmem>>, vector<1x128xf32>,
    %c4 = arith.constant 4 : index
    %c0_25 = arith.constant 0 : index
    %c0_26 = arith.constant 0 : index
    %29 = vector.load %arg1[%c4, %c0_25, %c0_26] : memref<12x4x128xf32, #tpu.memory_space<vmem>>, vector<1x4x128xf32>
    %30 = vector.shape_cast %29 : vector<1x4x128xf32> to vector<4x128xf32>
    %31 = arith.mulf %1, %30 : vector<4x128xf32>
    %cst_27 = arith.constant dense<0.000000e+00> : vector<128xf32>
    %32 = vector.multi_reduction <add>, %31, %cst_27 [0] : vector<4x128xf32> to vector<128xf32>
    %33 = vector.shape_cast %32 : vector<128xf32> to vector<1x128xf32>
    %c4_28 = arith.constant 4 : index
    %c0_29 = arith.constant 0 : index
    %34 = vector.load %arg5[%c4_28, %c0_29] : memref<144x128xf32, #tpu.memory_space<vmem>>, vector<1x128xf32>
    tpu.vector_store %arg5[%c4_28, %c0_29], %33 {strides = array<i32>} : memref<144x128xf32, #tpu.memory_space<vmem>>, vector<1x128xf32>,
    %c48 = arith.constant 48 : index
    %c0_30 = arith.constant 0 : index
    %35 = vector.load %arg5[%c48, %c0_30] : memref<144x128xf32, #tpu.memory_space<vmem>>, vector<1x128xf32>
    tpu.vector_store %arg5[%c48, %c0_30], %33 {strides = array<i32>} : memref<144x128xf32, #tpu.memory_space<vmem>>, vector<1x128xf32>,
    %c5 = arith.constant 5 : index
    %c0_31 = arith.constant 0 : index
    %c0_32 = arith.constant 0 : index
    %36 = vector.load %arg1[%c5, %c0_31, %c0_32] : memref<12x4x128xf32, #tpu.memory_space<vmem>>, vector<1x4x128xf32>
    %37 = vector.shape_cast %36 : vector<1x4x128xf32> to vector<4x128xf32>
    %38 = arith.mulf %1, %37 : vector<4x128xf32>
    %cst_33 = arith.constant dense<0.000000e+00> : vector<128xf32>
    %39 = vector.multi_reduction <add>, %38, %cst_33 [0] : vector<4x128xf32> to vector<128xf32>
    %40 = vector.shape_cast %39 : vector<128xf32> to vector<1x128xf32>
    %c5_34 = arith.constant 5 : index
    %c0_35 = arith.constant 0 : index
    %41 = vector.load %arg5[%c5_34, %c0_35] : memref<144x128xf32, #tpu.memory_space<vmem>>, vector<1x128xf32>
    tpu.vector_store %arg5[%c5_34, %c0_35], %40 {strides = array<i32>} : memref<144x128xf32, #tpu.memory_space<vmem>>, vector<1x128xf32>,
    %c60 = arith.constant 60 : index
    %c0_36 = arith.constant 0 : index
    %42 = vector.load %arg5[%c60, %c0_36] : memref<144x128xf32, #tpu.memory_space<vmem>>, vector<1x128xf32>
    tpu.vector_store %arg5[%c60, %c0_36], %40 {strides = array<i32>} : memref<144x128xf32, #tpu.memory_space<vmem>>, vector<1x128xf32>,
    %c6 = arith.constant 6 : index
    %c0_37 = arith.constant 0 : index
    %c0_38 = arith.constant 0 : index
    %43 = vector.load %arg1[%c6, %c0_37, %c0_38] : memref<12x4x128xf32, #tpu.memory_space<vmem>>, vector<1x4x128xf32>
    %44 = vector.shape_cast %43 : vector<1x4x128xf32> to vector<4x128xf32>
    %45 = arith.mulf %1, %44 : vector<4x128xf32>
    %cst_39 = arith.constant dense<0.000000e+00> : vector<128xf32>
    %46 = vector.multi_reduction <add>, %45, %cst_39 [0] : vector<4x128xf32> to vector<128xf32>
    %47 = vector.shape_cast %46 : vector<128xf32> to vector<1x128xf32>
    %c6_40 = arith.constant 6 : index
    %c0_41 = arith.constant 0 : index
    %48 = vector.load %arg5[%c6_40, %c0_41] : memref<144x128xf32, #tpu.memory_space<vmem>>, vector<1x128xf32>
    tpu.vector_store %arg5[%c6_40, %c0_41], %47 {strides = array<i32>} : memref<144x128xf32, #tpu.memory_space<vmem>>, vector<1x128xf32>,
    %c72 = arith.constant 72 : index
    %c0_42 = arith.constant 0 : index
    %49 = vector.load %arg5[%c72, %c0_42] : memref<144x128xf32, #tpu.memory_space<vmem>>, vector<1x128xf32>
    tpu.vector_store %arg5[%c72, %c0_42], %47 {strides = array<i32>} : memref<144x128xf32, #tpu.memory_space<vmem>>, vector<1x128xf32>,
    %c7 = arith.constant 7 : index
    %c0_43 = arith.constant 0 : index
    %c0_44 = arith.constant 0 : index
    %50 = vector.load %arg1[%c7, %c0_43, %c0_44] : memref<12x4x128xf32, #tpu.memory_space<vmem>>, vector<1x4x128xf32>
    %51 = vector.shape_cast %50 : vector<1x4x128xf32> to vector<4x128xf32>
    %52 = arith.mulf %1, %51 : vector<4x128xf32>
    %cst_45 = arith.constant dense<0.000000e+00> : vector<128xf32>
    %53 = vector.multi_reduction <add>, %52, %cst_45 [0] : vector<4x128xf32> to vector<128xf32>
    %54 = vector.shape_cast %53 : vector<128xf32> to vector<1x128xf32>
    %c7_46 = arith.constant 7 : index
    %c0_47 = arith.constant 0 : index
    %55 = vector.load %arg5[%c7_46, %c0_47] : memref<144x128xf32, #tpu.memory_space<vmem>>, vector<1x128xf32>
    tpu.vector_store %arg5[%c7_46, %c0_47], %54 {strides = array<i32>} : memref<144x128xf32, #tpu.memory_space<vmem>>, vector<1x128xf32>,
    %c84 = arith.constant 84 : index
    %c0_48 = arith.constant 0 : index
    %56 = vector.load %arg5[%c84, %c0_48] : memref<144x128xf32, #tpu.memory_space<vmem>>, vector<1x128xf32>
    tpu.vector_store %arg5[%c84, %c0_48], %54 {strides = array<i32>} : memref<144x128xf32, #tpu.memory_space<vmem>>, vector<1x128xf32>,
    %c8 = arith.constant 8 : index
    %c0_49 = arith.constant 0 : index
    %c0_50 = arith.constant 0 : index
    %57 = vector.load %arg1[%c8, %c0_49, %c0_50] : memref<12x4x128xf32, #tpu.memory_space<vmem>>, vector<1x4x128xf32>
    %58 = vector.shape_cast %57 : vector<1x4x128xf32> to vector<4x128xf32>
    %59 = arith.mulf %1, %58 : vector<4x128xf32>
    %cst_51 = arith.constant dense<0.000000e+00> : vector<128xf32>
    %60 = vector.multi_reduction <add>, %59, %cst_51 [0] : vector<4x128xf32> to vector<128xf32>
    %61 = vector.shape_cast %60 : vector<128xf32> to vector<1x128xf32>
    %c8_52 = arith.constant 8 : index
    %c0_53 = arith.constant 0 : index
    %62 = vector.load %arg5[%c8_52, %c0_53] : memref<144x128xf32, #tpu.memory_space<vmem>>, vector<1x128xf32>
    tpu.vector_store %arg5[%c8_52, %c0_53], %61 {strides = array<i32>} : memref<144x128xf32, #tpu.memory_space<vmem>>, vector<1x128xf32>,
    %c96 = arith.constant 96 : index
    %c0_54 = arith.constant 0 : index
    %63 = vector.load %arg5[%c96, %c0_54] : memref<144x128xf32, #tpu.memory_space<vmem>>, vector<1x128xf32>
    tpu.vector_store %arg5[%c96, %c0_54], %61 {strides = array<i32>} : memref<144x128xf32, #tpu.memory_space<vmem>>, vector<1x128xf32>,
    %c9 = arith.constant 9 : index
    %c0_55 = arith.constant 0 : index
    %c0_56 = arith.constant 0 : index
    %64 = vector.load %arg1[%c9, %c0_55, %c0_56] : memref<12x4x128xf32, #tpu.memory_space<vmem>>, vector<1x4x128xf32>
    %65 = vector.shape_cast %64 : vector<1x4x128xf32> to vector<4x128xf32>
    %66 = arith.mulf %1, %65 : vector<4x128xf32>
    %cst_57 = arith.constant dense<0.000000e+00> : vector<128xf32>
    %67 = vector.multi_reduction <add>, %66, %cst_57 [0] : vector<4x128xf32> to vector<128xf32>
    %68 = vector.shape_cast %67 : vector<128xf32> to vector<1x128xf32>
    %c9_58 = arith.constant 9 : index
    %c0_59 = arith.constant 0 : index
    %69 = vector.load %arg5[%c9_58, %c0_59] : memref<144x128xf32, #tpu.memory_space<vmem>>, vector<1x128xf32>
    tpu.vector_store %arg5[%c9_58, %c0_59], %68 {strides = array<i32>} : memref<144x128xf32, #tpu.memory_space<vmem>>, vector<1x128xf32>,
    %c108 = arith.constant 108 : index
    %c0_60 = arith.constant 0 : index
    %70 = vector.load %arg5[%c108, %c0_60] : memref<144x128xf32, #tpu.memory_space<vmem>>, vector<1x128xf32>
    tpu.vector_store %arg5[%c108, %c0_60], %68 {strides = array<i32>} : memref<144x128xf32, #tpu.memory_space<vmem>>, vector<1x128xf32>,
    %c10 = arith.constant 10 : index
    %c0_61 = arith.constant 0 : index
    %c0_62 = arith.constant 0 : index
    %71 = vector.load %arg1[%c10, %c0_61, %c0_62] : memref<12x4x128xf32, #tpu.memory_space<vmem>>, vector<1x4x128xf32>
    %72 = vector.shape_cast %71 : vector<1x4x128xf32> to vector<4x128xf32>
    %73 = arith.mulf %1, %72 : vector<4x128xf32>
    %cst_63 = arith.constant dense<0.000000e+00> : vector<128xf32>
    %74 = vector.multi_reduction <add>, %73, %cst_63 [0] : vector<4x128xf32> to vector<128xf32>
    %75 = vector.shape_cast %74 : vector<128xf32> to vector<1x128xf32>
    %c10_64 = arith.constant 10 : index
    %c0_65 = arith.constant 0 : index
    %76 = vector.load %arg5[%c10_64, %c0_65] : memref<144x128xf32, #tpu.memory_space<vmem>>, vector<1x128xf32>
    tpu.vector_store %arg5[%c10_64, %c0_65], %75 {strides = array<i32>} : memref<144x128xf32, #tpu.memory_space<vmem>>, vector<1x128xf32>,
    %c120 = arith.constant 120 : index
    %c0_66 = arith.constant 0 : index
    %77 = vector.load %arg5[%c120, %c0_66] : memref<144x128xf32, #tpu.memory_space<vmem>>, vector<1x128xf32>
    tpu.vector_store %arg5[%c120, %c0_66], %75 {strides = array<i32>} : memref<144x128xf32, #tpu.memory_space<vmem>>, vector<1x128xf32>,
    %c11 = arith.constant 11 : index
    %c0_67 = arith.constant 0 : index
    %c0_68 = arith.constant 0 : index
    %78 = vector.load %arg1[%c11, %c0_67, %c0_68] : memref<12x4x128xf32, #tpu.memory_space<vmem>>, vector<1x4x128xf32>
    %79 = vector.shape_cast %78 : vector<1x4x128xf32> to vector<4x128xf32>
    %80 = arith.mulf %1, %79 : vector<4x128xf32>
    %cst_69 = arith.constant dense<0.000000e+00> : vector<128xf32>
    %81 = vector.multi_reduction <add>, %80, %cst_69 [0] : vector<4x128xf32> to vector<128xf32>
    %82 = vector.shape_cast %81 : vector<128xf32> to vector<1x128xf32>
    %c11_70 = arith.constant 11 : index
    %c0_71 = arith.constant 0 : index
    %83 = vector.load %arg5[%c11_70, %c0_71] : memref<144x128xf32, #tpu.memory_space<vmem>>, vector<1x128xf32>
    tpu.vector_store %arg5[%c11_70, %c0_71], %82 {strides = array<i32>} : memref<144x128xf32, #tpu.memory_space<vmem>>, vector<1x128xf32>,
    %c132 = arith.constant 132 : index
    %c0_72 = arith.constant 0 : index
    %84 = vector.load %arg5[%c132, %c0_72] : memref<144x128xf32, #tpu.memory_space<vmem>>, vector<1x128xf32>
    tpu.vector_store %arg5[%c132, %c0_72], %82 {strides = array<i32>} : memref<144x128xf32, #tpu.memory_space<vmem>>, vector<1x128xf32>,
    %c1_73 = arith.constant 1 : index
    %c0_74 = arith.constant 0 : index
    %c0_75 = arith.constant 0 : index
    %85 = vector.load %arg1[%c1_73, %c0_74, %c0_75] : memref<12x4x128xf32, #tpu.memory_space<vmem>>, vector<1x4x128xf32>
    %86 = vector.shape_cast %85 : vector<1x4x128xf32> to vector<4x128xf32>
    %c1_76 = arith.constant 1 : index
    %c0_77 = arith.constant 0 : index
    %c0_78 = arith.constant 0 : index
    %87 = vector.load %arg1[%c1_76, %c0_77, %c0_78] : memref<12x4x128xf32, #tpu.memory_space<vmem>>, vector<1x4x128xf32>
    %88 = vector.shape_cast %87 : vector<1x4x128xf32> to vector<4x128xf32>
    %89 = arith.mulf %86, %88 : vector<4x128xf32>
    %cst_79 = arith.constant dense<0.000000e+00> : vector<128xf32>
    %90 = vector.multi_reduction <add>, %89, %cst_79 [0] : vector<4x128xf32> to vector<128xf32>
    %91 = vector.shape_cast %90 : vector<128xf32> to vector<1x128xf32>
    %c13 = arith.constant 13 : index
    %c0_80 = arith.constant 0 : index
    %92 = vector.load %arg5[%c13, %c0_80] : memref<144x128xf32, #tpu.memory_space<vmem>>, vector<1x128xf32>
    tpu.vector_store %arg5[%c13, %c0_80], %91 {strides = array<i32>} : memref<144x128xf32, #tpu.memory_space<vmem>>, vector<1x128xf32>,
    %c2_81 = arith.constant 2 : index
    %c0_82 = arith.constant 0 : index
    %c0_83 = arith.constant 0 : index
    %93 = vector.load %arg1[%c2_81, %c0_82, %c0_83] : memref<12x4x128xf32, #tpu.memory_space<vmem>>, vector<1x4x128xf32>
    %94 = vector.shape_cast %93 : vector<1x4x128xf32> to vector<4x128xf32>
    %95 = arith.mulf %86, %94 : vector<4x128xf32>
    %cst_84 = arith.constant dense<0.000000e+00> : vector<128xf32>
    %96 = vector.multi_reduction <add>, %95, %cst_84 [0] : vector<4x128xf32> to vector<128xf32>
    %97 = vector.shape_cast %96 : vector<128xf32> to vector<1x128xf32>
    %c14 = arith.constant 14 : index
    %c0_85 = arith.constant 0 : index
    %98 = vector.load %arg5[%c14, %c0_85] : memref<144x128xf32, #tpu.memory_space<vmem>>, vector<1x128xf32>
    tpu.vector_store %arg5[%c14, %c0_85], %97 {strides = array<i32>} : memref<144x128xf32, #tpu.memory_space<vmem>>, vector<1x128xf32>,
    %c25 = arith.constant 25 : index
    %c0_86 = arith.constant 0 : index
    %99 = vector.load %arg5[%c25, %c0_86] : memref<144x128xf32, #tpu.memory_space<vmem>>, vector<1x128xf32>
    tpu.vector_store %arg5[%c25, %c0_86], %97 {strides = array<i32>} : memref<144x128xf32, #tpu.memory_space<vmem>>, vector<1x128xf32>,
    %c3_87 = arith.constant 3 : index
    %c0_88 = arith.constant 0 : index
    %c0_89 = arith.constant 0 : index
    %100 = vector.load %arg1[%c3_87, %c0_88, %c0_89] : memref<12x4x128xf32, #tpu.memory_space<vmem>>, vector<1x4x128xf32>
    %101 = vector.shape_cast %100 : vector<1x4x128xf32> to vector<4x128xf32>
    %102 = arith.mulf %86, %101 : vector<4x128xf32>
    %cst_90 = arith.constant dense<0.000000e+00> : vector<128xf32>
    %103 = vector.multi_reduction <add>, %102, %cst_90 [0] : vector<4x128xf32> to vector<128xf32>
    %104 = vector.shape_cast %103 : vector<128xf32> to vector<1x128xf32>
    %c15 = arith.constant 15 : index
    %c0_91 = arith.constant 0 : index
    %105 = vector.load %arg5[%c15, %c0_91] : memref<144x128xf32, #tpu.memory_space<vmem>>, vector<1x128xf32>
    tpu.vector_store %arg5[%c15, %c0_91], %104 {strides = array<i32>} : memref<144x128xf32, #tpu.memory_space<vmem>>, vector<1x128xf32>,
    %c37 = arith.constant 37 : index
    %c0_92 = arith.constant 0 : index
    %106 = vector.load %arg5[%c37, %c0_92] : memref<144x128xf32, #tpu.memory_space<vmem>>, vector<1x128xf32>
    tpu.vector_store %arg5[%c37, %c0_92], %104 {strides = array<i32>} : memref<144x128xf32, #tpu.memory_space<vmem>>, vector<1x128xf32>,
    %c4_93 = arith.constant 4 : index
    %c0_94 = arith.constant 0 : index
    %c0_95 = arith.constant 0 : index
    %107 = vector.load %arg1[%c4_93, %c0_94, %c0_95] : memref<12x4x128xf32, #tpu.memory_space<vmem>>, vector<1x4x128xf32>
    %108 = vector.shape_cast %107 : vector<1x4x128xf32> to vector<4x128xf32>
    %109 = arith.mulf %86, %108 : vector<4x128xf32>
    %cst_96 = arith.constant dense<0.000000e+00> : vector<128xf32>
    %110 = vector.multi_reduction <add>, %109, %cst_96 [0] : vector<4x128xf32> to vector<128xf32>
    %111 = vector.shape_cast %110 : vector<128xf32> to vector<1x128xf32>
    %c16 = arith.constant 16 : index
    %c0_97 = arith.constant 0 : index
    %112 = vector.load %arg5[%c16, %c0_97] : memref<144x128xf32, #tpu.memory_space<vmem>>, vector<1x128xf32>
    tpu.vector_store %arg5[%c16, %c0_97], %111 {strides = array<i32>} : memref<144x128xf32, #tpu.memory_space<vmem>>, vector<1x128xf32>,
    %c49 = arith.constant 49 : index
    %c0_98 = arith.constant 0 : index
    %113 = vector.load %arg5[%c49, %c0_98] : memref<144x128xf32, #tpu.memory_space<vmem>>, vector<1x128xf32>
    tpu.vector_store %arg5[%c49, %c0_98], %111 {strides = array<i32>} : memref<144x128xf32, #tpu.memory_space<vmem>>, vector<1x128xf32>,
    %c5_99 = arith.constant 5 : index
    %c0_100 = arith.constant 0 : index
    %c0_101 = arith.constant 0 : index
    %114 = vector.load %arg1[%c5_99, %c0_100, %c0_101] : memref<12x4x128xf32, #tpu.memory_space<vmem>>, vector<1x4x128xf32>
    %115 = vector.shape_cast %114 : vector<1x4x128xf32> to vector<4x128xf32>
    %116 = arith.mulf %86, %115 : vector<4x128xf32>
    %cst_102 = arith.constant dense<0.000000e+00> : vector<128xf32>
    %117 = vector.multi_reduction <add>, %116, %cst_102 [0] : vector<4x128xf32> to vector<128xf32>
    %118 = vector.shape_cast %117 : vector<128xf32> to vector<1x128xf32>
    %c17 = arith.constant 17 : index
    %c0_103 = arith.constant 0 : index
    %119 = vector.load %arg5[%c17, %c0_103] : memref<144x128xf32, #tpu.memory_space<vmem>>, vector<1x128xf32>
    tpu.vector_store %arg5[%c17, %c0_103], %118 {strides = array<i32>} : memref<144x128xf32, #tpu.memory_space<vmem>>, vector<1x128xf32>,
    %c61 = arith.constant 61 : index
    %c0_104 = arith.constant 0 : index
    %120 = vector.load %arg5[%c61, %c0_104] : memref<144x128xf32, #tpu.memory_space<vmem>>, vector<1x128xf32>
    tpu.vector_store %arg5[%c61, %c0_104], %118 {strides = array<i32>} : memref<144x128xf32, #tpu.memory_space<vmem>>, vector<1x128xf32>,
    %c6_105 = arith.constant 6 : index
    %c0_106 = arith.constant 0 : index
    %c0_107 = arith.constant 0 : index
    %121 = vector.load %arg1[%c6_105, %c0_106, %c0_107] : memref<12x4x128xf32, #tpu.memory_space<vmem>>, vector<1x4x128xf32>
    %122 = vector.shape_cast %121 : vector<1x4x128xf32> to vector<4x128xf32>
    %123 = arith.mulf %86, %122 : vector<4x128xf32>
    %cst_108 = arith.constant dense<0.000000e+00> : vector<128xf32>
    %124 = vector.multi_reduction <add>, %123, %cst_108 [0] : vector<4x128xf32> to vector<128xf32>
    %125 = vector.shape_cast %124 : vector<128xf32> to vector<1x128xf32>
    %c18 = arith.constant 18 : index
    %c0_109 = arith.constant 0 : index
    %126 = vector.load %arg5[%c18, %c0_109] : memref<144x128xf32, #tpu.memory_space<vmem>>, vector<1x128xf32>
    tpu.vector_store %arg5[%c18, %c0_109], %125 {strides = array<i32>} : memref<144x128xf32, #tpu.memory_space<vmem>>, vector<1x128xf32>,
    %c73 = arith.constant 73 : index
    %c0_110 = arith.constant 0 : index
    %127 = vector.load %arg5[%c73, %c0_110] : memref<144x128xf32, #tpu.memory_space<vmem>>, vector<1x128xf32>
    tpu.vector_store %arg5[%c73, %c0_110], %125 {strides = array<i32>} : memref<144x128xf32, #tpu.memory_space<vmem>>, vector<1x128xf32>,
    %c7_111 = arith.constant 7 : index
    %c0_112 = arith.constant 0 : index
    %c0_113 = arith.constant 0 : index
    %128 = vector.load %arg1[%c7_111, %c0_112, %c0_113] : memref<12x4x128xf32, #tpu.memory_space<vmem>>, vector<1x4x128xf32>
    %129 = vector.shape_cast %128 : vector<1x4x128xf32> to vector<4x128xf32>
    %130 = arith.mulf %86, %129 : vector<4x128xf32>
    %cst_114 = arith.constant dense<0.000000e+00> : vector<128xf32>
    %131 = vector.multi_reduction <add>, %130, %cst_114 [0] : vector<4x128xf32> to vector<128xf32>
    %132 = vector.shape_cast %131 : vector<128xf32> to vector<1x128xf32>
    %c19 = arith.constant 19 : index
    %c0_115 = arith.constant 0 : index
    %133 = vector.load %arg5[%c19, %c0_115] : memref<144x128xf32, #tpu.memory_space<vmem>>, vector<1x128xf32>
    tpu.vector_store %arg5[%c19, %c0_115], %132 {strides = array<i32>} : memref<144x128xf32, #tpu.memory_space<vmem>>, vector<1x128xf32>,
    %c85 = arith.constant 85 : index
    %c0_116 = arith.constant 0 : index
    %134 = vector.load %arg5[%c85, %c0_116] : memref<144x128xf32, #tpu.memory_space<vmem>>, vector<1x128xf32>
    tpu.vector_store %arg5[%c85, %c0_116], %132 {strides = array<i32>} : memref<144x128xf32, #tpu.memory_space<vmem>>, vector<1x128xf32>,
    %c8_117 = arith.constant 8 : index
    %c0_118 = arith.constant 0 : index
    %c0_119 = arith.constant 0 : index
    %135 = vector.load %arg1[%c8_117, %c0_118, %c0_119] : memref<12x4x128xf32, #tpu.memory_space<vmem>>, vector<1x4x128xf32>
    %136 = vector.shape_cast %135 : vector<1x4x128xf32> to vector<4x128xf32>
    %137 = arith.mulf %86, %136 : vector<4x128xf32>
    %cst_120 = arith.constant dense<0.000000e+00> : vector<128xf32>
    %138 = vector.multi_reduction <add>, %137, %cst_120 [0] : vector<4x128xf32> to vector<128xf32>
    %139 = vector.shape_cast %138 : vector<128xf32> to vector<1x128xf32>
    %c20 = arith.constant 20 : index
    %c0_121 = arith.constant 0 : index
    %140 = vector.load %arg5[%c20, %c0_121] : memref<144x128xf32, #tpu.memory_space<vmem>>, vector<1x128xf32>
    tpu.vector_store %arg5[%c20, %c0_121], %139 {strides = array<i32>} : memref<144x128xf32, #tpu.memory_space<vmem>>, vector<1x128xf32>,
    %c97 = arith.constant 97 : index
    %c0_122 = arith.constant 0 : index
    %141 = vector.load %arg5[%c97, %c0_122] : memref<144x128xf32, #tpu.memory_space<vmem>>, vector<1x128xf32>
    tpu.vector_store %arg5[%c97, %c0_122], %139 {strides = array<i32>} : memref<144x128xf32, #tpu.memory_space<vmem>>, vector<1x128xf32>,
    %c9_123 = arith.constant 9 : index
    %c0_124 = arith.constant 0 : index
    %c0_125 = arith.constant 0 : index
    %142 = vector.load %arg1[%c9_123, %c0_124, %c0_125] : memref<12x4x128xf32, #tpu.memory_space<vmem>>, vector<1x4x128xf32>
    %143 = vector.shape_cast %142 : vector<1x4x128xf32> to vector<4x128xf32>
    %144 = arith.mulf %86, %143 : vector<4x128xf32>
    %cst_126 = arith.constant dense<0.000000e+00> : vector<128xf32>
    %145 = vector.multi_reduction <add>, %144, %cst_126 [0] : vector<4x128xf32> to vector<128xf32>
    %146 = vector.shape_cast %145 : vector<128xf32> to vector<1x128xf32>
    %c21 = arith.constant 21 : index
    %c0_127 = arith.constant 0 : index
    %147 = vector.load %arg5[%c21, %c0_127] : memref<144x128xf32, #tpu.memory_space<vmem>>, vector<1x128xf32>
    tpu.vector_store %arg5[%c21, %c0_127], %146 {strides = array<i32>} : memref<144x128xf32, #tpu.memory_space<vmem>>, vector<1x128xf32>,
    %c109 = arith.constant 109 : index
    %c0_128 = arith.constant 0 : index
    %148 = vector.load %arg5[%c109, %c0_128] : memref<144x128xf32, #tpu.memory_space<vmem>>, vector<1x128xf32>
    tpu.vector_store %arg5[%c109, %c0_128], %146 {strides = array<i32>} : memref<144x128xf32, #tpu.memory_space<vmem>>, vector<1x128xf32>,
    %c10_129 = arith.constant 10 : index
    %c0_130 = arith.constant 0 : index
    %c0_131 = arith.constant 0 : index
    %149 = vector.load %arg1[%c10_129, %c0_130, %c0_131] : memref<12x4x128xf32, #tpu.memory_space<vmem>>, vector<1x4x128xf32>
    %150 = vector.shape_cast %149 : vector<1x4x128xf32> to vector<4x128xf32>
    %151 = arith.mulf %86, %150 : vector<4x128xf32>
    %cst_132 = arith.constant dense<0.000000e+00> : vector<128xf32>
    %152 = vector.multi_reduction <add>, %151, %cst_132 [0] : vector<4x128xf32> to vector<128xf32>
    %153 = vector.shape_cast %152 : vector<128xf32> to vector<1x128xf32>
    %c22 = arith.constant 22 : index
    %c0_133 = arith.constant 0 : index
    %154 = vector.load %arg5[%c22, %c0_133] : memref<144x128xf32, #tpu.memory_space<vmem>>, vector<1x128xf32>
    tpu.vector_store %arg5[%c22, %c0_133], %153 {strides = array<i32>} : memref<144x128xf32, #tpu.memory_space<vmem>>, vector<1x128xf32>,
    %c121 = arith.constant 121 : index
    %c0_134 = arith.constant 0 : index
    %155 = vector.load %arg5[%c121, %c0_134] : memref<144x128xf32, #tpu.memory_space<vmem>>, vector<1x128xf32>
    tpu.vector_store %arg5[%c121, %c0_134], %153 {strides = array<i32>} : memref<144x128xf32, #tpu.memory_space<vmem>>, vector<1x128xf32>,
    %c11_135 = arith.constant 11 : index
    %c0_136 = arith.constant 0 : index
    %c0_137 = arith.constant 0 : index
    %156 = vector.load %arg1[%c11_135, %c0_136, %c0_137] : memref<12x4x128xf32, #tpu.memory_space<vmem>>, vector<1x4x128xf32>
    %157 = vector.shape_cast %156 : vector<1x4x128xf32> to vector<4x128xf32>
    %158 = arith.mulf %86, %157 : vector<4x128xf32>
    %cst_138 = arith.constant dense<0.000000e+00> : vector<128xf32>
    %159 = vector.multi_reduction <add>, %158, %cst_138 [0] : vector<4x128xf32> to vector<128xf32>
    %160 = vector.shape_cast %159 : vector<128xf32> to vector<1x128xf32>
    %c23 = arith.constant 23 : index
    %c0_139 = arith.constant 0 : index
    %161 = vector.load %arg5[%c23, %c0_139] : memref<144x128xf32, #tpu.memory_space<vmem>>, vector<1x128xf32>
    tpu.vector_store %arg5[%c23, %c0_139], %160 {strides = array<i32>} : memref<144x128xf32, #tpu.memory_space<vmem>>, vector<1x128xf32>,
    %c133 = arith.constant 133 : index
    %c0_140 = arith.constant 0 : index
    %162 = vector.load %arg5[%c133, %c0_140] : memref<144x128xf32, #tpu.memory_space<vmem>>, vector<1x128xf32>
    tpu.vector_store %arg5[%c133, %c0_140], %160 {strides = array<i32>} : memref<144x128xf32, #tpu.memory_space<vmem>>, vector<1x128xf32>,
    %c2_141 = arith.constant 2 : index
    %c0_142 = arith.constant 0 : index
    %c0_143 = arith.constant 0 : index
    %163 = vector.load %arg1[%c2_141, %c0_142, %c0_143] : memref<12x4x128xf32, #tpu.memory_space<vmem>>, vector<1x4x128xf32>
    %164 = vector.shape_cast %163 : vector<1x4x128xf32> to vector<4x128xf32>
    %c2_144 = arith.constant 2 : index
    %c0_145 = arith.constant 0 : index
    %c0_146 = arith.constant 0 : index
    %165 = vector.load %arg1[%c2_144, %c0_145, %c0_146] : memref<12x4x128xf32, #tpu.memory_space<vmem>>, vector<1x4x128xf32>
    %166 = vector.shape_cast %165 : vector<1x4x128xf32> to vector<4x128xf32>
    %167 = arith.mulf %164, %166 : vector<4x128xf32>
    %cst_147 = arith.constant dense<0.000000e+00> : vector<128xf32>
    %168 = vector.multi_reduction <add>, %167, %cst_147 [0] : vector<4x128xf32> to vector<128xf32>
    %169 = vector.shape_cast %168 : vector<128xf32> to vector<1x128xf32>
    %c26 = arith.constant 26 : index
    %c0_148 = arith.constant 0 : index
    %170 = vector.load %arg5[%c26, %c0_148] : memref<144x128xf32, #tpu.memory_space<vmem>>, vector<1x128xf32>
    tpu.vector_store %arg5[%c26, %c0_148], %169 {strides = array<i32>} : memref<144x128xf32, #tpu.memory_space<vmem>>, vector<1x128xf32>,
    %c3_149 = arith.constant 3 : index
    %c0_150 = arith.constant 0 : index
    %c0_151 = arith.constant 0 : index
    %171 = vector.load %arg1[%c3_149, %c0_150, %c0_151] : memref<12x4x128xf32, #tpu.memory_space<vmem>>, vector<1x4x128xf32>
    %172 = vector.shape_cast %171 : vector<1x4x128xf32> to vector<4x128xf32>
    %173 = arith.mulf %164, %172 : vector<4x128xf32>
    %cst_152 = arith.constant dense<0.000000e+00> : vector<128xf32>
    %174 = vector.multi_reduction <add>, %173, %cst_152 [0] : vector<4x128xf32> to vector<128xf32>
    %175 = vector.shape_cast %174 : vector<128xf32> to vector<1x128xf32>
    %c27 = arith.constant 27 : index
    %c0_153 = arith.constant 0 : index
    %176 = vector.load %arg5[%c27, %c0_153] : memref<144x128xf32, #tpu.memory_space<vmem>>, vector<1x128xf32>
    tpu.vector_store %arg5[%c27, %c0_153], %175 {strides = array<i32>} : memref<144x128xf32, #tpu.memory_space<vmem>>, vector<1x128xf32>,
    %c38 = arith.constant 38 : index
    %c0_154 = arith.constant 0 : index
    %177 = vector.load %arg5[%c38, %c0_154] : memref<144x128xf32, #tpu.memory_space<vmem>>, vector<1x128xf32>
    tpu.vector_store %arg5[%c38, %c0_154], %175 {strides = array<i32>} : memref<144x128xf32, #tpu.memory_space<vmem>>, vector<1x128xf32>,
    %c4_155 = arith.constant 4 : index
    %c0_156 = arith.constant 0 : index
    %c0_157 = arith.constant 0 : index
    %178 = vector.load %arg1[%c4_155, %c0_156, %c0_157] : memref<12x4x128xf32, #tpu.memory_space<vmem>>, vector<1x4x128xf32>
    %179 = vector.shape_cast %178 : vector<1x4x128xf32> to vector<4x128xf32>
    %180 = arith.mulf %164, %179 : vector<4x128xf32>
    %cst_158 = arith.constant dense<0.000000e+00> : vector<128xf32>
    %181 = vector.multi_reduction <add>, %180, %cst_158 [0] : vector<4x128xf32> to vector<128xf32>
    %182 = vector.shape_cast %181 : vector<128xf32> to vector<1x128xf32>
    %c28 = arith.constant 28 : index
    %c0_159 = arith.constant 0 : index
    %183 = vector.load %arg5[%c28, %c0_159] : memref<144x128xf32, #tpu.memory_space<vmem>>, vector<1x128xf32>
    tpu.vector_store %arg5[%c28, %c0_159], %182 {strides = array<i32>} : memref<144x128xf32, #tpu.memory_space<vmem>>, vector<1x128xf32>,
    %c50 = arith.constant 50 : index
    %c0_160 = arith.constant 0 : index
    %184 = vector.load %arg5[%c50, %c0_160] : memref<144x128xf32, #tpu.memory_space<vmem>>, vector<1x128xf32>
    tpu.vector_store %arg5[%c50, %c0_160], %182 {strides = array<i32>} : memref<144x128xf32, #tpu.memory_space<vmem>>, vector<1x128xf32>,
    %c5_161 = arith.constant 5 : index
    %c0_162 = arith.constant 0 : index
    %c0_163 = arith.constant 0 : index
    %185 = vector.load %arg1[%c5_161, %c0_162, %c0_163] : memref<12x4x128xf32, #tpu.memory_space<vmem>>, vector<1x4x128xf32>
    %186 = vector.shape_cast %185 : vector<1x4x128xf32> to vector<4x128xf32>
    %187 = arith.mulf %164, %186 : vector<4x128xf32>
    %cst_164 = arith.constant dense<0.000000e+00> : vector<128xf32>
    %188 = vector.multi_reduction <add>, %187, %cst_164 [0] : vector<4x128xf32> to vector<128xf32>
    %189 = vector.shape_cast %188 : vector<128xf32> to vector<1x128xf32>
    %c29 = arith.constant 29 : index
    %c0_165 = arith.constant 0 : index
    %190 = vector.load %arg5[%c29, %c0_165] : memref<144x128xf32, #tpu.memory_space<vmem>>, vector<1x128xf32>
    tpu.vector_store %arg5[%c29, %c0_165], %189 {strides = array<i32>} : memref<144x128xf32, #tpu.memory_space<vmem>>, vector<1x128xf32>,
    %c62 = arith.constant 62 : index
    %c0_166 = arith.constant 0 : index
    %191 = vector.load %arg5[%c62, %c0_166] : memref<144x128xf32, #tpu.memory_space<vmem>>, vector<1x128xf32>
    tpu.vector_store %arg5[%c62, %c0_166], %189 {strides = array<i32>} : memref<144x128xf32, #tpu.memory_space<vmem>>, vector<1x128xf32>,
    %c6_167 = arith.constant 6 : index
    %c0_168 = arith.constant 0 : index
    %c0_169 = arith.constant 0 : index
    %192 = vector.load %arg1[%c6_167, %c0_168, %c0_169] : memref<12x4x128xf32, #tpu.memory_space<vmem>>, vector<1x4x128xf32>
    %193 = vector.shape_cast %192 : vector<1x4x128xf32> to vector<4x128xf32>
    %194 = arith.mulf %164, %193 : vector<4x128xf32>
    %cst_170 = arith.constant dense<0.000000e+00> : vector<128xf32>
    %195 = vector.multi_reduction <add>, %194, %cst_170 [0] : vector<4x128xf32> to vector<128xf32>
    %196 = vector.shape_cast %195 : vector<128xf32> to vector<1x128xf32>
    %c30 = arith.constant 30 : index
    %c0_171 = arith.constant 0 : index
    %197 = vector.load %arg5[%c30, %c0_171] : memref<144x128xf32, #tpu.memory_space<vmem>>, vector<1x128xf32>
    tpu.vector_store %arg5[%c30, %c0_171], %196 {strides = array<i32>} : memref<144x128xf32, #tpu.memory_space<vmem>>, vector<1x128xf32>,
    %c74 = arith.constant 74 : index
    %c0_172 = arith.constant 0 : index
    %198 = vector.load %arg5[%c74, %c0_172] : memref<144x128xf32, #tpu.memory_space<vmem>>, vector<1x128xf32>
    tpu.vector_store %arg5[%c74, %c0_172], %196 {strides = array<i32>} : memref<144x128xf32, #tpu.memory_space<vmem>>, vector<1x128xf32>,
    %c7_173 = arith.constant 7 : index
    %c0_174 = arith.constant 0 : index
    %c0_175 = arith.constant 0 : index
    %199 = vector.load %arg1[%c7_173, %c0_174, %c0_175] : memref<12x4x128xf32, #tpu.memory_space<vmem>>, vector<1x4x128xf32>
    %200 = vector.shape_cast %199 : vector<1x4x128xf32> to vector<4x128xf32>
    %201 = arith.mulf %164, %200 : vector<4x128xf32>
    %cst_176 = arith.constant dense<0.000000e+00> : vector<128xf32>
    %202 = vector.multi_reduction <add>, %201, %cst_176 [0] : vector<4x128xf32> to vector<128xf32>
    %203 = vector.shape_cast %202 : vector<128xf32> to vector<1x128xf32>
    %c31 = arith.constant 31 : index
    %c0_177 = arith.constant 0 : index
    %204 = vector.load %arg5[%c31, %c0_177] : memref<144x128xf32, #tpu.memory_space<vmem>>, vector<1x128xf32>
    tpu.vector_store %arg5[%c31, %c0_177], %203 {strides = array<i32>} : memref<144x128xf32, #tpu.memory_space<vmem>>, vector<1x128xf32>,
    %c86 = arith.constant 86 : index
    %c0_178 = arith.constant 0 : index
    %205 = vector.load %arg5[%c86, %c0_178] : memref<144x128xf32, #tpu.memory_space<vmem>>, vector<1x128xf32>
    tpu.vector_store %arg5[%c86, %c0_178], %203 {strides = array<i32>} : memref<144x128xf32, #tpu.memory_space<vmem>>, vector<1x128xf32>,
    %c8_179 = arith.constant 8 : index
    %c0_180 = arith.constant 0 : index
    %c0_181 = arith.constant 0 : index
    %206 = vector.load %arg1[%c8_179, %c0_180, %c0_181] : memref<12x4x128xf32, #tpu.memory_space<vmem>>, vector<1x4x128xf32>
    %207 = vector.shape_cast %206 : vector<1x4x128xf32> to vector<4x128xf32>
    %208 = arith.mulf %164, %207 : vector<4x128xf32>
    %cst_182 = arith.constant dense<0.000000e+00> : vector<128xf32>
    %209 = vector.multi_reduction <add>, %208, %cst_182 [0] : vector<4x128xf32> to vector<128xf32>
    %210 = vector.shape_cast %209 : vector<128xf32> to vector<1x128xf32>
    %c32 = arith.constant 32 : index
    %c0_183 = arith.constant 0 : index
    %211 = vector.load %arg5[%c32, %c0_183] : memref<144x128xf32, #tpu.memory_space<vmem>>, vector<1x128xf32>
    tpu.vector_store %arg5[%c32, %c0_183], %210 {strides = array<i32>} : memref<144x128xf32, #tpu.memory_space<vmem>>, vector<1x128xf32>,
    %c98 = arith.constant 98 : index
    %c0_184 = arith.constant 0 : index
    %212 = vector.load %arg5[%c98, %c0_184] : memref<144x128xf32, #tpu.memory_space<vmem>>, vector<1x128xf32>
    tpu.vector_store %arg5[%c98, %c0_184], %210 {strides = array<i32>} : memref<144x128xf32, #tpu.memory_space<vmem>>, vector<1x128xf32>,
    %c9_185 = arith.constant 9 : index
    %c0_186 = arith.constant 0 : index
    %c0_187 = arith.constant 0 : index
    %213 = vector.load %arg1[%c9_185, %c0_186, %c0_187] : memref<12x4x128xf32, #tpu.memory_space<vmem>>, vector<1x4x128xf32>
    %214 = vector.shape_cast %213 : vector<1x4x128xf32> to vector<4x128xf32>
    %215 = arith.mulf %164, %214 : vector<4x128xf32>
    %cst_188 = arith.constant dense<0.000000e+00> : vector<128xf32>
    %216 = vector.multi_reduction <add>, %215, %cst_188 [0] : vector<4x128xf32> to vector<128xf32>
    %217 = vector.shape_cast %216 : vector<128xf32> to vector<1x128xf32>
    %c33 = arith.constant 33 : index
    %c0_189 = arith.constant 0 : index
    %218 = vector.load %arg5[%c33, %c0_189] : memref<144x128xf32, #tpu.memory_space<vmem>>, vector<1x128xf32>
    tpu.vector_store %arg5[%c33, %c0_189], %217 {strides = array<i32>} : memref<144x128xf32, #tpu.memory_space<vmem>>, vector<1x128xf32>,
    %c110 = arith.constant 110 : index
    %c0_190 = arith.constant 0 : index
    %219 = vector.load %arg5[%c110, %c0_190] : memref<144x128xf32, #tpu.memory_space<vmem>>, vector<1x128xf32>
    tpu.vector_store %arg5[%c110, %c0_190], %217 {strides = array<i32>} : memref<144x128xf32, #tpu.memory_space<vmem>>, vector<1x128xf32>,
    %c10_191 = arith.constant 10 : index
    %c0_192 = arith.constant 0 : index
    %c0_193 = arith.constant 0 : index
    %220 = vector.load %arg1[%c10_191, %c0_192, %c0_193] : memref<12x4x128xf32, #tpu.memory_space<vmem>>, vector<1x4x128xf32>
    %221 = vector.shape_cast %220 : vector<1x4x128xf32> to vector<4x128xf32>
    %222 = arith.mulf %164, %221 : vector<4x128xf32>
    %cst_194 = arith.constant dense<0.000000e+00> : vector<128xf32>
    %223 = vector.multi_reduction <add>, %222, %cst_194 [0] : vector<4x128xf32> to vector<128xf32>
    %224 = vector.shape_cast %223 : vector<128xf32> to vector<1x128xf32>
    %c34 = arith.constant 34 : index
    %c0_195 = arith.constant 0 : index
    %225 = vector.load %arg5[%c34, %c0_195] : memref<144x128xf32, #tpu.memory_space<vmem>>, vector<1x128xf32>
    tpu.vector_store %arg5[%c34, %c0_195], %224 {strides = array<i32>} : memref<144x128xf32, #tpu.memory_space<vmem>>, vector<1x128xf32>,
    %c122 = arith.constant 122 : index
    %c0_196 = arith.constant 0 : index
    %226 = vector.load %arg5[%c122, %c0_196] : memref<144x128xf32, #tpu.memory_space<vmem>>, vector<1x128xf32>
    tpu.vector_store %arg5[%c122, %c0_196], %224 {strides = array<i32>} : memref<144x128xf32, #tpu.memory_space<vmem>>, vector<1x128xf32>,
    %c11_197 = arith.constant 11 : index
    %c0_198 = arith.constant 0 : index
    %c0_199 = arith.constant 0 : index
    %227 = vector.load %arg1[%c11_197, %c0_198, %c0_199] : memref<12x4x128xf32, #tpu.memory_space<vmem>>, vector<1x4x128xf32>
    %228 = vector.shape_cast %227 : vector<1x4x128xf32> to vector<4x128xf32>
    %229 = arith.mulf %164, %228 : vector<4x128xf32>
    %cst_200 = arith.constant dense<0.000000e+00> : vector<128xf32>
    %230 = vector.multi_reduction <add>, %229, %cst_200 [0] : vector<4x128xf32> to vector<128xf32>
    %231 = vector.shape_cast %230 : vector<128xf32> to vector<1x128xf32>
    %c35 = arith.constant 35 : index
    %c0_201 = arith.constant 0 : index
    %232 = vector.load %arg5[%c35, %c0_201] : memref<144x128xf32, #tpu.memory_space<vmem>>, vector<1x128xf32>
    tpu.vector_store %arg5[%c35, %c0_201], %231 {strides = array<i32>} : memref<144x128xf32, #tpu.memory_space<vmem>>, vector<1x128xf32>,
    %c134 = arith.constant 134 : index
    %c0_202 = arith.constant 0 : index
    %233 = vector.load %arg5[%c134, %c0_202] : memref<144x128xf32, #tpu.memory_space<vmem>>, vector<1x128xf32>
    tpu.vector_store %arg5[%c134, %c0_202], %231 {strides = array<i32>} : memref<144x128xf32, #tpu.memory_space<vmem>>, vector<1x128xf32>,
    %c3_203 = arith.constant 3 : index
    %c0_204 = arith.constant 0 : index
    %c0_205 = arith.constant 0 : index
    %234 = vector.load %arg1[%c3_203, %c0_204, %c0_205] : memref<12x4x128xf32, #tpu.memory_space<vmem>>, vector<1x4x128xf32>
    %235 = vector.shape_cast %234 : vector<1x4x128xf32> to vector<4x128xf32>
    %c3_206 = arith.constant 3 : index
    %c0_207 = arith.constant 0 : index
    %c0_208 = arith.constant 0 : index
    %236 = vector.load %arg1[%c3_206, %c0_207, %c0_208] : memref<12x4x128xf32, #tpu.memory_space<vmem>>, vector<1x4x128xf32>
    %237 = vector.shape_cast %236 : vector<1x4x128xf32> to vector<4x128xf32>
    %238 = arith.mulf %235, %237 : vector<4x128xf32>
    %cst_209 = arith.constant dense<0.000000e+00> : vector<128xf32>
    %239 = vector.multi_reduction <add>, %238, %cst_209 [0] : vector<4x128xf32> to vector<128xf32>
    %240 = vector.shape_cast %239 : vector<128xf32> to vector<1x128xf32>
    %c39 = arith.constant 39 : index
    %c0_210 = arith.constant 0 : index
    %241 = vector.load %arg5[%c39, %c0_210] : memref<144x128xf32, #tpu.memory_space<vmem>>, vector<1x128xf32>
    tpu.vector_store %arg5[%c39, %c0_210], %240 {strides = array<i32>} : memref<144x128xf32, #tpu.memory_space<vmem>>, vector<1x128xf32>,
    %c4_211 = arith.constant 4 : index
    %c0_212 = arith.constant 0 : index
    %c0_213 = arith.constant 0 : index
    %242 = vector.load %arg1[%c4_211, %c0_212, %c0_213] : memref<12x4x128xf32, #tpu.memory_space<vmem>>, vector<1x4x128xf32>
    %243 = vector.shape_cast %242 : vector<1x4x128xf32> to vector<4x128xf32>
    %244 = arith.mulf %235, %243 : vector<4x128xf32>
    %cst_214 = arith.constant dense<0.000000e+00> : vector<128xf32>
    %245 = vector.multi_reduction <add>, %244, %cst_214 [0] : vector<4x128xf32> to vector<128xf32>
    %246 = vector.shape_cast %245 : vector<128xf32> to vector<1x128xf32>
    %c40 = arith.constant 40 : index
    %c0_215 = arith.constant 0 : index
    %247 = vector.load %arg5[%c40, %c0_215] : memref<144x128xf32, #tpu.memory_space<vmem>>, vector<1x128xf32>
    tpu.vector_store %arg5[%c40, %c0_215], %246 {strides = array<i32>} : memref<144x128xf32, #tpu.memory_space<vmem>>, vector<1x128xf32>,
    %c51 = arith.constant 51 : index
    %c0_216 = arith.constant 0 : index
    %248 = vector.load %arg5[%c51, %c0_216] : memref<144x128xf32, #tpu.memory_space<vmem>>, vector<1x128xf32>
    tpu.vector_store %arg5[%c51, %c0_216], %246 {strides = array<i32>} : memref<144x128xf32, #tpu.memory_space<vmem>>, vector<1x128xf32>,
    %c5_217 = arith.constant 5 : index
    %c0_218 = arith.constant 0 : index
    %c0_219 = arith.constant 0 : index
    %249 = vector.load %arg1[%c5_217, %c0_218, %c0_219] : memref<12x4x128xf32, #tpu.memory_space<vmem>>, vector<1x4x128xf32>
    %250 = vector.shape_cast %249 : vector<1x4x128xf32> to vector<4x128xf32>
    %251 = arith.mulf %235, %250 : vector<4x128xf32>
    %cst_220 = arith.constant dense<0.000000e+00> : vector<128xf32>
    %252 = vector.multi_reduction <add>, %251, %cst_220 [0] : vector<4x128xf32> to vector<128xf32>
    %253 = vector.shape_cast %252 : vector<128xf32> to vector<1x128xf32>
    %c41 = arith.constant 41 : index
    %c0_221 = arith.constant 0 : index
    %254 = vector.load %arg5[%c41, %c0_221] : memref<144x128xf32, #tpu.memory_space<vmem>>, vector<1x128xf32>
    tpu.vector_store %arg5[%c41, %c0_221], %253 {strides = array<i32>} : memref<144x128xf32, #tpu.memory_space<vmem>>, vector<1x128xf32>,
    %c63 = arith.constant 63 : index
    %c0_222 = arith.constant 0 : index
    %255 = vector.load %arg5[%c63, %c0_222] : memref<144x128xf32, #tpu.memory_space<vmem>>, vector<1x128xf32>
    tpu.vector_store %arg5[%c63, %c0_222], %253 {strides = array<i32>} : memref<144x128xf32, #tpu.memory_space<vmem>>, vector<1x128xf32>,
    %c6_223 = arith.constant 6 : index
    %c0_224 = arith.constant 0 : index
    %c0_225 = arith.constant 0 : index
    %256 = vector.load %arg1[%c6_223, %c0_224, %c0_225] : memref<12x4x128xf32, #tpu.memory_space<vmem>>, vector<1x4x128xf32>
    %257 = vector.shape_cast %256 : vector<1x4x128xf32> to vector<4x128xf32>
    %258 = arith.mulf %235, %257 : vector<4x128xf32>
    %cst_226 = arith.constant dense<0.000000e+00> : vector<128xf32>
    %259 = vector.multi_reduction <add>, %258, %cst_226 [0] : vector<4x128xf32> to vector<128xf32>
    %260 = vector.shape_cast %259 : vector<128xf32> to vector<1x128xf32>
    %c42 = arith.constant 42 : index
    %c0_227 = arith.constant 0 : index
    %261 = vector.load %arg5[%c42, %c0_227] : memref<144x128xf32, #tpu.memory_space<vmem>>, vector<1x128xf32>
    tpu.vector_store %arg5[%c42, %c0_227], %260 {strides = array<i32>} : memref<144x128xf32, #tpu.memory_space<vmem>>, vector<1x128xf32>,
    %c75 = arith.constant 75 : index
    %c0_228 = arith.constant 0 : index
    %262 = vector.load %arg5[%c75, %c0_228] : memref<144x128xf32, #tpu.memory_space<vmem>>, vector<1x128xf32>
    tpu.vector_store %arg5[%c75, %c0_228], %260 {strides = array<i32>} : memref<144x128xf32, #tpu.memory_space<vmem>>, vector<1x128xf32>,
    %c7_229 = arith.constant 7 : index
    %c0_230 = arith.constant 0 : index
    %c0_231 = arith.constant 0 : index
    %263 = vector.load %arg1[%c7_229, %c0_230, %c0_231] : memref<12x4x128xf32, #tpu.memory_space<vmem>>, vector<1x4x128xf32>
    %264 = vector.shape_cast %263 : vector<1x4x128xf32> to vector<4x128xf32>
    %265 = arith.mulf %235, %264 : vector<4x128xf32>
    %cst_232 = arith.constant dense<0.000000e+00> : vector<128xf32>
    %266 = vector.multi_reduction <add>, %265, %cst_232 [0] : vector<4x128xf32> to vector<128xf32>
    %267 = vector.shape_cast %266 : vector<128xf32> to vector<1x128xf32>
    %c43 = arith.constant 43 : index
    %c0_233 = arith.constant 0 : index
    %268 = vector.load %arg5[%c43, %c0_233] : memref<144x128xf32, #tpu.memory_space<vmem>>, vector<1x128xf32>
    tpu.vector_store %arg5[%c43, %c0_233], %267 {strides = array<i32>} : memref<144x128xf32, #tpu.memory_space<vmem>>, vector<1x128xf32>,
    %c87 = arith.constant 87 : index
    %c0_234 = arith.constant 0 : index
    %269 = vector.load %arg5[%c87, %c0_234] : memref<144x128xf32, #tpu.memory_space<vmem>>, vector<1x128xf32>
    tpu.vector_store %arg5[%c87, %c0_234], %267 {strides = array<i32>} : memref<144x128xf32, #tpu.memory_space<vmem>>, vector<1x128xf32>,
    %c8_235 = arith.constant 8 : index
    %c0_236 = arith.constant 0 : index
    %c0_237 = arith.constant 0 : index
    %270 = vector.load %arg1[%c8_235, %c0_236, %c0_237] : memref<12x4x128xf32, #tpu.memory_space<vmem>>, vector<1x4x128xf32>
    %271 = vector.shape_cast %270 : vector<1x4x128xf32> to vector<4x128xf32>
    %272 = arith.mulf %235, %271 : vector<4x128xf32>
    %cst_238 = arith.constant dense<0.000000e+00> : vector<128xf32>
    %273 = vector.multi_reduction <add>, %272, %cst_238 [0] : vector<4x128xf32> to vector<128xf32>
    %274 = vector.shape_cast %273 : vector<128xf32> to vector<1x128xf32>
    %c44 = arith.constant 44 : index
    %c0_239 = arith.constant 0 : index
    %275 = vector.load %arg5[%c44, %c0_239] : memref<144x128xf32, #tpu.memory_space<vmem>>, vector<1x128xf32>
    tpu.vector_store %arg5[%c44, %c0_239], %274 {strides = array<i32>} : memref<144x128xf32, #tpu.memory_space<vmem>>, vector<1x128xf32>,
    %c99 = arith.constant 99 : index
    %c0_240 = arith.constant 0 : index
    %276 = vector.load %arg5[%c99, %c0_240] : memref<144x128xf32, #tpu.memory_space<vmem>>, vector<1x128xf32>
    tpu.vector_store %arg5[%c99, %c0_240], %274 {strides = array<i32>} : memref<144x128xf32, #tpu.memory_space<vmem>>, vector<1x128xf32>,
    %c9_241 = arith.constant 9 : index
    %c0_242 = arith.constant 0 : index
    %c0_243 = arith.constant 0 : index
    %277 = vector.load %arg1[%c9_241, %c0_242, %c0_243] : memref<12x4x128xf32, #tpu.memory_space<vmem>>, vector<1x4x128xf32>
    %278 = vector.shape_cast %277 : vector<1x4x128xf32> to vector<4x128xf32>
    %279 = arith.mulf %235, %278 : vector<4x128xf32>
    %cst_244 = arith.constant dense<0.000000e+00> : vector<128xf32>
    %280 = vector.multi_reduction <add>, %279, %cst_244 [0] : vector<4x128xf32> to vector<128xf32>
    %281 = vector.shape_cast %280 : vector<128xf32> to vector<1x128xf32>
    %c45 = arith.constant 45 : index
    %c0_245 = arith.constant 0 : index
    %282 = vector.load %arg5[%c45, %c0_245] : memref<144x128xf32, #tpu.memory_space<vmem>>, vector<1x128xf32>
    tpu.vector_store %arg5[%c45, %c0_245], %281 {strides = array<i32>} : memref<144x128xf32, #tpu.memory_space<vmem>>, vector<1x128xf32>,
    %c111 = arith.constant 111 : index
    %c0_246 = arith.constant 0 : index
    %283 = vector.load %arg5[%c111, %c0_246] : memref<144x128xf32, #tpu.memory_space<vmem>>, vector<1x128xf32>
    tpu.vector_store %arg5[%c111, %c0_246], %281 {strides = array<i32>} : memref<144x128xf32, #tpu.memory_space<vmem>>, vector<1x128xf32>,
    %c10_247 = arith.constant 10 : index
    %c0_248 = arith.constant 0 : index
    %c0_249 = arith.constant 0 : index
    %284 = vector.load %arg1[%c10_247, %c0_248, %c0_249] : memref<12x4x128xf32, #tpu.memory_space<vmem>>, vector<1x4x128xf32>
    %285 = vector.shape_cast %284 : vector<1x4x128xf32> to vector<4x128xf32>
    %286 = arith.mulf %235, %285 : vector<4x128xf32>
    %cst_250 = arith.constant dense<0.000000e+00> : vector<128xf32>
    %287 = vector.multi_reduction <add>, %286, %cst_250 [0] : vector<4x128xf32> to vector<128xf32>
    %288 = vector.shape_cast %287 : vector<128xf32> to vector<1x128xf32>
    %c46 = arith.constant 46 : index
    %c0_251 = arith.constant 0 : index
    %289 = vector.load %arg5[%c46, %c0_251] : memref<144x128xf32, #tpu.memory_space<vmem>>, vector<1x128xf32>
    tpu.vector_store %arg5[%c46, %c0_251], %288 {strides = array<i32>} : memref<144x128xf32, #tpu.memory_space<vmem>>, vector<1x128xf32>,
    %c123 = arith.constant 123 : index
    %c0_252 = arith.constant 0 : index
    %290 = vector.load %arg5[%c123, %c0_252] : memref<144x128xf32, #tpu.memory_space<vmem>>, vector<1x128xf32>
    tpu.vector_store %arg5[%c123, %c0_252], %288 {strides = array<i32>} : memref<144x128xf32, #tpu.memory_space<vmem>>, vector<1x128xf32>,
    %c11_253 = arith.constant 11 : index
    %c0_254 = arith.constant 0 : index
    %c0_255 = arith.constant 0 : index
    %291 = vector.load %arg1[%c11_253, %c0_254, %c0_255] : memref<12x4x128xf32, #tpu.memory_space<vmem>>, vector<1x4x128xf32>
    %292 = vector.shape_cast %291 : vector<1x4x128xf32> to vector<4x128xf32>
    %293 = arith.mulf %235, %292 : vector<4x128xf32>
    %cst_256 = arith.constant dense<0.000000e+00> : vector<128xf32>
    %294 = vector.multi_reduction <add>, %293, %cst_256 [0] : vector<4x128xf32> to vector<128xf32>
    %295 = vector.shape_cast %294 : vector<128xf32> to vector<1x128xf32>
    %c47 = arith.constant 47 : index
    %c0_257 = arith.constant 0 : index
    %296 = vector.load %arg5[%c47, %c0_257] : memref<144x128xf32, #tpu.memory_space<vmem>>, vector<1x128xf32>
    tpu.vector_store %arg5[%c47, %c0_257], %295 {strides = array<i32>} : memref<144x128xf32, #tpu.memory_space<vmem>>, vector<1x128xf32>,
    %c135 = arith.constant 135 : index
    %c0_258 = arith.constant 0 : index
    %297 = vector.load %arg5[%c135, %c0_258] : memref<144x128xf32, #tpu.memory_space<vmem>>, vector<1x128xf32>
    tpu.vector_store %arg5[%c135, %c0_258], %295 {strides = array<i32>} : memref<144x128xf32, #tpu.memory_space<vmem>>, vector<1x128xf32>,
    %c4_259 = arith.constant 4 : index
    %c0_260 = arith.constant 0 : index
    %c0_261 = arith.constant 0 : index
    %298 = vector.load %arg1[%c4_259, %c0_260, %c0_261] : memref<12x4x128xf32, #tpu.memory_space<vmem>>, vector<1x4x128xf32>
    %299 = vector.shape_cast %298 : vector<1x4x128xf32> to vector<4x128xf32>
    %c4_262 = arith.constant 4 : index
    %c0_263 = arith.constant 0 : index
    %c0_264 = arith.constant 0 : index
    %300 = vector.load %arg1[%c4_262, %c0_263, %c0_264] : memref<12x4x128xf32, #tpu.memory_space<vmem>>, vector<1x4x128xf32>
    %301 = vector.shape_cast %300 : vector<1x4x128xf32> to vector<4x128xf32>
    %302 = arith.mulf %299, %301 : vector<4x128xf32>
    %cst_265 = arith.constant dense<0.000000e+00> : vector<128xf32>
    %303 = vector.multi_reduction <add>, %302, %cst_265 [0] : vector<4x128xf32> to vector<128xf32>
    %304 = vector.shape_cast %303 : vector<128xf32> to vector<1x128xf32>
    %c52 = arith.constant 52 : index
    %c0_266 = arith.constant 0 : index
    %305 = vector.load %arg5[%c52, %c0_266] : memref<144x128xf32, #tpu.memory_space<vmem>>, vector<1x128xf32>
    tpu.vector_store %arg5[%c52, %c0_266], %304 {strides = array<i32>} : memref<144x128xf32, #tpu.memory_space<vmem>>, vector<1x128xf32>,
    %c5_267 = arith.constant 5 : index
    %c0_268 = arith.constant 0 : index
    %c0_269 = arith.constant 0 : index
    %306 = vector.load %arg1[%c5_267, %c0_268, %c0_269] : memref<12x4x128xf32, #tpu.memory_space<vmem>>, vector<1x4x128xf32>
    %307 = vector.shape_cast %306 : vector<1x4x128xf32> to vector<4x128xf32>
    %308 = arith.mulf %299, %307 : vector<4x128xf32>
    %cst_270 = arith.constant dense<0.000000e+00> : vector<128xf32>
    %309 = vector.multi_reduction <add>, %308, %cst_270 [0] : vector<4x128xf32> to vector<128xf32>
    %310 = vector.shape_cast %309 : vector<128xf32> to vector<1x128xf32>
    %c53 = arith.constant 53 : index
    %c0_271 = arith.constant 0 : index
    %311 = vector.load %arg5[%c53, %c0_271] : memref<144x128xf32, #tpu.memory_space<vmem>>, vector<1x128xf32>
    tpu.vector_store %arg5[%c53, %c0_271], %310 {strides = array<i32>} : memref<144x128xf32, #tpu.memory_space<vmem>>, vector<1x128xf32>,
    %c64 = arith.constant 64 : index
    %c0_272 = arith.constant 0 : index
    %312 = vector.load %arg5[%c64, %c0_272] : memref<144x128xf32, #tpu.memory_space<vmem>>, vector<1x128xf32>
    tpu.vector_store %arg5[%c64, %c0_272], %310 {strides = array<i32>} : memref<144x128xf32, #tpu.memory_space<vmem>>, vector<1x128xf32>,
    %c6_273 = arith.constant 6 : index
    %c0_274 = arith.constant 0 : index
    %c0_275 = arith.constant 0 : index
    %313 = vector.load %arg1[%c6_273, %c0_274, %c0_275] : memref<12x4x128xf32, #tpu.memory_space<vmem>>, vector<1x4x128xf32>
    %314 = vector.shape_cast %313 : vector<1x4x128xf32> to vector<4x128xf32>
    %315 = arith.mulf %299, %314 : vector<4x128xf32>
    %cst_276 = arith.constant dense<0.000000e+00> : vector<128xf32>
    %316 = vector.multi_reduction <add>, %315, %cst_276 [0] : vector<4x128xf32> to vector<128xf32>
    %317 = vector.shape_cast %316 : vector<128xf32> to vector<1x128xf32>
    %c54 = arith.constant 54 : index
    %c0_277 = arith.constant 0 : index
    %318 = vector.load %arg5[%c54, %c0_277] : memref<144x128xf32, #tpu.memory_space<vmem>>, vector<1x128xf32>
    tpu.vector_store %arg5[%c54, %c0_277], %317 {strides = array<i32>} : memref<144x128xf32, #tpu.memory_space<vmem>>, vector<1x128xf32>,
    %c76 = arith.constant 76 : index
    %c0_278 = arith.constant 0 : index
    %319 = vector.load %arg5[%c76, %c0_278] : memref<144x128xf32, #tpu.memory_space<vmem>>, vector<1x128xf32>
    tpu.vector_store %arg5[%c76, %c0_278], %317 {strides = array<i32>} : memref<144x128xf32, #tpu.memory_space<vmem>>, vector<1x128xf32>,
    %c7_279 = arith.constant 7 : index
    %c0_280 = arith.constant 0 : index
    %c0_281 = arith.constant 0 : index
    %320 = vector.load %arg1[%c7_279, %c0_280, %c0_281] : memref<12x4x128xf32, #tpu.memory_space<vmem>>, vector<1x4x128xf32>
    %321 = vector.shape_cast %320 : vector<1x4x128xf32> to vector<4x128xf32>
    %322 = arith.mulf %299, %321 : vector<4x128xf32>
    %cst_282 = arith.constant dense<0.000000e+00> : vector<128xf32>
    %323 = vector.multi_reduction <add>, %322, %cst_282 [0] : vector<4x128xf32> to vector<128xf32>
    %324 = vector.shape_cast %323 : vector<128xf32> to vector<1x128xf32>
    %c55 = arith.constant 55 : index
    %c0_283 = arith.constant 0 : index
    %325 = vector.load %arg5[%c55, %c0_283] : memref<144x128xf32, #tpu.memory_space<vmem>>, vector<1x128xf32>
    tpu.vector_store %arg5[%c55, %c0_283], %324 {strides = array<i32>} : memref<144x128xf32, #tpu.memory_space<vmem>>, vector<1x128xf32>,
    %c88 = arith.constant 88 : index
    %c0_284 = arith.constant 0 : index
    %326 = vector.load %arg5[%c88, %c0_284] : memref<144x128xf32, #tpu.memory_space<vmem>>, vector<1x128xf32>
    tpu.vector_store %arg5[%c88, %c0_284], %324 {strides = array<i32>} : memref<144x128xf32, #tpu.memory_space<vmem>>, vector<1x128xf32>,
    %c8_285 = arith.constant 8 : index
    %c0_286 = arith.constant 0 : index
    %c0_287 = arith.constant 0 : index
    %327 = vector.load %arg1[%c8_285, %c0_286, %c0_287] : memref<12x4x128xf32, #tpu.memory_space<vmem>>, vector<1x4x128xf32>
    %328 = vector.shape_cast %327 : vector<1x4x128xf32> to vector<4x128xf32>
    %329 = arith.mulf %299, %328 : vector<4x128xf32>
    %cst_288 = arith.constant dense<0.000000e+00> : vector<128xf32>
    %330 = vector.multi_reduction <add>, %329, %cst_288 [0] : vector<4x128xf32> to vector<128xf32>
    %331 = vector.shape_cast %330 : vector<128xf32> to vector<1x128xf32>
    %c56 = arith.constant 56 : index
    %c0_289 = arith.constant 0 : index
    %332 = vector.load %arg5[%c56, %c0_289] : memref<144x128xf32, #tpu.memory_space<vmem>>, vector<1x128xf32>
    tpu.vector_store %arg5[%c56, %c0_289], %331 {strides = array<i32>} : memref<144x128xf32, #tpu.memory_space<vmem>>, vector<1x128xf32>,
    %c100 = arith.constant 100 : index
    %c0_290 = arith.constant 0 : index
    %333 = vector.load %arg5[%c100, %c0_290] : memref<144x128xf32, #tpu.memory_space<vmem>>, vector<1x128xf32>
    tpu.vector_store %arg5[%c100, %c0_290], %331 {strides = array<i32>} : memref<144x128xf32, #tpu.memory_space<vmem>>, vector<1x128xf32>,
    %c9_291 = arith.constant 9 : index
    %c0_292 = arith.constant 0 : index
    %c0_293 = arith.constant 0 : index
    %334 = vector.load %arg1[%c9_291, %c0_292, %c0_293] : memref<12x4x128xf32, #tpu.memory_space<vmem>>, vector<1x4x128xf32>
    %335 = vector.shape_cast %334 : vector<1x4x128xf32> to vector<4x128xf32>
    %336 = arith.mulf %299, %335 : vector<4x128xf32>
    %cst_294 = arith.constant dense<0.000000e+00> : vector<128xf32>
    %337 = vector.multi_reduction <add>, %336, %cst_294 [0] : vector<4x128xf32> to vector<128xf32>
    %338 = vector.shape_cast %337 : vector<128xf32> to vector<1x128xf32>
    %c57 = arith.constant 57 : index
    %c0_295 = arith.constant 0 : index
    %339 = vector.load %arg5[%c57, %c0_295] : memref<144x128xf32, #tpu.memory_space<vmem>>, vector<1x128xf32>
    tpu.vector_store %arg5[%c57, %c0_295], %338 {strides = array<i32>} : memref<144x128xf32, #tpu.memory_space<vmem>>, vector<1x128xf32>,
    %c112 = arith.constant 112 : index
    %c0_296 = arith.constant 0 : index
    %340 = vector.load %arg5[%c112, %c0_296] : memref<144x128xf32, #tpu.memory_space<vmem>>, vector<1x128xf32>
    tpu.vector_store %arg5[%c112, %c0_296], %338 {strides = array<i32>} : memref<144x128xf32, #tpu.memory_space<vmem>>, vector<1x128xf32>,
    %c10_297 = arith.constant 10 : index
    %c0_298 = arith.constant 0 : index
    %c0_299 = arith.constant 0 : index
    %341 = vector.load %arg1[%c10_297, %c0_298, %c0_299] : memref<12x4x128xf32, #tpu.memory_space<vmem>>, vector<1x4x128xf32>
    %342 = vector.shape_cast %341 : vector<1x4x128xf32> to vector<4x128xf32>
    %343 = arith.mulf %299, %342 : vector<4x128xf32>
    %cst_300 = arith.constant dense<0.000000e+00> : vector<128xf32>
    %344 = vector.multi_reduction <add>, %343, %cst_300 [0] : vector<4x128xf32> to vector<128xf32>
    %345 = vector.shape_cast %344 : vector<128xf32> to vector<1x128xf32>
    %c58 = arith.constant 58 : index
    %c0_301 = arith.constant 0 : index
    %346 = vector.load %arg5[%c58, %c0_301] : memref<144x128xf32, #tpu.memory_space<vmem>>, vector<1x128xf32>
    tpu.vector_store %arg5[%c58, %c0_301], %345 {strides = array<i32>} : memref<144x128xf32, #tpu.memory_space<vmem>>, vector<1x128xf32>,
    %c124 = arith.constant 124 : index
    %c0_302 = arith.constant 0 : index
    %347 = vector.load %arg5[%c124, %c0_302] : memref<144x128xf32, #tpu.memory_space<vmem>>, vector<1x128xf32>
    tpu.vector_store %arg5[%c124, %c0_302], %345 {strides = array<i32>} : memref<144x128xf32, #tpu.memory_space<vmem>>, vector<1x128xf32>,
    %c11_303 = arith.constant 11 : index
    %c0_304 = arith.constant 0 : index
    %c0_305 = arith.constant 0 : index
    %348 = vector.load %arg1[%c11_303, %c0_304, %c0_305] : memref<12x4x128xf32, #tpu.memory_space<vmem>>, vector<1x4x128xf32>
    %349 = vector.shape_cast %348 : vector<1x4x128xf32> to vector<4x128xf32>
    %350 = arith.mulf %299, %349 : vector<4x128xf32>
    %cst_306 = arith.constant dense<0.000000e+00> : vector<128xf32>
    %351 = vector.multi_reduction <add>, %350, %cst_306 [0] : vector<4x128xf32> to vector<128xf32>
    %352 = vector.shape_cast %351 : vector<128xf32> to vector<1x128xf32>
    %c59 = arith.constant 59 : index
    %c0_307 = arith.constant 0 : index
    %353 = vector.load %arg5[%c59, %c0_307] : memref<144x128xf32, #tpu.memory_space<vmem>>, vector<1x128xf32>
    tpu.vector_store %arg5[%c59, %c0_307], %352 {strides = array<i32>} : memref<144x128xf32, #tpu.memory_space<vmem>>, vector<1x128xf32>,
    %c136 = arith.constant 136 : index
    %c0_308 = arith.constant 0 : index
    %354 = vector.load %arg5[%c136, %c0_308] : memref<144x128xf32, #tpu.memory_space<vmem>>, vector<1x128xf32>
    tpu.vector_store %arg5[%c136, %c0_308], %352 {strides = array<i32>} : memref<144x128xf32, #tpu.memory_space<vmem>>, vector<1x128xf32>,
    %c5_309 = arith.constant 5 : index
    %c0_310 = arith.constant 0 : index
    %c0_311 = arith.constant 0 : index
    %355 = vector.load %arg1[%c5_309, %c0_310, %c0_311] : memref<12x4x128xf32, #tpu.memory_space<vmem>>, vector<1x4x128xf32>
    %356 = vector.shape_cast %355 : vector<1x4x128xf32> to vector<4x128xf32>
    %c5_312 = arith.constant 5 : index
    %c0_313 = arith.constant 0 : index
    %c0_314 = arith.constant 0 : index
    %357 = vector.load %arg1[%c5_312, %c0_313, %c0_314] : memref<12x4x128xf32, #tpu.memory_space<vmem>>, vector<1x4x128xf32>
    %358 = vector.shape_cast %357 : vector<1x4x128xf32> to vector<4x128xf32>
    %359 = arith.mulf %356, %358 : vector<4x128xf32>
    %cst_315 = arith.constant dense<0.000000e+00> : vector<128xf32>
    %360 = vector.multi_reduction <add>, %359, %cst_315 [0] : vector<4x128xf32> to vector<128xf32>
    %361 = vector.shape_cast %360 : vector<128xf32> to vector<1x128xf32>
    %c65 = arith.constant 65 : index
    %c0_316 = arith.constant 0 : index
    %362 = vector.load %arg5[%c65, %c0_316] : memref<144x128xf32, #tpu.memory_space<vmem>>, vector<1x128xf32>
    tpu.vector_store %arg5[%c65, %c0_316], %361 {strides = array<i32>} : memref<144x128xf32, #tpu.memory_space<vmem>>, vector<1x128xf32>,
    %c6_317 = arith.constant 6 : index
    %c0_318 = arith.constant 0 : index
    %c0_319 = arith.constant 0 : index
    %363 = vector.load %arg1[%c6_317, %c0_318, %c0_319] : memref<12x4x128xf32, #tpu.memory_space<vmem>>, vector<1x4x128xf32>
    %364 = vector.shape_cast %363 : vector<1x4x128xf32> to vector<4x128xf32>
    %365 = arith.mulf %356, %364 : vector<4x128xf32>
    %cst_320 = arith.constant dense<0.000000e+00> : vector<128xf32>
    %366 = vector.multi_reduction <add>, %365, %cst_320 [0] : vector<4x128xf32> to vector<128xf32>
    %367 = vector.shape_cast %366 : vector<128xf32> to vector<1x128xf32>
    %c66 = arith.constant 66 : index
    %c0_321 = arith.constant 0 : index
    %368 = vector.load %arg5[%c66, %c0_321] : memref<144x128xf32, #tpu.memory_space<vmem>>, vector<1x128xf32>
    tpu.vector_store %arg5[%c66, %c0_321], %367 {strides = array<i32>} : memref<144x128xf32, #tpu.memory_space<vmem>>, vector<1x128xf32>,
    %c77 = arith.constant 77 : index
    %c0_322 = arith.constant 0 : index
    %369 = vector.load %arg5[%c77, %c0_322] : memref<144x128xf32, #tpu.memory_space<vmem>>, vector<1x128xf32>
    tpu.vector_store %arg5[%c77, %c0_322], %367 {strides = array<i32>} : memref<144x128xf32, #tpu.memory_space<vmem>>, vector<1x128xf32>,
    %c7_323 = arith.constant 7 : index
    %c0_324 = arith.constant 0 : index
    %c0_325 = arith.constant 0 : index
    %370 = vector.load %arg1[%c7_323, %c0_324, %c0_325] : memref<12x4x128xf32, #tpu.memory_space<vmem>>, vector<1x4x128xf32>
    %371 = vector.shape_cast %370 : vector<1x4x128xf32> to vector<4x128xf32>
    %372 = arith.mulf %356, %371 : vector<4x128xf32>
    %cst_326 = arith.constant dense<0.000000e+00> : vector<128xf32>
    %373 = vector.multi_reduction <add>, %372, %cst_326 [0] : vector<4x128xf32> to vector<128xf32>
    %374 = vector.shape_cast %373 : vector<128xf32> to vector<1x128xf32>
    %c67 = arith.constant 67 : index
    %c0_327 = arith.constant 0 : index
    %375 = vector.load %arg5[%c67, %c0_327] : memref<144x128xf32, #tpu.memory_space<vmem>>, vector<1x128xf32>
    tpu.vector_store %arg5[%c67, %c0_327], %374 {strides = array<i32>} : memref<144x128xf32, #tpu.memory_space<vmem>>, vector<1x128xf32>,
    %c89 = arith.constant 89 : index
    %c0_328 = arith.constant 0 : index
    %376 = vector.load %arg5[%c89, %c0_328] : memref<144x128xf32, #tpu.memory_space<vmem>>, vector<1x128xf32>
    tpu.vector_store %arg5[%c89, %c0_328], %374 {strides = array<i32>} : memref<144x128xf32, #tpu.memory_space<vmem>>, vector<1x128xf32>,
    %c8_329 = arith.constant 8 : index
    %c0_330 = arith.constant 0 : index
    %c0_331 = arith.constant 0 : index
    %377 = vector.load %arg1[%c8_329, %c0_330, %c0_331] : memref<12x4x128xf32, #tpu.memory_space<vmem>>, vector<1x4x128xf32>
    %378 = vector.shape_cast %377 : vector<1x4x128xf32> to vector<4x128xf32>
    %379 = arith.mulf %356, %378 : vector<4x128xf32>
    %cst_332 = arith.constant dense<0.000000e+00> : vector<128xf32>
    %380 = vector.multi_reduction <add>, %379, %cst_332 [0] : vector<4x128xf32> to vector<128xf32>
    %381 = vector.shape_cast %380 : vector<128xf32> to vector<1x128xf32>
    %c68 = arith.constant 68 : index
    %c0_333 = arith.constant 0 : index
    %382 = vector.load %arg5[%c68, %c0_333] : memref<144x128xf32, #tpu.memory_space<vmem>>, vector<1x128xf32>
    tpu.vector_store %arg5[%c68, %c0_333], %381 {strides = array<i32>} : memref<144x128xf32, #tpu.memory_space<vmem>>, vector<1x128xf32>,
    %c101 = arith.constant 101 : index
    %c0_334 = arith.constant 0 : index
    %383 = vector.load %arg5[%c101, %c0_334] : memref<144x128xf32, #tpu.memory_space<vmem>>, vector<1x128xf32>
    tpu.vector_store %arg5[%c101, %c0_334], %381 {strides = array<i32>} : memref<144x128xf32, #tpu.memory_space<vmem>>, vector<1x128xf32>,
    %c9_335 = arith.constant 9 : index
    %c0_336 = arith.constant 0 : index
    %c0_337 = arith.constant 0 : index
    %384 = vector.load %arg1[%c9_335, %c0_336, %c0_337] : memref<12x4x128xf32, #tpu.memory_space<vmem>>, vector<1x4x128xf32>
    %385 = vector.shape_cast %384 : vector<1x4x128xf32> to vector<4x128xf32>
    %386 = arith.mulf %356, %385 : vector<4x128xf32>
    %cst_338 = arith.constant dense<0.000000e+00> : vector<128xf32>
    %387 = vector.multi_reduction <add>, %386, %cst_338 [0] : vector<4x128xf32> to vector<128xf32>
    %388 = vector.shape_cast %387 : vector<128xf32> to vector<1x128xf32>
    %c69 = arith.constant 69 : index
    %c0_339 = arith.constant 0 : index
    %389 = vector.load %arg5[%c69, %c0_339] : memref<144x128xf32, #tpu.memory_space<vmem>>, vector<1x128xf32>
    tpu.vector_store %arg5[%c69, %c0_339], %388 {strides = array<i32>} : memref<144x128xf32, #tpu.memory_space<vmem>>, vector<1x128xf32>,
    %c113 = arith.constant 113 : index
    %c0_340 = arith.constant 0 : index
    %390 = vector.load %arg5[%c113, %c0_340] : memref<144x128xf32, #tpu.memory_space<vmem>>, vector<1x128xf32>
    tpu.vector_store %arg5[%c113, %c0_340], %388 {strides = array<i32>} : memref<144x128xf32, #tpu.memory_space<vmem>>, vector<1x128xf32>,
    %c10_341 = arith.constant 10 : index
    %c0_342 = arith.constant 0 : index
    %c0_343 = arith.constant 0 : index
    %391 = vector.load %arg1[%c10_341, %c0_342, %c0_343] : memref<12x4x128xf32, #tpu.memory_space<vmem>>, vector<1x4x128xf32>
    %392 = vector.shape_cast %391 : vector<1x4x128xf32> to vector<4x128xf32>
    %393 = arith.mulf %356, %392 : vector<4x128xf32>
    %cst_344 = arith.constant dense<0.000000e+00> : vector<128xf32>
    %394 = vector.multi_reduction <add>, %393, %cst_344 [0] : vector<4x128xf32> to vector<128xf32>
    %395 = vector.shape_cast %394 : vector<128xf32> to vector<1x128xf32>
    %c70 = arith.constant 70 : index
    %c0_345 = arith.constant 0 : index
    %396 = vector.load %arg5[%c70, %c0_345] : memref<144x128xf32, #tpu.memory_space<vmem>>, vector<1x128xf32>
    tpu.vector_store %arg5[%c70, %c0_345], %395 {strides = array<i32>} : memref<144x128xf32, #tpu.memory_space<vmem>>, vector<1x128xf32>,
    %c125 = arith.constant 125 : index
    %c0_346 = arith.constant 0 : index
    %397 = vector.load %arg5[%c125, %c0_346] : memref<144x128xf32, #tpu.memory_space<vmem>>, vector<1x128xf32>
    tpu.vector_store %arg5[%c125, %c0_346], %395 {strides = array<i32>} : memref<144x128xf32, #tpu.memory_space<vmem>>, vector<1x128xf32>,
    %c11_347 = arith.constant 11 : index
    %c0_348 = arith.constant 0 : index
    %c0_349 = arith.constant 0 : index
    %398 = vector.load %arg1[%c11_347, %c0_348, %c0_349] : memref<12x4x128xf32, #tpu.memory_space<vmem>>, vector<1x4x128xf32>
    %399 = vector.shape_cast %398 : vector<1x4x128xf32> to vector<4x128xf32>
    %400 = arith.mulf %356, %399 : vector<4x128xf32>
    %cst_350 = arith.constant dense<0.000000e+00> : vector<128xf32>
    %401 = vector.multi_reduction <add>, %400, %cst_350 [0] : vector<4x128xf32> to vector<128xf32>
    %402 = vector.shape_cast %401 : vector<128xf32> to vector<1x128xf32>
    %c71 = arith.constant 71 : index
    %c0_351 = arith.constant 0 : index
    %403 = vector.load %arg5[%c71, %c0_351] : memref<144x128xf32, #tpu.memory_space<vmem>>, vector<1x128xf32>
    tpu.vector_store %arg5[%c71, %c0_351], %402 {strides = array<i32>} : memref<144x128xf32, #tpu.memory_space<vmem>>, vector<1x128xf32>,
    %c137 = arith.constant 137 : index
    %c0_352 = arith.constant 0 : index
    %404 = vector.load %arg5[%c137, %c0_352] : memref<144x128xf32, #tpu.memory_space<vmem>>, vector<1x128xf32>
    tpu.vector_store %arg5[%c137, %c0_352], %402 {strides = array<i32>} : memref<144x128xf32, #tpu.memory_space<vmem>>, vector<1x128xf32>,
    %c6_353 = arith.constant 6 : index
    %c0_354 = arith.constant 0 : index
    %c0_355 = arith.constant 0 : index
    %405 = vector.load %arg1[%c6_353, %c0_354, %c0_355] : memref<12x4x128xf32, #tpu.memory_space<vmem>>, vector<1x4x128xf32>
    %406 = vector.shape_cast %405 : vector<1x4x128xf32> to vector<4x128xf32>
    %c6_356 = arith.constant 6 : index
    %c0_357 = arith.constant 0 : index
    %c0_358 = arith.constant 0 : index
    %407 = vector.load %arg1[%c6_356, %c0_357, %c0_358] : memref<12x4x128xf32, #tpu.memory_space<vmem>>, vector<1x4x128xf32>
    %408 = vector.shape_cast %407 : vector<1x4x128xf32> to vector<4x128xf32>
    %409 = arith.mulf %406, %408 : vector<4x128xf32>
    %cst_359 = arith.constant dense<0.000000e+00> : vector<128xf32>
    %410 = vector.multi_reduction <add>, %409, %cst_359 [0] : vector<4x128xf32> to vector<128xf32>
    %411 = vector.shape_cast %410 : vector<128xf32> to vector<1x128xf32>
    %c78 = arith.constant 78 : index
    %c0_360 = arith.constant 0 : index
    %412 = vector.load %arg5[%c78, %c0_360] : memref<144x128xf32, #tpu.memory_space<vmem>>, vector<1x128xf32>
    tpu.vector_store %arg5[%c78, %c0_360], %411 {strides = array<i32>} : memref<144x128xf32, #tpu.memory_space<vmem>>, vector<1x128xf32>,
    %c7_361 = arith.constant 7 : index
    %c0_362 = arith.constant 0 : index
    %c0_363 = arith.constant 0 : index
    %413 = vector.load %arg1[%c7_361, %c0_362, %c0_363] : memref<12x4x128xf32, #tpu.memory_space<vmem>>, vector<1x4x128xf32>
    %414 = vector.shape_cast %413 : vector<1x4x128xf32> to vector<4x128xf32>
    %415 = arith.mulf %406, %414 : vector<4x128xf32>
    %cst_364 = arith.constant dense<0.000000e+00> : vector<128xf32>
    %416 = vector.multi_reduction <add>, %415, %cst_364 [0] : vector<4x128xf32> to vector<128xf32>
    %417 = vector.shape_cast %416 : vector<128xf32> to vector<1x128xf32>
    %c79 = arith.constant 79 : index
    %c0_365 = arith.constant 0 : index
    %418 = vector.load %arg5[%c79, %c0_365] : memref<144x128xf32, #tpu.memory_space<vmem>>, vector<1x128xf32>
    tpu.vector_store %arg5[%c79, %c0_365], %417 {strides = array<i32>} : memref<144x128xf32, #tpu.memory_space<vmem>>, vector<1x128xf32>,
    %c90 = arith.constant 90 : index
    %c0_366 = arith.constant 0 : index
    %419 = vector.load %arg5[%c90, %c0_366] : memref<144x128xf32, #tpu.memory_space<vmem>>, vector<1x128xf32>
    tpu.vector_store %arg5[%c90, %c0_366], %417 {strides = array<i32>} : memref<144x128xf32, #tpu.memory_space<vmem>>, vector<1x128xf32>,
    %c8_367 = arith.constant 8 : index
    %c0_368 = arith.constant 0 : index
    %c0_369 = arith.constant 0 : index
    %420 = vector.load %arg1[%c8_367, %c0_368, %c0_369] : memref<12x4x128xf32, #tpu.memory_space<vmem>>, vector<1x4x128xf32>
    %421 = vector.shape_cast %420 : vector<1x4x128xf32> to vector<4x128xf32>
    %422 = arith.mulf %406, %421 : vector<4x128xf32>
    %cst_370 = arith.constant dense<0.000000e+00> : vector<128xf32>
    %423 = vector.multi_reduction <add>, %422, %cst_370 [0] : vector<4x128xf32> to vector<128xf32>
    %424 = vector.shape_cast %423 : vector<128xf32> to vector<1x128xf32>
    %c80 = arith.constant 80 : index
    %c0_371 = arith.constant 0 : index
    %425 = vector.load %arg5[%c80, %c0_371] : memref<144x128xf32, #tpu.memory_space<vmem>>, vector<1x128xf32>
    tpu.vector_store %arg5[%c80, %c0_371], %424 {strides = array<i32>} : memref<144x128xf32, #tpu.memory_space<vmem>>, vector<1x128xf32>,
    %c102 = arith.constant 102 : index
    %c0_372 = arith.constant 0 : index
    %426 = vector.load %arg5[%c102, %c0_372] : memref<144x128xf32, #tpu.memory_space<vmem>>, vector<1x128xf32>
    tpu.vector_store %arg5[%c102, %c0_372], %424 {strides = array<i32>} : memref<144x128xf32, #tpu.memory_space<vmem>>, vector<1x128xf32>,
    %c9_373 = arith.constant 9 : index
    %c0_374 = arith.constant 0 : index
    %c0_375 = arith.constant 0 : index
    %427 = vector.load %arg1[%c9_373, %c0_374, %c0_375] : memref<12x4x128xf32, #tpu.memory_space<vmem>>, vector<1x4x128xf32>
    %428 = vector.shape_cast %427 : vector<1x4x128xf32> to vector<4x128xf32>
    %429 = arith.mulf %406, %428 : vector<4x128xf32>
    %cst_376 = arith.constant dense<0.000000e+00> : vector<128xf32>
    %430 = vector.multi_reduction <add>, %429, %cst_376 [0] : vector<4x128xf32> to vector<128xf32>
    %431 = vector.shape_cast %430 : vector<128xf32> to vector<1x128xf32>
    %c81 = arith.constant 81 : index
    %c0_377 = arith.constant 0 : index
    %432 = vector.load %arg5[%c81, %c0_377] : memref<144x128xf32, #tpu.memory_space<vmem>>, vector<1x128xf32>
    tpu.vector_store %arg5[%c81, %c0_377], %431 {strides = array<i32>} : memref<144x128xf32, #tpu.memory_space<vmem>>, vector<1x128xf32>,
    %c114 = arith.constant 114 : index
    %c0_378 = arith.constant 0 : index
    %433 = vector.load %arg5[%c114, %c0_378] : memref<144x128xf32, #tpu.memory_space<vmem>>, vector<1x128xf32>
    tpu.vector_store %arg5[%c114, %c0_378], %431 {strides = array<i32>} : memref<144x128xf32, #tpu.memory_space<vmem>>, vector<1x128xf32>,
    %c10_379 = arith.constant 10 : index
    %c0_380 = arith.constant 0 : index
    %c0_381 = arith.constant 0 : index
    %434 = vector.load %arg1[%c10_379, %c0_380, %c0_381] : memref<12x4x128xf32, #tpu.memory_space<vmem>>, vector<1x4x128xf32>
    %435 = vector.shape_cast %434 : vector<1x4x128xf32> to vector<4x128xf32>
    %436 = arith.mulf %406, %435 : vector<4x128xf32>
    %cst_382 = arith.constant dense<0.000000e+00> : vector<128xf32>
    %437 = vector.multi_reduction <add>, %436, %cst_382 [0] : vector<4x128xf32> to vector<128xf32>
    %438 = vector.shape_cast %437 : vector<128xf32> to vector<1x128xf32>
    %c82 = arith.constant 82 : index
    %c0_383 = arith.constant 0 : index
    %439 = vector.load %arg5[%c82, %c0_383] : memref<144x128xf32, #tpu.memory_space<vmem>>, vector<1x128xf32>
    tpu.vector_store %arg5[%c82, %c0_383], %438 {strides = array<i32>} : memref<144x128xf32, #tpu.memory_space<vmem>>, vector<1x128xf32>,
    %c126 = arith.constant 126 : index
    %c0_384 = arith.constant 0 : index
    %440 = vector.load %arg5[%c126, %c0_384] : memref<144x128xf32, #tpu.memory_space<vmem>>, vector<1x128xf32>
    tpu.vector_store %arg5[%c126, %c0_384], %438 {strides = array<i32>} : memref<144x128xf32, #tpu.memory_space<vmem>>, vector<1x128xf32>,
    %c11_385 = arith.constant 11 : index
    %c0_386 = arith.constant 0 : index
    %c0_387 = arith.constant 0 : index
    %441 = vector.load %arg1[%c11_385, %c0_386, %c0_387] : memref<12x4x128xf32, #tpu.memory_space<vmem>>, vector<1x4x128xf32>
    %442 = vector.shape_cast %441 : vector<1x4x128xf32> to vector<4x128xf32>
    %443 = arith.mulf %406, %442 : vector<4x128xf32>
    %cst_388 = arith.constant dense<0.000000e+00> : vector<128xf32>
    %444 = vector.multi_reduction <add>, %443, %cst_388 [0] : vector<4x128xf32> to vector<128xf32>
    %445 = vector.shape_cast %444 : vector<128xf32> to vector<1x128xf32>
    %c83 = arith.constant 83 : index
    %c0_389 = arith.constant 0 : index
    %446 = vector.load %arg5[%c83, %c0_389] : memref<144x128xf32, #tpu.memory_space<vmem>>, vector<1x128xf32>
    tpu.vector_store %arg5[%c83, %c0_389], %445 {strides = array<i32>} : memref<144x128xf32, #tpu.memory_space<vmem>>, vector<1x128xf32>,
    %c138 = arith.constant 138 : index
    %c0_390 = arith.constant 0 : index
    %447 = vector.load %arg5[%c138, %c0_390] : memref<144x128xf32, #tpu.memory_space<vmem>>, vector<1x128xf32>
    tpu.vector_store %arg5[%c138, %c0_390], %445 {strides = array<i32>} : memref<144x128xf32, #tpu.memory_space<vmem>>, vector<1x128xf32>,
    %c7_391 = arith.constant 7 : index
    %c0_392 = arith.constant 0 : index
    %c0_393 = arith.constant 0 : index
    %448 = vector.load %arg1[%c7_391, %c0_392, %c0_393] : memref<12x4x128xf32, #tpu.memory_space<vmem>>, vector<1x4x128xf32>
    %449 = vector.shape_cast %448 : vector<1x4x128xf32> to vector<4x128xf32>
    %c7_394 = arith.constant 7 : index
    %c0_395 = arith.constant 0 : index
    %c0_396 = arith.constant 0 : index
    %450 = vector.load %arg1[%c7_394, %c0_395, %c0_396] : memref<12x4x128xf32, #tpu.memory_space<vmem>>, vector<1x4x128xf32>
    %451 = vector.shape_cast %450 : vector<1x4x128xf32> to vector<4x128xf32>
    %452 = arith.mulf %449, %451 : vector<4x128xf32>
    %cst_397 = arith.constant dense<0.000000e+00> : vector<128xf32>
    %453 = vector.multi_reduction <add>, %452, %cst_397 [0] : vector<4x128xf32> to vector<128xf32>
    %454 = vector.shape_cast %453 : vector<128xf32> to vector<1x128xf32>
    %c91 = arith.constant 91 : index
    %c0_398 = arith.constant 0 : index
    %455 = vector.load %arg5[%c91, %c0_398] : memref<144x128xf32, #tpu.memory_space<vmem>>, vector<1x128xf32>
    tpu.vector_store %arg5[%c91, %c0_398], %454 {strides = array<i32>} : memref<144x128xf32, #tpu.memory_space<vmem>>, vector<1x128xf32>,
    %c8_399 = arith.constant 8 : index
    %c0_400 = arith.constant 0 : index
    %c0_401 = arith.constant 0 : index
    %456 = vector.load %arg1[%c8_399, %c0_400, %c0_401] : memref<12x4x128xf32, #tpu.memory_space<vmem>>, vector<1x4x128xf32>
    %457 = vector.shape_cast %456 : vector<1x4x128xf32> to vector<4x128xf32>
    %458 = arith.mulf %449, %457 : vector<4x128xf32>
    %cst_402 = arith.constant dense<0.000000e+00> : vector<128xf32>
    %459 = vector.multi_reduction <add>, %458, %cst_402 [0] : vector<4x128xf32> to vector<128xf32>
    %460 = vector.shape_cast %459 : vector<128xf32> to vector<1x128xf32>
    %c92 = arith.constant 92 : index
    %c0_403 = arith.constant 0 : index
    %461 = vector.load %arg5[%c92, %c0_403] : memref<144x128xf32, #tpu.memory_space<vmem>>, vector<1x128xf32>
    tpu.vector_store %arg5[%c92, %c0_403], %460 {strides = array<i32>} : memref<144x128xf32, #tpu.memory_space<vmem>>, vector<1x128xf32>,
    %c103 = arith.constant 103 : index
    %c0_404 = arith.constant 0 : index
    %462 = vector.load %arg5[%c103, %c0_404] : memref<144x128xf32, #tpu.memory_space<vmem>>, vector<1x128xf32>
    tpu.vector_store %arg5[%c103, %c0_404], %460 {strides = array<i32>} : memref<144x128xf32, #tpu.memory_space<vmem>>, vector<1x128xf32>,
    %c9_405 = arith.constant 9 : index
    %c0_406 = arith.constant 0 : index
    %c0_407 = arith.constant 0 : index
    %463 = vector.load %arg1[%c9_405, %c0_406, %c0_407] : memref<12x4x128xf32, #tpu.memory_space<vmem>>, vector<1x4x128xf32>
    %464 = vector.shape_cast %463 : vector<1x4x128xf32> to vector<4x128xf32>
    %465 = arith.mulf %449, %464 : vector<4x128xf32>
    %cst_408 = arith.constant dense<0.000000e+00> : vector<128xf32>
    %466 = vector.multi_reduction <add>, %465, %cst_408 [0] : vector<4x128xf32> to vector<128xf32>
    %467 = vector.shape_cast %466 : vector<128xf32> to vector<1x128xf32>
    %c93 = arith.constant 93 : index
    %c0_409 = arith.constant 0 : index
    %468 = vector.load %arg5[%c93, %c0_409] : memref<144x128xf32, #tpu.memory_space<vmem>>, vector<1x128xf32>
    tpu.vector_store %arg5[%c93, %c0_409], %467 {strides = array<i32>} : memref<144x128xf32, #tpu.memory_space<vmem>>, vector<1x128xf32>,
    %c115 = arith.constant 115 : index
    %c0_410 = arith.constant 0 : index
    %469 = vector.load %arg5[%c115, %c0_410] : memref<144x128xf32, #tpu.memory_space<vmem>>, vector<1x128xf32>
    tpu.vector_store %arg5[%c115, %c0_410], %467 {strides = array<i32>} : memref<144x128xf32, #tpu.memory_space<vmem>>, vector<1x128xf32>,
    %c10_411 = arith.constant 10 : index
    %c0_412 = arith.constant 0 : index
    %c0_413 = arith.constant 0 : index
    %470 = vector.load %arg1[%c10_411, %c0_412, %c0_413] : memref<12x4x128xf32, #tpu.memory_space<vmem>>, vector<1x4x128xf32>
    %471 = vector.shape_cast %470 : vector<1x4x128xf32> to vector<4x128xf32>
    %472 = arith.mulf %449, %471 : vector<4x128xf32>
    %cst_414 = arith.constant dense<0.000000e+00> : vector<128xf32>
    %473 = vector.multi_reduction <add>, %472, %cst_414 [0] : vector<4x128xf32> to vector<128xf32>
    %474 = vector.shape_cast %473 : vector<128xf32> to vector<1x128xf32>
    %c94 = arith.constant 94 : index
    %c0_415 = arith.constant 0 : index
    %475 = vector.load %arg5[%c94, %c0_415] : memref<144x128xf32, #tpu.memory_space<vmem>>, vector<1x128xf32>
    tpu.vector_store %arg5[%c94, %c0_415], %474 {strides = array<i32>} : memref<144x128xf32, #tpu.memory_space<vmem>>, vector<1x128xf32>,
    %c127 = arith.constant 127 : index
    %c0_416 = arith.constant 0 : index
    %476 = vector.load %arg5[%c127, %c0_416] : memref<144x128xf32, #tpu.memory_space<vmem>>, vector<1x128xf32>
    tpu.vector_store %arg5[%c127, %c0_416], %474 {strides = array<i32>} : memref<144x128xf32, #tpu.memory_space<vmem>>, vector<1x128xf32>,
    %c11_417 = arith.constant 11 : index
    %c0_418 = arith.constant 0 : index
    %c0_419 = arith.constant 0 : index
    %477 = vector.load %arg1[%c11_417, %c0_418, %c0_419] : memref<12x4x128xf32, #tpu.memory_space<vmem>>, vector<1x4x128xf32>
    %478 = vector.shape_cast %477 : vector<1x4x128xf32> to vector<4x128xf32>
    %479 = arith.mulf %449, %478 : vector<4x128xf32>
    %cst_420 = arith.constant dense<0.000000e+00> : vector<128xf32>
    %480 = vector.multi_reduction <add>, %479, %cst_420 [0] : vector<4x128xf32> to vector<128xf32>
    %481 = vector.shape_cast %480 : vector<128xf32> to vector<1x128xf32>
    %c95 = arith.constant 95 : index
    %c0_421 = arith.constant 0 : index
    %482 = vector.load %arg5[%c95, %c0_421] : memref<144x128xf32, #tpu.memory_space<vmem>>, vector<1x128xf32>
    tpu.vector_store %arg5[%c95, %c0_421], %481 {strides = array<i32>} : memref<144x128xf32, #tpu.memory_space<vmem>>, vector<1x128xf32>,
    %c139 = arith.constant 139 : index
    %c0_422 = arith.constant 0 : index
    %483 = vector.load %arg5[%c139, %c0_422] : memref<144x128xf32, #tpu.memory_space<vmem>>, vector<1x128xf32>
    tpu.vector_store %arg5[%c139, %c0_422], %481 {strides = array<i32>} : memref<144x128xf32, #tpu.memory_space<vmem>>, vector<1x128xf32>,
    %c8_423 = arith.constant 8 : index
    %c0_424 = arith.constant 0 : index
    %c0_425 = arith.constant 0 : index
    %484 = vector.load %arg1[%c8_423, %c0_424, %c0_425] : memref<12x4x128xf32, #tpu.memory_space<vmem>>, vector<1x4x128xf32>
    %485 = vector.shape_cast %484 : vector<1x4x128xf32> to vector<4x128xf32>
    %c8_426 = arith.constant 8 : index
    %c0_427 = arith.constant 0 : index
    %c0_428 = arith.constant 0 : index
    %486 = vector.load %arg1[%c8_426, %c0_427, %c0_428] : memref<12x4x128xf32, #tpu.memory_space<vmem>>, vector<1x4x128xf32>
    %487 = vector.shape_cast %486 : vector<1x4x128xf32> to vector<4x128xf32>
    %488 = arith.mulf %485, %487 : vector<4x128xf32>
    %cst_429 = arith.constant dense<0.000000e+00> : vector<128xf32>
    %489 = vector.multi_reduction <add>, %488, %cst_429 [0] : vector<4x128xf32> to vector<128xf32>
    %490 = vector.shape_cast %489 : vector<128xf32> to vector<1x128xf32>
    %c104 = arith.constant 104 : index
    %c0_430 = arith.constant 0 : index
    %491 = vector.load %arg5[%c104, %c0_430] : memref<144x128xf32, #tpu.memory_space<vmem>>, vector<1x128xf32>
    tpu.vector_store %arg5[%c104, %c0_430], %490 {strides = array<i32>} : memref<144x128xf32, #tpu.memory_space<vmem>>, vector<1x128xf32>,
    %c9_431 = arith.constant 9 : index
    %c0_432 = arith.constant 0 : index
    %c0_433 = arith.constant 0 : index
    %492 = vector.load %arg1[%c9_431, %c0_432, %c0_433] : memref<12x4x128xf32, #tpu.memory_space<vmem>>, vector<1x4x128xf32>
    %493 = vector.shape_cast %492 : vector<1x4x128xf32> to vector<4x128xf32>
    %494 = arith.mulf %485, %493 : vector<4x128xf32>
    %cst_434 = arith.constant dense<0.000000e+00> : vector<128xf32>
    %495 = vector.multi_reduction <add>, %494, %cst_434 [0] : vector<4x128xf32> to vector<128xf32>
    %496 = vector.shape_cast %495 : vector<128xf32> to vector<1x128xf32>
    %c105 = arith.constant 105 : index
    %c0_435 = arith.constant 0 : index
    %497 = vector.load %arg5[%c105, %c0_435] : memref<144x128xf32, #tpu.memory_space<vmem>>, vector<1x128xf32>
    tpu.vector_store %arg5[%c105, %c0_435], %496 {strides = array<i32>} : memref<144x128xf32, #tpu.memory_space<vmem>>, vector<1x128xf32>,
    %c116 = arith.constant 116 : index
    %c0_436 = arith.constant 0 : index
    %498 = vector.load %arg5[%c116, %c0_436] : memref<144x128xf32, #tpu.memory_space<vmem>>, vector<1x128xf32>
    tpu.vector_store %arg5[%c116, %c0_436], %496 {strides = array<i32>} : memref<144x128xf32, #tpu.memory_space<vmem>>, vector<1x128xf32>,
    %c10_437 = arith.constant 10 : index
    %c0_438 = arith.constant 0 : index
    %c0_439 = arith.constant 0 : index
    %499 = vector.load %arg1[%c10_437, %c0_438, %c0_439] : memref<12x4x128xf32, #tpu.memory_space<vmem>>, vector<1x4x128xf32>
    %500 = vector.shape_cast %499 : vector<1x4x128xf32> to vector<4x128xf32>
    %501 = arith.mulf %485, %500 : vector<4x128xf32>
    %cst_440 = arith.constant dense<0.000000e+00> : vector<128xf32>
    %502 = vector.multi_reduction <add>, %501, %cst_440 [0] : vector<4x128xf32> to vector<128xf32>
    %503 = vector.shape_cast %502 : vector<128xf32> to vector<1x128xf32>
    %c106 = arith.constant 106 : index
    %c0_441 = arith.constant 0 : index
    %504 = vector.load %arg5[%c106, %c0_441] : memref<144x128xf32, #tpu.memory_space<vmem>>, vector<1x128xf32>
    tpu.vector_store %arg5[%c106, %c0_441], %503 {strides = array<i32>} : memref<144x128xf32, #tpu.memory_space<vmem>>, vector<1x128xf32>,
    %c128 = arith.constant 128 : index
    %c0_442 = arith.constant 0 : index
    %505 = vector.load %arg5[%c128, %c0_442] : memref<144x128xf32, #tpu.memory_space<vmem>>, vector<1x128xf32>
    tpu.vector_store %arg5[%c128, %c0_442], %503 {strides = array<i32>} : memref<144x128xf32, #tpu.memory_space<vmem>>, vector<1x128xf32>,
    %c11_443 = arith.constant 11 : index
    %c0_444 = arith.constant 0 : index
    %c0_445 = arith.constant 0 : index
    %506 = vector.load %arg1[%c11_443, %c0_444, %c0_445] : memref<12x4x128xf32, #tpu.memory_space<vmem>>, vector<1x4x128xf32>
    %507 = vector.shape_cast %506 : vector<1x4x128xf32> to vector<4x128xf32>
    %508 = arith.mulf %485, %507 : vector<4x128xf32>
    %cst_446 = arith.constant dense<0.000000e+00> : vector<128xf32>
    %509 = vector.multi_reduction <add>, %508, %cst_446 [0] : vector<4x128xf32> to vector<128xf32>
    %510 = vector.shape_cast %509 : vector<128xf32> to vector<1x128xf32>
    %c107 = arith.constant 107 : index
    %c0_447 = arith.constant 0 : index
    %511 = vector.load %arg5[%c107, %c0_447] : memref<144x128xf32, #tpu.memory_space<vmem>>, vector<1x128xf32>
    tpu.vector_store %arg5[%c107, %c0_447], %510 {strides = array<i32>} : memref<144x128xf32, #tpu.memory_space<vmem>>, vector<1x128xf32>,
    %c140 = arith.constant 140 : index
    %c0_448 = arith.constant 0 : index
    %512 = vector.load %arg5[%c140, %c0_448] : memref<144x128xf32, #tpu.memory_space<vmem>>, vector<1x128xf32>
    tpu.vector_store %arg5[%c140, %c0_448], %510 {strides = array<i32>} : memref<144x128xf32, #tpu.memory_space<vmem>>, vector<1x128xf32>,
    %c9_449 = arith.constant 9 : index
    %c0_450 = arith.constant 0 : index
    %c0_451 = arith.constant 0 : index
    %513 = vector.load %arg1[%c9_449, %c0_450, %c0_451] : memref<12x4x128xf32, #tpu.memory_space<vmem>>, vector<1x4x128xf32>
    %514 = vector.shape_cast %513 : vector<1x4x128xf32> to vector<4x128xf32>
    %c9_452 = arith.constant 9 : index
    %c0_453 = arith.constant 0 : index
    %c0_454 = arith.constant 0 : index
    %515 = vector.load %arg1[%c9_452, %c0_453, %c0_454] : memref<12x4x128xf32, #tpu.memory_space<vmem>>, vector<1x4x128xf32>
    %516 = vector.shape_cast %515 : vector<1x4x128xf32> to vector<4x128xf32>
    %517 = arith.mulf %514, %516 : vector<4x128xf32>
    %cst_455 = arith.constant dense<0.000000e+00> : vector<128xf32>
    %518 = vector.multi_reduction <add>, %517, %cst_455 [0] : vector<4x128xf32> to vector<128xf32>
    %519 = vector.shape_cast %518 : vector<128xf32> to vector<1x128xf32>
    %c117 = arith.constant 117 : index
    %c0_456 = arith.constant 0 : index
    %520 = vector.load %arg5[%c117, %c0_456] : memref<144x128xf32, #tpu.memory_space<vmem>>, vector<1x128xf32>
    tpu.vector_store %arg5[%c117, %c0_456], %519 {strides = array<i32>} : memref<144x128xf32, #tpu.memory_space<vmem>>, vector<1x128xf32>,
    %c10_457 = arith.constant 10 : index
    %c0_458 = arith.constant 0 : index
    %c0_459 = arith.constant 0 : index
    %521 = vector.load %arg1[%c10_457, %c0_458, %c0_459] : memref<12x4x128xf32, #tpu.memory_space<vmem>>, vector<1x4x128xf32>
    %522 = vector.shape_cast %521 : vector<1x4x128xf32> to vector<4x128xf32>
    %523 = arith.mulf %514, %522 : vector<4x128xf32>
    %cst_460 = arith.constant dense<0.000000e+00> : vector<128xf32>
    %524 = vector.multi_reduction <add>, %523, %cst_460 [0] : vector<4x128xf32> to vector<128xf32>
    %525 = vector.shape_cast %524 : vector<128xf32> to vector<1x128xf32>
    %c118 = arith.constant 118 : index
    %c0_461 = arith.constant 0 : index
    %526 = vector.load %arg5[%c118, %c0_461] : memref<144x128xf32, #tpu.memory_space<vmem>>, vector<1x128xf32>
    tpu.vector_store %arg5[%c118, %c0_461], %525 {strides = array<i32>} : memref<144x128xf32, #tpu.memory_space<vmem>>, vector<1x128xf32>,
    %c129 = arith.constant 129 : index
    %c0_462 = arith.constant 0 : index
    %527 = vector.load %arg5[%c129, %c0_462] : memref<144x128xf32, #tpu.memory_space<vmem>>, vector<1x128xf32>
    tpu.vector_store %arg5[%c129, %c0_462], %525 {strides = array<i32>} : memref<144x128xf32, #tpu.memory_space<vmem>>, vector<1x128xf32>,
    %c11_463 = arith.constant 11 : index
    %c0_464 = arith.constant 0 : index
    %c0_465 = arith.constant 0 : index
    %528 = vector.load %arg1[%c11_463, %c0_464, %c0_465] : memref<12x4x128xf32, #tpu.memory_space<vmem>>, vector<1x4x128xf32>
    %529 = vector.shape_cast %528 : vector<1x4x128xf32> to vector<4x128xf32>
    %530 = arith.mulf %514, %529 : vector<4x128xf32>
    %cst_466 = arith.constant dense<0.000000e+00> : vector<128xf32>
    %531 = vector.multi_reduction <add>, %530, %cst_466 [0] : vector<4x128xf32> to vector<128xf32>
    %532 = vector.shape_cast %531 : vector<128xf32> to vector<1x128xf32>
    %c119 = arith.constant 119 : index
    %c0_467 = arith.constant 0 : index
    %533 = vector.load %arg5[%c119, %c0_467] : memref<144x128xf32, #tpu.memory_space<vmem>>, vector<1x128xf32>
    tpu.vector_store %arg5[%c119, %c0_467], %532 {strides = array<i32>} : memref<144x128xf32, #tpu.memory_space<vmem>>, vector<1x128xf32>,
    %c141 = arith.constant 141 : index
    %c0_468 = arith.constant 0 : index
    %534 = vector.load %arg5[%c141, %c0_468] : memref<144x128xf32, #tpu.memory_space<vmem>>, vector<1x128xf32>
    tpu.vector_store %arg5[%c141, %c0_468], %532 {strides = array<i32>} : memref<144x128xf32, #tpu.memory_space<vmem>>, vector<1x128xf32>,
    %c10_469 = arith.constant 10 : index
    %c0_470 = arith.constant 0 : index
    %c0_471 = arith.constant 0 : index
    %535 = vector.load %arg1[%c10_469, %c0_470, %c0_471] : memref<12x4x128xf32, #tpu.memory_space<vmem>>, vector<1x4x128xf32>
    %536 = vector.shape_cast %535 : vector<1x4x128xf32> to vector<4x128xf32>
    %c10_472 = arith.constant 10 : index
    %c0_473 = arith.constant 0 : index
    %c0_474 = arith.constant 0 : index
    %537 = vector.load %arg1[%c10_472, %c0_473, %c0_474] : memref<12x4x128xf32, #tpu.memory_space<vmem>>, vector<1x4x128xf32>
    %538 = vector.shape_cast %537 : vector<1x4x128xf32> to vector<4x128xf32>
    %539 = arith.mulf %536, %538 : vector<4x128xf32>
    %cst_475 = arith.constant dense<0.000000e+00> : vector<128xf32>
    %540 = vector.multi_reduction <add>, %539, %cst_475 [0] : vector<4x128xf32> to vector<128xf32>
    %541 = vector.shape_cast %540 : vector<128xf32> to vector<1x128xf32>
    %c130 = arith.constant 130 : index
    %c0_476 = arith.constant 0 : index
    %542 = vector.load %arg5[%c130, %c0_476] : memref<144x128xf32, #tpu.memory_space<vmem>>, vector<1x128xf32>
    tpu.vector_store %arg5[%c130, %c0_476], %541 {strides = array<i32>} : memref<144x128xf32, #tpu.memory_space<vmem>>, vector<1x128xf32>,
    %c11_477 = arith.constant 11 : index
    %c0_478 = arith.constant 0 : index
    %c0_479 = arith.constant 0 : index
    %543 = vector.load %arg1[%c11_477, %c0_478, %c0_479] : memref<12x4x128xf32, #tpu.memory_space<vmem>>, vector<1x4x128xf32>
    %544 = vector.shape_cast %543 : vector<1x4x128xf32> to vector<4x128xf32>
    %545 = arith.mulf %536, %544 : vector<4x128xf32>
    %cst_480 = arith.constant dense<0.000000e+00> : vector<128xf32>
    %546 = vector.multi_reduction <add>, %545, %cst_480 [0] : vector<4x128xf32> to vector<128xf32>
    %547 = vector.shape_cast %546 : vector<128xf32> to vector<1x128xf32>
    %c131 = arith.constant 131 : index
    %c0_481 = arith.constant 0 : index
    %548 = vector.load %arg5[%c131, %c0_481] : memref<144x128xf32, #tpu.memory_space<vmem>>, vector<1x128xf32>
    tpu.vector_store %arg5[%c131, %c0_481], %547 {strides = array<i32>} : memref<144x128xf32, #tpu.memory_space<vmem>>, vector<1x128xf32>,
    %c142 = arith.constant 142 : index
    %c0_482 = arith.constant 0 : index
    %549 = vector.load %arg5[%c142, %c0_482] : memref<144x128xf32, #tpu.memory_space<vmem>>, vector<1x128xf32>
    tpu.vector_store %arg5[%c142, %c0_482], %547 {strides = array<i32>} : memref<144x128xf32, #tpu.memory_space<vmem>>, vector<1x128xf32>,
    %c11_483 = arith.constant 11 : index
    %c0_484 = arith.constant 0 : index
    %c0_485 = arith.constant 0 : index
    %550 = vector.load %arg1[%c11_483, %c0_484, %c0_485] : memref<12x4x128xf32, #tpu.memory_space<vmem>>, vector<1x4x128xf32>
    %551 = vector.shape_cast %550 : vector<1x4x128xf32> to vector<4x128xf32>
    %c11_486 = arith.constant 11 : index
    %c0_487 = arith.constant 0 : index
    %c0_488 = arith.constant 0 : index
    %552 = vector.load %arg1[%c11_486, %c0_487, %c0_488] : memref<12x4x128xf32, #tpu.memory_space<vmem>>, vector<1x4x128xf32>
    %553 = vector.shape_cast %552 : vector<1x4x128xf32> to vector<4x128xf32>
    %554 = arith.mulf %551, %553 : vector<4x128xf32>
    %cst_489 = arith.constant dense<0.000000e+00> : vector<128xf32>
    %555 = vector.multi_reduction <add>, %554, %cst_489 [0] : vector<4x128xf32> to vector<128xf32>
    %556 = vector.shape_cast %555 : vector<128xf32> to vector<1x128xf32>
    %c143 = arith.constant 143 : index
    %c0_490 = arith.constant 0 : index
    %557 = vector.load %arg5[%c143, %c0_490] : memref<144x128xf32, #tpu.memory_space<vmem>>, vector<1x128xf32>
    tpu.vector_store %arg5[%c143, %c0_490], %556 {strides = array<i32>} : memref<144x128xf32, #tpu.memory_space<vmem>>, vector<1x128xf32>,
    %c0_491 = arith.constant 0 : index
    %c0_492 = arith.constant 0 : index
    %558 = vector.load %arg2[%c0_491, %c0_492] : memref<10x144xf32, #tpu.memory_space<vmem>>, vector<10x144xf32>
    %c0_493 = arith.constant 0 : index
    %c0_494 = arith.constant 0 : index
    %559 = vector.load %arg5[%c0_493, %c0_494] : memref<144x128xf32, #tpu.memory_space<vmem>>, vector<144x128xf32>
    %cst_495 = arith.constant dense<0.000000e+00> : vector<10x128xf32>
    %560 = tpu.matmul %558, %559, %cst_495 {dimension_numbers = #tpu.dot_dimension_numbers<[1], [0], [0], [1], [0, 0, 1, 1], [], []>} : vector<10x144xf32>, vector<144x128xf32>, vector<10x128xf32> -> vector<10x128xf32>
    %c0_496 = arith.constant 0 : index
    %c0_497 = arith.constant 0 : index
    %561 = vector.load %arg3[%c0_496, %c0_497] : memref<10x1xf32, #tpu.memory_space<vmem>>, vector<10x1xf32>
    %562 = vector.broadcast %561 : vector<10x1xf32> to vector<10x128xf32>
    %563 = arith.addf %560, %562 : vector<10x128xf32>
    %cst_498 = arith.constant dense<0xFF800000> : vector<128xf32>
    %564 = vector.multi_reduction <maximumf>, %563, %cst_498 [0] : vector<10x128xf32> to vector<128xf32>
    %565 = vector.shape_cast %564 : vector<128xf32> to vector<1x128xf32>
    %566 = vector.broadcast %565 : vector<1x128xf32> to vector<10x128xf32>
    %567 = arith.subf %563, %566 : vector<10x128xf32>
    %568 = math.exp %567 : vector<10x128xf32>
    %cst_499 = arith.constant dense<0.000000e+00> : vector<128xf32>
    %569 = vector.multi_reduction <add>, %568, %cst_499 [0] : vector<10x128xf32> to vector<128xf32>
    %570 = vector.shape_cast %569 : vector<128xf32> to vector<1x128xf32>
    %571 = math.log %570 : vector<1x128xf32>
    %572 = vector.broadcast %571 : vector<1x128xf32> to vector<10x128xf32>
    %573 = arith.subf %567, %572 : vector<10x128xf32>
    %c0_500 = arith.constant 0 : index
    %c0_501 = arith.constant 0 : index
    %574 = vector.load %arg4[%c0_500, %c0_501] : memref<10x128xf32, #tpu.memory_space<vmem>>, vector<10x128xf32>
    tpu.vector_store %arg4[%c0_500, %c0_501], %573 {strides = array<i32>} : memref<10x128xf32, #tpu.memory_space<vmem>>, vector<10x128xf32>,
    return
  }
  func.func @transform_0(%arg0: i32) -> (i32, i32, i32) {
    %c0_i32 = arith.constant 0 : i32
    %c0_i32_0 = arith.constant 0 : i32
    %c0_i32_1 = arith.constant 0 : i32
    return %c0_i32, %c0_i32_0, %arg0 : i32, i32, i32
  }
  func.func @transform_1(%arg0: i32) -> (i32, i32) {
    %c0_i32 = arith.constant 0 : i32
    %c0_i32_0 = arith.constant 0 : i32
    %c0_i32_1 = arith.constant 0 : i32
    return %c0_i32, %c0_i32_0 : i32, i32
  }
  func.func @transform_2(%arg0: i32) -> (i32, i32) {
    %c0_i32 = arith.constant 0 : i32
    %c0_i32_0 = arith.constant 0 : i32
    %c0_i32_1 = arith.constant 0 : i32
    return %c0_i32, %c0_i32_0 : i32, i32
  }
  func.func @transform_3(%arg0: i32) -> (i32, i32) {
    %c0_i32 = arith.constant 0 : i32
    %c0_i32_0 = arith.constant 0 : i32
    return %c0_i32, %arg0 : i32, i32
  }
}

</mosaic_0001>

<bundles_post_ra>
// kernel: custom-call.8
= control target key start
LH: loop header
LB: loop body
LE: loop exit
PB: predicated region body
PF: predicated region fallthrough
CT: control target
= control target key end

     0   :  { %s791_s9 = smov 0   ;;  %s793_s10 = smov 0   ;;  %s998_s0 = inlined_call_operand.vmem [shape: f32[2,16,12,4], index: 0, kind: input, shape index: {}]   ;;  %s999_s1 = inlined_call_operand.vmem [shape: f32[2,16,12,4], index: 1, kind: output, shape index: {0}]   ;;  %s1000_s2 = inlined_call_operand.vmem [shape: f32[2,16,4], index: 2, kind: output, shape index: {1}]  }
   0x1   :  { %s795_s11 = smov 0   ;;  %s797_s12 = smov 0  }
   0x2   :  { %s799_s13 = smov 0   ;;  %s801_s14 = smov 0  }
   0x3   :  { %s803_s15 = smov 0  }
   0x4 LB: > { %s31_s16 = sadd.s32 1, %s760_s13  ;;  %s35_s17 = sadd.s32 1, %s764_s14  ;;  %s768_s15 = sphi %s803_s15, %s9_s15   ;;  %s764_s14 = sphi %s801_s14, %s1009_s14   ;;  %s760_s13 = sphi %s799_s13, %s1008_s13   ;;  %s756_s12 = sphi %s797_s12, %s1007_s12   ;;  %s752_s11 = sphi %s795_s11, %s1006_s11   ;;  %s748_s10 = sphi %s793_s10, %s1005_s10   ;;  %s744_s9 = sphi %s791_s9, %s1004_s9  }
   0x5   : > { %p33_p0 = scmp.ge.s32.totalorder %s31_s16, 16  ;;  %s40_s18 = ssub.s32 0, %s760_s13 }
   0x6   : > { %s602_s19 = smin.u32 %s760_s13, %s40_s18  ;;  %s600_s22 = sadd.s32 4294967295, %s768_s15  }
   0x7   : > { %s1011_s16 = smov (%p33_p0, %s31_s16), 0  ;;  %s1013_s17 = smov (!%p33_p0, %s35_s17), %s764_s14 }
   0x8   : > { %p37_p1 = scmp.ge.s32.totalorder %s1013_s17, 2  ;;  %s42_s20 = sshrl.u32 %s602_s19, 3 }
   0x9   : > { %s46_s21 = ssub.s32 0, %s1011_s16  ;;  %p66_p2 = scmp.ne.s32.totalorder %s748_s10, %s744_s9 }
   0xa   : > { %s1015_s17 = smov (%p37_p1, %s1013_s17), 0  ;;  %s603_s23 = smin.u32 %s46_s21, %s1011_s16 }
   0xb   : > { %s48_s24 = sshrl.u32 %s603_s23, 3  ;;  %s51_s25 = ssub.s32 %s764_s14, %s1015_s17 }
   0xc   : > { %p67_p3 = scmp.eq.s32.totalorder %s600_s22, 31  ;;  %s52_s26 = ssub.s32 %s42_s20, %s48_s24 }
   0xd   : > { %s56_s27 = sadd.s32 1, %s748_s10  ;;  %s53_s28 = sor.u32 %s52_s26, %s51_s25 }
   0xe   : > { %p845_p4 = por %p67_p3, %p66_p2  ;;  %p54_p5 = scmp.eq.s32.totalorder %s53_s28, 0 }
   0xf   : > { %p605_p6 = scmp.ge.s32.totalorder %s768_s15, 32 }
  0x10   : > { %s850_s30 = scalar_select %p54_p5, %s748_s10, %s56_s27  }
  0x11   : > { %89 = sbr.rel (%p605_p6) target bundleno = 25 (0x19), region = 16  ;;  %s91_s3 = sand.u32 (!%p605_p6), 1, %s768_s15  }
  0x12   : > { %s607_s4 = sshll.u32 (!%p605_p6), %s760_s13, 1  ;;  %s606_s5 = sshll.u32 (!%p605_p6), %s91_s3, 4 }
  0x13   : > { %s608_s6 = sshll.u32 (!%p605_p6), %s764_s14, 5  ;;  %s93_s21 = scalar_lea.vmem (!%p605_p6), [#allocation0], %s606_s5 }
  0x14   : > { %s99_s7 = sadd.s32 (!%p605_p6), %s608_s6, %s607_s4 }
  0x15   : > { %s609_s8 = sshll.u32 (!%p605_p6), %s99_s7, 3 }
  0x16   : > { %s101_s20 = scalar_lea.vmem (!%p605_p6), %s998_s0, %s609_s8 }
  0x17   : > { %v131_v0 = vld [vmem:[%s101_s20] sm:$0xff] (!%p605_p6)  ;;  %v133_v1 = vld [vmem:[%s101_s20 + $0x8] sm:$0xff] (!%p605_p6) }
  0x18   : > { %132 = vst [vmem:[%s93_s21] sm:$0xff] %v131_v0  ;;  %134 = vst [vmem:[%s93_s21 + $0x8] sm:$0xff] %v133_v1 }
  0x19 PF: > { %p610_p7 = scmp.ge.s32.totalorder %s768_s15, 1  ;;  %p139_p8 = scmp.lt.s32.totalorder %s768_s15, 33 }
  0x1b   : > { %p140_p9 = pnand %p610_p7, %p139_p8 }
  0x1d   : > { %143 = sbr.rel (%p140_p9) target bundleno = 347 (0x15b), region = 54 }
  0x24   : > { %s146_s23 = sand.u32 1, %s600_s22   ;;  %s160_s24 = sand.u32 1, %s744_s9   ;;  %v774_v4 = vmov 0.0  }
  0x25   : > { %s611_s25 = sshll.u32 %s146_s23, 4  ;;  %s864_s26 = sshll.u32 %s160_s24, 3 }
  0x26   : > { %s171_s27 = sand.u32 7, %s752_s11   ;;  %s148_s28 = scalar_lea.vmem [#allocation0], %s611_s25 }
  0x27   : > { %v173_v2 = vld [vmem:[%s148_s28] sm:$0xff]  ;;  %v614_v3 = vld [vmem:[%s148_s28 + $0x8] sm:$0xff]  ;;  %s162_s3 = scalar_lea.vmem [#allocation2], %s864_s26  ;;  %s872_s5 = scalar_lea.vmem [#allocation1], %s611_s25 }
  0x28   : > { %s870_s4 = scalar_lea.vmem %s162_s3, %s171_s27 [#allocation2]  ;;  %174 = vst [vmem:[%s872_s5] sm:$0xff] %v173_v2  ;;  %615 = vst [vmem:[%s872_s5 + $0x8] sm:$0xff] %v614_v3  ;;  %s877_s9 = smov 0  }
  0x29   : > { %179 = vst [vmem:[%s870_s4] sm:$0x1] %v774_v4 }
  0x2a LB: >> { %v187_v5 = vlaneseq  ;;  %v887_v8 = vstv %s772_s9  ;;  %s224_s22 = scalar_lea.vmem %s872_s5, %s772_s9 [#allocation1]  ;;  %s300_s6 = scalar_lea.vmem [#allocation3], %s772_s9  ;;  %s772_s9 = sphi %s877_s9, %s185_s9  }
  0x2b   : >> { %s317_s7 = smov [#allocation3] }
  0x2c   : >> { %v884_v7 = vshrl.u32 %v187_v5, 7  ;;  %v916_v56 = vand.u32 127, %v187_v5 }
  0x2e   : >> { %vm191_vm0 = vcmp.gt.s32.totalorder %v884_v7, %v887_v8  ;;  %v198_v9 = vadd.s32 8, %v884_v7  ;;  %v263_v7 = vmov %v884_v7  ;;  %vm920_vm14 = vcmp.eq.s32.totalorder %v916_v56, %v887_v8 }
  0x2f   : >> { %v186_v6 = vld [vmem:[%s872_s5] sm:$0xff]  ;;  %v616_v11 = vld [vmem:[%s872_s5 + $0x8] sm:$0xff]  ;;  %v282_v52 = vadd.s32 8, %v263_v7  ;;  %s260_s5 = smov %s872_s5  ;;  %vm267_vm12 = vcmp.gt.s32.totalorder %v263_v7, %v887_v8  ;;  %v320_v7 = vmov %v884_v7 }
  0x30   : >> { %v192_v10 = vsel %vm191_vm0, %v186_v6, 0.0  ;;  %vm200_vm1 = vcmp.gt.s32.totalorder %v198_v9, %v887_v8  ;;  %vm201_vm2 = vcmp.lt.s32.totalorder %v198_v9, 12  ;;  %v225_v22 = vld [vmem:[%s224_s22] ss:$0 sm:$0xff]  ;;  %v618_v55 = vld [vmem:[%s260_s5 + $0x8] sm:$0xff] }
  0x31   : >> { %v193_v12 = vmul.f32 %v192_v10, %v192_v10  ;;  %vm202_vm3 = vmand %vm200_vm1, %vm201_vm2  ;;  %v226_v23 = vand.u32 2147483647, %v225_v22  ;;  %vm251_vm9 = vcmp.lt.f32.partialorder %v225_v22, 0.0  ;;  %vm284_vm10 = vcmp.gt.s32.totalorder %v282_v52, %v887_v8  ;;  %v264_v54 = vld [vmem:[%s260_s5] sm:$0xff]  ;;  %s316_s5 = smov %s872_s5 }
  0x32   : >> { %v203_v13 = vsel %vm202_vm3, %v616_v11, 0.0  ;;  %vm285_vm11 = vcmp.lt.s32.totalorder %v282_v52, 12  ;;  %v268_v58 = vsel %vm267_vm12, %v264_v54, 0.0  ;;  %v313_v9 = vld [vmem:[%s870_s4] ss:$0 sm:$0xff]  ;;  %vm353_vm2 = vcmp.gt.s32.totalorder %v916_v56, %v887_v8 }
  0x33   : >> { %v204_v14 = vmul.f32 %v203_v13, %v203_v13  ;;  %v227_v28 = vmax.f32 %v226_v23, 0.0  ;;  %vm286_vm13 = vmand %vm284_vm10, %vm285_vm11 }
  0x34   : >> { %v287_v59 = vsel %vm286_vm13, %v618_v55, 0.0 }
  0x35   : >> { %v205_v15 = vadd.f32 %v204_v14, %v193_v12  ;;  %v775_v14 = vmov 1.0  }
  0x37   : >> { %v206_v16 = vrot.slane %v205_v15, 4 }
  0x39   : >> { %v207_v17 = vadd.f32 %v206_v16, %v205_v15  ;;  %v325_v15 = vadd.s32 8, %v320_v7  ;;  %v323_v16 = vld [vmem:[%s316_s5] sm:$0xff]  ;;  %v344_v7 = vmov %v884_v7 }
  0x3a   : >> { %vm361_vm0 = vcmp.ge.s32.totalorder %v344_v7, %v887_v8 }
  0x3b   : >> { %v208_v18 = vrot.slane %v207_v17, 2  ;;  %vm331_vm15 = vcmp.lt.s32.totalorder %v325_v15, 12  ;;  %vm362_vm3 = vmand %vm920_vm14, %vm361_vm0 }
  0x3d   : >> { %v209_v19 = vadd.f32 %v208_v18, %v207_v17  ;;  %v620_v17 = vld [vmem:[%s316_s5 + $0x8] sm:$0xff]  ;;  %s340_s5 = smov %s316_s5 }
  0x3e   : >> { %s386_s8 = scalar_lea.vmem %s340_s5, %s772_s9  ;;  %s185_s9 = sadd.s32 1, %s772_s9  }
  0x3f   : >> { %v210_v20 = vrot.slane %v209_v19, 1  ;;  %p182_p10 = scmp.ge.s32.totalorder %s185_s9, 4  }
  0x40   : > { %s626_s18 = sshll.u32 (%p182_p10), %s752_s11, 1  ;;  %s627_s19 = sshll.u32 (%p182_p10), %s756_s12, 5 }
  0x41   : >> { %v894_v21 = vadd.f32 %v210_v20, %v209_v19  ;;  %s407_s20 = sadd.s32 (%p182_p10), %s627_s19, %s626_s18 }
  0x42   : > { %s628_s21 = sshll.u32 (%p182_p10), %s407_s20, 3 }
  0x43   : >> { %700 = vrsqrt.f32 %v894_v21  ;;  %vm214_vm4 = vcmp.eq.f32.partialorder %v894_v21, inf  ;;  %v217_v25 = vand.u32 2147483648, %v894_v21  ;;  %vm216_vm5 = vcmp.eq.f32.partialorder %v894_v21, 0.0  ;;  %s409_s25 = scalar_lea.vmem (%p182_p10), %s999_s1, %s628_s21 }
  0x4d   : >> { %v701_v24 = vpop.eup %700 }
  0x4e   : >> { %v213_v26 = vmul.f32 %v701_v24, %v894_v21 }
  0x50   : >> { %v215_v27 = vsel %vm214_vm4, %v894_v21, %v213_v26 }
  0x51   : >> { %v218_v29 = vsel %vm216_vm5, %v217_v25, %v215_v27 }
  0x52   : >> { %v228_v30 = vand.u32 2147483647, %v218_v29  ;;  %v365_v29 = vadd.s32 8, %v344_v7 }
  0x54   : >> { %v229_v31 = vmax.f32 %v227_v28, %v228_v30  ;;  %vm382_vm1 = vcmp.ge.s32.totalorder %v365_v29, %v887_v8 }
  0x55   : >> { %vm383_vm4 = vmand %vm920_vm14, %vm382_vm1 }
  0x56   : >> { %702 = vrcp.f32 %v229_v31  ;;  %vm241_vm8 = vcmp.eq.f32.partialorder %v229_v31, 0.0 }
  0x60   : >> { %v703_v32 = vpop.eup %702 }
  0x61   : >> { %v231_v33 = vmul.f32 %v703_v32, %v226_v23  ;;  %v234_v34 = vmul.f32 0.0, %v703_v32  ;;  %v238_v35 = vmul.f32 %v703_v32, %v228_v30 }
  0x63   : >> { %v232_v36 = vmul.f32 %v231_v33, %v231_v33  ;;  %v235_v37 = vmul.f32 %v234_v34, %v234_v34  ;;  %v239_v38 = vmul.f32 %v238_v35, %v238_v35  ;;  %v622_v35 = vld [vmem:[%s340_s5 + $0x8] sm:$0xff] }
  0x65   : >> { %v236_v39 = vadd.f32 %v235_v37, %v232_v36 }
  0x67   : >> { %v240_v40 = vadd.f32 %v239_v38, %v236_v39 }
  0x69   : >> { %704 = vrsqrt.f32 %v240_v40  ;;  %vm244_vm6 = vcmp.eq.f32.partialorder %v240_v40, inf  ;;  %v247_v42 = vand.u32 2147483648, %v240_v40  ;;  %vm246_vm7 = vcmp.eq.f32.partialorder %v240_v40, 0.0 }
  0x73   : >> { %v705_v41 = vpop.eup %704 }
  0x74   : >> { %v243_v43 = vmul.f32 %v705_v41, %v240_v40 }
  0x76   : >> { %v245_v44 = vsel %vm244_vm6, %v240_v40, %v243_v43 }
  0x77   : >> { %v248_v45 = vsel %vm246_vm7, %v247_v42, %v245_v44 }
  0x78   : >> { %v249_v46 = vmul.f32 %v248_v45, %v229_v31  ;;  %v351_v31 = vld [vmem:[%s340_s5] sm:$0xff] }
  0x7a   : >> { %v250_v47 = vsel %vm241_vm8, 0.0, %v249_v46 }
  0x7b   : >> { %v252_v48 = vxor.u32 2147483648, %v250_v47 }
  0x7d   : >> { %v253_v49 = vsel %vm251_vm9, %v250_v47, %v252_v48 }
  0x7e   : >> { %v909_v50 = vsel %vm216_vm5, %v225_v22, %v253_v49  ;;  %706 = vrcp.f32 %v253_v49  ;;  %v254_v53 = vsub.f32 %v253_v49, %v225_v22 }
  0x7f   : >> { %v259_v51 = vsub.f32 %v225_v22, %v909_v50 }
  0x81   : >> { %708 = vrcp.f32 %v259_v51 }
  0x88   : >> { %v707_v57 = vpop.eup %706 }
  0x89   : >> { %v256_v60 = vmul.f32 %v707_v57, %v254_v53 }
  0x8b   : >> { %v709_v61 = vpop.eup %708  ;;  %v258_v63 = vsel %vm216_vm5, 0.0, %v256_v60 }
  0x8c   : >> { %v270_v0 = vmul.f32 %v709_v61, %v268_v58  ;;  %v289_v1 = vmul.f32 %v709_v61, %v287_v59  ;;  %v306_v2 = vsel %vm920_vm14, %v258_v63, 0.0 }
  0x8d   : >> { %307 = vadd.xlane.f32.xlu1 %v306_v2 }
  0x8e   : >> { %v271_v3 = vsel %vm216_vm5, 0.0, %v270_v0  ;;  %v290_v4 = vsel %vm216_vm5, 0.0, %v289_v1 }
  0x8f   : >> { %v276_v5 = vsel %vm920_vm14, %v271_v3, 0.0  ;;  %v295_v6 = vsel %vm920_vm14, %v290_v4, 0.0 }
  0x90   : >> { %277 = vadd.xlane.f32.xlu0 %v276_v5 }
  0x94   : >> { %296 = vadd.xlane.f32.xlu0 %v295_v6 }
 0x11a   : >> { %v308_v10 = vpop.xlane.xlu1 %307 }
 0x11b   : >> { %v314_v11 = vsel %vm920_vm14, %v308_v10, %v313_v9 }
 0x11c   : >> { %315 = vst [vmem:[%s870_s4] sm:$0x1] %v314_v11 }
 0x11d   : >> { %v278_v12 = vpop.xlane.xlu0 %277 }
 0x11e   : >> { %279 = vst [vmem:[#allocation3] sm:$0xff] %v278_v12 }
 0x121   : >> { %v297_v13 = vpop.xlane.xlu0 %296 }
 0x122   : >> { %299 = vst [vmem:[#allocation3 + $0x8] sm:$0xff] %v297_v13 }
 0x123   : >> { %301 = vst [vmem:[%s300_s6] sm:$0x1] %v775_v14 }
 0x12a   : >> { %v322_v18 = vld [vmem:[%s317_s7] sm:$0xff]  ;;  %v619_v19 = vld [vmem:[%s317_s7 + $0x8] sm:$0xff]  ;;  %s341_s7 = smov %s317_s7 }
 0x12b   : >> { %v324_v20 = vmul.f32 %v323_v16, %v322_v18  ;;  %v330_v21 = vmul.f32 %v620_v17, %v619_v19  ;;  %v349_v33 = vld [vmem:[%s341_s7] sm:$0xff]  ;;  %v621_v34 = vld [vmem:[%s341_s7 + $0x8] sm:$0xff] }
 0x12d   : >> { %v332_v22 = vsel %vm331_vm15, %v330_v21, 0.0 }
 0x12e   : >> { %v333_v23 = vadd.f32 %v332_v22, %v324_v20 }
 0x130   : >> { %v334_v24 = vrot.slane %v333_v23, 4 }
 0x132   : >> { %v335_v25 = vadd.f32 %v334_v24, %v333_v23 }
 0x134   : >> { %v336_v26 = vrot.slane %v335_v25, 2 }
 0x136   : >> { %v337_v27 = vadd.f32 %v336_v26, %v335_v25 }
 0x138   : >> { %v338_v28 = vrot.slane %v337_v27, 1 }
 0x13a   : >> { %v339_v30 = vadd.f32 %v338_v28, %v337_v27 }
 0x13c   : >> { %v345_v32 = vmul.f32 %v339_v30, %v308_v10 }
 0x13e   : >> { %v350_v36 = vmul.f32 %v349_v33, %v345_v32  ;;  %v370_v37 = vmul.f32 %v621_v34, %v345_v32 }
 0x140   : >> { %v354_v38 = vsub.f32 %v351_v31, %v350_v36  ;;  %v375_v7 = vsub.f32 %v622_v35, %v370_v37 }
 0x142   : >> { %v355_v39 = vsel %vm353_vm2, %v354_v38, %v351_v31  ;;  %v376_v40 = vsel %vm353_vm2, %v375_v7, %v622_v35 }
 0x143   : >> { %v363_v41 = vsel %vm362_vm3, %v349_v33, %v355_v39  ;;  %v384_v42 = vsel %vm383_vm4, %v621_v34, %v376_v40 }
 0x144   : >> { %364 = vst [vmem:[%s340_s5] sm:$0xff] %v363_v41  ;;  %623 = vst [vmem:[%s340_s5 + $0x8] sm:$0xff] %v384_v42 }
 0x147   : > { %184 = sbr.rel (!%p182_p10) target bundleno = 42 (0x2a), region = 188 }
 0x14b   : >> { %v387_v43 = vld [vmem:[%s386_s8] ss:$0 sm:$0xff] }
 0x14c   : >> { %v392_v8 = vsel %vm920_vm14, %v909_v50, %v387_v43 }
 0x14d   : >> { %393 = vst [vmem:[%s386_s8] sm:$0x1] %v392_v8 }
 0x14e   : > { %p449_p11 = scmp.lt.s32.totalorder (%p845_p4), %s752_s11, 0  ;;  %s450_s27 = ssub.s32 (%p845_p4), 0, %s752_s11  ;;  %v486_v46 = vld [vmem:[%s162_s3] sm:$0xff] (%p845_p4) }
 0x14f   : > { %448 = sbr.rel (!%p845_p4) target bundleno = 347 (0x15b), region = 99  ;;  %s629_s28 = smin.u32 (%p845_p4), %s752_s11, %s450_s27 }
 0x150   : > { %s452_s4 = sshrl.u32 (%p845_p4), %s629_s28, 3  ;;  %s630_s9 = sshll.u32 (%p845_p4), %s756_s12, 1 }
 0x154   : > { %v439_v44 = vld [vmem:[%s872_s5] sm:$0xff]  ;;  %v441_v45 = vld [vmem:[%s872_s5 + $0x8] sm:$0xff]  ;;  %s453_s5 = ssub.s32 (%p845_p4), 0, %s452_s4 }
 0x155   : > { %440 = vst [vmem:[%s409_s25] sm:$0xff] %v439_v44  ;;  %442 = vst [vmem:[%s409_s25 + $0x8] sm:$0xff] %v441_v45 }
 0x156   : > { %s1017_s5 = smov (!%p449_p11, %s453_s5), %s452_s4 }
 0x157   : > { %s456_s22 = sadd.s32 %s630_s9, %s1017_s5 }
 0x158   : > { %s631_s6 = sshll.u32 %s456_s22, 3 }
 0x159   : > { %s458_s29 = scalar_lea.vmem %s1000_s2, %s631_s6 }
 0x15a   : > { %487 = vst [vmem:[%s458_s29] sm:$0xff] %v486_v46 }
 0x15b PF: > { %s9_s15 = sadd.s32 1, %s768_s15   ;;  %s1004_s9 = smov %s748_s10 }
 0x15c   : > { %p6_p12 = scmp.ge.s32.totalorder %s9_s15, 34   ;;  %s1005_s10 = smov %s850_s30 }
 0x15d   : > { %s1006_s11 = smov %s760_s13  ;;  %s1007_s12 = smov %s764_s14 }
 0x15e   : > { %s1008_s13 = smov %s1011_s16  ;;  %s1009_s14 = smov %s1015_s17 }
 0x15f   :  { %8 = sbr.rel (!%p6_p12) target bundleno = 4 (0x4), region = 199 }

// kernel: custom-call.10
= control target key start
LH: loop header
LB: loop body
LE: loop exit
PB: predicated region body
PF: predicated region fallthrough
CT: control target
= control target key end

     0   :  { %s345_s6 = smov 0   ;;  %s347_s7 = smov 0   ;;  %s417_s0 = inlined_call_operand.vmem [shape: f32[2,16,4,4], index: 0, kind: input, shape index: {}]   ;;  %s418_s1 = inlined_call_operand.vmem [shape: f32[2,16,4,4], index: 1, kind: output, shape index: {}]  }
   0x1   :  { %s349_s8 = smov 0   ;;  %s351_s9 = smov 0  }
   0x2   :  { %s353_s10 = smov 0  }
   0x3 LB: > { %s241_s11 = sadd.s32 4294967295, %s333_s10   ;;  %s16_s12 = sadd.s32 1, %s325_s8  ;;  %s333_s10 = sphi %s353_s10, %s7_s10   ;;  %s329_s9 = sphi %s351_s9, %s422_s9   ;;  %s325_s8 = sphi %s349_s8, %s421_s8   ;;  %s321_s7 = sphi %s347_s7, %s420_s7   ;;  %s317_s6 = sphi %s345_s6, %s419_s6  }
   0x4   : > { %p17_p0 = scmp.ge.s32.totalorder %s16_s12, 16  ;;  %s19_s13 = sadd.s32 1, %s329_s9 }
   0x5   : > { %p243_p2 = scmp.ge.s32.totalorder %s333_s10, 32 }
   0x6   : > { %s424_s12 = smov (%p17_p0, %s16_s12), 0  ;;  %s426_s13 = smov (!%p17_p0, %s19_s13), %s329_s9 }
   0x7   : > { %p21_p1 = scmp.ge.s32.totalorder %s426_s13, 2  ;;  %33 = sbr.rel (%p243_p2) target bundleno = 15 (0xf), region = 16 }
   0x8   : > { %s35_s14 = sand.u32 (!%p243_p2), 1, %s333_s10   ;;  %s245_s15 = sshll.u32 (!%p243_p2), %s329_s9, 4 }
   0x9   : > { %s428_s13 = smov (%p21_p1, %s426_s13), 0  ;;  %s244_s16 = sshll.u32 (!%p243_p2), %s35_s14, 2 }
   0xa   : > { %s39_s17 = sadd.s32 (!%p243_p2), %s325_s8, %s245_s15  ;;  %s37_s22 = scalar_lea.vmem (!%p243_p2), [#allocation1], %s244_s16 }
   0xb   : > { %s246_s18 = sshll.u32 (!%p243_p2), %s39_s17, 2 }
   0xc   : > { %s41_s21 = scalar_lea.vmem (!%p243_p2), %s417_s0, %s246_s18 }
   0xd   : > { %v57_v0 = vld [vmem:[%s41_s21] sm:$0xf] (!%p243_p2) }
   0xe   : > { %58 = vst [vmem:[%s37_s22] sm:$0xf] %v57_v0 }
   0xf PF: > { %p247_p3 = scmp.ge.s32.totalorder %s333_s10, 1  ;;  %p74_p4 = scmp.lt.s32.totalorder %s333_s10, 33 }
  0x11   : > { %p75_p5 = pnand %p247_p3, %p74_p4 }
  0x12   : > { %s387_s23 = sand.u32 (!%p75_p5), 1, %s241_s11   ;;  %v96_v1 = vlaneseq (!%p75_p5)  ;;  %vm110_vm1 = vcmask (!%p75_p5), 31744   ;;  %s251_s26 = sshll.u32 (!%p75_p5), %s321_s7, 4 }
  0x13   : > { %78 = sbr.rel (%p75_p5) target bundleno = 484 (0x1e4), region = 50  ;;  %s248_s24 = sshll.u32 (!%p75_p5), %s387_s23, 2 }
  0x14   : > { %s87_s25 = scalar_lea.vmem (!%p75_p5), [#allocation1], %s248_s24  ;;  %v97_v3 = vand.u32 (!%p75_p5), 127, %v96_v1  ;;  %v99_v4 = vshrl.u32 (!%p75_p5), %v96_v1, 7  ;;  %s153_s27 = sadd.s32 (!%p75_p5), %s317_s6, %s251_s26 }
  0x15   : > { %v94_v2 = vld [vmem:[%s87_s25] sm:$0xf] (!%p75_p5)  ;;  %s91_s28 = scalar_lea.vmem (!%p75_p5), [#allocation3], %s248_s24  ;;  %s252_s29 = sshll.u32 (!%p75_p5), %s153_s27, 2 }
  0x16   : > { %95 = vst [vmem:[#allocation0] sm:$0xf] (!%p75_p5), %v94_v2  ;;  %vm105_vm0 = vcmp.eq.s32.totalorder (!%p75_p5), %v97_v3, 0  ;;  %vm101_vm2 = vcmp.eq.s32.totalorder (!%p75_p5), %v97_v3, %v99_v4  ;;  %vm114_vm3 = vcmp.eq.s32.totalorder (!%p75_p5), %v97_v3, 1  ;;  %vm125_vm4 = vcmp.eq.s32.totalorder (!%p75_p5), %v97_v3, 2  ;;  %s155_s3 = scalar_lea.vmem (!%p75_p5), %s418_s1, %s252_s29 }
  0x17   : > { %vm136_vm5 = vcmp.eq.s32.totalorder (!%p75_p5), %v97_v3, 3 }
  0x1d   : > { %v102_v5 = vld [vmem:[#allocation0] sm:$0xff] }
  0x1e   : > { %v109_v6 = vld [vmem:[#allocation0 + $0x1] ss:$0 sm:$0xff]  ;;  %v106_v7 = vsel %vm105_vm0, %v102_v5, 1.0  ;;  %v120_v11 = vld [vmem:[#allocation0 + $0x2] ss:$0 sm:$0xff] }
  0x1f   : > { %v111_v8 = vsel %vm110_vm1, %v109_v6, 0.0  ;;  %v107_v9 = vsel %vm101_vm2, %v106_v7, 0.0  ;;  %v122_v12 = vsel %vm110_vm1, %v120_v11, 0.0  ;;  %v131_v16 = vld [vmem:[#allocation0 + $0x3] ss:$0 sm:$0xff] }
  0x20   : > { %v115_v10 = vmul.f32 %v111_v8, %v107_v9  ;;  %v133_v17 = vsel %vm110_vm1, %v131_v16, 0.0 }
  0x22   : > { %116 = vadd.xlane.f32.xlu0 %v115_v10 }
  0xaf   : > { %v117_v13 = vpop.xlane.xlu0 %116 }
  0xb0   : > { %v118_v14 = vsel %vm114_vm3, %v117_v13, %v107_v9 }
  0xb1   : > { %v126_v15 = vmul.f32 %v122_v12, %v118_v14 }
  0xb3   : > { %127 = vadd.xlane.f32.xlu0 %v126_v15 }
 0x140   : > { %v128_v18 = vpop.xlane.xlu0 %127 }
 0x141   : > { %v129_v19 = vsel %vm125_vm4, %v128_v18, %v118_v14 }
 0x142   : > { %v137_v20 = vmul.f32 %v133_v17, %v129_v19 }
 0x144   : > { %138 = vadd.xlane.f32.xlu1 %v137_v20 }
 0x1d1   : > { %v139_v21 = vpop.xlane.xlu1 %138 }
 0x1d2   : > { %v140_v22 = vsel %vm136_vm5, %v139_v21, %v129_v19 }
 0x1d3   : > { %141 = vst [vmem:[#allocation2] sm:$0xff] %v140_v22 }
 0x1da   : > { %v145_v23 = vld [vmem:[#allocation2] sm:$0xf] }
 0x1db   : > { %147 = vst [vmem:[%s91_s28] sm:$0xf] %v145_v23 }
 0x1e2   : > { %v171_v24 = vld [vmem:[%s91_s28] sm:$0xf] }
 0x1e3   : > { %172 = vst [vmem:[%s155_s3] sm:$0xf] %v171_v24 }
 0x1e4 PF: > { %s7_s10 = sadd.s32 1, %s333_s10   ;;  %s419_s6 = smov %s325_s8 }
 0x1e5   : > { %p4_p6 = scmp.ge.s32.totalorder %s7_s10, 34   ;;  %s420_s7 = smov %s329_s9 }
 0x1e6   : > { %s421_s8 = smov %s424_s12  ;;  %s422_s9 = smov %s428_s13 }
 0x1e7   :  { %6 = sbr.rel (!%p4_p6) target bundleno = 3 (0x3), region = 113 }

// kernel: grnet_forward.3
= control target key start
LH: loop header
LB: loop body
LE: loop exit
PB: predicated region body
PF: predicated region fallthrough
CT: control target
= control target key end

     0   :  { %vm37_vm0 = vcmask 130048   ;;  %s608_s1 = inlined_call_operand.vmem [shape: f32[16,128], index: 1, kind: input, shape index: {}]   ;;  %s609_s0 = inlined_call_operand.vmem [shape: f32[192,16], index: 0, kind: input, shape index: {}]   ;;  %s610_s2 = inlined_call_operand.vmem [shape: f32[192,128], index: 2, kind: output, shape index: {}]  }
   0x1   :  { %v35_v0 = vld [vmem:[%s608_s1] sm:$0xff]  ;;  %v36_v1 = vld [vmem:[%s608_s1 + $0x8] sm:$0xff]  ;;  %v13_v7 = vld [vmem:[%s609_s0 + $0x10] sm:$0xff] }
   0x2   :  { %v11_v2 = vld [vmem:[%s609_s0] sm:$0xff]  ;;  %v413_v3 = vpack.c.bf16 %v36_v1, %v35_v0  ;;  %v12_v5 = vld [vmem:[%s609_s0 + $0x8] sm:$0xff]  ;;  %v25_v8 = vld [vmem:[%s609_s0 + $0x70] sm:$0xff] }
   0x3   :  { %377 = vmatprep.mubr.msk.f32.mxu0 %vm37_vm0, %v11_v2  ;;  %v23_v4 = vld [vmem:[%s609_s0 + $0x60] sm:$0xff]  ;;  %v24_v6 = vld [vmem:[%s609_s0 + $0x68] sm:$0xff]  ;;  %v14_v9 = vld [vmem:[%s609_s0 + $0x18] sm:$0xff] }
   0x4   :  { %395 = vmatprep.mubr.msk.f32.mxu1 %vm37_vm0, %v23_v4  ;;  %414 = vmatprep.subr.bf16.mxu0 %v413_v3  ;;  %v26_v10 = vld [vmem:[%s609_s0 + $0x78] sm:$0xff]  ;;  %v15_v11 = vld [vmem:[%s609_s0 + $0x20] sm:$0xff]  ;;  %v16_v13 = vld [vmem:[%s609_s0 + $0x28] sm:$0xff] }
   0x5   :  { %417 = vmatprep.subr.bf16.mxu1 %v413_v3  ;;  %416 = vmatpush3.bf16.msra.mxu0 %v413_v3  ;;  %v27_v12 = vld [vmem:[%s609_s0 + $0x80] sm:$0xff]  ;;  %v28_v14 = vld [vmem:[%s609_s0 + $0x88] sm:$0xff]  ;;  %v17_v15 = vld [vmem:[%s609_s0 + $0x30] sm:$0xff] }
   0x6   :  { %418 = vmatpush3.bf16.msra.mxu1 %v413_v3  ;;  %v29_v16 = vld [vmem:[%s609_s0 + $0x90] sm:$0xff]  ;;  %v18_v17 = vld [vmem:[%s609_s0 + $0x38] sm:$0xff]  ;;  %v19_v19 = vld [vmem:[%s609_s0 + $0x40] sm:$0xff] }
   0x7   :  { %v30_v18 = vld [vmem:[%s609_s0 + $0x98] sm:$0xff]  ;;  %v31_v20 = vld [vmem:[%s609_s0 + $0xa0] sm:$0xff]  ;;  %v20_v21 = vld [vmem:[%s609_s0 + $0x48] sm:$0xff] }
   0x8   :  { %378 = vmatmul.mubr.msk.f32.vlgmr.msra.gmra.mrb[0].mxu0 %vm37_vm0, %v12_v5  ;;  %v32_v22 = vld [vmem:[%s609_s0 + $0xa8] sm:$0xff]  ;;  %v21_v23 = vld [vmem:[%s609_s0 + $0x50] sm:$0xff]  ;;  %v22_v25 = vld [vmem:[%s609_s0 + $0x58] sm:$0xff] }
   0x9   :  { %396 = vmatmul.mubr.msk.f32.vlgmr.msra.gmra.mrb[0].mxu1 %vm37_vm0, %v24_v6  ;;  %380 = vmatprep.mubr.msk.f32.mxu0 %vm37_vm0, %v13_v7  ;;  %v33_v24 = vld [vmem:[%s609_s0 + $0xb0] sm:$0xff]  ;;  %v34_v26 = vld [vmem:[%s609_s0 + $0xb8] sm:$0xff] }
   0xa   :  { %398 = vmatprep.mubr.msk.f32.mxu1 %vm37_vm0, %v25_v8 }
   0xc   :  { %381 = vmatmul.mubr.msk.f32.gmra.mrb[2].mxu0 %vm37_vm0, %v14_v9 }
   0xd   :  { %399 = vmatmul.mubr.msk.f32.gmra.mrb[2].mxu1 %vm37_vm0, %v26_v10  ;;  %383 = vmatprep.mubr.msk.f32.mxu0 %vm37_vm0, %v15_v11 }
   0xe   :  { %401 = vmatprep.mubr.msk.f32.mxu1 %vm37_vm0, %v27_v12 }
  0x10   :  { %384 = vmatmul.mubr.msk.f32.gmra.mrb[4].mxu0 %vm37_vm0, %v16_v13 }
  0x11   :  { %402 = vmatmul.mubr.msk.f32.gmra.mrb[4].mxu1 %vm37_vm0, %v28_v14  ;;  %386 = vmatprep.mubr.msk.f32.mxu0 %vm37_vm0, %v17_v15 }
  0x12   :  { %404 = vmatprep.mubr.msk.f32.mxu1 %vm37_vm0, %v29_v16 }
  0x14   :  { %387 = vmatmul.mubr.msk.f32.gmra.mrb[6].mxu0 %vm37_vm0, %v18_v17 }
  0x15   :  { %405 = vmatmul.mubr.msk.f32.gmra.mrb[6].mxu1 %vm37_vm0, %v30_v18  ;;  %389 = vmatprep.mubr.msk.f32.mxu0 %vm37_vm0, %v19_v19 }
  0x16   :  { %407 = vmatprep.mubr.msk.f32.mxu1 %vm37_vm0, %v31_v20 }
  0x18   :  { %390 = vmatmul.mubr.msk.f32.gmra.mrb[8].mxu0 %vm37_vm0, %v20_v21 }
  0x19   :  { %408 = vmatmul.mubr.msk.f32.gmra.mrb[8].mxu1 %vm37_vm0, %v32_v22  ;;  %392 = vmatprep.mubr.msk.f32.mxu0 %vm37_vm0, %v21_v23 }
  0x1a   :  { %410 = vmatprep.mubr.msk.f32.mxu1 %vm37_vm0, %v33_v24 }
  0x1c   :  { %393 = vmatmul.mubr.msk.f32.gmra.mrb[10].mxu0 %vm37_vm0, %v22_v25 }
  0x1d   :  { %411 = vmatmul.mubr.msk.f32.gmra.mrb[10].mxu1 %vm37_vm0, %v34_v26 }
  0xdb   :  { %v379_v27 = vpop.f32.mrb[0].mxu0 }
  0xdc   :  { %v397_v28 = vpop.f32.mrb[0].mxu1  ;;  %296 = vst [vmem:[%s610_s2 + $0x8] sm:$0xff] %v379_v27  ;;  %v176_v29 = vpop.f32.mrb[1].mxu0 }
  0xdd   :  { %308 = vst [vmem:[%s610_s2 + $0x68] sm:$0xff] %v397_v28  ;;  %v236_v30 = vpop.f32.mrb[1].mxu1  ;;  %295 = vst [vmem:[%s610_s2] sm:$0xff] %v176_v29 }
  0xde   :  { %307 = vst [vmem:[%s610_s2 + $0x60] sm:$0xff] %v236_v30 }
  0xdf   :  { %v382_v31 = vpop.f32.mrb[2].mxu0 }
  0xe0   :  { %v400_v32 = vpop.f32.mrb[2].mxu1  ;;  %298 = vst [vmem:[%s610_s2 + $0x18] sm:$0xff] %v382_v31  ;;  %v186_v33 = vpop.f32.mrb[3].mxu0 }
  0xe1   :  { %310 = vst [vmem:[%s610_s2 + $0x78] sm:$0xff] %v400_v32  ;;  %v246_v34 = vpop.f32.mrb[3].mxu1  ;;  %297 = vst [vmem:[%s610_s2 + $0x10] sm:$0xff] %v186_v33 }
  0xe2   :  { %309 = vst [vmem:[%s610_s2 + $0x70] sm:$0xff] %v246_v34 }
  0xe3   :  { %v385_v35 = vpop.f32.mrb[4].mxu0 }
  0xe4   :  { %v403_v36 = vpop.f32.mrb[4].mxu1  ;;  %300 = vst [vmem:[%s610_s2 + $0x28] sm:$0xff] %v385_v35  ;;  %v196_v37 = vpop.f32.mrb[5].mxu0 }
  0xe5   :  { %312 = vst [vmem:[%s610_s2 + $0x88] sm:$0xff] %v403_v36  ;;  %v256_v38 = vpop.f32.mrb[5].mxu1  ;;  %299 = vst [vmem:[%s610_s2 + $0x20] sm:$0xff] %v196_v37 }
  0xe6   :  { %311 = vst [vmem:[%s610_s2 + $0x80] sm:$0xff] %v256_v38 }
  0xe7   :  { %v388_v39 = vpop.f32.mrb[6].mxu0 }
  0xe8   :  { %v406_v40 = vpop.f32.mrb[6].mxu1  ;;  %302 = vst [vmem:[%s610_s2 + $0x38] sm:$0xff] %v388_v39  ;;  %v206_v41 = vpop.f32.mrb[7].mxu0 }
  0xe9   :  { %314 = vst [vmem:[%s610_s2 + $0x98] sm:$0xff] %v406_v40  ;;  %v266_v42 = vpop.f32.mrb[7].mxu1  ;;  %301 = vst [vmem:[%s610_s2 + $0x30] sm:$0xff] %v206_v41 }
  0xea   :  { %313 = vst [vmem:[%s610_s2 + $0x90] sm:$0xff] %v266_v42 }
  0xeb   :  { %v391_v43 = vpop.f32.mrb[8].mxu0 }
  0xec   :  { %v409_v44 = vpop.f32.mrb[8].mxu1  ;;  %304 = vst [vmem:[%s610_s2 + $0x48] sm:$0xff] %v391_v43  ;;  %v216_v45 = vpop.f32.mrb[9].mxu0 }
  0xed   :  { %316 = vst [vmem:[%s610_s2 + $0xa8] sm:$0xff] %v409_v44  ;;  %v276_v46 = vpop.f32.mrb[9].mxu1  ;;  %303 = vst [vmem:[%s610_s2 + $0x40] sm:$0xff] %v216_v45 }
  0xee   :  { %315 = vst [vmem:[%s610_s2 + $0xa0] sm:$0xff] %v276_v46 }
  0xef   :  { %v394_v47 = vpop.f32.mrb[10].mxu0 }
  0xf0   :  { %v412_v48 = vpop.f32.mrb[10].mxu1  ;;  %306 = vst [vmem:[%s610_s2 + $0x58] sm:$0xff] %v394_v47  ;;  %v226_v49 = vpop.f32.mrb[11].mxu0 }
  0xf1   :  { %318 = vst [vmem:[%s610_s2 + $0xb8] sm:$0xff] %v412_v48  ;;  %v286_v50 = vpop.f32.mrb[11].mxu1  ;;  %305 = vst [vmem:[%s610_s2 + $0x50] sm:$0xff] %v226_v49 }
  0xf2   :  { %317 = vst [vmem:[%s610_s2 + $0xb0] sm:$0xff] %v286_v50 }

// kernel: custom-call.11
= control target key start
LH: loop header
LB: loop body
LE: loop exit
PB: predicated region body
PF: predicated region fallthrough
CT: control target
= control target key end

     0   :  { %s1672_s30 = smov 0   ;;  %s1674_s10 = smov 0   ;;  %s1999_s0 = inlined_call_operand.vmem [shape: f32[2,6,6], index: 0, kind: input, shape index: {}]   ;;  %s2000_s1 = inlined_call_operand.vmem [shape: f32[2,6,6], index: 1, kind: input, shape index: {}]   ;;  %s2001_s2 = inlined_call_operand.vmem [shape: f32[2,6,6], index: 2, kind: input, shape index: {}]   ;;  %s2002_s3 = inlined_call_operand.vmem [shape: f32[2,6,6], index: 3, kind: input, shape index: {}]   ;;  %s2003_s4 = inlined_call_operand.vmem [shape: f32[2,6], index: 4, kind: output, shape index: {0}]   ;;  %s2004_s5 = inlined_call_operand.vmem [shape: f32[2,6], index: 5, kind: output, shape index: {1}]   ;;  %s2005_s6 = inlined_call_operand.vmem [shape: f32[2,6,6], index: 6, kind: output, shape index: {2}]   ;;  %s2006_s7 = inlined_call_operand.vmem [shape: f32[2,6,6], index: 7, kind: output, shape index: {3}]   ;;  %s2007_s8 = inlined_call_operand.vmem [shape: f32[2,6,6], index: 8, kind: output, shape index: {4}]   ;;  %s2008_s9 = inlined_call_operand.vmem [shape: f32[2,6,6], index: 9, kind: output, shape index: {5}]  }
   0x1   :  { %s1676_s11 = smov 0  }
   0x2 LB: > { %s1688_s12 = sadd.s32 4294967295, %s1609_s11   ;;  %s1691_s13 = sadd.s32 1, %s1609_s11   ;;  %s1609_s11 = sphi %s1676_s11, %s2017_s11   ;;  %s1605_s10 = sphi %s1674_s10, %s2016_s10   ;;  %s1601_s30 = sphi %s1672_s30, %s2015_s30  }
   0x3   : > { %s20_s14 = sshrl.u32 %s1609_s11, 3  ;;  %s21_s15 = sshrl.u32 %s1691_s13, 3 }
   0x4   : > { %s22_s16 = ssub.s32 %s20_s14, %s21_s15  ;;  %s25_s17 = sadd.s32 1, %s1605_s10 }
   0x5   : > { %p23_p0 = scmp.eq.s32.totalorder %s22_s16, 0  ;;  %p35_p1 = scmp.ne.s32.totalorder %s1605_s10, %s1601_s30 }
   0x6   : > { %p36_p2 = scmp.eq.s32.totalorder %s1688_s12, 1  ;;  %p1470_p4 = scmp.ge.s32.totalorder %s1609_s11, 2 }
   0x7   : > { %s1700_s18 = scalar_select %p23_p0, %s1605_s10, %s25_s17  }
   0x8   : > { %p1702_p3 = por %p36_p2, %p35_p1  ;;  %86 = sbr.rel (%p1470_p4) target bundleno = 17 (0x11), region = 16 }
   0x9   : > { %2009 = sst [smem:[#allocation25_spill]] %s1700_s18  ;;  %s88_s20 = sand.u32 (!%p1470_p4), 1, %s1609_s11  }
   0xa   : > { %s1472_s21 = sshll.u32 (!%p1470_p4), %s1609_s11, 3  ;;  %s1471_s22 = sshll.u32 (!%p1470_p4), %s88_s20, 3 }
   0xb   : > { %s92_s25 = scalar_lea.vmem (!%p1470_p4), %s1999_s0, %s1472_s21  ;;  %s90_s26 = scalar_lea.vmem (!%p1470_p4), [#allocation0], %s1471_s22 }
   0xc   : > { %v120_v0 = vld [vmem:[%s92_s25] sm:$0xff] (!%p1470_p4)  ;;  %s130_s29 = scalar_lea.vmem (!%p1470_p4), %s2000_s1, %s1472_s21  ;;  %s168_s16 = scalar_lea.vmem (!%p1470_p4), %s2001_s2, %s1472_s21 }
   0xd   : > { %121 = vst [vmem:[%s90_s26] sm:$0xff] (!%p1470_p4), %v120_v0  ;;  %v158_v1 = vld [vmem:[%s130_s29] sm:$0xff] (!%p1470_p4)  ;;  %s128_s17 = scalar_lea.vmem (!%p1470_p4), [#allocation1], %s1471_s22  ;;  %s206_s23 = scalar_lea.vmem (!%p1470_p4), %s2002_s3, %s1472_s21 }
   0xe   : > { %159 = vst [vmem:[%s128_s17] sm:$0xff] (!%p1470_p4), %v158_v1  ;;  %v196_v2 = vld [vmem:[%s168_s16] sm:$0xff] (!%p1470_p4)  ;;  %s166_s24 = scalar_lea.vmem (!%p1470_p4), [#allocation2], %s1471_s22  ;;  %s204_s25 = scalar_lea.vmem (!%p1470_p4), [#allocation3], %s1471_s22 }
   0xf   : > { %197 = vst [vmem:[%s166_s24] sm:$0xff] %v196_v2  ;;  %v234_v3 = vld [vmem:[%s206_s23] sm:$0xff] }
  0x10   : > { %235 = vst [vmem:[%s204_s25] sm:$0xff] %v234_v3 }
  0x11 PF: > { %p1479_p5 = scmp.ge.s32.totalorder %s1609_s11, 1  ;;  %p240_p6 = scmp.lt.s32.totalorder %s1609_s11, 3 }
  0x13   : > { %p241_p7 = pnand %p1479_p5, %p240_p6 }
  0x15   : > { %244 = sbr.rel (%p241_p7) target bundleno = 992 (0x3e0), region = 156 }
  0x1c   : > { %s247_s26 = sand.u32 1, %s1688_s12   ;;  %s281_s27 = sand.u32 1, %s1601_s30   ;;  %v325_v4 = vlaneseq  ;;  %v1619_v11 = vmov 0.0  }
  0x1d   : > { %s1480_s28 = sshll.u32 %s247_s26, 3  ;;  %s1725_s18 = sshll.u32 %s281_s27, 1 }
  0x1e   : > { %v1727_v5 = vand.u32 127, %v325_v4  ;;  %v1729_v6 = vshrl.u32 %v325_v4, 7  ;;  %s249_s21 = scalar_lea.vmem [#allocation0], %s1480_s28  ;;  %s253_s22 = scalar_lea.vmem [#allocation1], %s1480_s28 }
  0x1f   : > { %v309_v7 = vld [vmem:[%s249_s21] sm:$0xff]  ;;  %v312_v8 = vld [vmem:[%s253_s22] sm:$0xff]  ;;  %s257_s29 = scalar_lea.vmem [#allocation2], %s1480_s28  ;;  %s261_s11 = scalar_lea.vmem [#allocation3], %s1480_s28 }
  0x20   : > { %v315_v9 = vld [vmem:[%s257_s29] sm:$0xff]  ;;  %v318_v10 = vld [vmem:[%s261_s11] sm:$0xff]  ;;  %s1731_s14 = scalar_lea.vmem [#allocation8], %s1480_s28  ;;  %s1734_s30 = scalar_lea.vmem [#allocation9], %s1480_s28  ;;  %v327_v5 = vmov %v1727_v5  ;;  %v330_v6 = vmov %v1729_v6  ;;  %vm1359_vm2 = vcmp.lt.s32.totalorder %v1727_v5, 6 }
  0x21   : > { %320 = vst [vmem:[%s1731_s14] sm:$0xff] %v1619_v11  ;;  %321 = vst [vmem:[%s1734_s30] sm:$0xff] %v1619_v11  ;;  %s308_s15 = smov [#allocation12]  ;;  %s311_s16 = smov [#allocation13]  ;;  %v340_v5 = vmov %v1727_v5  ;;  %v343_v6 = vmov %v1729_v6  ;;  %vm334_vm0 = vcmp.eq.s32.totalorder %v330_v6, %v327_v5 }
  0x22   : > { %s1737_s17 = scalar_lea.vmem [#allocation10], %s1480_s28  ;;  %s1740_s20 = scalar_lea.vmem [#allocation11], %s1480_s28  ;;  %310 = vst [vmem:[%s308_s15] sm:$0xff] %v309_v7  ;;  %313 = vst [vmem:[%s311_s16] sm:$0xff] %v312_v8  ;;  %vm347_vm1 = vcmp.eq.s32.totalorder %v343_v6, %v340_v5  ;;  %v1351_v5 = vmov %v1727_v5  ;;  %v1354_v6 = vmov %v1729_v6 }
  0x23   : > { %322 = vst [vmem:[%s1737_s17] sm:$0xff] %v1619_v11  ;;  %323 = vst [vmem:[%s1740_s20] sm:$0xff] %v1619_v11  ;;  %s314_s23 = smov [#allocation14]  ;;  %s317_s24 = smov [#allocation15]  ;;  %vm1364_vm3 = vcmp.eq.s32.totalorder %v1354_v6, %v1351_v5  ;;  %v1402_v5 = vmov %v1727_v5  ;;  %v1371_v6 = vmov %v1729_v6 }
  0x24   : > { %316 = vst [vmem:[%s314_s23] sm:$0xff] %v315_v9  ;;  %319 = vst [vmem:[%s317_s24] sm:$0xff] %v318_v10  ;;  %s324_s14 = smov %s1731_s14  ;;  %s337_s20 = smov %s1740_s20  ;;  %v1368_v5 = vmov %v1727_v5  ;;  %v1405_v6 = vmov %v1729_v6 }
  0x25   : > { %s283_s25 = scalar_lea.vmem [#allocation5], %s1725_s18  ;;  %s1355_s27 = smov [#allocation12]  ;;  %v1385_v5 = vmov %v1727_v5  ;;  %v1388_v6 = vmov %v1729_v6  ;;  %vm1415_vm4 = vcmp.eq.s32.totalorder %v1405_v6, %v1402_v5 }
  0x26   : > { %s1372_s28 = smov [#allocation13]  ;;  %s1389_s21 = smov [#allocation14] }
  0x27   : > { %s1406_s22 = smov [#allocation15] }
  0x28   : > { %v331_v12 = vld [vmem:[%s324_s14] sm:$0x3f] }
  0x29   : > { %v335_v13 = vsel %vm334_vm0, 1.0, %v331_v12  ;;  %v1361_v16 = vld [vmem:[%s1355_s27] sm:$0x3f] }
  0x2a   : > { %v344_v14 = vld [vmem:[%s337_s20] sm:$0x3f]  ;;  %336 = vst [vmem:[%s324_s14] sm:$0x3f] %v335_v13  ;;  %v1362_v18 = vsel %vm1359_vm2, %v1361_v16, 0.0 }
  0x2b   : > { %v348_v15 = vsel %vm347_vm1, 1.0, %v344_v14  ;;  %v1378_v17 = vld [vmem:[%s1372_s28] sm:$0x3f]  ;;  %v1363_v22 = vmul.f32 %v1362_v18, %v1362_v18 }
  0x2c   : > { %349 = vst [vmem:[%s337_s20] sm:$0x3f] %v348_v15  ;;  %v1379_v19 = vsel %vm1359_vm2, %v1378_v17, 0.0  ;;  %v1395_v20 = vld [vmem:[%s1389_s21] sm:$0x3f] }
  0x2d   : > { %v1412_v21 = vld [vmem:[%s1406_s22] sm:$0x3f]  ;;  %v1380_v23 = vmul.f32 %v1379_v19, %v1379_v19  ;;  %v1396_v24 = vsel %vm1359_vm2, %v1395_v20, 0.0  ;;  %v1365_v29 = vsel %vm1364_vm3, 0.0, %v1363_v22 }
  0x2e   : > { %v1413_v25 = vsel %vm1359_vm2, %v1412_v21, 0.0  ;;  %v1397_v26 = vmul.f32 %v1396_v24, %v1396_v24 }
  0x2f   : > { %v1382_v27 = vadd.f32 %v1380_v23, %v1363_v22  ;;  %v1414_v28 = vmul.f32 %v1413_v25, %v1413_v25  ;;  %v1381_v30 = vadd.f32 %v1380_v23, %v1365_v29 }
  0x31   : > { %v1399_v31 = vadd.f32 %v1397_v26, %v1382_v27  ;;  %v1398_v32 = vadd.f32 %v1397_v26, %v1381_v30  ;;  %v1416_v33 = vsel %vm1415_vm4, 0.0, %v1414_v28 }
  0x33   : > { %v1418_v34 = vadd.f32 %v1414_v28, %v1399_v31  ;;  %v1417_v35 = vadd.f32 %v1416_v33, %v1398_v32 }
  0x35   : > { %1419 = vadd.xlane.f32.xlu0 %v1418_v34 }
  0x39   : > { %1427 = vadd.xlane.f32.xlu0 %v1417_v35 }
  0xc2   : > { %v1420_v36 = vpop.xlane.xlu0 %1419 }
  0xc3   : > { %v1421_v37 = vrot.slane %v1420_v36, 4 }
  0xc5   : > { %v1422_v38 = vadd.f32 %v1421_v37, %v1420_v36 }
  0xc6   : > { %v1428_v39 = vpop.xlane.xlu0 %1427 }
  0xc7   : > { %v1423_v40 = vrot.slane %v1422_v38, 2  ;;  %v1429_v41 = vrot.slane %v1428_v39, 4 }
  0xc9   : > { %v1430_v42 = vadd.f32 %v1429_v41, %v1428_v39  ;;  %v1424_v43 = vadd.f32 %v1423_v40, %v1422_v38 }
  0xcb   : > { %v1431_v44 = vrot.slane %v1430_v42, 2  ;;  %v1425_v46 = vrot.slane %v1424_v43, 1 }
  0xcd   : > { %v1432_v45 = vadd.f32 %v1431_v44, %v1430_v42  ;;  %v1426_v49 = vadd.f32 %v1425_v46, %v1424_v43 }
  0xcf   : > { %v1433_v47 = vrot.slane %v1432_v45, 1 }
  0xd1   : > { %v1434_v48 = vadd.f32 %v1433_v47, %v1432_v45 }
  0xd3   : > { %1520 = vpush %v1434_v48 }
  0xd4   : > { %1522 = vpush %v1426_v49 }
 0x104   : > { %s1521_s29 = spop %1520 }
 0x105   : > { %s1523_s11 = spop %1522 }
 0x106   : > { %s1437_s15 = smul.f32 1e-10, %s1523_s11 }
 0x108   : > { %p1438_p8 = scmp.le.f32.partialorder %s1521_s29, %s1437_s15 }
 0x109   : > { %s1769_s16 = smov (!%p1438_p8), 0  }
 0x10a   : > { %1441 = sbr.rel (%p1438_p8) target bundleno = 948 (0x3b4), region = 499 }
 0x111 LB: >> { %s1774_s23 = smov 0   ;;  %s1613_s16 = sphi %s1769_s16, %s2011_s16  }
 0x112 LB: >>> { %s454_s24 = smov [#allocation12]  ;;  %v458_v5 = vmov %v1727_v5  ;;  %v461_v6 = vmov %v1729_v6  ;;  %s474_s27 = smov [#allocation13]  ;;  %vm777_vm14 = vcmp.eq.s32.totalorder %v1729_v6, 0  ;;  %vm789_vm15 = vcmp.eq.s32.totalorder %v1729_v6, 5  ;;  %s1617_s23 = sphi %s1774_s23, %s453_s23  }
 0x113   : >>> { %v478_v5 = vmov %v1727_v5  ;;  %v481_v6 = vmov %v1729_v6  ;;  %v462_v50 = vld [vmem:[%s454_s24] sm:$0x3f]  ;;  %vm465_vm5 = vcmp.eq.s32.totalorder %v461_v6, %v458_v5  ;;  %s494_s28 = smov [#allocation15]  ;;  %s455_s21 = smov [#allocation16] }
 0x114   : >>> { %vm485_vm6 = vcmp.eq.s32.totalorder %v481_v6, %v478_v5  ;;  %v498_v5 = vmov %v1727_v5  ;;  %v501_v6 = vmov %v1729_v6  ;;  %v466_v51 = vsel %vm465_vm5, %v462_v50, 0.0  ;;  %v482_v52 = vld [vmem:[%s474_s27] sm:$0x3f]  ;;  %s475_s22 = smov [#allocation17]  ;;  %s495_s29 = smov [#allocation18] }
 0x115   : >>> { %vm505_vm7 = vcmp.eq.s32.totalorder %v501_v6, %v498_v5  ;;  %v467_v53 = vrot.slane %v466_v51, 4  ;;  %v486_v54 = vsel %vm485_vm6, %v482_v52, 0.0  ;;  %v502_v55 = vld [vmem:[%s494_s28] sm:$0x3f]  ;;  %s518_s11 = smov [#allocation17]  ;;  %s516_s15 = smov [#allocation16]  ;;  %v567_v5 = vmov %v1727_v5 }
 0x116   : >>> { %v487_v56 = vrot.slane %v486_v54, 4  ;;  %v506_v57 = vsel %vm505_vm7, %v502_v55, 0.0  ;;  %s520_s24 = smov [#allocation18]  ;;  %s555_s27 = smov [#allocation19]  ;;  %v570_v6 = vmov %v1729_v6  ;;  %v582_v5 = vmov %v1727_v5 }
 0x117   : >>> { %v468_v58 = vadd.f32 %v467_v53, %v466_v51  ;;  %v507_v59 = vrot.slane %v506_v57, 4  ;;  %s557_s28 = smov [#allocation20]  ;;  %v585_v6 = vmov %v1729_v6  ;;  %vm572_vm12 = vcmp.eq.s32.totalorder %v570_v6, %v567_v5  ;;  %s1798_s14 = smov %s1731_s14 }
 0x118   : >>> { %v488_v60 = vadd.f32 %v487_v56, %v486_v54  ;;  %vm587_vm13 = vcmp.eq.s32.totalorder %v585_v6, %v582_v5  ;;  %s1801_s30 = smov %s1734_s30  ;;  %s1804_s17 = smov %s1737_s17  ;;  %v825_v53 = vld [vmem:[%s1798_s14] sm:$0x3f]  ;;  %v680_v5 = vmov %v1727_v5  ;;  %v683_v6 = vmov %v1729_v6 }
 0x119   : >>> { %v469_v61 = vrot.slane %v468_v58, 2  ;;  %v508_v62 = vadd.f32 %v507_v59, %v506_v57  ;;  %s1809_s20 = smov %s1740_s20  ;;  %v826_v54 = vld [vmem:[%s1801_s30] sm:$0x3f]  ;;  %s819_s26 = smov [#allocation24]  ;;  %v694_v5 = vmov %v1727_v5  ;;  %v697_v6 = vmov %v1729_v6 }
 0x11a   : >>> { %v489_v63 = vrot.slane %v488_v60, 2  ;;  %v827_v55 = vld [vmem:[%s1804_s17] sm:$0x3f]  ;;  %vm687_vm0 = vcmp.eq.s32.totalorder %v683_v6, %v680_v5  ;;  %v653_v5 = vmov %v1727_v5  ;;  %v656_v6 = vmov %v1729_v6  ;;  %s453_s23 = sadd.s32 1, %s1617_s23  }
 0x11b   : >>> { %v470_v0 = vadd.f32 %v469_v61, %v468_v58  ;;  %v509_v1 = vrot.slane %v508_v62, 2  ;;  %v828_v57 = vld [vmem:[%s1809_s20] sm:$0x3f]  ;;  %v667_v5 = vmov %v1727_v5  ;;  %v670_v6 = vmov %v1729_v6  ;;  %p450_p9 = scmp.ge.s32.totalorder %s453_s23, 11  }
 0x11c   : >>> { %v490_v2 = vadd.f32 %v489_v63, %v488_v60  ;;  %vm702_vm1 = vcmp.eq.s32.totalorder %v697_v6, %v694_v5  ;;  %vm661_vm3 = vcmp.eq.s32.totalorder %v656_v6, %v653_v5  ;;  %vm674_vm4 = vcmp.eq.s32.totalorder %v670_v6, %v667_v5 }
 0x11d   : >>> { %v471_v3 = vrot.slane %v470_v0, 1  ;;  %v510_v4 = vadd.f32 %v509_v1, %v508_v62  ;;  %vm716_vm5 = vcmp.eq.s32.totalorder %v1727_v5, 0  ;;  %vm720_vm6 = vcmp.eq.s32.totalorder %v1727_v5, 1 }
 0x11e   : >>> { %v491_v7 = vrot.slane %v490_v2, 1  ;;  %vm733_vm7 = vcmp.eq.s32.totalorder %v1727_v5, 5  ;;  %v354_v5 = vmov (%p450_p9), %v1727_v5  ;;  %v357_v6 = vmov (%p450_p9), %v1729_v6 }
 0x11f   : >>> { %v472_v8 = vadd.f32 %v471_v3, %v470_v0  ;;  %v511_v9 = vrot.slane %v510_v4, 1  ;;  %v407_v5 = vmov (%p450_p9), %v1727_v5 }
 0x120   : >>> { %v492_v10 = vadd.f32 %v491_v7, %v490_v2 }
 0x121   : >>> { %473 = vst [vmem:[%s455_s21] sm:$0x1] %v472_v8  ;;  %v512_v11 = vadd.f32 %v511_v9, %v510_v4  ;;  %s514_s21 = smov [#allocation21] }
 0x122   : >>> { %493 = vst [vmem:[%s475_s22] sm:$0x1] %v492_v10  ;;  %s515_s22 = smov [#allocation22]  ;;  %s559_s21 = smov %s514_s21 }
 0x123   : >>> { %513 = vst [vmem:[%s495_s29] sm:$0x1] %v512_v11  ;;  %s561_s22 = smov %s515_s22  ;;  %s563_s29 = smov [#allocation21] }
 0x128   : >>> { %v517_v14 = vld [vmem:[%s516_s15] sm:$0xff]  ;;  %s576_s15 = smov [#allocation23] }
 0x129   : >>> { %v519_v12 = vld [vmem:[%s518_s11] sm:$0xff]  ;;  %v540_v27 = vand.u32 2147483647, %v517_v14  ;;  %s578_s11 = smov [#allocation22] }
 0x12a   : >>> { %v523_v13 = vmul.f32 2.0, %v519_v12  ;;  %v521_v15 = vld [vmem:[%s520_s24] sm:$0xff]  ;;  %v541_v32 = vand.u32 2147483647, %v519_v12  ;;  %s593_s24 = smov [#allocation23] }
 0x12b   : >>> { %v522_v16 = vsub.f32 %v521_v15, %v517_v14  ;;  %v542_v28 = vand.u32 2147483647, %v521_v15 }
 0x12c   : >>> { %1571 = vrcp.f32 %v523_v13 }
 0x12d   : >>> { %v543_v31 = vmin.f32 %v540_v27, %v542_v28 }
 0x12f   : >>> { %v544_v33 = vmul.f32 1.1920929e-08, %v543_v31 }
 0x131   : >>> { %vm545_vm11 = vcmp.le.f32.partialorder %v541_v32, %v544_v33 }
 0x136   : >>> { %v1572_v17 = vpop.eup %1571 }
 0x137   : >>> { %v525_v18 = vmul.f32 %v1572_v17, %v522_v16 }
 0x139   : >>> { %v527_v19 = vmul.f32 %v525_v18, %v525_v18  ;;  %vm526_vm10 = vcmp.ge.f32.partialorder %v525_v18, 0.0 }
 0x13b   : >>> { %v528_v20 = vadd.f32 1.0, %v527_v19 }
 0x13d   : >>> { %1573 = vrsqrt.f32 %v528_v20  ;;  %vm531_vm8 = vcmp.eq.f32.partialorder %v528_v20, inf  ;;  %v534_v22 = vand.u32 2147483648, %v528_v20  ;;  %vm533_vm9 = vcmp.eq.f32.partialorder %v528_v20, 0.0 }
 0x147   : >>> { %v1574_v21 = vpop.eup %1573 }
 0x148   : >>> { %v530_v23 = vmul.f32 %v1574_v21, %v528_v20 }
 0x14a   : >>> { %v532_v24 = vsel %vm531_vm8, %v528_v20, %v530_v23  ;;  %vm369_vm8 = vcmp.eq.s32.totalorder (%p450_p9), %v357_v6, %v354_v5  ;;  %v410_v6 = vmov (%p450_p9), %v1729_v6  ;;  %v373_v5 = vmov (%p450_p9), %v1727_v5 }
 0x14b   : >>> { %v535_v25 = vsel %vm533_vm9, %v534_v22, %v532_v24  ;;  %v376_v6 = vmov (%p450_p9), %v1729_v6  ;;  %v390_v5 = vmov (%p450_p9), %v1727_v5  ;;  %vm422_vm9 = vcmp.eq.s32.totalorder (%p450_p9), %v410_v6, %v407_v5 }
 0x14c   : >>> { %v536_v26 = vxor.u32 2147483648, %v535_v25  ;;  %v393_v6 = vmov (%p450_p9), %v1729_v6 }
 0x14e   : >>> { %v537_v29 = vsel %vm526_vm10, %v535_v25, %v536_v26 }
 0x14f   : >>> { %v538_v30 = vadd.f32 %v537_v29, %v525_v18 }
 0x151   : >>> { %1575 = vrcp.f32 %v538_v30 }
 0x15b   : >>> { %v1576_v34 = vpop.eup %1575 }
 0x15c   : >>> { %v546_v35 = vsel %vm545_vm11, 0.0, %v1576_v34 }
 0x15d   : >>> { %v547_v36 = vmul.f32 %v546_v35, %v546_v35  ;;  %v551_v37 = vmul.f32 %v546_v35, %v519_v12 }
 0x15f   : >>> { %v548_v38 = vadd.f32 1.0, %v547_v36  ;;  %v552_v39 = vsub.f32 %v517_v14, %v551_v37  ;;  %v554_v40 = vadd.f32 %v551_v37, %v521_v15 }
 0x161   : >>> { %1577 = vrsqrt.f32 %v548_v38  ;;  %556 = vst [vmem:[%s555_s27] sm:$0xff] %v552_v39  ;;  %558 = vst [vmem:[%s557_s28] sm:$0xff] %v554_v40  ;;  %s1789_s27 = smov [#allocation12]  ;;  %s591_s28 = smov [#allocation24] }
 0x162   : >>> { %v601_v49 = vld [vmem:[%s1789_s27] sm:$0x3f] }
 0x16b   : >>> { %v1578_v41 = vpop.eup %1577 }
 0x16c   : >>> { %560 = vst [vmem:[%s559_s21] sm:$0xff] %v1578_v41  ;;  %v550_v42 = vmul.f32 %v1578_v41, %v546_v35  ;;  %s1791_s21 = smov [#allocation13] }
 0x16d   : >>> { %v602_v50 = vld [vmem:[%s1791_s21] sm:$0x3f] }
 0x16e   : >>> { %562 = vst [vmem:[%s561_s22] sm:$0xff] %v550_v42  ;;  %s1793_s22 = smov [#allocation14] }
 0x16f   : >>> { %v603_v51 = vld [vmem:[%s1793_s22] sm:$0x3f] }
 0x173   : >>> { %v564_v43 = vld [vmem:[%s563_s29] ss:$0 sm:$0xff]  ;;  %s1795_s29 = smov [#allocation15] }
 0x174   : >>> { %v573_v44 = vsel %vm572_vm12, %v564_v43, 0.0  ;;  %v604_v52 = vld [vmem:[%s1795_s29] sm:$0x3f] }
 0x175   : >>> { %574 = vadd.xlane.f32.xlu0 %v573_v44  ;;  %v579_v45 = vld [vmem:[%s578_s11] ss:$0 sm:$0xff]  ;;  %s817_s11 = smov [#allocation23] }
 0x176   : >>> { %v588_v46 = vsel %vm587_vm13, %v579_v45, 0.0 }
 0x179   : >>> { %589 = vadd.xlane.f32.xlu0 %v588_v46 }
 0x202   : >>> { %v575_v47 = vpop.xlane.xlu0 %574 }
 0x203   : >>> { %577 = vst [vmem:[%s576_s15] sm:$0xff] %v575_v47  ;;  %s595_s15 = smov [#allocation24] }
 0x206   : >>> { %v590_v48 = vpop.xlane.xlu0 %589 }
 0x207   : >>> { %592 = vst [vmem:[%s591_s28] sm:$0xff] %v590_v48  ;;  %s1825_s28 = smov [#allocation14] }
 0x20a   : >>> { %v594_v56 = vld [vmem:[%s593_s24] sm:$0xff]  ;;  %s623_s24 = smov [#allocation22] }
 0x20b   : >>> { %v818_v58 = vld [vmem:[%s817_s11] sm:$0xff]  ;;  %v605_v59 = vmul.f32 %v601_v49, %v594_v56  ;;  %v608_v60 = vmul.f32 %v602_v50, %v594_v56  ;;  %v612_v61 = vmul.f32 %v603_v51, %v594_v56  ;;  %v615_v62 = vmul.f32 %v604_v52, %v594_v56  ;;  %s1827_s11 = smov [#allocation15] }
 0x20c   : >>> { %v829_v63 = vmul.f32 %v825_v53, %v818_v58  ;;  %v832_v0 = vmul.f32 %v826_v54, %v818_v58  ;;  %v836_v1 = vmul.f32 %v827_v55, %v818_v58  ;;  %v839_v2 = vmul.f32 %v828_v57, %v818_v58  ;;  %v624_v24 = vld [vmem:[%s623_s24] ss:$0 sm:$0xff]  ;;  %s649_s24 = smov [#allocation12] }
 0x20e   : >>> { %v596_v3 = vld [vmem:[%s595_s15] sm:$0xff]  ;;  %s1829_s15 = smov [#allocation12] }
 0x20f   : >>> { %v820_v4 = vld [vmem:[%s819_s26] sm:$0xff]  ;;  %v606_v7 = vmul.f32 %v603_v51, %v596_v3  ;;  %v609_v8 = vmul.f32 %v604_v52, %v596_v3  ;;  %v611_v9 = vmul.f32 %v601_v49, %v596_v3  ;;  %v614_v10 = vmul.f32 %v602_v50, %v596_v3  ;;  %s621_s26 = smov [#allocation21] }
 0x210   : >>> { %v830_v11 = vmul.f32 %v827_v55, %v820_v4  ;;  %v833_v12 = vmul.f32 %v828_v57, %v820_v4  ;;  %v835_v13 = vmul.f32 %v825_v53, %v820_v4  ;;  %v838_v14 = vmul.f32 %v826_v54, %v820_v4  ;;  %v622_v23 = vld [vmem:[%s621_s26] ss:$0 sm:$0xff]  ;;  %s650_s26 = smov [#allocation19] }
 0x211   : >>> { %v607_v15 = vsub.f32 %v605_v59, %v606_v7  ;;  %v610_v16 = vsub.f32 %v608_v60, %v609_v8  ;;  %v613_v17 = vadd.f32 %v612_v61, %v611_v9  ;;  %v616_v18 = vadd.f32 %v615_v62, %v614_v10  ;;  %v657_v59 = vld [vmem:[%s650_s26] ss:$0 sm:$0xff]  ;;  %s769_s26 = smov [#allocation12] }
 0x212   : >>> { %v831_v19 = vsub.f32 %v829_v63, %v830_v11  ;;  %v834_v20 = vsub.f32 %v832_v0, %v833_v12  ;;  %v837_v21 = vadd.f32 %v836_v1, %v835_v13  ;;  %v840_v22 = vadd.f32 %v839_v2, %v838_v14 }
 0x213   : >>> { %618 = vst [vmem:[%s1791_s21] sm:$0x3f] %v610_v16  ;;  %620 = vst [vmem:[%s1795_s29] sm:$0x3f] %v616_v18  ;;  %s691_s21 = smov [#allocation20]  ;;  %s690_s29 = smov [#allocation15] }
 0x214   : >>> { %617 = vst [vmem:[%s1789_s27] sm:$0x3f] %v607_v15  ;;  %619 = vst [vmem:[%s1793_s22] sm:$0x3f] %v613_v17  ;;  %s1842_s27 = smov [#allocation13]  ;;  %s677_s22 = smov [#allocation14]  ;;  %v698_v55 = vld [vmem:[%s691_s21] ss:$0 sm:$0xff] }
 0x215   : >>> { %841 = vst [vmem:[%s1798_s14] sm:$0x3f] %v831_v19  ;;  %842 = vst [vmem:[%s1801_s30] sm:$0x3f] %v834_v20  ;;  %s1832_s14 = smov %s1731_s14  ;;  %s1840_s30 = smov %s1734_s30 }
 0x216   : >>> { %843 = vst [vmem:[%s1804_s17] sm:$0x3f] %v837_v21  ;;  %844 = vst [vmem:[%s1809_s20] sm:$0x3f] %v840_v22  ;;  %s1835_s17 = smov %s1737_s17  ;;  %s1845_s20 = smov %s1740_s20 }
 0x217   : >>> { %s706_s21 = smov [#allocation13] }
 0x21a   : >>> { %v632_v26 = vld [vmem:[%s1827_s11] sm:$0x3f] }
 0x21b   : >>> { %v631_v25 = vld [vmem:[%s1825_s28] sm:$0x3f]  ;;  %v640_v32 = vmul.f32 %v632_v26, %v624_v24  ;;  %v643_v38 = vmul.f32 %v632_v26, %v622_v23 }
 0x21c   : >>> { %v629_v27 = vld [vmem:[%s1829_s15] sm:$0x3f]  ;;  %v639_v31 = vmul.f32 %v631_v25, %v622_v23  ;;  %v642_v33 = vmul.f32 %v631_v25, %v624_v24 }
 0x21d   : >>> { %v847_v28 = vld [vmem:[%s1832_s14] ss:$0 sm:$0xff]  ;;  %v1499_v30 = vld [vmem:[%s1832_s14 + $0x5] ss:$0 sm:$0xff]  ;;  %v633_v44 = vmul.f32 %v629_v27, %v622_v23  ;;  %v636_v45 = vmul.f32 %v629_v27, %v624_v24 }
 0x21e   : >>> { %v1498_v29 = vld [vmem:[%s1832_s14 - $0x1] sm:$0x3e]  ;;  %v1503_v41 = vld [vmem:[%s1840_s30 + $0x5] ss:$0 sm:$0xff]  ;;  %v641_v43 = vsub.f32 %v639_v31, %v640_v32  ;;  %v644_v49 = vadd.f32 %v643_v38, %v642_v33 }
 0x21f   : >>> { %v854_v34 = vsel %vm777_vm14, %v847_v28, %v1498_v29  ;;  %v858_v35 = vld [vmem:[%s1835_s17] ss:$0 sm:$0xff]  ;;  %v1501_v36 = vld [vmem:[%s1835_s17 + $0x1] sm:$0x1f] }
 0x220   : >>> { %v871_v37 = vld [vmem:[%s1840_s30] ss:$0 sm:$0xff]  ;;  %857 = vst [vmem:[%s1832_s14] sm:$0x3f] %v854_v34  ;;  %v866_v39 = vsel %vm789_vm15, %v1499_v30, %v1501_v36  ;;  %v1505_v47 = vld [vmem:[%s1845_s20 + $0x1] sm:$0x1f]  ;;  %647 = vst [vmem:[%s1825_s28] sm:$0x3f] %v641_v43 }
 0x221   : >>> { %v1502_v40 = vld [vmem:[%s1840_s30 - $0x1] sm:$0x3e]  ;;  %1500 = vst [vmem:[%s1832_s14 + $0x1] sm:$0x1] %v858_v35  ;;  %868 = vst [vmem:[%s1835_s17] sm:$0x3f] %v866_v39  ;;  %v890_v50 = vsel %vm789_vm15, %v1503_v41, %v1505_v47  ;;  %s664_s28 = smov [#allocation13] }
 0x222   : >>> { %v882_v42 = vld [vmem:[%s1845_s20] ss:$0 sm:$0xff]  ;;  %v878_v46 = vsel %vm777_vm14, %v871_v37, %v1502_v40  ;;  %648 = vst [vmem:[%s1827_s11] sm:$0x3f] %v644_v49  ;;  %s1887_s11 = smov [#allocation14] }
 0x223   : >>> { %v630_v48 = vld [vmem:[%s1842_s27] sm:$0x3f]  ;;  %881 = vst [vmem:[%s1840_s30] sm:$0x3f] %v878_v46  ;;  %892 = vst [vmem:[%s1845_s20] sm:$0x3f] %v890_v50 }
 0x224   : >>> { %v634_v51 = vmul.f32 %v630_v48, %v624_v24  ;;  %v637_v52 = vmul.f32 %v630_v48, %v622_v23  ;;  %1504 = vst [vmem:[%s1840_s30 + $0x1] sm:$0x1] %v882_v42 }
 0x226   : >>> { %v635_v53 = vsub.f32 %v633_v44, %v634_v51  ;;  %v638_v54 = vadd.f32 %v637_v52, %v636_v45 }
 0x227   : >>> { %v684_v56 = vld [vmem:[%s677_s22] sm:$0x3f] }
 0x228   : >>> { %645 = vst [vmem:[%s1829_s15] sm:$0x3f] %v635_v53  ;;  %646 = vst [vmem:[%s1842_s27] sm:$0x3f] %v638_v54  ;;  %v688_v57 = vsel %vm687_vm0, 0.0, %v684_v56  ;;  %s1620_s15 = smov 1   ;;  %s705_s27 = smov [#allocation12] }
 0x229   : >>> { %v699_v58 = vld [vmem:[%s690_s29] sm:$0x3f]  ;;  %689 = vst [vmem:[%s677_s22] sm:$0x3f] %v688_v57  ;;  %s1621_s22 = smov 127  }
 0x22a   : >>> { %v703_v60 = vsel %vm702_vm1, %v698_v55, %v699_v58 }
 0x22b   : >>> { %704 = vst [vmem:[%s690_s29] sm:$0x3f] %v703_v60  ;;  %s1890_s29 = smov [#allocation15] }
 0x22f   : >>> { %v658_v61 = vld [vmem:[%s649_s24] sm:$0x3f] }
 0x230   : >>> { %v671_v62 = vld [vmem:[%s664_s28] sm:$0x3f]  ;;  %v662_v63 = vsel %vm661_vm3, %v657_v59, %v658_v61 }
 0x231   : >>> { %v675_v0 = vsel %vm674_vm4, 0.0, %v671_v62  ;;  %663 = vst [vmem:[%s649_s24] sm:$0x3f] %v662_v63  ;;  %v743_v1 = vld [vmem:[%s1887_s11] sm:$0x3f]  ;;  %s793_s24 = smov [#allocation13] }
 0x232   : >>> { %676 = vst [vmem:[%s664_s28] sm:$0x3f] %v675_v0  ;;  %744 = vrot.lane.b32.xlu0 %v743_v1, %s1620_s15  ;;  %v739_v7 = vld [vmem:[%s1890_s29] sm:$0x3f]  ;;  %s770_s28 = smov [#allocation14] }
 0x233   : >>> { %v760_v8 = vld [vmem:[%s1890_s29] sm:$0x3f] }
 0x234   : >>> { %v742_v26 = vld [vmem:[%s1887_s11] sm:$0x3f] }
 0x238   : >>> { %v711_v2 = vld [vmem:[%s705_s27] sm:$0x3f] }
 0x239   : >>> { %712 = vrot.lane.b32.xlu1 %v711_v2, %s1620_s15  ;;  %v707_v3 = vld [vmem:[%s706_s21] sm:$0x3f] }
 0x23a   : >>> { %v728_v4 = vld [vmem:[%s706_s21] sm:$0x3f] }
 0x23b   : >>> { %v710_v14 = vld [vmem:[%s705_s27] sm:$0x3f] }
 0x23d   : >>> { %708 = vrot.lane.b32.xlu1 %v707_v3, %s1620_s15 }
 0x241   : >>> { %729 = vrot.lane.b32.xlu1 %v728_v4, %s1621_s22 }
 0x245   : >>> { %740 = vrot.lane.b32.xlu1 %v739_v7, %s1620_s15  ;;  %s794_s15 = smov [#allocation15] }
 0x249   : >>> { %761 = vrot.lane.b32.xlu1 %v760_v8, %s1621_s22  ;;  %s394_s22 = smov (%p450_p9), [#allocation14] }
 0x2a4   : >>> { %v745_v16 = vpop.permute.xlu0 %744 }
 0x2a5   : >>> { %v749_v18 = vsel %vm716_vm5, %v743_v1, %v745_v16 }
 0x2ab   : >>> { %v713_v9 = vpop.permute.xlu1 %712 }
 0x2ac   : >>> { %v717_v10 = vsel %vm716_vm5, %v711_v2, %v713_v9 }
 0x2af   : >>> { %v709_v11 = vpop.permute.xlu1 %708 }
 0x2b0   : >>> { %v721_v12 = vsel %vm720_vm6, %v709_v11, %v717_v10 }
 0x2b1   : >>> { %v727_v13 = vsel %vm1359_vm2, %v721_v12, 0.0 }
 0x2b2   : >>> { %735 = vst [vmem:[%s705_s27] sm:$0x3f] %v727_v13  ;;  %s358_s27 = smov (%p450_p9), [#allocation12] }
 0x2b3   : >>> { %v730_v15 = vpop.permute.xlu1 %729 }
 0x2b4   : >>> { %v734_v17 = vsel %vm733_vm7, %v710_v14, %v730_v15 }
 0x2b5   : >>> { %736 = vst [vmem:[%s706_s21] sm:$0x3f] %v734_v17  ;;  %s377_s21 = smov (%p450_p9), [#allocation13] }
 0x2b7   : >>> { %v741_v19 = vpop.permute.xlu1 %740 }
 0x2b8   : >>> { %v753_v20 = vsel %vm720_vm6, %v741_v19, %v749_v18 }
 0x2b9   : >>> { %v771_v21 = vld [vmem:[%s769_s26] ss:$0 sm:$0xff]  ;;  %v1491_v23 = vld [vmem:[%s769_s26 + $0x5] ss:$0 sm:$0xff]  ;;  %v759_v25 = vsel %vm1359_vm2, %v753_v20, 0.0 }
 0x2ba   : >>> { %v1490_v22 = vld [vmem:[%s769_s26 - $0x1] sm:$0x3e]  ;;  %767 = vst [vmem:[%s1887_s11] sm:$0x3f] %v759_v25  ;;  %s893_s11 = sadd.s32 (%p450_p9), 1, %s1613_s16  }
 0x2bb   : >>> { %v778_v24 = vsel %vm777_vm14, %v771_v21, %v1490_v22  ;;  %v762_v27 = vpop.permute.xlu1 %761  ;;  %p446_p10 = scmp.ge.s32.totalorder (%p450_p9), %s893_s11, 15  ;;  %s2011_s16 = smov (%p450_p9), %s893_s11 }
 0x2bc   : >>> { %781 = vst [vmem:[%s769_s26] sm:$0x3f] %v778_v24  ;;  %v795_v28 = vld [vmem:[%s793_s24] ss:$0 sm:$0xff]  ;;  %v1495_v30 = vld [vmem:[%s793_s24 + $0x5] ss:$0 sm:$0xff]  ;;  %v766_v31 = vsel %vm733_vm7, %v742_v26, %v762_v27 }
 0x2bd   : >>> { %v1494_v29 = vld [vmem:[%s793_s24 - $0x1] sm:$0x3e]  ;;  %768 = vst [vmem:[%s1890_s29] sm:$0x3f] %v766_v31  ;;  %s411_s29 = smov (%p450_p9), [#allocation15] }
 0x2be   : >>> { %v802_v32 = vsel %vm777_vm14, %v795_v28, %v1494_v29 }
 0x2bf   : >>> { %805 = vst [vmem:[%s793_s24] sm:$0x3f] %v802_v32 }
 0x2c1   : >>> { %v782_v33 = vld [vmem:[%s770_s28] ss:$0 sm:$0xff]  ;;  %v1493_v34 = vld [vmem:[%s770_s28 + $0x1] sm:$0x1f] }
 0x2c2   : >>> { %1492 = vst [vmem:[%s769_s26 + $0x1] sm:$0x1] %v782_v33  ;;  %v790_v35 = vsel %vm789_vm15, %v1491_v23, %v1493_v34  ;;  %452 = sbr.rel (!%p450_p9) target bundleno = 274 (0x112), region = 494 }
 0x2c3   : >>> { %792 = vst [vmem:[%s770_s28] sm:$0x3f] %v790_v35 }
 0x2c4   : >>> { %v806_v36 = vld [vmem:[%s794_s15] ss:$0 sm:$0xff]  ;;  %v1497_v37 = vld [vmem:[%s794_s15 + $0x1] sm:$0x1f] }
 0x2c5   : >>> { %1496 = vst [vmem:[%s793_s24 + $0x1] sm:$0x1] %v806_v36  ;;  %v814_v38 = vsel %vm789_vm15, %v1495_v30, %v1497_v37 }
 0x2c6   : >>> { %816 = vst [vmem:[%s794_s15] sm:$0x3f] %v814_v38 }
 0x2c9   : >> { %v364_v39 = vld [vmem:[%s358_s27] sm:$0x3f] }
 0x2ca   : >> { %v365_v41 = vsel %vm1359_vm2, %v364_v39, 0.0  ;;  %v400_v43 = vld [vmem:[%s394_s22] sm:$0x3f] }
 0x2cb   : >> { %v366_v45 = vmul.f32 %v365_v41, %v365_v41  ;;  %v401_v47 = vsel %vm1359_vm2, %v400_v43, 0.0 }
 0x2cc   : >> { %v383_v40 = vld [vmem:[%s377_s21] sm:$0x3f]  ;;  %v402_v49 = vmul.f32 %v401_v47, %v401_v47 }
 0x2cd   : >> { %v384_v42 = vsel %vm1359_vm2, %v383_v40, 0.0  ;;  %v417_v44 = vld [vmem:[%s411_s29] sm:$0x3f]  ;;  %v370_v52 = vsel %vm369_vm8, 0.0, %v366_v45 }
 0x2ce   : >> { %v385_v46 = vmul.f32 %v384_v42, %v384_v42  ;;  %v418_v48 = vsel %vm1359_vm2, %v417_v44, 0.0 }
 0x2cf   : >> { %v419_v51 = vmul.f32 %v418_v48, %v418_v48 }
 0x2d0   : >> { %v387_v50 = vadd.f32 %v385_v46, %v366_v45  ;;  %v386_v53 = vadd.f32 %v385_v46, %v370_v52 }
 0x2d1   : >> { %v423_v56 = vsel %vm422_vm9, 0.0, %v419_v51 }
 0x2d2   : >> { %v404_v54 = vadd.f32 %v402_v49, %v387_v50  ;;  %v403_v55 = vadd.f32 %v402_v49, %v386_v53 }
 0x2d4   : >> { %v425_v57 = vadd.f32 %v419_v51, %v404_v54  ;;  %v424_v58 = vadd.f32 %v423_v56, %v403_v55 }
 0x2d6   : >> { %426 = vadd.xlane.f32.xlu0 %v425_v57 }
 0x2da   : >> { %434 = vadd.xlane.f32.xlu0 %v424_v58 }
 0x363   : >> { %v427_v59 = vpop.xlane.xlu0 %426 }
 0x364   : >> { %v428_v60 = vrot.slane %v427_v59, 4 }
 0x366   : >> { %v429_v61 = vadd.f32 %v428_v60, %v427_v59 }
 0x367   : >> { %v435_v62 = vpop.xlane.xlu0 %434 }
 0x368   : >> { %v430_v63 = vrot.slane %v429_v61, 2  ;;  %v436_v0 = vrot.slane %v435_v62, 4 }
 0x36a   : >> { %v437_v1 = vadd.f32 %v436_v0, %v435_v62  ;;  %v431_v2 = vadd.f32 %v430_v63, %v429_v61 }
 0x36c   : >> { %v438_v3 = vrot.slane %v437_v1, 2  ;;  %v432_v7 = vrot.slane %v431_v2, 1 }
 0x36e   : >> { %v439_v4 = vadd.f32 %v438_v3, %v437_v1  ;;  %v433_v10 = vadd.f32 %v432_v7, %v431_v2 }
 0x370   : >> { %v440_v8 = vrot.slane %v439_v4, 1 }
 0x372   : >> { %v441_v9 = vadd.f32 %v440_v8, %v439_v4 }
 0x374   : >> { %1524 = vpush %v441_v9 }
 0x375   : >> { %1526 = vpush %v433_v10 }
 0x3a5   : >> { %s1525_s23 = spop %1524 }
 0x3a6   : >> { %s1527_s26 = spop %1526 }
 0x3a7   : >> { %s444_s24 = smul.f32 1e-10, %s1527_s26 }
 0x3a9   : >> { %p445_p11 = scmp.le.f32.partialorder %s1525_s23, %s444_s24 }
 0x3ab   : >> { %p447_p12 = por %p446_p10, %p445_p11 }
 0x3ad   : > { %895 = sbr.rel (!%p447_p12) target bundleno = 273 (0x111), region = 505 }
 0x3b4 PF: > { %s900_s28 = smov [#allocation12]  ;;  %v904_v5 = vmov %v1727_v5  ;;  %v907_v6 = vmov %v1729_v6  ;;  %s920_s15 = smov [#allocation15] }
 0x3b5   : > { %v924_v5 = vmov %v1727_v5  ;;  %v927_v6 = vmov %v1729_v6  ;;  %v908_v11 = vld [vmem:[%s900_s28] sm:$0x3f]  ;;  %vm911_vm10 = vcmp.eq.s32.totalorder %v907_v6, %v904_v5  ;;  %s896_s16 = sand.u32 7, %s1688_s12   ;;  %s2012_s21 = scalar_lea.vmem [#allocation7], %s1725_s18 }
 0x3b6   : > { %vm931_vm11 = vcmp.eq.s32.totalorder %v927_v6, %v924_v5  ;;  %v912_v12 = vsel %vm911_vm10, %v908_v11, 0.0  ;;  %v928_v14 = vld [vmem:[%s920_s15] sm:$0x3f]  ;;  %s897_s11 = scalar_lea.vmem [#allocation4], %s896_s16  ;;  %s899_s27 = scalar_lea.vmem [#allocation6], %s896_s16 }
 0x3b7   : > { %v913_v13 = vrot.slane %v912_v12, 4  ;;  %v932_v15 = vsel %vm931_vm11, %v928_v14, 0.0  ;;  %s901_s11 = smov %s897_s11  ;;  %s921_s27 = smov %s899_s27 }
 0x3b8   : > { %v933_v17 = vrot.slane %v932_v15, 4  ;;  %s979_s22 = sshrl.u32 (%p1702_p3), %s1688_s12, 3 }
 0x3b9   : > { %v914_v16 = vadd.f32 %v913_v13, %v912_v12  ;;  %s1512_s29 = sshll.u32 (%p1702_p3), %s979_s22, 1 }
 0x3ba   : > { %v934_v19 = vadd.f32 %v933_v17, %v932_v15  ;;  %s981_s24 = scalar_lea.vmem (%p1702_p3), %s2003_s4, %s1512_s29 }
 0x3bb   : > { %v915_v18 = vrot.slane %v914_v16, 2 }
 0x3bc   : > { %v935_v21 = vrot.slane %v934_v19, 2 }
 0x3bd   : > { %v916_v20 = vadd.f32 %v915_v18, %v914_v16 }
 0x3be   : > { %v936_v23 = vadd.f32 %v935_v21, %v934_v19 }
 0x3bf   : > { %v917_v22 = vrot.slane %v916_v20, 1 }
 0x3c0   : > { %v937_v5 = vrot.slane %v936_v23, 1 }
 0x3c1   : > { %v918_v24 = vadd.f32 %v917_v22, %v916_v20 }
 0x3c2   : > { %v938_v6 = vadd.f32 %v937_v5, %v936_v23 }
 0x3c3   : > { %919 = vst [vmem:[%s901_s11] sm:$0x1] %v918_v24 }
 0x3c4   : > { %939 = vst [vmem:[%s921_s27] sm:$0x1] %v938_v6 }
 0x3c6   : > { %978 = sbr.rel (!%p1702_p3) target bundleno = 980 (0x3d4), region = 174 }
 0x3ca   : > { %v943_v25 = vld [vmem:[#allocation4] sm:$0x3] }
 0x3cb   : > { %945 = vst [vmem:[%s283_s25] sm:$0x3] %v943_v25  ;;  %v949_v26 = vld [vmem:[#allocation6] sm:$0x3] }
 0x3cc   : > { %951 = vst [vmem:[%s2012_s21] sm:$0x3] %v949_v26 }
 0x3d2   : > { %v997_v27 = vld [vmem:[%s283_s25] sm:$0x3] }
 0x3d3   : > { %998 = vst [vmem:[%s981_s24] sm:$0x3] %v997_v27 }
 0x3d4 PF: > { %1015 = sbr.rel (!%p1702_p3) target bundleno = 988 (0x3dc), region = 208  ;;  %s1016_s28 = sshrl.u32 (%p1702_p3), %s1688_s12, 3 }
 0x3d5   : > { %s2013_s15 = scalar_lea.vmem (%p1702_p3), [#allocation7], %s1725_s18  ;;  %s1513_s16 = sshll.u32 (%p1702_p3), %s1016_s28, 1 }
 0x3d6   : > { %s1018_s25 = scalar_lea.vmem (%p1702_p3), %s2004_s5, %s1513_s16 }
 0x3da   : > { %v1034_v28 = vld [vmem:[%s2013_s15] sm:$0x3] (%p1702_p3) }
 0x3db   : > { %1035 = vst [vmem:[%s1018_s25] sm:$0x3] %v1034_v28 }
 0x3dc PF: > { %s1514_s21 = sshll.u32 %s1688_s12, 3  ;;  %v1079_v29 = vld [vmem:[%s1731_s14] sm:$0xff]  ;;  %v1113_v30 = vld [vmem:[%s1734_s30] sm:$0xff] }
 0x3dd   : > { %v1147_v31 = vld [vmem:[%s1737_s17] sm:$0xff]  ;;  %s1051_s18 = scalar_lea.vmem %s2005_s6, %s1514_s21  ;;  %s1085_s26 = scalar_lea.vmem %s2006_s7, %s1514_s21  ;;  %v1181_v32 = vld [vmem:[%s1740_s20] sm:$0xff] }
 0x3de   : > { %1080 = vst [vmem:[%s1051_s18] sm:$0xff] %v1079_v29  ;;  %1114 = vst [vmem:[%s1085_s26] sm:$0xff] %v1113_v30  ;;  %s1119_s15 = scalar_lea.vmem %s2007_s8, %s1514_s21  ;;  %s1153_s14 = scalar_lea.vmem %s2008_s9, %s1514_s21 }
 0x3df   : > { %1148 = vst [vmem:[%s1119_s15] sm:$0xff] %v1147_v31  ;;  %1182 = vst [vmem:[%s1153_s14] sm:$0xff] %v1181_v32 }
 0x3e0 PF: > { %s2014_s17 = sld [smem:[#allocation25_spill]]  ;;  %p13_p13 = scmp.ge.s32.totalorder %s1691_s13, 4  }
 0x3e1   : > { %s2015_s30 = smov %s1605_s10  ;;  %s2017_s11 = smov %s1691_s13 }
 0x3e2   :  { %15 = sbr.rel (!%p13_p13) target bundleno = 2 (0x2), region = 516 }
 0x3e6   : > { %s2016_s10 = smov %s2014_s17 }

// kernel: grnet_forward.4
= control target key start
LH: loop header
LB: loop body
LE: loop exit
PB: predicated region body
PF: predicated region fallthrough
CT: control target
= control target key end

     0   :  { %s6153_s0 = inlined_call_operand.vmem [shape: f32[12,64,128], index: 0, kind: input, shape index: {}]   ;;  %s6154_s1 = inlined_call_operand.vmem [shape: f32[144,128], index: 1, kind: output, shape index: {}]  }
   0x1   :  { %v3066_v0 = vld [vmem:[%s6153_s0] sm:$0xff]  ;;  %v3071_v1 = vld [vmem:[%s6153_s0 + $0x8] sm:$0xff]  ;;  %v3076_v2 = vld [vmem:[%s6153_s0 + $0x10] sm:$0xff] }
   0x2   :  { %v3081_v3 = vld [vmem:[%s6153_s0 + $0x18] sm:$0xff]  ;;  %v3086_v4 = vld [vmem:[%s6153_s0 + $0x20] sm:$0xff]  ;;  %v3091_v5 = vld [vmem:[%s6153_s0 + $0x28] sm:$0xff]  ;;  %v16_v6 = vmul.f32 %v3066_v0, %v3066_v0  ;;  %v17_v7 = vmul.f32 %v3071_v1, %v3071_v1  ;;  %v18_v8 = vmul.f32 %v3076_v2, %v3076_v2 }
   0x3   :  { %v3102_v9 = vld [vmem:[%s6153_s0 + $0x30] sm:$0xff]  ;;  %v3107_v10 = vld [vmem:[%s6153_s0 + $0x38] sm:$0xff]  ;;  %v3112_v11 = vld [vmem:[%s6153_s0 + $0x40] sm:$0xff]  ;;  %v19_v12 = vmul.f32 %v3081_v3, %v3081_v3  ;;  %v20_v18 = vmul.f32 %v3086_v4, %v3086_v4  ;;  %v21_v19 = vmul.f32 %v3091_v5, %v3091_v5 }
   0x4   :  { %v24_v13 = vadd.f32 %v17_v7, %v16_v6  ;;  %v3119_v14 = vld [vmem:[%s6153_s0 + $0x48] sm:$0xff]  ;;  %v3124_v15 = vld [vmem:[%s6153_s0 + $0x50] sm:$0xff]  ;;  %v3129_v16 = vld [vmem:[%s6153_s0 + $0x58] sm:$0xff]  ;;  %v47_v17 = vmul.f32 %v3112_v11, %v3066_v0  ;;  %v22_v25 = vmul.f32 %v3102_v9, %v3102_v9  ;;  %v3160_v26 = vmul.f32 %v3107_v10, %v3107_v10 }
   0x5   :  { %v3140_v20 = vld [vmem:[%s6153_s0 + $0x60] sm:$0xff]  ;;  %v3145_v21 = vld [vmem:[%s6153_s0 + $0x68] sm:$0xff]  ;;  %v3150_v22 = vld [vmem:[%s6153_s0 + $0x70] sm:$0xff]  ;;  %v48_v23 = vmul.f32 %v3119_v14, %v3071_v1  ;;  %v49_v24 = vmul.f32 %v3124_v15, %v3076_v2  ;;  %v50_v29 = vmul.f32 %v3129_v16, %v3081_v3 }
   0x6   :  { %v25_v27 = vadd.f32 %v24_v13, %v18_v8  ;;  %v3165_v28 = vld [vmem:[%s6153_s0 + $0x78] sm:$0xff]  ;;  %v3172_v30 = vld [vmem:[%s6153_s0 + $0x80] sm:$0xff]  ;;  %v3177_v31 = vld [vmem:[%s6153_s0 + $0x88] sm:$0xff]  ;;  %v51_v32 = vmul.f32 %v3140_v20, %v3086_v4  ;;  %v52_v40 = vmul.f32 %v3145_v21, %v3091_v5  ;;  %v53_v41 = vmul.f32 %v3150_v22, %v3102_v9 }
   0x7   :  { %v55_v33 = vadd.f32 %v48_v23, %v47_v17  ;;  %v3184_v34 = vld [vmem:[%s6153_s0 + $0x90] sm:$0xff]  ;;  %v3189_v35 = vld [vmem:[%s6153_s0 + $0x98] sm:$0xff]  ;;  %v3194_v36 = vld [vmem:[%s6153_s0 + $0xa0] sm:$0xff]  ;;  %v79_v37 = vmul.f32 %v3172_v30, %v3066_v0  ;;  %v80_v38 = vmul.f32 %v3177_v31, %v3071_v1  ;;  %v54_v46 = vmul.f32 %v3165_v28, %v3107_v10 }
   0x8   :  { %v26_v39 = vadd.f32 %v25_v27, %v19_v12  ;;  %v3207_v42 = vld [vmem:[%s6153_s0 + $0xa8] sm:$0xff]  ;;  %v3212_v43 = vld [vmem:[%s6153_s0 + $0xb0] sm:$0xff]  ;;  %v3217_v44 = vld [vmem:[%s6153_s0 + $0xb8] sm:$0xff]  ;;  %v81_v45 = vmul.f32 %v3184_v34, %v3076_v2  ;;  %v82_v48 = vmul.f32 %v3189_v35, %v3081_v3  ;;  %v83_v49 = vmul.f32 %v3194_v36, %v3086_v4 }
   0x9   :  { %v56_v47 = vadd.f32 %v55_v33, %v49_v24  ;;  %v3230_v50 = vld [vmem:[%s6153_s0 + $0xc0] sm:$0xff]  ;;  %v3235_v51 = vld [vmem:[%s6153_s0 + $0xc8] sm:$0xff]  ;;  %v3240_v52 = vld [vmem:[%s6153_s0 + $0xd0] sm:$0xff]  ;;  %v87_v54 = vadd.f32 %v80_v38, %v79_v37  ;;  %v84_v60 = vmul.f32 %v3207_v42, %v3091_v5  ;;  %v85_v61 = vmul.f32 %v3212_v43, %v3102_v9 }
   0xa   :  { %v27_v53 = vadd.f32 %v26_v39, %v20_v18  ;;  %v3245_v55 = vld [vmem:[%s6153_s0 + $0xd8] sm:$0xff]  ;;  %v3250_v56 = vld [vmem:[%s6153_s0 + $0xe0] sm:$0xff]  ;;  %v111_v57 = vmul.f32 %v3230_v50, %v3066_v0  ;;  %v112_v58 = vmul.f32 %v3235_v51, %v3071_v1  ;;  %v3263_v62 = vld [vmem:[%s6153_s0 + $0xe8] sm:$0xff]  ;;  %v113_v63 = vmul.f32 %v3240_v52, %v3076_v2 }
   0xb   :  { %v57_v59 = vadd.f32 %v56_v47, %v50_v29  ;;  %v3270_v6 = vld [vmem:[%s6153_s0 + $0x100] sm:$0xff]  ;;  %v86_v8 = vmul.f32 %v3217_v44, %v3107_v10  ;;  %v88_v12 = vadd.f32 %v87_v54, %v81_v45  ;;  %v3277_v13 = vld [vmem:[%s6153_s0 + $0xf0] sm:$0xff]  ;;  %v114_v17 = vmul.f32 %v3245_v55, %v3081_v3  ;;  %v3284_v18 = vld [vmem:[%s6153_s0 + $0x108] sm:$0xff] }
   0xc   :  { %v28_v7 = vadd.f32 %v27_v53, %v21_v19  ;;  %6284 = vst [vmem:[#allocation2_spill] sm:$0xff] %v3277_v13  ;;  %v3289_v19 = vld [vmem:[%s6153_s0 + $0x110] sm:$0xff]  ;;  %v3294_v24 = vld [vmem:[%s6153_s0 + $0xf8] sm:$0xff]  ;;  %v115_v27 = vmul.f32 %v3250_v56, %v3086_v4  ;;  %v119_v29 = vadd.f32 %v112_v58, %v111_v57  ;;  %v143_v37 = vmul.f32 %v3270_v6, %v3066_v0  ;;  %v3310_v45 = vld [vmem:[%s6153_s0 + $0x120] sm:$0xff] }
   0xd   :  { %6285 = vst [vmem:[#allocation3_spill] sm:$0xff] %v3289_v19  ;;  %v58_v23 = vadd.f32 %v57_v59, %v51_v32  ;;  %6286 = vst [vmem:[#allocation4_spill] sm:$0xff] %v3294_v24  ;;  %v3301_v33 = vld [vmem:[%s6153_s0 + $0x118] sm:$0xff]  ;;  %v89_v39 = vadd.f32 %v88_v12, %v82_v48  ;;  %v116_v32 = vmul.f32 %v3263_v62, %v3091_v5  ;;  %v3326_v58 = vld [vmem:[%s6153_s0 + $0x140] sm:$0xff] }
   0xe   :  { %6287 = vst [vmem:[#allocation5_spill] sm:$0xff] %v3301_v33  ;;  %v29_v38 = vadd.f32 %v28_v7, %v22_v25  ;;  %6288 = vst [vmem:[#allocation6_spill] sm:$0xff] %v3310_v45  ;;  %v144_v47 = vmul.f32 %v3284_v18, %v3071_v1  ;;  %v117_v54 = vmul.f32 %v3277_v13, %v3102_v9  ;;  %v3319_v25 = vld [vmem:[%s6153_s0 + $0x128] sm:$0xff]  ;;  %v3341_v13 = vld [vmem:[%s6153_s0 + $0x130] sm:$0xff] }
   0xf   :  { %v59_v53 = vadd.f32 %v58_v23, %v52_v40  ;;  %v120_v57 = vadd.f32 %v119_v29, %v113_v63  ;;  %6289 = vst [vmem:[#allocation7_spill] sm:$0xff] %v3319_v25  ;;  %v145_v48 = vmul.f32 %v3289_v19, %v3076_v2  ;;  %v90_v40 = vadd.f32 %v89_v39, %v83_v49  ;;  %v3336_v12 = vld [vmem:[%s6153_s0 + $0x148] sm:$0xff] }
  0x10   :  { %v30_v59 = vadd.f32 %v29_v38, %v3160_v26  ;;  %v118_v7 = vmul.f32 %v3294_v24, %v3107_v10  ;;  %v146_v63 = vmul.f32 %v3301_v33, %v3081_v3  ;;  %6290 = vst [vmem:[#allocation8_spill] sm:$0xff] %v3341_v13  ;;  %v3346_v26 = vld [vmem:[%s6153_s0 + $0x138] sm:$0xff]  ;;  %v147_v49 = vmul.f32 %v3310_v45, %v3086_v4  ;;  %v3383_v45 = vld [vmem:[%s6153_s0 + $0x170] sm:$0xff] }
  0x11   :  { %v60_v23 = vadd.f32 %v59_v53, %v53_v41  ;;  %v121_v29 = vadd.f32 %v120_v57, %v114_v17  ;;  %6291 = vst [vmem:[#allocation9_spill] sm:$0xff] %v3346_v26  ;;  %v151_v38 = vadd.f32 %v144_v47, %v143_v37  ;;  %v91_v24 = vadd.f32 %v90_v40, %v84_v60  ;;  %v3355_v17 = vld [vmem:[%s6153_s0 + $0x150] sm:$0xff]  ;;  %v3362_v37 = vld [vmem:[%s6153_s0 + $0x158] sm:$0xff]  ;;  %v3367_v60 = vld [vmem:[%s6153_s0 + $0x160] sm:$0xff] }
  0x12   :  { %v31_v39 = vrot.slane %v30_v59, 4  ;;  %v148_v41 = vmul.f32 %v3319_v25, %v3091_v5  ;;  %6292 = vst [vmem:[#allocation10_spill] sm:$0xff] %v3355_v17  ;;  %v175_v53 = vmul.f32 %v3326_v58, %v3066_v0  ;;  %6293 = vst [vmem:[#allocation11_spill] sm:$0xff] %v3362_v37  ;;  %v176_v47 = vmul.f32 %v3336_v12, %v3071_v1 }
  0x13   :  { %v61_v57 = vadd.f32 %v60_v23, %v54_v46  ;;  %v122_v33 = vadd.f32 %v121_v29, %v115_v27  ;;  %v152_v19 = vadd.f32 %v151_v38, %v145_v48  ;;  %6294 = vst [vmem:[#allocation12_spill] sm:$0xff] %v3367_v60  ;;  %v92_v25 = vadd.f32 %v91_v24, %v85_v61  ;;  %v3378_v38 = vld [vmem:[%s6153_s0 + $0x168] sm:$0xff] }
  0x14   :  { %v32_v40 = vadd.f32 %v31_v39, %v30_v59  ;;  %v149_v46 = vmul.f32 %v3341_v13, %v3102_v9  ;;  %v150_v27 = vmul.f32 %v3346_v26, %v3107_v10  ;;  %6295 = vst [vmem:[#allocation13_spill] sm:$0xff] %v3378_v38  ;;  %6296 = vst [vmem:[#allocation14_spill] sm:$0xff] %v3383_v45  ;;  %v3394_v13 = vld [vmem:[%s6153_s0 + $0x180] sm:$0xff] }
  0x15   :  { %v62_v48 = vrot.slane %v61_v57, 4  ;;  %v123_v23 = vadd.f32 %v122_v33, %v116_v32  ;;  %v153_v29 = vadd.f32 %v152_v19, %v146_v63  ;;  %v177_v61 = vmul.f32 %v3355_v17, %v3076_v2  ;;  %v3399_v17 = vld [vmem:[%s6153_s0 + $0x188] sm:$0xff] }
  0x16   :  { %v33_v24 = vrot.slane %v32_v40, 2  ;;  %v93_v59 = vadd.f32 %v92_v25, %v86_v8  ;;  %v178_v39 = vmul.f32 %v3362_v37, %v3081_v3  ;;  %v179_v19 = vmul.f32 %v3367_v60, %v3086_v4  ;;  %6297 = vst [vmem:[#allocation15_spill] sm:$0xff] %v3399_v17 }
  0x17   :  { %v63_v33 = vadd.f32 %v62_v48, %v61_v57  ;;  %v124_v32 = vadd.f32 %v123_v23, %v117_v54  ;;  %v154_v63 = vadd.f32 %v153_v29, %v147_v49  ;;  %v183_v26 = vadd.f32 %v176_v47, %v175_v53  ;;  %v3408_v47 = vld [vmem:[%s6153_s0 + $0x178] sm:$0xff] }
  0x18   :  { %v34_v8 = vadd.f32 %v33_v24, %v32_v40  ;;  %v94_v25 = vrot.slane %v93_v59, 4  ;;  %v180_v37 = vmul.f32 %v3378_v38, %v3091_v5  ;;  %v181_v54 = vmul.f32 %v3383_v45, %v3102_v9  ;;  %6298 = vst [vmem:[#allocation16_spill] sm:$0xff] %v3408_v47  ;;  %v3413_v40 = vld [vmem:[%s6153_s0 + $0x190] sm:$0xff] }
  0x19   :  { %v64_v49 = vrot.slane %v63_v33, 2  ;;  %v125_v53 = vadd.f32 %v124_v32, %v118_v7  ;;  %v155_v57 = vadd.f32 %v154_v63, %v148_v41  ;;  %v184_v48 = vadd.f32 %v183_v26, %v177_v61  ;;  %6299 = vst [vmem:[#allocation17_spill] sm:$0xff] %v3413_v40  ;;  %v3422_v26 = vld [vmem:[%s6153_s0 + $0x198] sm:$0xff]  ;;  %v3427_v61 = vld [vmem:[%s6153_s0 + $0x1a0] sm:$0xff] }
  0x1a   :  { %v35_v23 = vrot.slane %v34_v8, 1  ;;  %v95_v29 = vadd.f32 %v94_v25, %v93_v59  ;;  %v207_v24 = vmul.f32 %v3394_v13, %v3066_v0  ;;  %v208_v7 = vmul.f32 %v3399_v17, %v3071_v1  ;;  %6300 = vst [vmem:[#allocation18_spill] sm:$0xff] %v3422_v26  ;;  %6301 = vst [vmem:[#allocation19_spill] sm:$0xff] %v3427_v61 }
  0x1b   :  { %v65_v41 = vadd.f32 %v64_v49, %v63_v33  ;;  %v126_v32 = vrot.slane %v125_v53, 4  ;;  %v156_v63 = vadd.f32 %v155_v57, %v149_v46  ;;  %v185_v45 = vadd.f32 %v184_v48, %v178_v39  ;;  %v3436_v48 = vld [vmem:[%s6153_s0 + $0x1c0] sm:$0xff] }
  0x1c   :  { %v36_v59 = vadd.f32 %v35_v23, %v34_v8  ;;  %v96_v25 = vrot.slane %v95_v29, 2  ;;  %v182_v38 = vmul.f32 %v3408_v47, %v3107_v10  ;;  %v209_v33 = vmul.f32 %v3413_v40, %v3076_v2  ;;  %6302 = vst [vmem:[#allocation20_spill] sm:$0xff] %v3436_v48  ;;  %v3441_v8 = vld [vmem:[%s6153_s0 + $0x1c8] sm:$0xff] }
  0x1d   :  { %v66_v46 = vrot.slane %v65_v41, 1  ;;  %v127_v39 = vadd.f32 %v126_v32, %v125_v53  ;;  %v157_v49 = vadd.f32 %v156_v63, %v150_v27  ;;  %v186_v57 = vadd.f32 %v185_v45, %v179_v19  ;;  %6303 = vst [vmem:[#allocation21_spill] sm:$0xff] %v3441_v8  ;;  %v3453_v40 = vld [vmem:[%s6153_s0 + $0x1a8] sm:$0xff] }
  0x1e   :  { %37 = vst [vmem:[%s6154_s1] sm:$0x1] %v36_v59  ;;  %v97_v23 = vadd.f32 %v96_v25, %v95_v29  ;;  %v210_v53 = vmul.f32 %v3422_v26, %v3081_v3  ;;  %v211_v45 = vmul.f32 %v3427_v61, %v3086_v4  ;;  %v215_v27 = vadd.f32 %v208_v7, %v207_v24  ;;  %v3458_v29 = vld [vmem:[%s6153_s0 + $0x1d0] sm:$0xff] }
  0x1f   :  { %v67_v19 = vadd.f32 %v66_v46, %v65_v41  ;;  %v128_v32 = vrot.slane %v127_v39, 2  ;;  %v158_v63 = vrot.slane %v157_v49, 4  ;;  %v187_v47 = vadd.f32 %v186_v57, %v180_v37  ;;  %6304 = vst [vmem:[#allocation22_spill] sm:$0xff] %v3453_v40  ;;  %6305 = vst [vmem:[#allocation23_spill] sm:$0xff] %v3458_v29  ;;  %v3463_v25 = vld [vmem:[%s6153_s0 + $0x1b0] sm:$0xff] }
  0x20   :  { %v98_v59 = vrot.slane %v97_v23, 1  ;;  %6306 = vst [vmem:[#allocation24_spill] sm:$0xff] %v3463_v25  ;;  %v216_v24 = vadd.f32 %v215_v27, %v209_v33  ;;  %v239_v37 = vmul.f32 %v3436_v48, %v3066_v0  ;;  %v240_v7 = vmul.f32 %v3441_v8, %v3071_v1  ;;  %v3478_v33 = vld [vmem:[%s6153_s0 + $0x1b8] sm:$0xff] }
  0x21   :  { %68 = vst [vmem:[%s6154_s1 + $0x1] sm:$0x1] %v67_v19  ;;  %69 = vst [vmem:[%s6154_s1 + $0xc] sm:$0x1] %v67_v19  ;;  %v129_v41 = vadd.f32 %v128_v32, %v127_v39  ;;  %v159_v46 = vadd.f32 %v158_v63, %v157_v49  ;;  %v188_v57 = vadd.f32 %v187_v47, %v181_v54  ;;  %v3483_v27 = vld [vmem:[%s6153_s0 + $0x1d8] sm:$0xff]  ;;  %v3492_v54 = vld [vmem:[%s6153_s0 + $0x200] sm:$0xff] }
  0x22   :  { %6307 = vst [vmem:[#allocation25_spill] sm:$0xff] %v3478_v33  ;;  %6308 = vst [vmem:[#allocation26_spill] sm:$0xff] %v3483_v27  ;;  %v99_v8 = vadd.f32 %v98_v59, %v97_v23  ;;  %v212_v48 = vmul.f32 %v3453_v40, %v3091_v5  ;;  %v217_v61 = vadd.f32 %v216_v24, %v210_v53  ;;  %v3499_v23 = vld [vmem:[%s6153_s0 + $0x1e0] sm:$0xff]  ;;  %v3504_v53 = vld [vmem:[%s6153_s0 + $0x208] sm:$0xff] }
  0x23   :  { %v241_v39 = vmul.f32 %v3458_v29, %v3076_v2  ;;  %6309 = vst [vmem:[#allocation27_spill] sm:$0xff] %v3492_v54  ;;  %v130_v47 = vrot.slane %v129_v41, 1  ;;  %v160_v49 = vrot.slane %v159_v46, 2  ;;  %v189_v19 = vadd.f32 %v188_v57, %v182_v38  ;;  %6310 = vst [vmem:[#allocation28_spill] sm:$0xff] %v3499_v23  ;;  %v3519_v57 = vld [vmem:[%s6153_s0 + $0x210] sm:$0xff] }
  0x24   :  { %v213_v32 = vmul.f32 %v3463_v25, %v3102_v9  ;;  %6311 = vst [vmem:[#allocation29_spill] sm:$0xff] %v3504_v53  ;;  %100 = vst [vmem:[%s6154_s1 + $0x2] sm:$0x1] %v99_v8  ;;  %v214_v38 = vmul.f32 %v3478_v33, %v3107_v10  ;;  %v218_v63 = vadd.f32 %v217_v61, %v211_v45  ;;  %v3529_v61 = vld [vmem:[%s6153_s0 + $0x1f0] sm:$0xff] }
  0x25   :  { %101 = vst [vmem:[%s6154_s1 + $0x18] sm:$0x1] %v99_v8  ;;  %v242_v59 = vmul.f32 %v3483_v27, %v3081_v3  ;;  %v247_v24 = vadd.f32 %v240_v7, %v239_v37  ;;  %6312 = vst [vmem:[#allocation30_spill] sm:$0xff] %v3519_v57  ;;  %v131_v25 = vadd.f32 %v130_v47, %v129_v41  ;;  %v190_v40 = vrot.slane %v189_v19, 4  ;;  %v3524_v8 = vld [vmem:[%s6153_s0 + $0x1e8] sm:$0xff] }
  0x26   :  { %v161_v29 = vadd.f32 %v160_v49, %v159_v46  ;;  %6313 = vst [vmem:[#allocation31_spill] sm:$0xff] %v3524_v8  ;;  %6314 = vst [vmem:[#allocation32_spill] sm:$0xff] %v3529_v61  ;;  %v271_v45 = vmul.f32 %v3492_v54, %v3066_v0  ;;  %v219_v37 = vadd.f32 %v218_v63, %v212_v48  ;;  %v3538_v46 = vld [vmem:[%s6153_s0 + $0x218] sm:$0xff]  ;;  %v3553_v63 = vld [vmem:[%s6153_s0 + $0x240] sm:$0xff] }
  0x27   :  { %v243_v7 = vmul.f32 %v3499_v23, %v3086_v4  ;;  %v248_v41 = vadd.f32 %v247_v24, %v241_v39  ;;  %6315 = vst [vmem:[#allocation33_spill] sm:$0xff] %v3538_v46  ;;  %v272_v47 = vmul.f32 %v3504_v53, %v3071_v1  ;;  %132 = vst [vmem:[%s6154_s1 + $0x3] sm:$0x1] %v131_v25  ;;  %v3558_v24 = vld [vmem:[%s6153_s0 + $0x248] sm:$0xff]  ;;  %v3576_v54 = vld [vmem:[%s6153_s0 + $0x220] sm:$0xff] }
  0x28   :  { %133 = vst [vmem:[%s6154_s1 + $0x24] sm:$0x1] %v131_v25  ;;  %v162_v48 = vrot.slane %v161_v29, 1  ;;  %v191_v49 = vadd.f32 %v190_v40, %v189_v19  ;;  %v273_v39 = vmul.f32 %v3519_v57, %v3076_v2  ;;  %6316 = vst [vmem:[#allocation34_spill] sm:$0xff] %v3553_v63  ;;  %v3562_v23 = vmul.f32 %v3112_v11, %v3112_v11  ;;  %v3567_v40 = vld [vmem:[%s6153_s0 + $0x1f8] sm:$0xff] }
  0x29   :  { %6317 = vst [vmem:[#allocation35_spill] sm:$0xff] %v3558_v24  ;;  %v220_v25 = vadd.f32 %v219_v37, %v213_v32  ;;  %6318 = vst [vmem:[#allocation36_spill] sm:$0xff] %v3567_v40  ;;  %v244_v19 = vmul.f32 %v3524_v8, %v3091_v5  ;;  %v245_v57 = vmul.f32 %v3529_v61, %v3102_v9  ;;  %v3581_v32 = vld [vmem:[%s6153_s0 + $0x228] sm:$0xff] }
  0x2a   :  { %v249_v53 = vadd.f32 %v248_v41, %v242_v59  ;;  %6319 = vst [vmem:[#allocation37_spill] sm:$0xff] %v3576_v54  ;;  %v163_v27 = vadd.f32 %v162_v48, %v161_v29  ;;  %v192_v33 = vrot.slane %v191_v49, 2  ;;  %6320 = vst [vmem:[#allocation38_spill] sm:$0xff] %v3581_v32  ;;  %v274_v37 = vmul.f32 %v3538_v46, %v3081_v3  ;;  %v3588_v59 = vld [vmem:[%s6153_s0 + $0x250] sm:$0xff]  ;;  %v3598_v48 = vld [vmem:[%s6153_s0 + $0x238] sm:$0xff] }
  0x2b   :  { %v279_v8 = vadd.f32 %v272_v47, %v271_v45  ;;  %6321 = vst [vmem:[#allocation39_spill] sm:$0xff] %v3588_v59  ;;  %v221_v41 = vadd.f32 %v220_v25, %v214_v38  ;;  %v3593_v29 = vld [vmem:[%s6153_s0 + $0x230] sm:$0xff]  ;;  %6323 = vst [vmem:[#allocation41_spill] sm:$0xff] %v3598_v48  ;;  %v303_v45 = vmul.f32 %v3553_v63, %v3066_v0 }
  0x2c   :  { %v250_v61 = vadd.f32 %v249_v53, %v243_v7  ;;  %6322 = vst [vmem:[#allocation40_spill] sm:$0xff] %v3593_v29  ;;  %v304_v47 = vmul.f32 %v3558_v24, %v3071_v1  ;;  %164 = vst [vmem:[%s6154_s1 + $0x4] sm:$0x1] %v163_v27  ;;  %v193_v53 = vadd.f32 %v192_v33, %v191_v49  ;;  %v3617_v24 = vld [vmem:[%s6153_s0 + $0x258] sm:$0xff] }
  0x2d   :  { %165 = vst [vmem:[%s6154_s1 + $0x30] sm:$0x1] %v163_v27  ;;  %v246_v38 = vmul.f32 %v3567_v40, %v3107_v10  ;;  %v275_v7 = vmul.f32 %v3576_v54, %v3086_v4  ;;  %v280_v25 = vadd.f32 %v279_v8, %v273_v39  ;;  %6324 = vst [vmem:[#allocation42_spill] sm:$0xff] %v3617_v24  ;;  %v222_v63 = vrot.slane %v221_v41, 4  ;;  %v3626_v27 = vld [vmem:[%s6153_s0 + $0x280] sm:$0xff]  ;;  %v3631_v8 = vld [vmem:[%s6153_s0 + $0x288] sm:$0xff] }
  0x2e   :  { %v251_v46 = vadd.f32 %v250_v61, %v244_v19  ;;  %v276_v26 = vmul.f32 %v3581_v32, %v3091_v5  ;;  %v305_v33 = vmul.f32 %v3588_v59, %v3076_v2  ;;  %6325 = vst [vmem:[#allocation43_spill] sm:$0xff] %v3626_v27  ;;  %6326 = vst [vmem:[#allocation44_spill] sm:$0xff] %v3631_v8  ;;  %v194_v49 = vrot.slane %v193_v53, 1  ;;  %v3640_v32 = vld [vmem:[%s6153_s0 + $0x260] sm:$0xff]  ;;  %v3645_v40 = vld [vmem:[%s6153_s0 + $0x268] sm:$0xff] }
  0x2f   :  { %v277_v61 = vmul.f32 %v3593_v29, %v3102_v9  ;;  %v278_v39 = vmul.f32 %v3598_v48, %v3107_v10  ;;  %v281_v19 = vadd.f32 %v280_v25, %v274_v37  ;;  %6327 = vst [vmem:[#allocation45_spill] sm:$0xff] %v3640_v32  ;;  %v223_v59 = vadd.f32 %v222_v63, %v221_v41  ;;  %v3650_v29 = vld [vmem:[%s6153_s0 + $0x270] sm:$0xff]  ;;  %v3662_v63 = vld [vmem:[%s6153_s0 + $0x278] sm:$0xff] }
  0x30   :  { %v252_v54 = vadd.f32 %v251_v46, %v245_v57  ;;  %6328 = vst [vmem:[#allocation46_spill] sm:$0xff] %v3645_v40  ;;  %6329 = vst [vmem:[#allocation47_spill] sm:$0xff] %v3650_v29  ;;  %v306_v37 = vmul.f32 %v3617_v24, %v3081_v3  ;;  %v311_v25 = vadd.f32 %v304_v47, %v303_v45  ;;  %v3657_v48 = vld [vmem:[%s6153_s0 + $0x290] sm:$0xff] }
  0x31   :  { %6330 = vst [vmem:[#allocation48_spill] sm:$0xff] %v3657_v48  ;;  %v195_v57 = vadd.f32 %v194_v49, %v193_v53  ;;  %v282_v46 = vadd.f32 %v281_v19, %v275_v7  ;;  %6331 = vst [vmem:[#allocation49_spill] sm:$0xff] %v3662_v63  ;;  %v335_v41 = vmul.f32 %v3626_v27, %v3066_v0  ;;  %v224_v24 = vrot.slane %v223_v59, 2  ;;  %v3673_v53 = vld [vmem:[%s6153_s0 + $0x298] sm:$0xff]  ;;  %v3678_v7 = vld [vmem:[%s6153_s0 + $0x2c0] sm:$0xff] }
  0x32   :  { %v336_v60 = vmul.f32 %v3631_v8, %v3071_v1  ;;  %v253_v45 = vadd.f32 %v252_v54, %v246_v38  ;;  %v307_v47 = vmul.f32 %v3640_v32, %v3086_v4  ;;  %v312_v17 = vadd.f32 %v311_v25, %v305_v33  ;;  %6332 = vst [vmem:[#allocation50_spill] sm:$0xff] %v3678_v7  ;;  %v3695_v19 = vld [vmem:[%s6153_s0 + $0x2c8] sm:$0xff]  ;;  %v3721_v27 = vld [vmem:[%s6153_s0 + $0x2b0] sm:$0xff] }
  0x33   :  { %196 = vst [vmem:[%s6154_s1 + $0x5] sm:$0x1] %v195_v57  ;;  %197 = vst [vmem:[%s6154_s1 + $0x3c] sm:$0x1] %v195_v57  ;;  %v283_v54 = vadd.f32 %v282_v46, %v276_v26  ;;  %v308_v38 = vmul.f32 %v3645_v40, %v3091_v5  ;;  %v309_v33 = vmul.f32 %v3650_v29, %v3102_v9  ;;  %v3702_v46 = vld [vmem:[%s6153_s0 + $0x2a0] sm:$0xff]  ;;  %v3707_v29 = vld [vmem:[%s6153_s0 + $0x2a8] sm:$0xff] }
  0x34   :  { %v337_v49 = vmul.f32 %v3657_v48, %v3076_v2  ;;  %v225_v25 = vadd.f32 %v224_v24, %v223_v59  ;;  %v254_v32 = vrot.slane %v253_v45, 4  ;;  %v310_v57 = vmul.f32 %v3662_v63, %v3107_v10  ;;  %6333 = vst [vmem:[#allocation51_spill] sm:$0xff] %v3707_v29  ;;  %v3714_v59 = vld [vmem:[%s6153_s0 + $0x2d0] sm:$0xff]  ;;  %6334 = vst [vmem:[#allocation52_spill] sm:$0xff] %v3721_v27 }
  0x35   :  { %v313_v26 = vadd.f32 %v312_v17, %v306_v37  ;;  %v284_v40 = vadd.f32 %v283_v54, %v277_v61  ;;  %v338_v48 = vmul.f32 %v3673_v53, %v3081_v3  ;;  %v343_v24 = vadd.f32 %v336_v60, %v335_v41  ;;  %v3726_v60 = vld [vmem:[%s6153_s0 + $0x2b8] sm:$0xff] }
  0x36   :  { %v367_v17 = vmul.f32 %v3678_v7, %v3066_v0  ;;  %v226_v37 = vrot.slane %v225_v25, 1  ;;  %v255_v63 = vadd.f32 %v254_v32, %v253_v45  ;;  %6335 = vst [vmem:[#allocation53_spill] sm:$0xff] %v3726_v60  ;;  %v368_v61 = vmul.f32 %v3695_v19, %v3071_v1  ;;  %v3742_v1 = vld [vmem:[%s6153_s0 + $0x2e0] sm:$0xff] }
  0x37   :  { %v314_v8 = vadd.f32 %v313_v26, %v307_v47  ;;  %v285_v41 = vadd.f32 %v284_v40, %v278_v39  ;;  %v339_v0 = vmul.f32 %v3702_v46, %v3086_v4  ;;  %v340_v32 = vmul.f32 %v3707_v29, %v3091_v5  ;;  %v3737_v47 = vld [vmem:[%s6153_s0 + $0x2d8] sm:$0xff]  ;;  %6337 = vst [vmem:[#allocation55_spill] sm:$0xff] %v3742_v1 }
  0x38   :  { %v344_v45 = vadd.f32 %v343_v24, %v337_v49  ;;  %6336 = vst [vmem:[#allocation54_spill] sm:$0xff] %v3737_v47  ;;  %v227_v54 = vadd.f32 %v226_v37, %v225_v25  ;;  %v256_v26 = vrot.slane %v255_v63, 2  ;;  %v369_v40 = vmul.f32 %v3714_v59, %v3076_v2  ;;  %v3764_v25 = vld [vmem:[%s6153_s0 + $0x2f0] sm:$0xff] }
  0x39   :  { %v315_v7 = vadd.f32 %v314_v8, %v308_v38  ;;  %v286_v39 = vrot.slane %v285_v41, 4  ;;  %v341_v49 = vmul.f32 %v3721_v27, %v3102_v9  ;;  %v342_v24 = vmul.f32 %v3726_v60, %v3107_v10  ;;  %v3753_v8 = vld [vmem:[%s6153_s0 + $0x2e8] sm:$0xff]  ;;  %v3771_v27 = vld [vmem:[%s6153_s0 + $0x2f8] sm:$0xff] }
  0x3a   :  { %v345_v29 = vadd.f32 %v344_v45, %v338_v48  ;;  %228 = vst [vmem:[%s6154_s1 + $0x6] sm:$0x1] %v227_v54  ;;  %229 = vst [vmem:[%s6154_s1 + $0x48] sm:$0x1] %v227_v54  ;;  %v257_v2 = vadd.f32 %v256_v26, %v255_v63  ;;  %v370_v48 = vmul.f32 %v3737_v47, %v3081_v3 }
  0x3b   :  { %v316_v38 = vadd.f32 %v315_v7, %v309_v33  ;;  %v375_v37 = vadd.f32 %v368_v61, %v367_v17  ;;  %v287_v45 = vadd.f32 %v286_v39, %v285_v41  ;;  %v371_v63 = vmul.f32 %v3742_v1, %v3086_v4 }
  0x3c   :  { %v346_v60 = vadd.f32 %v345_v29, %v339_v0  ;;  %v399_v7 = vmul.f32 %v3119_v14, %v3119_v14  ;;  %v258_v33 = vrot.slane %v257_v2, 1  ;;  %v372_v26 = vmul.f32 %v3753_v8, %v3091_v5 }
  0x3d   :  { %v317_v54 = vadd.f32 %v316_v38, %v310_v57  ;;  %v376_v3 = vadd.f32 %v375_v37, %v369_v40  ;;  %v288_v17 = vrot.slane %v287_v45, 2  ;;  %v373_v29 = vmul.f32 %v3764_v25, %v3102_v9 }
  0x3e   :  { %v347_v61 = vadd.f32 %v346_v60, %v340_v32  ;;  %v400_v41 = vmul.f32 %v3124_v15, %v3124_v15  ;;  %v259_v0 = vadd.f32 %v258_v33, %v257_v2  ;;  %v374_v4 = vmul.f32 %v3771_v27, %v3107_v10 }
  0x3f   :  { %v318_v39 = vrot.slane %v317_v54, 4  ;;  %v377_v1 = vadd.f32 %v376_v3, %v370_v48  ;;  %v289_v47 = vadd.f32 %v288_v17, %v287_v45  ;;  %v401_v5 = vmul.f32 %v3129_v16, %v3129_v16 }
  0x40   :  { %v348_v57 = vadd.f32 %v347_v61, %v341_v49  ;;  %v406_v40 = vadd.f32 %v399_v7, %v3562_v23  ;;  %260 = vst [vmem:[%s6154_s1 + $0x7] sm:$0x1] %v259_v0  ;;  %261 = vst [vmem:[%s6154_s1 + $0x54] sm:$0x1] %v259_v0  ;;  %v428_v10 = vmul.f32 %v3172_v30, %v3112_v11 }
  0x41   :  { %v319_v9 = vadd.f32 %v318_v39, %v317_v54  ;;  %v378_v60 = vadd.f32 %v377_v1, %v371_v63  ;;  %v429_v32 = vmul.f32 %v3177_v31, %v3119_v14  ;;  %v290_v49 = vrot.slane %v289_v47, 1 }
  0x42   :  { %v349_v2 = vadd.f32 %v348_v57, %v342_v24  ;;  %v402_v23 = vmul.f32 %v3140_v20, %v3140_v20  ;;  %v407_v38 = vadd.f32 %v406_v40, %v400_v41  ;;  %v403_v45 = vmul.f32 %v3145_v21, %v3145_v21 }
  0x43   :  { %v320_v48 = vrot.slane %v319_v9, 2  ;;  %v379_v37 = vadd.f32 %v378_v60, %v372_v26  ;;  %v430_v1 = vmul.f32 %v3184_v34, %v3124_v15  ;;  %v291_v63 = vadd.f32 %v290_v49, %v289_v47 }
  0x44   :  { %v350_v7 = vrot.slane %v349_v2, 4  ;;  %v404_v30 = vmul.f32 %v3150_v22, %v3150_v22  ;;  %v408_v31 = vadd.f32 %v407_v38, %v401_v5  ;;  %v431_v54 = vmul.f32 %v3189_v35, %v3129_v16 }
  0x45   :  { %v321_v33 = vadd.f32 %v320_v48, %v319_v9  ;;  %v380_v24 = vadd.f32 %v379_v37, %v373_v29  ;;  %v436_v3 = vadd.f32 %v429_v32, %v428_v10  ;;  %292 = vst [vmem:[%s6154_s1 + $0x8] sm:$0x1] %v291_v63  ;;  %293 = vst [vmem:[%s6154_s1 + $0x60] sm:$0x1] %v291_v63 }
  0x46   :  { %v351_v34 = vadd.f32 %v350_v7, %v349_v2  ;;  %v409_v47 = vadd.f32 %v408_v31, %v402_v23  ;;  %v432_v26 = vmul.f32 %v3194_v36, %v3140_v20  ;;  %v459_v17 = vmul.f32 %v3230_v50, %v3112_v11  ;;  %v6338_v7 = vld [vmem:[#allocation3_spill] sm:$0xff] }
  0x47   :  { %v322_v61 = vrot.slane %v321_v33, 1  ;;  %v381_v29 = vadd.f32 %v380_v24, %v374_v4  ;;  %v437_v35 = vadd.f32 %v436_v3, %v430_v1  ;;  %v460_v41 = vmul.f32 %v3235_v51, %v3119_v14 }
  0x48   :  { %v352_v0 = vrot.slane %v351_v34, 2  ;;  %v405_v39 = vmul.f32 %v3165_v28, %v3165_v28  ;;  %v410_v57 = vadd.f32 %v409_v47, %v403_v45  ;;  %v433_v5 = vmul.f32 %v3207_v42, %v3145_v21 }
  0x49   :  { %v323_v40 = vadd.f32 %v322_v61, %v321_v33  ;;  %v382_v9 = vrot.slane %v381_v29, 4  ;;  %v438_v36 = vadd.f32 %v437_v35, %v431_v54  ;;  %v461_v50 = vmul.f32 %v3240_v52, %v3124_v15  ;;  %v6341_v35 = vld [vmem:[#allocation4_spill] sm:$0xff] }
  0x4a   :  { %v353_v60 = vadd.f32 %v352_v0, %v351_v34  ;;  %v411_v4 = vadd.f32 %v410_v57, %v404_v30  ;;  %v434_v10 = vmul.f32 %v3212_v43, %v3150_v22  ;;  %v435_v51 = vmul.f32 %v3217_v44, %v3165_v28  ;;  %v6342_v0 = vld [vmem:[#allocation6_spill] sm:$0xff] }
  0x4b   :  { %324 = vst [vmem:[%s6154_s1 + $0x9] sm:$0x1] %v323_v40  ;;  %325 = vst [vmem:[%s6154_s1 + $0x6c] sm:$0x1] %v323_v40  ;;  %v383_v42 = vadd.f32 %v382_v9, %v381_v29  ;;  %v439_v32 = vadd.f32 %v438_v36, %v432_v26  ;;  %v462_v52 = vmul.f32 %v3245_v55, %v3129_v16  ;;  %v6343_v36 = vld [vmem:[#allocation10_spill] sm:$0xff] }
  0x4c   :  { %v467_v49 = vadd.f32 %v460_v41, %v459_v17  ;;  %v354_v2 = vrot.slane %v353_v60, 1  ;;  %v412_v23 = vadd.f32 %v411_v4, %v405_v39  ;;  %v490_v43 = vmul.f32 %v3270_v6, %v3112_v11  ;;  %v6339_v6 = vld [vmem:[#allocation2_spill] sm:$0xff] }
  0x4d   :  { %v491_v44 = vmul.f32 %v3284_v18, %v3119_v14  ;;  %v384_v38 = vrot.slane %v383_v42, 2  ;;  %v440_v48 = vadd.f32 %v439_v32, %v433_v5  ;;  %v463_v37 = vmul.f32 %v3250_v56, %v3140_v20 }
  0x4e   :  { %v468_v45 = vadd.f32 %v467_v49, %v461_v50  ;;  %v355_v1 = vadd.f32 %v354_v2, %v353_v60  ;;  %v413_v63 = vrot.slane %v412_v23, 4  ;;  %v464_v55 = vmul.f32 %v3263_v62, %v3145_v21  ;;  %v6340_v62 = vld [vmem:[#allocation5_spill] sm:$0xff]  ;;  %v6344_v60 = vld [vmem:[#allocation7_spill] sm:$0xff] }
  0x4f   :  { %v492_v30 = vmul.f32 %v6338_v7, %v3124_v15  ;;  %v385_v31 = vadd.f32 %v384_v38, %v383_v42  ;;  %v441_v33 = vadd.f32 %v440_v48, %v434_v10  ;;  %v465_v24 = vmul.f32 %v6339_v6, %v3150_v22  ;;  %v6347_v38 = vld [vmem:[#allocation15_spill] sm:$0xff]  ;;  %v6350_v6 = vld [vmem:[#allocation17_spill] sm:$0xff] }
  0x50   :  { %v469_v18 = vadd.f32 %v468_v45, %v462_v52  ;;  %356 = vst [vmem:[%s6154_s1 + $0xa] sm:$0x1] %v355_v1  ;;  %357 = vst [vmem:[%s6154_s1 + $0x78] sm:$0x1] %v355_v1  ;;  %v414_v56 = vadd.f32 %v413_v63, %v412_v23  ;;  %v493_v54 = vmul.f32 %v6340_v62, %v3129_v16  ;;  %v6346_v52 = vld [vmem:[#allocation11_spill] sm:$0xff]  ;;  %v6348_v1 = vld [vmem:[#allocation12_spill] sm:$0xff] }
  0x51   :  { %v498_v3 = vadd.f32 %v491_v44, %v490_v43  ;;  %v521_v34 = vmul.f32 %v3326_v58, %v3112_v11  ;;  %v386_v47 = vrot.slane %v385_v31, 1  ;;  %v442_v26 = vadd.f32 %v441_v33, %v435_v51 }
  0x52   :  { %v470_v17 = vadd.f32 %v469_v18, %v463_v37  ;;  %v522_v61 = vmul.f32 %v3336_v12, %v3119_v14  ;;  %v415_v29 = vrot.slane %v414_v56, 2  ;;  %v466_v41 = vmul.f32 %v6341_v35, %v3165_v28  ;;  %v6345_v12 = vld [vmem:[#allocation8_spill] sm:$0xff] }
  0x53   :  { %v494_v39 = vmul.f32 %v6342_v0, %v3140_v20  ;;  %v499_v57 = vadd.f32 %v498_v3, %v492_v30  ;;  %v387_v5 = vadd.f32 %v386_v47, %v385_v31  ;;  %v443_v40 = vrot.slane %v442_v26, 4  ;;  %v6349_v30 = vld [vmem:[#allocation9_spill] sm:$0xff]  ;;  %v6354_v0 = vld [vmem:[#allocation19_spill] sm:$0xff] }
  0x54   :  { %v471_v9 = vadd.f32 %v470_v17, %v464_v55  ;;  %v523_v58 = vmul.f32 %v6343_v36, %v3124_v15  ;;  %v416_v50 = vadd.f32 %v415_v29, %v414_v56  ;;  %v495_v4 = vmul.f32 %v6344_v60, %v3145_v21  ;;  %v6356_v36 = vld [vmem:[#allocation21_spill] sm:$0xff] }
  0x55   :  { %v496_v10 = vmul.f32 %v6345_v12, %v3150_v22  ;;  %v500_v51 = vadd.f32 %v499_v57, %v493_v54  ;;  %388 = vst [vmem:[%s6154_s1 + $0xb] sm:$0x1] %v387_v5  ;;  %389 = vst [vmem:[%s6154_s1 + $0x84] sm:$0x1] %v387_v5  ;;  %v444_v42 = vadd.f32 %v443_v40, %v442_v26  ;;  %v6353_v26 = vld [vmem:[#allocation18_spill] sm:$0xff]  ;;  %v6355_v40 = vld [vmem:[#allocation20_spill] sm:$0xff] }
  0x56   :  { %v472_v32 = vadd.f32 %v471_v9, %v465_v24  ;;  %v524_v49 = vmul.f32 %v6346_v52, %v3129_v16  ;;  %v529_v2 = vadd.f32 %v522_v61, %v521_v34  ;;  %v417_v23 = vrot.slane %v416_v50, 1  ;;  %v6352_v34 = vld [vmem:[#allocation14_spill] sm:$0xff] }
  0x57   :  { %v501_v43 = vadd.f32 %v500_v51, %v494_v39  ;;  %v552_v44 = vmul.f32 %v3394_v13, %v3112_v11  ;;  %v553_v48 = vmul.f32 %v6347_v38, %v3119_v14  ;;  %v445_v37 = vrot.slane %v444_v42, 2  ;;  %v6351_v13 = vld [vmem:[#allocation13_spill] sm:$0xff] }
  0x58   :  { %v473_v45 = vadd.f32 %v472_v32, %v466_v41  ;;  %v525_v63 = vmul.f32 %v6348_v1, %v3140_v20  ;;  %v530_v55 = vadd.f32 %v529_v2, %v523_v58  ;;  %v418_v7 = vadd.f32 %v417_v23, %v416_v50 }
  0x59   :  { %v497_v31 = vmul.f32 %v6349_v30, %v3165_v28  ;;  %v502_v33 = vadd.f32 %v501_v43, %v495_v4  ;;  %v554_v24 = vmul.f32 %v6350_v6, %v3124_v15  ;;  %v446_v18 = vadd.f32 %v445_v37, %v444_v42  ;;  %v6357_v4 = vld [vmem:[#allocation16_spill] sm:$0xff]  ;;  %v6358_v42 = vld [vmem:[#allocation22_spill] sm:$0xff] }
  0x5a   :  { %v474_v56 = vrot.slane %v473_v45, 4  ;;  %v526_v62 = vmul.f32 %v6351_v13, %v3145_v21  ;;  %v531_v54 = vadd.f32 %v530_v55, %v524_v49  ;;  %419 = vst [vmem:[%s6154_s1 + $0xd] sm:$0x1] %v418_v7  ;;  %v527_v47 = vmul.f32 %v6352_v34, %v3150_v22  ;;  %v6359_v49 = vld [vmem:[#allocation23_spill] sm:$0xff] }
  0x5b   :  { %v503_v3 = vadd.f32 %v502_v33, %v496_v10  ;;  %v555_v17 = vmul.f32 %v6353_v26, %v3129_v16  ;;  %v560_v61 = vadd.f32 %v553_v48, %v552_v44  ;;  %v447_v29 = vrot.slane %v446_v18, 1  ;;  %v6360_v44 = vld [vmem:[#allocation24_spill] sm:$0xff]  ;;  %v6361_v48 = vld [vmem:[#allocation25_spill] sm:$0xff]  ;;  %v6363_v33 = vld [vmem:[#allocation27_spill] sm:$0xff] }
  0x5c   :  { %v475_v35 = vadd.f32 %v474_v56, %v473_v45  ;;  %v532_v41 = vadd.f32 %v531_v54, %v525_v63  ;;  %v556_v39 = vmul.f32 %v6354_v0, %v3140_v20  ;;  %v583_v9 = vmul.f32 %v6355_v40, %v3112_v11  ;;  %v6362_v63 = vld [vmem:[#allocation26_spill] sm:$0xff]  ;;  %v6366_v26 = vld [vmem:[#allocation31_spill] sm:$0xff]  ;;  %v6368_v0 = vld [vmem:[#allocation32_spill] sm:$0xff] }
  0x5d   :  { %v504_v57 = vadd.f32 %v503_v3, %v497_v31  ;;  %v561_v5 = vadd.f32 %v560_v61, %v554_v24  ;;  %v584_v58 = vmul.f32 %v6356_v36, %v3119_v14  ;;  %v448_v50 = vadd.f32 %v447_v29, %v446_v18  ;;  %v6364_v24 = vld [vmem:[#allocation29_spill] sm:$0xff]  ;;  %v6367_v61 = vld [vmem:[#allocation30_spill] sm:$0xff] }
  0x5e   :  { %v476_v60 = vrot.slane %v475_v35, 2  ;;  %v528_v12 = vmul.f32 %v6357_v4, %v3165_v28  ;;  %v533_v10 = vadd.f32 %v532_v41, %v526_v62  ;;  %v557_v32 = vmul.f32 %v6358_v42, %v3145_v21  ;;  %v6365_v62 = vld [vmem:[#allocation28_spill] sm:$0xff]  ;;  %v6369_v40 = vld [vmem:[#allocation33_spill] sm:$0xff] }
  0x5f   :  { %v505_v51 = vrot.slane %v504_v57, 4  ;;  %v562_v52 = vadd.f32 %v561_v5, %v555_v17  ;;  %v585_v2 = vmul.f32 %v6359_v49, %v3124_v15  ;;  %449 = vst [vmem:[%s6154_s1 + $0xe] sm:$0x1] %v448_v50  ;;  %450 = vst [vmem:[%s6154_s1 + $0x19] sm:$0x1] %v448_v50  ;;  %v558_v38 = vmul.f32 %v6360_v44, %v3150_v22  ;;  %v6373_v49 = vld [vmem:[#allocation37_spill] sm:$0xff] }
  0x60   :  { %v477_v23 = vadd.f32 %v476_v60, %v475_v35  ;;  %v534_v43 = vadd.f32 %v533_v10, %v527_v47  ;;  %v559_v37 = vmul.f32 %v6361_v48, %v3165_v28  ;;  %v586_v55 = vmul.f32 %v6362_v63, %v3129_v16  ;;  %v6371_v10 = vld [vmem:[#allocation35_spill] sm:$0xff] }
  0x61   :  { %v506_v45 = vadd.f32 %v505_v51, %v504_v57  ;;  %v563_v1 = vadd.f32 %v562_v52, %v556_v39  ;;  %v591_v7 = vadd.f32 %v584_v58, %v583_v9  ;;  %v614_v6 = vmul.f32 %v6363_v33, %v3112_v11  ;;  %v6370_v58 = vld [vmem:[#allocation34_spill] sm:$0xff]  ;;  %v6374_v48 = vld [vmem:[#allocation39_spill] sm:$0xff] }
  0x62   :  { %v478_v30 = vrot.slane %v477_v23, 1  ;;  %v535_v31 = vadd.f32 %v534_v43, %v528_v12  ;;  %v615_v18 = vmul.f32 %v6364_v24, %v3119_v14  ;;  %v587_v54 = vmul.f32 %v6365_v62, %v3140_v20 }
  0x63   :  { %v507_v56 = vrot.slane %v506_v45, 2  ;;  %v564_v13 = vadd.f32 %v563_v1, %v557_v32  ;;  %v592_v3 = vadd.f32 %v591_v7, %v585_v2  ;;  %v588_v17 = vmul.f32 %v6366_v26, %v3145_v21  ;;  %v6372_v32 = vld [vmem:[#allocation36_spill] sm:$0xff] }
  0x64   :  { %v479_v34 = vadd.f32 %v478_v30, %v477_v23  ;;  %v536_v47 = vrot.slane %v535_v31, 4  ;;  %v616_v29 = vmul.f32 %v6367_v61, %v3124_v15  ;;  %v589_v39 = vmul.f32 %v6368_v0, %v3150_v22 }
  0x65   :  { %v508_v35 = vadd.f32 %v507_v56, %v506_v45  ;;  %v565_v41 = vadd.f32 %v564_v13, %v558_v38  ;;  %v593_v57 = vadd.f32 %v592_v3, %v586_v55  ;;  %v617_v9 = vmul.f32 %v6369_v40, %v3129_v16  ;;  %v6379_v56 = vld [vmem:[#allocation44_spill] sm:$0xff]  ;;  %v6380_v3 = vld [vmem:[#allocation45_spill] sm:$0xff]  ;;  %v6383_v40 = vld [vmem:[#allocation46_spill] sm:$0xff] }
  0x66   :  { %480 = vst [vmem:[%s6154_s1 + $0xf] sm:$0x1] %v479_v34  ;;  %481 = vst [vmem:[%s6154_s1 + $0x25] sm:$0x1] %v479_v34  ;;  %v537_v5 = vadd.f32 %v536_v47, %v535_v31  ;;  %v622_v36 = vadd.f32 %v615_v18, %v614_v6  ;;  %v645_v50 = vmul.f32 %v6370_v58, %v3112_v11  ;;  %v6378_v6 = vld [vmem:[#allocation43_spill] sm:$0xff]  ;;  %v3050_v58 = vld [vmem:[%s6153_s0 + $0x70] sm:$0xff] }
  0x67   :  { %v509_v60 = vrot.slane %v508_v35, 1  ;;  %v566_v4 = vadd.f32 %v565_v41, %v559_v37  ;;  %v594_v12 = vadd.f32 %v593_v57, %v587_v54  ;;  %v646_v51 = vmul.f32 %v6371_v10, %v3119_v14  ;;  %v6375_v37 = vld [vmem:[#allocation38_spill] sm:$0xff]  ;;  %v6376_v14 = vld [vmem:[#allocation40_spill] sm:$0xff]  ;;  %v3046_v18 = vld [vmem:[%s6153_s0 + $0x48] sm:$0xff] }
  0x68   :  { %v538_v42 = vrot.slane %v537_v5, 2  ;;  %v590_v52 = vmul.f32 %v6372_v32, %v3165_v28  ;;  %v618_v2 = vmul.f32 %v6373_v49, %v3140_v20  ;;  %v623_v23 = vadd.f32 %v622_v36, %v616_v29  ;;  %v6382_v41 = vld [vmem:[#allocation48_spill] sm:$0xff] }
  0x69   :  { %v510_v43 = vadd.f32 %v509_v60, %v508_v35  ;;  %v567_v44 = vrot.slane %v566_v4, 4  ;;  %v595_v38 = vadd.f32 %v594_v12, %v588_v17  ;;  %v647_v11 = vmul.f32 %v6374_v48, %v3124_v15  ;;  %v6377_v15 = vld [vmem:[#allocation42_spill] sm:$0xff]  ;;  %v6381_v17 = vld [vmem:[#allocation41_spill] sm:$0xff]  ;;  %v3048_v35 = vld [vmem:[%s6153_s0 + $0x50] sm:$0xff] }
  0x6a   :  { %v539_v45 = vadd.f32 %v538_v42, %v537_v5  ;;  %v619_v1 = vmul.f32 %v6375_v37, %v3145_v21  ;;  %v620_v63 = vmul.f32 %v6376_v14, %v3150_v22  ;;  %v624_v55 = vadd.f32 %v623_v23, %v617_v9  ;;  %v3045_v22 = vld [vmem:[%s6153_s0 + $0x40] sm:$0xff]  ;;  %v3049_v5 = vld [vmem:[%s6153_s0 + $0x68] sm:$0xff] }
  0x6b   :  { %511 = vst [vmem:[%s6154_s1 + $0x10] sm:$0x1] %v510_v43  ;;  %512 = vst [vmem:[%s6154_s1 + $0x31] sm:$0x1] %v510_v43  ;;  %v568_v20 = vadd.f32 %v567_v44, %v566_v4  ;;  %v596_v7 = vadd.f32 %v595_v38, %v589_v39  ;;  %v648_v30 = vmul.f32 %v6377_v15, %v3129_v16  ;;  %v3047_v16 = vld [vmem:[%s6153_s0 + $0x60] sm:$0xff]  ;;  %v3051_v4 = vld [vmem:[%s6153_s0 + $0x58] sm:$0xff] }
  0x6c   :  { %v653_v31 = vadd.f32 %v646_v51, %v645_v50  ;;  %v540_v33 = vrot.slane %v539_v45, 1  ;;  %v625_v21 = vadd.f32 %v624_v55, %v618_v2  ;;  %v676_v24 = vmul.f32 %v3045_v22, %v6378_v6  ;;  %v6384_v50 = vld [vmem:[#allocation47_spill] sm:$0xff]  ;;  %v6385_v23 = vld [vmem:[#allocation50_spill] sm:$0xff]  ;;  %v6388_v15 = vld [vmem:[#allocation52_spill] sm:$0xff] }
  0x6d   :  { %v677_v13 = vmul.f32 %v3046_v18, %v6379_v56  ;;  %v569_v62 = vrot.slane %v568_v20, 2  ;;  %v597_v54 = vadd.f32 %v596_v7, %v590_v52  ;;  %v649_v34 = vmul.f32 %v3047_v16, %v6380_v3  ;;  %v6387_v14 = vld [vmem:[#allocation51_spill] sm:$0xff]  ;;  %v6390_v6 = vld [vmem:[#allocation54_spill] sm:$0xff]  ;;  %v4032_v56 = vld [vmem:[%s6153_s0 + $0x90] sm:$0xff] }
  0x6e   :  { %v654_v47 = vadd.f32 %v653_v31, %v647_v11  ;;  %v541_v26 = vadd.f32 %v540_v33, %v539_v45  ;;  %v621_v61 = vmul.f32 %v6381_v17, %v3165_v28  ;;  %v626_v29 = vadd.f32 %v625_v21, %v619_v1  ;;  %v3052_v11 = vld [vmem:[%s6153_s0 + $0x78] sm:$0xff] }
  0x6f   :  { %v678_v0 = vmul.f32 %v3048_v35, %v6382_v41  ;;  %v570_v39 = vadd.f32 %v569_v62, %v568_v20  ;;  %v598_v57 = vrot.slane %v597_v54, 4  ;;  %v650_v9 = vmul.f32 %v3049_v5, %v6383_v40  ;;  %v6386_v45 = vld [vmem:[#allocation49_spill] sm:$0xff]  ;;  %v4013_v20 = vld [vmem:[%s6153_s0 + $0x80] sm:$0xff] }
  0x70   :  { %v655_v36 = vadd.f32 %v654_v47, %v648_v30  ;;  %542 = vst [vmem:[%s6154_s1 + $0x11] sm:$0x1] %v541_v26  ;;  %543 = vst [vmem:[%s6154_s1 + $0x3d] sm:$0x1] %v541_v26  ;;  %v627_v28 = vadd.f32 %v626_v29, %v620_v63  ;;  %v651_v60 = vmul.f32 %v3050_v58, %v6384_v50  ;;  %v6389_v31 = vld [vmem:[#allocation53_spill] sm:$0xff]  ;;  %v6391_v26 = vld [vmem:[#allocation55_spill] sm:$0xff] }
  0x71   :  { %v679_v12 = vmul.f32 %v3051_v4, %v3673_v53  ;;  %v684_v10 = vadd.f32 %v677_v13, %v676_v24  ;;  %v571_v51 = vrot.slane %v570_v39, 1  ;;  %v599_v42 = vadd.f32 %v598_v57, %v597_v54  ;;  %v4042_v29 = vld [vmem:[%s6153_s0 + $0x98] sm:$0xff]  ;;  %v4061_v50 = vld [vmem:[%s6153_s0 + $0xa0] sm:$0xff] }
  0x72   :  { %v656_v32 = vadd.f32 %v655_v36, %v649_v34  ;;  %v680_v52 = vmul.f32 %v3047_v16, %v3702_v46  ;;  %v628_v49 = vadd.f32 %v627_v28, %v621_v61  ;;  %v707_v43 = vmul.f32 %v3045_v22, %v6385_v23 }
  0x73   :  { %v685_v2 = vadd.f32 %v684_v10, %v678_v0  ;;  %v708_v44 = vmul.f32 %v3046_v18, %v3695_v19  ;;  %v572_v38 = vadd.f32 %v571_v51, %v570_v39  ;;  %v600_v48 = vrot.slane %v599_v42, 2  ;;  %v4018_v19 = vld [vmem:[%s6153_s0 + $0x88] sm:$0xff] }
  0x74   :  { %v652_v53 = vmul.f32 %v3052_v11, %v6386_v45  ;;  %v657_v37 = vadd.f32 %v656_v32, %v650_v9  ;;  %v629_v1 = vrot.slane %v628_v49, 4  ;;  %v681_v63 = vmul.f32 %v3049_v5, %v6387_v14  ;;  %v4081_v51 = vld [vmem:[%s6153_s0 + $0xa8] sm:$0xff] }
  0x75   :  { %v686_v55 = vadd.f32 %v685_v2, %v679_v12  ;;  %v709_v46 = vmul.f32 %v3048_v35, %v3714_v59  ;;  %573 = vst [vmem:[%s6154_s1 + $0x12] sm:$0x1] %v572_v38  ;;  %574 = vst [vmem:[%s6154_s1 + $0x49] sm:$0x1] %v572_v38  ;;  %v601_v7 = vadd.f32 %v600_v48, %v599_v42  ;;  %v4047_v35 = vld [vmem:[%s6153_s0 + $0xc0] sm:$0xff]  ;;  %v4086_v42 = vld [vmem:[%s6153_s0 + $0xb0] sm:$0xff] }
  0x76   :  { %v658_v59 = vadd.f32 %v657_v37, %v651_v60  ;;  %v682_v30 = vmul.f32 %v3050_v58, %v6388_v15  ;;  %v683_v33 = vmul.f32 %v3052_v11, %v6389_v31  ;;  %v630_v21 = vadd.f32 %v629_v1, %v628_v49 }
  0x77   :  { %v687_v22 = vadd.f32 %v686_v55, %v680_v52  ;;  %v710_v24 = vmul.f32 %v3051_v4, %v6390_v6  ;;  %v715_v18 = vadd.f32 %v708_v44, %v707_v43  ;;  %v602_v13 = vrot.slane %v601_v7, 1  ;;  %v4096_v43 = vld [vmem:[%s6153_s0 + $0xd8] sm:$0xff] }
  0x78   :  { %v659_v62 = vadd.f32 %v658_v59, %v652_v53  ;;  %v738_v54 = vmul.f32 %v4013_v20, %v4013_v20  ;;  %v739_v3 = vmul.f32 %v4018_v19, %v4018_v19  ;;  %v631_v34 = vrot.slane %v630_v21, 2  ;;  %v4103_v53 = vld [vmem:[%s6153_s0 + $0x100] sm:$0xff] }
  0x79   :  { %v688_v47 = vadd.f32 %v687_v22, %v681_v63  ;;  %v711_v17 = vmul.f32 %v3047_v16, %v6391_v26  ;;  %v716_v61 = vadd.f32 %v715_v18, %v709_v46  ;;  %v603_v41 = vadd.f32 %v602_v13, %v601_v7  ;;  %v4055_v16 = vld [vmem:[%s6153_s0 + $0xc8] sm:$0xff]  ;;  %v4117_v63 = vld [vmem:[%s6153_s0 + $0xe0] sm:$0xff]  ;;  %v4128_v7 = vld [vmem:[%s6153_s0 + $0xb8] sm:$0xff] }
  0x7a   :  { %v660_v0 = vrot.slane %v659_v62, 4  ;;  %v712_v39 = vmul.f32 %v3049_v5, %v3753_v8  ;;  %v740_v57 = vmul.f32 %v4032_v56, %v4032_v56  ;;  %v632_v40 = vadd.f32 %v631_v34, %v630_v21  ;;  %v4140_v21 = vld [vmem:[%s6153_s0 + $0xe8] sm:$0xff]  ;;  %v4149_v13 = vld [vmem:[%s6153_s0 + $0xf0] sm:$0xff] }
  0x7b   :  { %v689_v9 = vadd.f32 %v688_v47, %v682_v30  ;;  %v713_v36 = vmul.f32 %v3050_v58, %v3764_v25  ;;  %v717_v28 = vadd.f32 %v716_v61, %v710_v24  ;;  %604 = vst [vmem:[%s6154_s1 + $0x13] sm:$0x1] %v603_v41  ;;  %605 = vst [vmem:[%s6154_s1 + $0x55] sm:$0x1] %v603_v41  ;;  %v4074_v25 = vld [vmem:[%s6153_s0 + $0xd0] sm:$0xff] }
  0x7c   :  { %v661_v8 = vadd.f32 %v660_v0, %v659_v62  ;;  %v741_v5 = vmul.f32 %v4042_v29, %v4042_v29  ;;  %v746_v60 = vadd.f32 %v739_v3, %v738_v54  ;;  %v768_v58 = vmul.f32 %v4047_v35, %v4013_v20  ;;  %v4135_v30 = vld [vmem:[%s6153_s0 + $0x110] sm:$0xff]  ;;  %v4156_v3 = vld [vmem:[%s6153_s0 + $0x118] sm:$0xff] }
  0x7d   :  { %v633_v4 = vrot.slane %v632_v40, 1  ;;  %v690_v12 = vadd.f32 %v689_v9, %v683_v33  ;;  %v718_v10 = vadd.f32 %v717_v28, %v711_v17  ;;  %v769_v32 = vmul.f32 %v4055_v16, %v4018_v19  ;;  %v4163_v17 = vld [vmem:[%s6153_s0 + $0x120] sm:$0xff]  ;;  %v4177_v9 = vld [vmem:[%s6153_s0 + $0x148] sm:$0xff]  ;;  %v4188_v28 = vld [vmem:[%s6153_s0 + $0xf8] sm:$0xff] }
  0x7e   :  { %v662_v52 = vrot.slane %v661_v8, 2  ;;  %v714_v49 = vmul.f32 %v3052_v11, %v3771_v27  ;;  %v742_v2 = vmul.f32 %v4061_v50, %v4061_v50  ;;  %v747_v23 = vadd.f32 %v746_v60, %v740_v57  ;;  %v4108_v27 = vld [vmem:[%s6153_s0 + $0x108] sm:$0xff] }
  0x7f   :  { %v634_v44 = vadd.f32 %v633_v4, %v632_v40  ;;  %v691_v38 = vrot.slane %v690_v12, 4  ;;  %v719_v48 = vadd.f32 %v718_v10, %v712_v39  ;;  %v770_v45 = vmul.f32 %v4074_v25, %v4032_v56  ;;  %v4172_v40 = vld [vmem:[%s6153_s0 + $0x140] sm:$0xff]  ;;  %v4197_v10 = vld [vmem:[%s6153_s0 + $0x128] sm:$0xff] }
  0x80   :  { %v663_v11 = vadd.f32 %v662_v52, %v661_v8  ;;  %v743_v37 = vmul.f32 %v4081_v51, %v4081_v51  ;;  %v744_v1 = vmul.f32 %v4086_v42, %v4086_v42  ;;  %v748_v14 = vadd.f32 %v747_v23, %v741_v5  ;;  %v4204_v52 = vld [vmem:[%s6153_s0 + $0x150] sm:$0xff]  ;;  %v4214_v23 = vld [vmem:[%s6153_s0 + $0x138] sm:$0xff] }
  0x81   :  { %635 = vst [vmem:[%s6154_s1 + $0x14] sm:$0x1] %v634_v44  ;;  %636 = vst [vmem:[%s6154_s1 + $0x61] sm:$0x1] %v634_v44  ;;  %v692_v55 = vadd.f32 %v691_v38, %v690_v12  ;;  %v720_v46 = vadd.f32 %v719_v48, %v713_v36  ;;  %v771_v59 = vmul.f32 %v4096_v43, %v4042_v29 }
  0x82   :  { %v776_v15 = vadd.f32 %v769_v32, %v768_v58  ;;  %v664_v31 = vrot.slane %v663_v11, 1  ;;  %v749_v33 = vadd.f32 %v748_v14, %v742_v2  ;;  %v799_v22 = vmul.f32 %v4103_v53, %v4013_v20  ;;  %v4209_v2 = vld [vmem:[%s6153_s0 + $0x130] sm:$0xff]  ;;  %v4225_v14 = vld [vmem:[%s6153_s0 + $0x158] sm:$0xff] }
  0x83   :  { %v800_v6 = vmul.f32 %v4108_v27, %v4018_v19  ;;  %v693_v24 = vrot.slane %v692_v55, 2  ;;  %v721_v18 = vadd.f32 %v720_v46, %v714_v49  ;;  %v772_v62 = vmul.f32 %v4117_v63, %v4061_v50 }
  0x84   :  { %v777_v54 = vadd.f32 %v776_v15, %v770_v45  ;;  %v665_v34 = vadd.f32 %v664_v31, %v663_v11  ;;  %v745_v47 = vmul.f32 %v4128_v7, %v4128_v7  ;;  %v750_v26 = vadd.f32 %v749_v33, %v743_v37  ;;  %v4234_v31 = vld [vmem:[%s6153_s0 + $0x180] sm:$0xff]  ;;  %v4239_v33 = vld [vmem:[%s6153_s0 + $0x188] sm:$0xff] }
  0x85   :  { %v801_v61 = vmul.f32 %v4135_v30, %v4032_v56  ;;  %v694_v41 = vadd.f32 %v693_v24, %v692_v55  ;;  %v722_v0 = vrot.slane %v721_v18, 4  ;;  %v773_v39 = vmul.f32 %v4140_v21, %v4081_v51 }
  0x86   :  { %v778_v57 = vadd.f32 %v777_v54, %v771_v59  ;;  %666 = vst [vmem:[%s6154_s1 + $0x15] sm:$0x1] %v665_v34  ;;  %667 = vst [vmem:[%s6154_s1 + $0x6d] sm:$0x1] %v665_v34  ;;  %v751_v36 = vadd.f32 %v750_v26, %v744_v1  ;;  %v774_v8 = vmul.f32 %v4149_v13, %v4086_v42 }
  0x87   :  { %v802_v5 = vmul.f32 %v4156_v3, %v4042_v29  ;;  %v807_v60 = vadd.f32 %v800_v6, %v799_v22  ;;  %v695_v58 = vrot.slane %v694_v41, 1  ;;  %v723_v4 = vadd.f32 %v722_v0, %v721_v18 }
  0x88   :  { %v779_v12 = vadd.f32 %v778_v57, %v772_v62  ;;  %v803_v32 = vmul.f32 %v4163_v17, %v4061_v50  ;;  %v752_v49 = vadd.f32 %v751_v36, %v745_v47  ;;  %v830_v38 = vmul.f32 %v4172_v40, %v4013_v20  ;;  %v4254_v62 = vld [vmem:[%s6153_s0 + $0x160] sm:$0xff]  ;;  %v4259_v47 = vld [vmem:[%s6153_s0 + $0x168] sm:$0xff]  ;;  %v4271_v57 = vld [vmem:[%s6153_s0 + $0x170] sm:$0xff] }
  0x89   :  { %v808_v44 = vadd.f32 %v807_v60, %v801_v61  ;;  %v831_v48 = vmul.f32 %v4177_v9, %v4018_v19  ;;  %v696_v45 = vadd.f32 %v695_v58, %v694_v41  ;;  %v724_v11 = vrot.slane %v723_v4, 2  ;;  %v4266_v41 = vld [vmem:[%s6153_s0 + $0x190] sm:$0xff] }
  0x8a   :  { %v775_v37 = vmul.f32 %v4188_v28, %v4128_v7  ;;  %v780_v1 = vadd.f32 %v779_v12, %v773_v39  ;;  %v753_v55 = vrot.slane %v752_v49, 4  ;;  %v804_v46 = vmul.f32 %v4197_v10, %v4081_v51  ;;  %v4282_v12 = vld [vmem:[%s6153_s0 + $0x198] sm:$0xff] }
  0x8b   :  { %v809_v59 = vadd.f32 %v808_v44, %v802_v5  ;;  %v832_v15 = vmul.f32 %v4204_v52, %v4032_v56  ;;  %697 = vst [vmem:[%s6154_s1 + $0x16] sm:$0x1] %v696_v45  ;;  %698 = vst [vmem:[%s6154_s1 + $0x79] sm:$0x1] %v696_v45  ;;  %v725_v22 = vadd.f32 %v724_v11, %v723_v4  ;;  %v4296_v45 = vld [vmem:[%s6153_s0 + $0x1c8] sm:$0xff] }
  0x8c   :  { %v781_v6 = vadd.f32 %v780_v1, %v774_v8  ;;  %v805_v24 = vmul.f32 %v4209_v2, %v4086_v42  ;;  %v806_v18 = vmul.f32 %v4214_v23, %v4128_v7  ;;  %v754_v54 = vadd.f32 %v753_v55, %v752_v49  ;;  %v4301_v1 = vld [vmem:[%s6153_s0 + $0x178] sm:$0xff] }
  0x8d   :  { %v810_v34 = vadd.f32 %v809_v59, %v803_v32  ;;  %v833_v26 = vmul.f32 %v4225_v14, %v4042_v29  ;;  %v838_v61 = vadd.f32 %v831_v48, %v830_v38  ;;  %v726_v0 = vrot.slane %v725_v22, 1  ;;  %v4287_v32 = vld [vmem:[%s6153_s0 + $0x1c0] sm:$0xff]  ;;  %6392 = vst [vmem:[#allocation3_spill] sm:$0xff] %v4301_v1 }
  0x8e   :  { %v782_v39 = vadd.f32 %v781_v6, %v775_v37  ;;  %v861_v36 = vmul.f32 %v4234_v31, %v4013_v20  ;;  %v862_v8 = vmul.f32 %v4239_v33, %v4018_v19  ;;  %v755_v5 = vrot.slane %v754_v54, 2  ;;  %v4308_v59 = vld [vmem:[%s6153_s0 + $0x1a0] sm:$0xff] }
  0x8f   :  { %v811_v60 = vadd.f32 %v810_v34, %v804_v46  ;;  %v834_v58 = vmul.f32 %v4254_v62, %v4061_v50  ;;  %v839_v4 = vadd.f32 %v838_v61, %v832_v15  ;;  %v727_v49 = vadd.f32 %v726_v0, %v725_v22  ;;  %6393 = vst [vmem:[#allocation2_spill] sm:$0xff] %v4308_v59  ;;  %v4328_v0 = vld [vmem:[%s6153_s0 + $0x1a8] sm:$0xff] }
  0x90   :  { %v783_v44 = vrot.slane %v782_v39, 4  ;;  %v835_v38 = vmul.f32 %v4259_v47, %v4081_v51  ;;  %v863_v48 = vmul.f32 %v4266_v41, %v4032_v56  ;;  %v756_v11 = vadd.f32 %v755_v5, %v754_v54  ;;  %6395 = vst [vmem:[#allocation4_spill] sm:$0xff] %v4328_v0 }
  0x91   :  { %v812_v37 = vadd.f32 %v811_v60, %v805_v24  ;;  %v836_v55 = vmul.f32 %v4271_v57, %v4086_v42  ;;  %v840_v46 = vadd.f32 %v839_v4, %v833_v26  ;;  %728 = vst [vmem:[%s6154_s1 + $0x17] sm:$0x1] %v727_v49  ;;  %729 = vst [vmem:[%s6154_s1 + $0x85] sm:$0x1] %v727_v49  ;;  %v4321_v24 = vld [vmem:[%s6153_s0 + $0x1d0] sm:$0xff] }
  0x92   :  { %v784_v15 = vadd.f32 %v783_v44, %v782_v39  ;;  %v864_v22 = vmul.f32 %v4282_v12, %v4042_v29  ;;  %v869_v6 = vadd.f32 %v862_v8, %v861_v36  ;;  %6394 = vst [vmem:[#allocation5_spill] sm:$0xff] %v4321_v24  ;;  %v892_v54 = vmul.f32 %v4287_v32, %v4013_v20  ;;  %v4333_v39 = vld [vmem:[%s6153_s0 + $0x1b0] sm:$0xff] }
  0x93   :  { %v757_v34 = vrot.slane %v756_v11, 1  ;;  %v813_v26 = vadd.f32 %v812_v37, %v806_v18  ;;  %v841_v61 = vadd.f32 %v840_v46, %v834_v58  ;;  %6396 = vst [vmem:[#allocation6_spill] sm:$0xff] %v4333_v39  ;;  %v893_v36 = vmul.f32 %v4296_v45, %v4018_v19  ;;  %v4344_v58 = vld [vmem:[%s6153_s0 + $0x1d8] sm:$0xff]  ;;  %v4351_v46 = vld [vmem:[%s6153_s0 + $0x200] sm:$0xff] }
  0x94   :  { %v785_v8 = vrot.slane %v784_v15, 2  ;;  %v837_v5 = vmul.f32 %v4301_v1, %v4128_v7  ;;  %v865_v18 = vmul.f32 %v4308_v59, %v4061_v50  ;;  %v870_v60 = vadd.f32 %v869_v6, %v863_v48  ;;  %6397 = vst [vmem:[#allocation10_spill] sm:$0xff] %v4344_v58  ;;  %6398 = vst [vmem:[#allocation7_spill] sm:$0xff] %v4351_v46  ;;  %v4356_v48 = vld [vmem:[%s6153_s0 + $0x208] sm:$0xff] }
  0x95   :  { %v758_v4 = vadd.f32 %v757_v34, %v756_v11  ;;  %v814_v49 = vrot.slane %v813_v26, 4  ;;  %v842_v44 = vadd.f32 %v841_v61, %v835_v38  ;;  %v894_v37 = vmul.f32 %v4321_v24, %v4032_v56  ;;  %6399 = vst [vmem:[#allocation8_spill] sm:$0xff] %v4356_v48  ;;  %v4365_v34 = vld [vmem:[%s6153_s0 + $0x1e0] sm:$0xff] }
  0x96   :  { %v786_v6 = vadd.f32 %v785_v8, %v784_v15  ;;  %v866_v1 = vmul.f32 %v4328_v0, %v4081_v51  ;;  %v867_v38 = vmul.f32 %v4333_v39, %v4086_v42  ;;  %v871_v11 = vadd.f32 %v870_v60, %v864_v22  ;;  %6400 = vst [vmem:[#allocation11_spill] sm:$0xff] %v4365_v34  ;;  %v4373_v15 = vld [vmem:[%s6153_s0 + $0x1b8] sm:$0xff]  ;;  %v4380_v60 = vld [vmem:[%s6153_s0 + $0x210] sm:$0xff] }
  0x97   :  { %759 = vst [vmem:[%s6154_s1 + $0x1a] sm:$0x1] %v758_v4  ;;  %v815_v61 = vadd.f32 %v814_v49, %v813_v26  ;;  %v843_v24 = vadd.f32 %v842_v44, %v836_v55  ;;  %6401 = vst [vmem:[#allocation15_spill] sm:$0xff] %v4373_v15  ;;  %v895_v8 = vmul.f32 %v4344_v58, %v4042_v29  ;;  %v4385_v55 = vld [vmem:[%s6153_s0 + $0x1e8] sm:$0xff] }
  0x98   :  { %v900_v22 = vadd.f32 %v893_v36, %v892_v54  ;;  %6402 = vst [vmem:[#allocation12_spill] sm:$0xff] %v4380_v60  ;;  %v787_v39 = vrot.slane %v786_v6, 1  ;;  %v872_v0 = vadd.f32 %v871_v11, %v865_v18  ;;  %6403 = vst [vmem:[#allocation9_spill] sm:$0xff] %v4385_v55  ;;  %v923_v26 = vmul.f32 %v4351_v46, %v4013_v20  ;;  %v4394_v36 = vld [vmem:[%s6153_s0 + $0x1f0] sm:$0xff]  ;;  %v4401_v11 = vld [vmem:[%s6153_s0 + $0x218] sm:$0xff] }
  0x99   :  { %v924_v4 = vmul.f32 %v4356_v48, %v4018_v19  ;;  %v816_v49 = vrot.slane %v815_v61, 2  ;;  %v844_v54 = vadd.f32 %v843_v24, %v837_v5  ;;  %6404 = vst [vmem:[#allocation17_spill] sm:$0xff] %v4394_v36  ;;  %v896_v18 = vmul.f32 %v4365_v34, %v4061_v50  ;;  %6405 = vst [vmem:[#allocation13_spill] sm:$0xff] %v4401_v11  ;;  %v4408_v24 = vld [vmem:[%s6153_s0 + $0x220] sm:$0xff] }
  0x9a   :  { %v901_v44 = vadd.f32 %v900_v22, %v894_v37  ;;  %v788_v46 = vadd.f32 %v787_v39, %v786_v6  ;;  %v868_v48 = vmul.f32 %v4373_v15, %v4128_v7  ;;  %v873_v58 = vadd.f32 %v872_v0, %v866_v1  ;;  %6406 = vst [vmem:[#allocation14_spill] sm:$0xff] %v4408_v24  ;;  %v4417_v39 = vld [vmem:[%s6153_s0 + $0x240] sm:$0xff]  ;;  %v4422_v1 = vld [vmem:[%s6153_s0 + $0x248] sm:$0xff]  ;;  %v4433_v6 = vld [vmem:[%s6153_s0 + $0x1f8] sm:$0xff] }
  0x9b   :  { %v925_v5 = vmul.f32 %v4380_v60, %v4032_v56  ;;  %v817_v34 = vadd.f32 %v816_v49, %v815_v61  ;;  %v845_v37 = vrot.slane %v844_v54, 4  ;;  %v897_v22 = vmul.f32 %v4385_v55, %v4081_v51  ;;  %6407 = vst [vmem:[#allocation18_spill] sm:$0xff] %v4417_v39  ;;  %6408 = vst [vmem:[#allocation19_spill] sm:$0xff] %v4422_v1 }
  0x9c   :  { %v902_v59 = vadd.f32 %v901_v44, %v895_v8  ;;  %789 = vst [vmem:[%s6154_s1 + $0x1b] sm:$0x1] %v788_v46  ;;  %790 = vst [vmem:[%s6154_s1 + $0x26] sm:$0x1] %v788_v46  ;;  %v874_v0 = vadd.f32 %v873_v58, %v867_v38  ;;  %v898_v61 = vmul.f32 %v4394_v36, %v4086_v42  ;;  %v4442_v46 = vld [vmem:[%s6153_s0 + $0x228] sm:$0xff]  ;;  %v4449_v38 = vld [vmem:[%s6153_s0 + $0x250] sm:$0xff] }
  0x9d   :  { %6409 = vst [vmem:[#allocation20_spill] sm:$0xff] %v4433_v6  ;;  %v926_v8 = vmul.f32 %v4401_v11, %v4042_v29  ;;  %v931_v49 = vadd.f32 %v924_v4, %v923_v26  ;;  %v818_v44 = vrot.slane %v817_v34, 1  ;;  %v846_v60 = vadd.f32 %v845_v37, %v844_v54  ;;  %6410 = vst [vmem:[#allocation21_spill] sm:$0xff] %v4442_v46  ;;  %v4454_v26 = vld [vmem:[%s6153_s0 + $0x230] sm:$0xff]  ;;  %v4470_v11 = vld [vmem:[%s6153_s0 + $0x258] sm:$0xff] }
  0x9e   :  { %v903_v55 = vadd.f32 %v902_v59, %v896_v18  ;;  %v927_v58 = vmul.f32 %v4408_v24, %v4061_v50  ;;  %6411 = vst [vmem:[#allocation16_spill] sm:$0xff] %v4449_v38  ;;  %v875_v36 = vadd.f32 %v874_v0, %v868_v48  ;;  %v4459_v59 = vld [vmem:[%s6153_s0 + $0x238] sm:$0xff]  ;;  %v954_v54 = vmul.f32 %v4417_v39, %v4013_v20 }
  0x9f   :  { %6412 = vst [vmem:[#allocation22_spill] sm:$0xff] %v4459_v59  ;;  %v932_v4 = vadd.f32 %v931_v49, %v925_v5  ;;  %v955_v18 = vmul.f32 %v4422_v1, %v4018_v19  ;;  %v819_v37 = vadd.f32 %v818_v44, %v817_v34  ;;  %v847_v24 = vrot.slane %v846_v60, 2  ;;  %6413 = vst [vmem:[#allocation23_spill] sm:$0xff] %v4470_v11  ;;  %v4479_v34 = vld [vmem:[%s6153_s0 + $0x280] sm:$0xff] }
  0xa0   :  { %v899_v48 = vmul.f32 %v4433_v6, %v4128_v7  ;;  %v904_v0 = vadd.f32 %v903_v55, %v897_v22  ;;  %v876_v15 = vrot.slane %v875_v36, 4  ;;  %v928_v5 = vmul.f32 %v4442_v46, %v4081_v51  ;;  %6414 = vst [vmem:[#allocation24_spill] sm:$0xff] %v4479_v34  ;;  %v4484_v55 = vld [vmem:[%s6153_s0 + $0x288] sm:$0xff] }
  0xa1   :  { %v933_v49 = vadd.f32 %v932_v4, %v926_v8  ;;  %v956_v39 = vmul.f32 %v4449_v38, %v4032_v56  ;;  %6415 = vst [vmem:[#allocation25_spill] sm:$0xff] %v4484_v55  ;;  %820 = vst [vmem:[%s6154_s1 + $0x1c] sm:$0x1] %v819_v37  ;;  %v848_v22 = vadd.f32 %v847_v24, %v846_v60  ;;  %v4499_v38 = vld [vmem:[%s6153_s0 + $0x260] sm:$0xff]  ;;  %v4504_v6 = vld [vmem:[%s6153_s0 + $0x268] sm:$0xff] }
  0xa2   :  { %821 = vst [vmem:[%s6154_s1 + $0x32] sm:$0x1] %v819_v37  ;;  %v905_v8 = vadd.f32 %v904_v0, %v898_v61  ;;  %v929_v44 = vmul.f32 %v4454_v26, %v4086_v42  ;;  %v930_v4 = vmul.f32 %v4459_v59, %v4128_v7  ;;  %6416 = vst [vmem:[#allocation26_spill] sm:$0xff] %v4499_v38  ;;  %v4511_v61 = vld [vmem:[%s6153_s0 + $0x290] sm:$0xff] }
  0xa3   :  { %v877_v46 = vadd.f32 %v876_v15, %v875_v36  ;;  %v934_v1 = vadd.f32 %v933_v49, %v927_v58  ;;  %6417 = vst [vmem:[#allocation27_spill] sm:$0xff] %v4504_v6  ;;  %v957_v60 = vmul.f32 %v4470_v11, %v4042_v29  ;;  %v962_v24 = vadd.f32 %v955_v18, %v954_v54  ;;  %v4516_v15 = vld [vmem:[%s6153_s0 + $0x270] sm:$0xff] }
  0xa4   :  { %6418 = vst [vmem:[#allocation29_spill] sm:$0xff] %v4511_v61  ;;  %v849_v37 = vrot.slane %v848_v22, 1  ;;  %v906_v0 = vadd.f32 %v905_v8, %v899_v48  ;;  %6419 = vst [vmem:[#allocation28_spill] sm:$0xff] %v4516_v15  ;;  %v985_v36 = vmul.f32 %v4479_v34, %v4013_v20  ;;  %v986_v58 = vmul.f32 %v4484_v55, %v4018_v19  ;;  %v4527_v48 = vld [vmem:[%s6153_s0 + $0x298] sm:$0xff]  ;;  %v4532_v8 = vld [vmem:[%s6153_s0 + $0x2c0] sm:$0xff] }
  0xa5   :  { %v878_v49 = vrot.slane %v877_v46, 2  ;;  %v935_v54 = vadd.f32 %v934_v1, %v928_v5  ;;  %v958_v18 = vmul.f32 %v4499_v38, %v4061_v50  ;;  %v963_v59 = vadd.f32 %v962_v24, %v956_v39  ;;  %6420 = vst [vmem:[#allocation31_spill] sm:$0xff] %v4527_v48  ;;  %6421 = vst [vmem:[#allocation30_spill] sm:$0xff] %v4532_v8  ;;  %v4541_v39 = vld [vmem:[%s6153_s0 + $0x2c8] sm:$0xff]  ;;  %v4546_v38 = vld [vmem:[%s6153_s0 + $0x278] sm:$0xff] }
  0xa6   :  { %v850_v34 = vadd.f32 %v849_v37, %v848_v22  ;;  %v907_v11 = vrot.slane %v906_v0, 4  ;;  %v959_v55 = vmul.f32 %v4504_v6, %v4081_v51  ;;  %v987_v1 = vmul.f32 %v4511_v61, %v4032_v56  ;;  %6422 = vst [vmem:[#allocation32_spill] sm:$0xff] %v4541_v39  ;;  %6423 = vst [vmem:[#allocation33_spill] sm:$0xff] %v4546_v38  ;;  %v4553_v6 = vld [vmem:[%s6153_s0 + $0x2a0] sm:$0xff] }
  0xa7   :  { %v879_v5 = vadd.f32 %v878_v49, %v877_v46  ;;  %v936_v24 = vadd.f32 %v935_v54, %v929_v44  ;;  %v960_v22 = vmul.f32 %v4516_v15, %v4086_v42  ;;  %v964_v37 = vadd.f32 %v963_v59, %v957_v60  ;;  %6424 = vst [vmem:[#allocation34_spill] sm:$0xff] %v4553_v6  ;;  %v4566_v59 = vld [vmem:[%s6153_s0 + $0x2d0] sm:$0xff] }
  0xa8   :  { %851 = vst [vmem:[%s6154_s1 + $0x1d] sm:$0x1] %v850_v34  ;;  %852 = vst [vmem:[%s6154_s1 + $0x3e] sm:$0x1] %v850_v34  ;;  %v908_v46 = vadd.f32 %v907_v11, %v906_v0  ;;  %v988_v44 = vmul.f32 %v4527_v48, %v4042_v29  ;;  %v993_v49 = vadd.f32 %v986_v58, %v985_v36  ;;  %v4573_v34 = vld [vmem:[%s6153_s0 + $0x2a8] sm:$0xff]  ;;  %v4578_v11 = vld [vmem:[%s6153_s0 + $0x2b0] sm:$0xff] }
  0xa9   :  { %v1016_v60 = vmul.f32 %v4532_v8, %v4013_v20  ;;  %v880_v54 = vrot.slane %v879_v5, 1  ;;  %v937_v15 = vadd.f32 %v936_v24, %v930_v4  ;;  %v965_v61 = vadd.f32 %v964_v37, %v958_v18  ;;  %v4589_v18 = vld [vmem:[%s6153_s0 + $0x2d8] sm:$0xff] }
  0xaa   :  { %v1017_v0 = vmul.f32 %v4541_v39, %v4018_v19  ;;  %v909_v36 = vrot.slane %v908_v46, 2  ;;  %v961_v20 = vmul.f32 %v4546_v38, %v4128_v7  ;;  %v989_v4 = vmul.f32 %v4553_v6, %v4061_v50  ;;  %6425 = vst [vmem:[#allocation35_spill] sm:$0xff] %v4589_v18 }
  0xab   :  { %v994_v58 = vadd.f32 %v993_v49, %v987_v1  ;;  %v881_v24 = vadd.f32 %v880_v54, %v879_v5  ;;  %v938_v37 = vrot.slane %v937_v15, 4  ;;  %v966_v8 = vadd.f32 %v965_v61, %v959_v55  ;;  %v4600_v1 = vld [vmem:[%s6153_s0 + $0x2e0] sm:$0xff]  ;;  %v4611_v61 = vld [vmem:[%s6153_s0 + $0x2b8] sm:$0xff]  ;;  %v4618_v54 = vld [vmem:[%s6153_s0 + $0x2e8] sm:$0xff] }
  0xac   :  { %v1018_v48 = vmul.f32 %v4566_v59, %v4032_v56  ;;  %v910_v19 = vadd.f32 %v909_v36, %v908_v46  ;;  %v990_v39 = vmul.f32 %v4573_v34, %v4081_v51  ;;  %v991_v38 = vmul.f32 %v4578_v11, %v4086_v42 }
  0xad   :  { %v995_v6 = vadd.f32 %v994_v58, %v988_v44  ;;  %882 = vst [vmem:[%s6154_s1 + $0x1e] sm:$0x1] %v881_v24  ;;  %883 = vst [vmem:[%s6154_s1 + $0x4a] sm:$0x1] %v881_v24  ;;  %v939_v56 = vadd.f32 %v938_v37, %v937_v15  ;;  %v967_v55 = vadd.f32 %v966_v8, %v960_v22 }
  0xae   :  { %v1019_v5 = vmul.f32 %v4589_v18, %v4042_v29  ;;  %v1024_v46 = vadd.f32 %v1017_v0, %v1016_v60  ;;  %v911_v44 = vrot.slane %v910_v19, 1  ;;  %v1047_v15 = vmul.f32 %v4047_v35, %v4047_v35  ;;  %v4627_v29 = vld [vmem:[%s6153_s0 + $0x2f0] sm:$0xff] }
  0xaf   :  { %v996_v49 = vadd.f32 %v995_v6, %v989_v4  ;;  %v1048_v8 = vmul.f32 %v4055_v16, %v4055_v16  ;;  %v940_v22 = vrot.slane %v939_v56, 2  ;;  %v968_v36 = vadd.f32 %v967_v55, %v961_v20 }
  0xb0   :  { %v1020_v6 = vmul.f32 %v4600_v1, %v4061_v50  ;;  %v1025_v60 = vadd.f32 %v1024_v46, %v1018_v48  ;;  %v912_v0 = vadd.f32 %v911_v44, %v910_v19  ;;  %v992_v4 = vmul.f32 %v4611_v61, %v4128_v7  ;;  %v4646_v48 = vld [vmem:[%s6153_s0 + $0x2f8] sm:$0xff] }
  0xb1   :  { %v997_v58 = vadd.f32 %v996_v49, %v990_v39  ;;  %v1049_v24 = vmul.f32 %v4074_v25, %v4074_v25  ;;  %v941_v37 = vadd.f32 %v940_v22, %v939_v56  ;;  %v969_v18 = vrot.slane %v968_v36, 4 }
  0xb2   :  { %v1021_v20 = vmul.f32 %v4618_v54, %v4081_v51  ;;  %v1026_v55 = vadd.f32 %v1025_v60, %v1019_v5  ;;  %913 = vst [vmem:[%s6154_s1 + $0x1f] sm:$0x1] %v912_v0  ;;  %914 = vst [vmem:[%s6154_s1 + $0x56] sm:$0x1] %v912_v0  ;;  %v1022_v39 = vmul.f32 %v4627_v29, %v4086_v42 }
  0xb3   :  { %v998_v50 = vadd.f32 %v997_v58, %v991_v38  ;;  %v1050_v51 = vmul.f32 %v4096_v43, %v4096_v43  ;;  %v1055_v19 = vadd.f32 %v1048_v8, %v1047_v15  ;;  %v942_v56 = vrot.slane %v941_v37, 1 }
  0xb4   :  { %v970_v5 = vadd.f32 %v969_v18, %v968_v36  ;;  %v1027_v46 = vadd.f32 %v1026_v55, %v1020_v6  ;;  %v1051_v44 = vmul.f32 %v4117_v63, %v4117_v63  ;;  %v1077_v22 = vmul.f32 %v4103_v53, %v4047_v35 }
  0xb5   :  { %v999_v49 = vadd.f32 %v998_v50, %v992_v4  ;;  %v1056_v38 = vadd.f32 %v1055_v19, %v1049_v24  ;;  %v1078_v60 = vmul.f32 %v4108_v27, %v4055_v16  ;;  %v943_v0 = vadd.f32 %v942_v56, %v941_v37 }
  0xb6   :  { %v971_v42 = vrot.slane %v970_v5, 2  ;;  %v1023_v58 = vmul.f32 %v4646_v48, %v4128_v7  ;;  %v1028_v15 = vadd.f32 %v1027_v46, %v1021_v20  ;;  %v1052_v18 = vmul.f32 %v4140_v21, %v4140_v21 }
  0xb7   :  { %v1000_v8 = vrot.slane %v999_v49, 4  ;;  %v1057_v36 = vadd.f32 %v1056_v38, %v1050_v51  ;;  %v1079_v6 = vmul.f32 %v4135_v30, %v4074_v25  ;;  %944 = vst [vmem:[%s6154_s1 + $0x20] sm:$0x1] %v943_v0  ;;  %945 = vst [vmem:[%s6154_s1 + $0x62] sm:$0x1] %v943_v0  ;;  %v1053_v7 = vmul.f32 %v4149_v13, %v4149_v13 }
  0xb8   :  { %v972_v53 = vadd.f32 %v971_v42, %v970_v5  ;;  %v1029_v27 = vadd.f32 %v1028_v15, %v1022_v39  ;;  %v1054_v4 = vmul.f32 %v4188_v28, %v4188_v28  ;;  %v1080_v30 = vmul.f32 %v4156_v3, %v4096_v43 }
  0xb9   :  { %v1001_v24 = vadd.f32 %v1000_v8, %v999_v49  ;;  %v1058_v37 = vadd.f32 %v1057_v36, %v1051_v44  ;;  %v1085_v20 = vadd.f32 %v1078_v60, %v1077_v22  ;;  %v1108_v51 = vmul.f32 %v4172_v40, %v4047_v35 }
  0xba   :  { %v973_v55 = vrot.slane %v972_v53, 1  ;;  %v1030_v50 = vadd.f32 %v1029_v27, %v1023_v58  ;;  %v1109_v39 = vmul.f32 %v4177_v9, %v4055_v16  ;;  %v1081_v5 = vmul.f32 %v4163_v17, %v4117_v63 }
  0xbb   :  { %v1002_v19 = vrot.slane %v1001_v24, 2  ;;  %v1059_v56 = vadd.f32 %v1058_v37, %v1052_v18  ;;  %v1086_v46 = vadd.f32 %v1085_v20, %v1079_v6  ;;  %v1082_v3 = vmul.f32 %v4197_v10, %v4140_v21 }
  0xbc   :  { %v974_v49 = vadd.f32 %v973_v55, %v972_v53  ;;  %v1031_v44 = vrot.slane %v1030_v50, 4  ;;  %v1110_v38 = vmul.f32 %v4204_v52, %v4074_v25  ;;  %v1083_v40 = vmul.f32 %v4209_v2, %v4149_v13 }
  0xbd   :  { %v1003_v22 = vadd.f32 %v1002_v19, %v1001_v24  ;;  %v1060_v60 = vadd.f32 %v1059_v56, %v1053_v7  ;;  %v1087_v9 = vadd.f32 %v1086_v46, %v1080_v30  ;;  %v1111_v10 = vmul.f32 %v4225_v14, %v4096_v43 }
  0xbe   :  { %975 = vst [vmem:[%s6154_s1 + $0x21] sm:$0x1] %v974_v49  ;;  %976 = vst [vmem:[%s6154_s1 + $0x6e] sm:$0x1] %v974_v49  ;;  %v1032_v17 = vadd.f32 %v1031_v44, %v1030_v50  ;;  %v1116_v0 = vadd.f32 %v1109_v39, %v1108_v51  ;;  %v1139_v52 = vmul.f32 %v4234_v31, %v4047_v35  ;;  %v6426_v51 = vld [vmem:[#allocation2_spill] sm:$0xff]  ;;  %v6428_v49 = vld [vmem:[#allocation5_spill] sm:$0xff] }
  0xbf   :  { %v1004_v42 = vrot.slane %v1003_v22, 1  ;;  %v1061_v58 = vadd.f32 %v1060_v60, %v1054_v4  ;;  %v1088_v2 = vadd.f32 %v1087_v9, %v1081_v5  ;;  %v1140_v15 = vmul.f32 %v4239_v33, %v4055_v16  ;;  %v6427_v5 = vld [vmem:[#allocation3_spill] sm:$0xff] }
  0xc0   :  { %v1033_v8 = vrot.slane %v1032_v17, 2  ;;  %v1084_v18 = vmul.f32 %v4214_v23, %v4188_v28  ;;  %v1112_v36 = vmul.f32 %v4254_v62, %v4117_v63  ;;  %v1117_v6 = vadd.f32 %v1116_v0, %v1110_v38 }
  0xc1   :  { %v1005_v53 = vadd.f32 %v1004_v42, %v1003_v22  ;;  %v1062_v14 = vrot.slane %v1061_v58, 4  ;;  %v1089_v27 = vadd.f32 %v1088_v2, %v1082_v3  ;;  %v1141_v31 = vmul.f32 %v4266_v41, %v4074_v25  ;;  %v6432_v2 = vld [vmem:[#allocation11_spill] sm:$0xff] }
  0xc2   :  { %v1034_v7 = vadd.f32 %v1033_v8, %v1032_v17  ;;  %v1113_v4 = vmul.f32 %v4259_v47, %v4140_v21  ;;  %v1114_v33 = vmul.f32 %v4271_v57, %v4149_v13  ;;  %v1118_v24 = vadd.f32 %v1117_v6, %v1111_v10  ;;  %v6431_v17 = vld [vmem:[#allocation10_spill] sm:$0xff] }
  0xc3   :  { %1006 = vst [vmem:[%s6154_s1 + $0x22] sm:$0x1] %v1005_v53  ;;  %1007 = vst [vmem:[%s6154_s1 + $0x7a] sm:$0x1] %v1005_v53  ;;  %v1063_v23 = vadd.f32 %v1062_v14, %v1061_v58  ;;  %v1090_v62 = vadd.f32 %v1089_v27, %v1083_v40  ;;  %v1142_v41 = vmul.f32 %v4282_v12, %v4096_v43  ;;  %v6430_v40 = vld [vmem:[#allocation6_spill] sm:$0xff]  ;;  %v6434_v53 = vld [vmem:[#allocation8_spill] sm:$0xff] }
  0xc4   :  { %v1147_v37 = vadd.f32 %v1140_v15, %v1139_v52  ;;  %v1035_v30 = vrot.slane %v1034_v7, 1  ;;  %v1119_v47 = vadd.f32 %v1118_v24, %v1112_v36  ;;  %v1170_v57 = vmul.f32 %v4287_v32, %v4047_v35  ;;  %v6429_v32 = vld [vmem:[#allocation4_spill] sm:$0xff]  ;;  %v6433_v36 = vld [vmem:[#allocation7_spill] sm:$0xff] }
  0xc5   :  { %v1171_v20 = vmul.f32 %v4296_v45, %v4055_v16  ;;  %v1064_v55 = vrot.slane %v1063_v23, 2  ;;  %v1091_v50 = vadd.f32 %v1090_v62, %v1084_v18  ;;  %v1143_v39 = vmul.f32 %v6426_v51, %v4117_v63 }
  0xc6   :  { %v1148_v19 = vadd.f32 %v1147_v37, %v1141_v31  ;;  %v1036_v56 = vadd.f32 %v1035_v30, %v1034_v7  ;;  %v1115_v46 = vmul.f32 %v6427_v5, %v4188_v28  ;;  %v1120_v12 = vadd.f32 %v1119_v47, %v1113_v4  ;;  %v6435_v7 = vld [vmem:[#allocation15_spill] sm:$0xff]  ;;  %v6437_v37 = vld [vmem:[#allocation12_spill] sm:$0xff] }
  0xc7   :  { %v1172_v44 = vmul.f32 %v6428_v49, %v4074_v25  ;;  %v1065_v3 = vadd.f32 %v1064_v55, %v1063_v23  ;;  %v1092_v38 = vrot.slane %v1091_v50, 4  ;;  %v1144_v22 = vmul.f32 %v6429_v32, %v4140_v21  ;;  %v6436_v23 = vld [vmem:[#allocation9_spill] sm:$0xff] }
  0xc8   :  { %v1149_v45 = vadd.f32 %v1148_v19, %v1142_v41  ;;  %1037 = vst [vmem:[%s6154_s1 + $0x23] sm:$0x1] %v1036_v56  ;;  %1038 = vst [vmem:[%s6154_s1 + $0x86] sm:$0x1] %v1036_v56  ;;  %v1121_v60 = vadd.f32 %v1120_v12, %v1114_v33  ;;  %v1145_v9 = vmul.f32 %v6430_v40, %v4149_v13  ;;  %v6440_v56 = vld [vmem:[#allocation13_spill] sm:$0xff] }
  0xc9   :  { %v1173_v10 = vmul.f32 %v6431_v17, %v4096_v43  ;;  %v1178_v0 = vadd.f32 %v1171_v20, %v1170_v57  ;;  %v1066_v52 = vrot.slane %v1065_v3, 1  ;;  %v1093_v42 = vadd.f32 %v1092_v38, %v1091_v50  ;;  %v6438_v20 = vld [vmem:[#allocation17_spill] sm:$0xff]  ;;  %v6439_v50 = vld [vmem:[#allocation20_spill] sm:$0xff]  ;;  %v6442_v38 = vld [vmem:[#allocation19_spill] sm:$0xff] }
  0xca   :  { %v1150_v58 = vadd.f32 %v1149_v45, %v1143_v39  ;;  %v1174_v15 = vmul.f32 %v6432_v2, %v4117_v63  ;;  %v1122_v8 = vadd.f32 %v1121_v60, %v1115_v46  ;;  %v1201_v6 = vmul.f32 %v6433_v36, %v4047_v35  ;;  %v6443_v60 = vld [vmem:[#allocation14_spill] sm:$0xff] }
  0xcb   :  { %v1179_v18 = vadd.f32 %v1178_v0, %v1172_v44  ;;  %v1202_v14 = vmul.f32 %v6434_v53, %v4055_v16  ;;  %v1067_v27 = vadd.f32 %v1066_v52, %v1065_v3  ;;  %v1094_v31 = vrot.slane %v1093_v42, 2  ;;  %v6441_v44 = vld [vmem:[#allocation18_spill] sm:$0xff]  ;;  %v6444_v0 = vld [vmem:[#allocation21_spill] sm:$0xff] }
  0xcc   :  { %v1146_v4 = vmul.f32 %v6435_v7, %v4188_v28  ;;  %v1151_v33 = vadd.f32 %v1150_v58, %v1144_v22  ;;  %v1123_v24 = vrot.slane %v1122_v8, 4  ;;  %v1175_v62 = vmul.f32 %v6436_v23, %v4140_v21 }
  0xcd   :  { %v1180_v41 = vadd.f32 %v1179_v18, %v1173_v10  ;;  %v1203_v30 = vmul.f32 %v6437_v37, %v4074_v25  ;;  %1068 = vst [vmem:[%s6154_s1 + $0x27] sm:$0x1] %v1067_v27  ;;  %v1095_v47 = vadd.f32 %v1094_v31, %v1093_v42  ;;  %v1176_v55 = vmul.f32 %v6438_v20, %v4149_v13  ;;  %v6445_v42 = vld [vmem:[#allocation16_spill] sm:$0xff]  ;;  %v6450_v37 = vld [vmem:[#allocation26_spill] sm:$0xff] }
  0xce   :  { %v1152_v57 = vadd.f32 %v1151_v33, %v1145_v9  ;;  %v1177_v51 = vmul.f32 %v6439_v50, %v4188_v28  ;;  %v1124_v39 = vadd.f32 %v1123_v24, %v1122_v8  ;;  %v1204_v5 = vmul.f32 %v6440_v56, %v4096_v43  ;;  %v6447_v27 = vld [vmem:[#allocation24_spill] sm:$0xff]  ;;  %v6448_v33 = vld [vmem:[#allocation25_spill] sm:$0xff] }
  0xcf   :  { %v1181_v19 = vadd.f32 %v1180_v41, %v1174_v15  ;;  %v1209_v46 = vadd.f32 %v1202_v14, %v1201_v6  ;;  %v1096_v12 = vrot.slane %v1095_v47, 1  ;;  %v1232_v3 = vmul.f32 %v6441_v44, %v4047_v35  ;;  %v6446_v6 = vld [vmem:[#allocation23_spill] sm:$0xff]  ;;  %v6451_v50 = vld [vmem:[#allocation29_spill] sm:$0xff] }
  0xd0   :  { %v1153_v49 = vadd.f32 %v1152_v57, %v1146_v4  ;;  %v1233_v32 = vmul.f32 %v6442_v38, %v4055_v16  ;;  %v1125_v22 = vrot.slane %v1124_v39, 2  ;;  %v1205_v40 = vmul.f32 %v6443_v60, %v4117_v63  ;;  %v6455_v60 = vld [vmem:[#allocation30_spill] sm:$0xff] }
  0xd1   :  { %v1182_v45 = vadd.f32 %v1181_v19, %v1175_v62  ;;  %v1210_v9 = vadd.f32 %v1209_v46, %v1203_v30  ;;  %v1097_v17 = vadd.f32 %v1096_v12, %v1095_v47  ;;  %v1206_v52 = vmul.f32 %v6444_v0, %v4140_v21  ;;  %v6449_v62 = vld [vmem:[#allocation22_spill] sm:$0xff] }
  0xd2   :  { %v1154_v10 = vrot.slane %v1153_v49, 4  ;;  %v1234_v58 = vmul.f32 %v6445_v42, %v4074_v25  ;;  %v1126_v2 = vadd.f32 %v1125_v22, %v1124_v39  ;;  %v1207_v8 = vmul.f32 %v4454_v26, %v4149_v13 }
  0xd3   :  { %v1183_v15 = vadd.f32 %v1182_v45, %v1176_v55  ;;  %v1211_v18 = vadd.f32 %v1210_v9, %v1204_v5  ;;  %1098 = vst [vmem:[%s6154_s1 + $0x28] sm:$0x1] %v1097_v17  ;;  %1099 = vst [vmem:[%s6154_s1 + $0x33] sm:$0x1] %v1097_v17  ;;  %v1235_v53 = vmul.f32 %v6446_v6, %v4096_v43  ;;  %v6453_v5 = vld [vmem:[#allocation28_spill] sm:$0xff] }
  0xd4   :  { %v1155_v36 = vadd.f32 %v1154_v10, %v1153_v49  ;;  %v1240_v14 = vadd.f32 %v1233_v32, %v1232_v3  ;;  %v1263_v31 = vmul.f32 %v6447_v27, %v4047_v35  ;;  %v1127_v7 = vrot.slane %v1126_v2, 1  ;;  %v6454_v3 = vld [vmem:[#allocation31_spill] sm:$0xff]  ;;  %v6456_v9 = vld [vmem:[#allocation32_spill] sm:$0xff] }
  0xd5   :  { %v1184_v4 = vadd.f32 %v1183_v15, %v1177_v51  ;;  %v1212_v26 = vadd.f32 %v1211_v18, %v1205_v40  ;;  %v1264_v24 = vmul.f32 %v6448_v33, %v4055_v16  ;;  %v1208_v41 = vmul.f32 %v6449_v62, %v4188_v28  ;;  %v6452_v51 = vld [vmem:[#allocation27_spill] sm:$0xff]  ;;  %v6458_v15 = vld [vmem:[#allocation33_spill] sm:$0xff] }
  0xd6   :  { %v1156_v23 = vrot.slane %v1155_v36, 2  ;;  %v1236_v30 = vmul.f32 %v6450_v37, %v4117_v63  ;;  %v1241_v47 = vadd.f32 %v1240_v14, %v1234_v58  ;;  %v1128_v57 = vadd.f32 %v1127_v7, %v1126_v2  ;;  %v4818_v14 = vld [vmem:[%s6153_s0 + $0x100] sm:$0xff]  ;;  %v4823_v27 = vld [vmem:[%s6153_s0 + $0x108] sm:$0xff] }
  0xd7   :  { %v1185_v20 = vrot.slane %v1184_v4, 4  ;;  %v1213_v55 = vadd.f32 %v1212_v26, %v1206_v52  ;;  %v1265_v39 = vmul.f32 %v6451_v50, %v4074_v25  ;;  %v1237_v56 = vmul.f32 %v6452_v51, %v4140_v21  ;;  %v6457_v52 = vld [vmem:[#allocation34_spill] sm:$0xff] }
  0xd8   :  { %v1157_v19 = vadd.f32 %v1156_v23, %v1155_v36  ;;  %v1238_v46 = vmul.f32 %v6453_v5, %v4149_v13  ;;  %v1242_v12 = vadd.f32 %v1241_v47, %v1235_v53  ;;  %1129 = vst [vmem:[%s6154_s1 + $0x29] sm:$0x1] %v1128_v57  ;;  %1130 = vst [vmem:[%s6154_s1 + $0x3f] sm:$0x1] %v1128_v57  ;;  %v4840_v23 = vld [vmem:[%s6153_s0 + $0x110] sm:$0xff] }
  0xd9   :  { %v1186_v49 = vadd.f32 %v1185_v20, %v1184_v4  ;;  %v1214_v44 = vadd.f32 %v1213_v55, %v1207_v8  ;;  %v1266_v38 = vmul.f32 %v6454_v3, %v4096_v43  ;;  %v1271_v32 = vadd.f32 %v1264_v24, %v1263_v31 }
  0xda   :  { %v1158_v22 = vrot.slane %v1157_v19, 1  ;;  %v1243_v45 = vadd.f32 %v1242_v12, %v1236_v30  ;;  %v1294_v40 = vmul.f32 %v6455_v60, %v4047_v35  ;;  %v1295_v17 = vmul.f32 %v6456_v9, %v4055_v16  ;;  %v4885_v12 = vld [vmem:[%s6153_s0 + $0x128] sm:$0xff]  ;;  %v4913_v9 = vld [vmem:[%s6153_s0 + $0x180] sm:$0xff] }
  0xdb   :  { %v1187_v10 = vrot.slane %v1186_v49, 2  ;;  %v1215_v0 = vadd.f32 %v1214_v44, %v1208_v41  ;;  %v1267_v42 = vmul.f32 %v6457_v52, %v4117_v63  ;;  %v1272_v58 = vadd.f32 %v1271_v32, %v1265_v39  ;;  %v4860_v39 = vld [vmem:[%s6153_s0 + $0x140] sm:$0xff] }
  0xdc   :  { %v1159_v2 = vadd.f32 %v1158_v22, %v1157_v19  ;;  %v1239_v8 = vmul.f32 %v6458_v15, %v4188_v28  ;;  %v1244_v18 = vadd.f32 %v1243_v45, %v1237_v56  ;;  %v1296_v36 = vmul.f32 %v4566_v59, %v4074_v25  ;;  %v4880_v56 = vld [vmem:[%s6153_s0 + $0x120] sm:$0xff]  ;;  %v4927_v15 = vld [vmem:[%s6153_s0 + $0x138] sm:$0xff] }
  0xdd   :  { %v1188_v6 = vadd.f32 %v1187_v10, %v1186_v49  ;;  %v1216_v53 = vrot.slane %v1215_v0, 4  ;;  %v1268_v35 = vmul.f32 %v4573_v34, %v4140_v21  ;;  %v1273_v16 = vadd.f32 %v1272_v58, %v1266_v38  ;;  %v6459_v34 = vld [vmem:[#allocation35_spill] sm:$0xff] }
  0xde   :  { %1160 = vst [vmem:[%s6154_s1 + $0x2a] sm:$0x1] %v1159_v2  ;;  %1161 = vst [vmem:[%s6154_s1 + $0x4b] sm:$0x1] %v1159_v2  ;;  %v1245_v25 = vadd.f32 %v1244_v18, %v1238_v46  ;;  %v1269_v59 = vmul.f32 %v4578_v11, %v4149_v13  ;;  %v1297_v31 = vmul.f32 %v6459_v34, %v4096_v43 }
  0xdf   :  { %v1302_v7 = vadd.f32 %v1295_v17, %v1294_v40  ;;  %v1189_v4 = vrot.slane %v1188_v6, 1  ;;  %v1217_v26 = vadd.f32 %v1216_v53, %v1215_v0  ;;  %v1274_v33 = vadd.f32 %v1273_v16, %v1267_v42  ;;  %v4908_v40 = vld [vmem:[%s6153_s0 + $0x158] sm:$0xff]  ;;  %v4922_v42 = vld [vmem:[%s6153_s0 + $0x188] sm:$0xff]  ;;  %v4947_v16 = vld [vmem:[%s6153_s0 + $0x190] sm:$0xff] }
  0xe0   :  { %v1298_v24 = vmul.f32 %v4600_v1, %v4117_v63  ;;  %v1246_v62 = vadd.f32 %v1245_v25, %v1239_v8  ;;  %v1325_v11 = vmul.f32 %v4818_v14, %v4818_v14  ;;  %v1326_v43 = vmul.f32 %v4823_v27, %v4823_v27  ;;  %v4851_v63 = vld [vmem:[%s6153_s0 + $0x118] sm:$0xff] }
  0xe1   :  { %v1303_v41 = vadd.f32 %v1302_v7, %v1296_v36  ;;  %v1190_v37 = vadd.f32 %v1189_v4, %v1188_v6  ;;  %v1218_v30 = vrot.slane %v1217_v26, 2  ;;  %v1270_v47 = vmul.f32 %v4611_v61, %v4188_v28  ;;  %v4865_v61 = vld [vmem:[%s6153_s0 + $0x148] sm:$0xff]  ;;  %v4934_v36 = vld [vmem:[%s6153_s0 + $0x160] sm:$0xff]  ;;  %v4959_v4 = vld [vmem:[%s6153_s0 + $0x170] sm:$0xff] }
  0xe2   :  { %v1275_v57 = vadd.f32 %v1274_v33, %v1268_v35  ;;  %v1247_v1 = vrot.slane %v1246_v62, 4  ;;  %v1299_v20 = vmul.f32 %v4618_v54, %v4140_v21  ;;  %v1327_v50 = vmul.f32 %v4840_v23, %v4840_v23  ;;  %v4954_v7 = vld [vmem:[%s6153_s0 + $0x168] sm:$0xff] }
  0xe3   :  { %v1304_v55 = vadd.f32 %v1303_v41, %v1297_v31  ;;  %1191 = vst [vmem:[%s6154_s1 + $0x2b] sm:$0x1] %v1190_v37  ;;  %1192 = vst [vmem:[%s6154_s1 + $0x57] sm:$0x1] %v1190_v37  ;;  %v1219_v21 = vadd.f32 %v1218_v30, %v1217_v26  ;;  %v1300_v19 = vmul.f32 %v4627_v29, %v4149_v13  ;;  %v4892_v13 = vld [vmem:[%s6153_s0 + $0x150] sm:$0xff] }
  0xe4   :  { %v1276_v54 = vadd.f32 %v1275_v57, %v1269_v59  ;;  %v1301_v51 = vmul.f32 %v4646_v48, %v4188_v28  ;;  %v1248_v5 = vadd.f32 %v1247_v1, %v1246_v62  ;;  %v1328_v49 = vmul.f32 %v4851_v63, %v4851_v63  ;;  %v4897_v48 = vld [vmem:[%s6153_s0 + $0x130] sm:$0xff]  ;;  %v4977_v57 = vld [vmem:[%s6153_s0 + $0x1c0] sm:$0xff]  ;;  %v4982_v1 = vld [vmem:[%s6153_s0 + $0x1c8] sm:$0xff] }
  0xe5   :  { %v1305_v46 = vadd.f32 %v1304_v55, %v1298_v24  ;;  %v1333_v44 = vadd.f32 %v1326_v43, %v1325_v11  ;;  %v1220_v28 = vrot.slane %v1219_v21, 1  ;;  %v1355_v3 = vmul.f32 %v4860_v39, %v4818_v14  ;;  %v4970_v11 = vld [vmem:[%s6153_s0 + $0x198] sm:$0xff] }
  0xe6   :  { %v1277_v29 = vadd.f32 %v1276_v54, %v1270_v47  ;;  %v1356_v38 = vmul.f32 %v4865_v61, %v4823_v27  ;;  %v1249_v32 = vrot.slane %v1248_v5, 2  ;;  %v1329_v45 = vmul.f32 %v4880_v56, %v4880_v56  ;;  %v4991_v54 = vld [vmem:[%s6153_s0 + $0x1a0] sm:$0xff] }
  0xe7   :  { %v1306_v22 = vadd.f32 %v1305_v46, %v1299_v20  ;;  %v1334_v60 = vadd.f32 %v1333_v44, %v1327_v50  ;;  %v1221_v17 = vadd.f32 %v1220_v28, %v1219_v21  ;;  %v1330_v0 = vmul.f32 %v4885_v12, %v4885_v12  ;;  %v5009_v44 = vld [vmem:[%s6153_s0 + $0x1d0] sm:$0xff] }
  0xe8   :  { %v1278_v10 = vrot.slane %v1277_v29, 4  ;;  %v1357_v52 = vmul.f32 %v4892_v13, %v4840_v23  ;;  %v1250_v58 = vadd.f32 %v1249_v32, %v1248_v5  ;;  %v1331_v8 = vmul.f32 %v4897_v48, %v4897_v48  ;;  %v5002_v5 = vld [vmem:[%s6153_s0 + $0x178] sm:$0xff] }
  0xe9   :  { %v1307_v2 = vadd.f32 %v1306_v22, %v1300_v19  ;;  %v1335_v18 = vadd.f32 %v1334_v60, %v1328_v49  ;;  %1222 = vst [vmem:[%s6154_s1 + $0x2c] sm:$0x1] %v1221_v17  ;;  %1223 = vst [vmem:[%s6154_s1 + $0x63] sm:$0x1] %v1221_v17  ;;  %v1358_v53 = vmul.f32 %v4908_v40, %v4851_v63  ;;  %v5023_v60 = vld [vmem:[%s6153_s0 + $0x1b0] sm:$0xff] }
  0xea   :  { %v1279_v6 = vadd.f32 %v1278_v10, %v1277_v29  ;;  %v1363_v35 = vadd.f32 %v1356_v38, %v1355_v3  ;;  %v1386_v25 = vmul.f32 %v4913_v9, %v4818_v14  ;;  %v1251_v59 = vrot.slane %v1250_v58, 1  ;;  %v5014_v3 = vld [vmem:[%s6153_s0 + $0x1a8] sm:$0xff] }
  0xeb   :  { %v1308_v34 = vadd.f32 %v1307_v2, %v1301_v51  ;;  %v1336_v31 = vadd.f32 %v1335_v18, %v1329_v45  ;;  %v1387_v26 = vmul.f32 %v4922_v42, %v4823_v27  ;;  %v1332_v24 = vmul.f32 %v4927_v15, %v4927_v15 }
  0xec   :  { %v1280_v33 = vrot.slane %v1279_v6, 2  ;;  %v1359_v62 = vmul.f32 %v4934_v36, %v4880_v56  ;;  %v1364_v41 = vadd.f32 %v1363_v35, %v1357_v52  ;;  %v1252_v43 = vadd.f32 %v1251_v59, %v1250_v58  ;;  %v5046_v59 = vld [vmem:[%s6153_s0 + $0x200] sm:$0xff] }
  0xed   :  { %v1309_v37 = vrot.slane %v1308_v34, 4  ;;  %v1337_v30 = vadd.f32 %v1336_v31, %v1330_v0  ;;  %v1388_v47 = vmul.f32 %v4947_v16, %v4840_v23  ;;  %v1360_v55 = vmul.f32 %v4954_v7, %v4885_v12  ;;  %v5030_v0 = vld [vmem:[%s6153_s0 + $0x1d8] sm:$0xff] }
  0xee   :  { %v1281_v20 = vadd.f32 %v1280_v33, %v1279_v6  ;;  %v1361_v50 = vmul.f32 %v4959_v4, %v4897_v48  ;;  %v1365_v21 = vadd.f32 %v1364_v41, %v1358_v53  ;;  %1253 = vst [vmem:[%s6154_s1 + $0x2d] sm:$0x1] %v1252_v43  ;;  %1254 = vst [vmem:[%s6154_s1 + $0x6f] sm:$0x1] %v1252_v43 }
  0xef   :  { %v1310_v19 = vadd.f32 %v1309_v37, %v1308_v34  ;;  %v1338_v51 = vadd.f32 %v1337_v30, %v1331_v8  ;;  %v1389_v46 = vmul.f32 %v4970_v11, %v4851_v63  ;;  %v1394_v49 = vadd.f32 %v1387_v26, %v1386_v25  ;;  %v5037_v8 = vld [vmem:[%s6153_s0 + $0x1e0] sm:$0xff]  ;;  %v5051_v34 = vld [vmem:[%s6153_s0 + $0x208] sm:$0xff]  ;;  %v5062_v26 = vld [vmem:[%s6153_s0 + $0x1b8] sm:$0xff] }
  0xf0   :  { %v1282_v28 = vrot.slane %v1281_v20, 1  ;;  %v1366_v29 = vadd.f32 %v1365_v21, %v1359_v62  ;;  %v1417_v38 = vmul.f32 %v4977_v57, %v4818_v14  ;;  %v1418_v32 = vmul.f32 %v4982_v1, %v4823_v27  ;;  %v5071_v30 = vld [vmem:[%s6153_s0 + $0x1e8] sm:$0xff]  ;;  %v5088_v21 = vld [vmem:[%s6153_s0 + $0x1f8] sm:$0xff] }
  0xf1   :  { %v1311_v22 = vrot.slane %v1310_v19, 2  ;;  %v1339_v45 = vadd.f32 %v1338_v51, %v1332_v24  ;;  %v1390_v17 = vmul.f32 %v4991_v54, %v4880_v56  ;;  %v1395_v10 = vadd.f32 %v1394_v49, %v1388_v47  ;;  %6460 = vst [vmem:[#allocation36_spill] sm:$0xff] %v5088_v21 }
  0xf2   :  { %v1283_v52 = vadd.f32 %v1282_v28, %v1281_v20  ;;  %v1362_v58 = vmul.f32 %v5002_v5, %v4927_v15  ;;  %v1367_v2 = vadd.f32 %v1366_v29, %v1360_v55  ;;  %v1419_v18 = vmul.f32 %v5009_v44, %v4840_v23  ;;  %v5078_v20 = vld [vmem:[%s6153_s0 + $0x210] sm:$0xff] }
  0xf3   :  { %v1312_v6 = vadd.f32 %v1311_v22, %v1310_v19  ;;  %v1340_v53 = vrot.slane %v1339_v45, 4  ;;  %v1391_v35 = vmul.f32 %v5014_v3, %v4885_v12  ;;  %v1396_v25 = vadd.f32 %v1395_v10, %v1389_v46 }
  0xf4   :  { %1284 = vst [vmem:[%s6154_s1 + $0x2e] sm:$0x1] %v1283_v52  ;;  %1285 = vst [vmem:[%s6154_s1 + $0x7b] sm:$0x1] %v1283_v52  ;;  %v1368_v31 = vadd.f32 %v1367_v2, %v1361_v50  ;;  %v1392_v33 = vmul.f32 %v5023_v60, %v4897_v48  ;;  %v1420_v24 = vmul.f32 %v5030_v0, %v4851_v63  ;;  %v5083_v50 = vld [vmem:[%s6153_s0 + $0x1f0] sm:$0xff]  ;;  %v5108_v52 = vld [vmem:[%s6153_s0 + $0x240] sm:$0xff] }
  0xf5   :  { %v1425_v62 = vadd.f32 %v1418_v32, %v1417_v38  ;;  %v1313_v41 = vrot.slane %v1312_v6, 1  ;;  %v1341_v43 = vadd.f32 %v1340_v53, %v1339_v45  ;;  %v1397_v37 = vadd.f32 %v1396_v25, %v1390_v17  ;;  %v5099_v32 = vld [vmem:[%s6153_s0 + $0x218] sm:$0xff] }
  0xf6   :  { %v1421_v47 = vmul.f32 %v5037_v8, %v4880_v56  ;;  %v1369_v55 = vadd.f32 %v1368_v31, %v1362_v58  ;;  %v1448_v51 = vmul.f32 %v5046_v59, %v4818_v14  ;;  %v1449_v46 = vmul.f32 %v5051_v34, %v4823_v27  ;;  %v5113_v58 = vld [vmem:[%s6153_s0 + $0x248] sm:$0xff] }
  0xf7   :  { %v1426_v19 = vadd.f32 %v1425_v62, %v1419_v18  ;;  %v1314_v49 = vadd.f32 %v1313_v41, %v1312_v6  ;;  %v1342_v28 = vrot.slane %v1341_v43, 2  ;;  %v1393_v29 = vmul.f32 %v5062_v26, %v4927_v15  ;;  %6461 = vst [vmem:[#allocation37_spill] sm:$0xff] %v5113_v58  ;;  %v5140_v41 = vld [vmem:[%s6153_s0 + $0x250] sm:$0xff] }
  0xf8   :  { %v1398_v38 = vadd.f32 %v1397_v37, %v1391_v35  ;;  %v1370_v22 = vrot.slane %v1369_v55, 4  ;;  %v1422_v45 = vmul.f32 %v5071_v30, %v4885_v12  ;;  %v1450_v10 = vmul.f32 %v5078_v20, %v4840_v23  ;;  %v5128_v35 = vld [vmem:[%s6153_s0 + $0x220] sm:$0xff]  ;;  %6464 = vst [vmem:[#allocation40_spill] sm:$0xff] %v5140_v41 }
  0xf9   :  { %v1427_v17 = vadd.f32 %v1426_v19, %v1420_v24  ;;  %1315 = vst [vmem:[%s6154_s1 + $0x2f] sm:$0x1] %v1314_v49  ;;  %1316 = vst [vmem:[%s6154_s1 + $0x87] sm:$0x1] %v1314_v49  ;;  %v1343_v2 = vadd.f32 %v1342_v28, %v1341_v43  ;;  %v1423_v6 = vmul.f32 %v5083_v50, %v4897_v48  ;;  %v5133_v24 = vld [vmem:[%s6153_s0 + $0x228] sm:$0xff] }
  0xfa   :  { %v1399_v18 = vadd.f32 %v1398_v38, %v1392_v33  ;;  %v1424_v53 = vmul.f32 %v5088_v21, %v4927_v15  ;;  %6462 = vst [vmem:[#allocation39_spill] sm:$0xff] %v5128_v35  ;;  %v1371_v25 = vadd.f32 %v1370_v22, %v1369_v55  ;;  %6463 = vst [vmem:[#allocation38_spill] sm:$0xff] %v5133_v24  ;;  %v5161_v38 = vld [vmem:[%s6153_s0 + $0x280] sm:$0xff]  ;;  %v5175_v21 = vld [vmem:[%s6153_s0 + $0x238] sm:$0xff] }
  0xfb   :  { %v1428_v31 = vadd.f32 %v1427_v17, %v1421_v47  ;;  %v1451_v33 = vmul.f32 %v5099_v32, %v4851_v63  ;;  %v1456_v62 = vadd.f32 %v1449_v46, %v1448_v51  ;;  %v1344_v43 = vrot.slane %v1343_v2, 1  ;;  %v5145_v47 = vld [vmem:[%s6153_s0 + $0x230] sm:$0xff]  ;;  %6467 = vst [vmem:[#allocation44_spill] sm:$0xff] %v5161_v38  ;;  %6469 = vst [vmem:[#allocation41_spill] sm:$0xff] %v5175_v21 }
  0xfc   :  { %v1400_v37 = vadd.f32 %v1399_v18, %v1393_v29  ;;  %6465 = vst [vmem:[#allocation42_spill] sm:$0xff] %v5145_v47  ;;  %v1479_v55 = vmul.f32 %v5108_v52, %v4818_v14  ;;  %v1480_v19 = vmul.f32 %v5113_v58, %v4823_v27  ;;  %v1372_v49 = vrot.slane %v1371_v25, 2  ;;  %v5156_v29 = vld [vmem:[%s6153_s0 + $0x258] sm:$0xff] }
  0xfd   :  { %v1429_v51 = vadd.f32 %v1428_v31, %v1422_v45  ;;  %v1452_v46 = vmul.f32 %v5128_v35, %v4880_v56  ;;  %v1457_v28 = vadd.f32 %v1456_v62, %v1450_v10  ;;  %6466 = vst [vmem:[#allocation43_spill] sm:$0xff] %v5156_v29  ;;  %v1345_v22 = vadd.f32 %v1344_v43, %v1343_v2  ;;  %v5170_v10 = vld [vmem:[%s6153_s0 + $0x288] sm:$0xff] }
  0xfe   :  { %v1401_v17 = vrot.slane %v1400_v37, 4  ;;  %v1453_v18 = vmul.f32 %v5133_v24, %v4885_v12  ;;  %v1481_v45 = vmul.f32 %v5140_v41, %v4840_v23  ;;  %6468 = vst [vmem:[#allocation45_spill] sm:$0xff] %v5170_v10  ;;  %v1373_v31 = vadd.f32 %v1372_v49, %v1371_v25  ;;  %v5182_v41 = vld [vmem:[%s6153_s0 + $0x260] sm:$0xff] }
  0xff   :  { %v1430_v62 = vadd.f32 %v1429_v51, %v1423_v6  ;;  %v1454_v2 = vmul.f32 %v5145_v47, %v4897_v48  ;;  %v1458_v43 = vadd.f32 %v1457_v28, %v1451_v33  ;;  %6470 = vst [vmem:[#allocation48_spill] sm:$0xff] %v5182_v41  ;;  %1346 = vst [vmem:[%s6154_s1 + $0x34] sm:$0x1] %v1345_v22  ;;  %v5192_v51 = vld [vmem:[%s6153_s0 + $0x290] sm:$0xff]  ;;  %v5199_v22 = vld [vmem:[%s6153_s0 + $0x268] sm:$0xff] }
 0x100   :  { %v1402_v25 = vadd.f32 %v1401_v17, %v1400_v37  ;;  %v1482_v6 = vmul.f32 %v5156_v29, %v4851_v63  ;;  %v1487_v49 = vadd.f32 %v1480_v19, %v1479_v55  ;;  %6471 = vst [vmem:[#allocation46_spill] sm:$0xff] %v5192_v51  ;;  %v1510_v33 = vmul.f32 %v5161_v38, %v4818_v14  ;;  %v5204_v37 = vld [vmem:[%s6153_s0 + $0x270] sm:$0xff] }
 0x101   :  { %v1374_v28 = vrot.slane %v1373_v31, 1  ;;  %v1431_v47 = vadd.f32 %v1430_v62, %v1424_v53  ;;  %v1459_v24 = vadd.f32 %v1458_v43, %v1452_v46  ;;  %6472 = vst [vmem:[#allocation47_spill] sm:$0xff] %v5199_v22  ;;  %6473 = vst [vmem:[#allocation50_spill] sm:$0xff] %v5204_v37  ;;  %v1511_v55 = vmul.f32 %v5170_v10, %v4823_v27  ;;  %v5215_v62 = vld [vmem:[%s6153_s0 + $0x298] sm:$0xff]  ;;  %v5222_v10 = vld [vmem:[%s6153_s0 + $0x2c0] sm:$0xff] }
 0x102   :  { %v1403_v19 = vrot.slane %v1402_v25, 2  ;;  %v1455_v17 = vmul.f32 %v5175_v21, %v4927_v15  ;;  %v1483_v53 = vmul.f32 %v5182_v41, %v4880_v56  ;;  %v1488_v46 = vadd.f32 %v1487_v49, %v1481_v45  ;;  %6474 = vst [vmem:[#allocation49_spill] sm:$0xff] %v5215_v62  ;;  %6475 = vst [vmem:[#allocation51_spill] sm:$0xff] %v5222_v10  ;;  %v5227_v45 = vld [vmem:[%s6153_s0 + $0x2c8] sm:$0xff] }
 0x103   :  { %v1375_v43 = vadd.f32 %v1374_v28, %v1373_v31  ;;  %v1432_v38 = vrot.slane %v1431_v47, 4  ;;  %v1460_v29 = vadd.f32 %v1459_v24, %v1453_v18  ;;  %v1512_v58 = vmul.f32 %v5192_v51, %v4840_v23  ;;  %6476 = vst [vmem:[#allocation52_spill] sm:$0xff] %v5227_v45  ;;  %v5236_v31 = vld [vmem:[%s6153_s0 + $0x2a0] sm:$0xff] }
 0x104   :  { %v1404_v49 = vadd.f32 %v1403_v19, %v1402_v25  ;;  %v1484_v41 = vmul.f32 %v5199_v22, %v4885_v12  ;;  %v1485_v24 = vmul.f32 %v5204_v37, %v4897_v48  ;;  %v1489_v18 = vadd.f32 %v1488_v46, %v1482_v6  ;;  %6477 = vst [vmem:[#allocation53_spill] sm:$0xff] %v5236_v31  ;;  %v5247_v19 = vld [vmem:[%s6153_s0 + $0x278] sm:$0xff]  ;;  %v5254_v37 = vld [vmem:[%s6153_s0 + $0x2d0] sm:$0xff] }
 0x105   :  { %1376 = vst [vmem:[%s6154_s1 + $0x35] sm:$0x1] %v1375_v43  ;;  %1377 = vst [vmem:[%s6154_s1 + $0x40] sm:$0x1] %v1375_v43  ;;  %v1433_v25 = vadd.f32 %v1432_v38, %v1431_v47  ;;  %v1461_v28 = vadd.f32 %v1460_v29, %v1454_v2  ;;  %v1513_v6 = vmul.f32 %v5215_v62, %v4851_v63  ;;  %v5259_v47 = vld [vmem:[%s6153_s0 + $0x2a8] sm:$0xff] }
 0x106   :  { %v1518_v46 = vadd.f32 %v1511_v55, %v1510_v33  ;;  %v1405_v51 = vrot.slane %v1404_v49, 1  ;;  %v1490_v22 = vadd.f32 %v1489_v18, %v1483_v53  ;;  %v1541_v29 = vmul.f32 %v5222_v10, %v4818_v14  ;;  %v5268_v55 = vld [vmem:[%s6153_s0 + $0x2b0] sm:$0xff]  ;;  %v5275_v18 = vld [vmem:[%s6153_s0 + $0x2d8] sm:$0xff] }
 0x107   :  { %v1542_v38 = vmul.f32 %v5227_v45, %v4823_v27  ;;  %v1434_v2 = vrot.slane %v1433_v25, 2  ;;  %v1462_v33 = vadd.f32 %v1461_v28, %v1455_v17  ;;  %v1514_v53 = vmul.f32 %v5236_v31, %v4880_v56  ;;  %6478 = vst [vmem:[#allocation54_spill] sm:$0xff] %v5275_v18  ;;  %v5282_v17 = vld [vmem:[%s6153_s0 + $0x2e0] sm:$0xff] }
 0x108   :  { %v1519_v43 = vadd.f32 %v1518_v46, %v1512_v58  ;;  %v1406_v14 = vadd.f32 %v1405_v51, %v1404_v49  ;;  %v1486_v27 = vmul.f32 %v5247_v19, %v4927_v15  ;;  %v1491_v45 = vadd.f32 %v1490_v22, %v1484_v41  ;;  %6479 = vst [vmem:[#allocation55_spill] sm:$0xff] %v5282_v17  ;;  %v5297_v51 = vld [vmem:[%s6153_s0 + $0x2b8] sm:$0xff] }
 0x109   :  { %v1543_v28 = vmul.f32 %v5254_v37, %v4840_v23  ;;  %v1435_v31 = vadd.f32 %v1434_v2, %v1433_v25  ;;  %v1463_v58 = vrot.slane %v1462_v33, 4  ;;  %v1515_v46 = vmul.f32 %v5259_v47, %v4885_v12  ;;  %6480 = vst [vmem:[#allocation2_spill] sm:$0xff] %v5297_v51 }
 0x10a   :  { %v1520_v10 = vadd.f32 %v1519_v43, %v1513_v6  ;;  %1407 = vst [vmem:[%s6154_s1 + $0x36] sm:$0x1] %v1406_v14  ;;  %1408 = vst [vmem:[%s6154_s1 + $0x4c] sm:$0x1] %v1406_v14  ;;  %v1492_v41 = vadd.f32 %v1491_v45, %v1485_v24  ;;  %v1516_v23 = vmul.f32 %v5268_v55, %v4897_v48  ;;  %v5306_v43 = vld [vmem:[%s6153_s0 + $0x2e8] sm:$0xff]  ;;  %v5313_v14 = vld [vmem:[%s6153_s0 + $0x2f0] sm:$0xff] }
 0x10b   :  { %v1544_v22 = vmul.f32 %v5275_v18, %v4851_v63  ;;  %v1549_v49 = vadd.f32 %v1542_v38, %v1541_v29  ;;  %v1436_v25 = vrot.slane %v1435_v31, 1  ;;  %v1464_v6 = vadd.f32 %v1463_v58, %v1462_v33  ;;  %6481 = vst [vmem:[#allocation3_spill] sm:$0xff] %v5306_v43  ;;  %v5318_v63 = vld [vmem:[%s6153_s0 + $0x2f8] sm:$0xff] }
 0x10c   :  { %v1521_v2 = vadd.f32 %v1520_v10, %v1514_v53  ;;  %v1545_v45 = vmul.f32 %v5282_v17, %v4880_v56  ;;  %v1493_v24 = vadd.f32 %v1492_v41, %v1486_v27  ;;  %v1572_v29 = vmul.f32 %v4860_v39, %v4860_v39 }
 0x10d   :  { %v1550_v10 = vadd.f32 %v1549_v49, %v1543_v28  ;;  %v1573_v38 = vmul.f32 %v4865_v61, %v4865_v61  ;;  %v1437_v33 = vadd.f32 %v1436_v25, %v1435_v31  ;;  %v1465_v56 = vrot.slane %v1464_v6, 2 }
 0x10e   :  { %v1517_v53 = vmul.f32 %v5297_v51, %v4927_v15  ;;  %v1522_v27 = vadd.f32 %v1521_v2, %v1515_v46  ;;  %v1494_v58 = vrot.slane %v1493_v24, 4  ;;  %v1546_v41 = vmul.f32 %v5306_v43, %v4885_v12 }
 0x10f   :  { %v1551_v17 = vadd.f32 %v1550_v10, %v1544_v22  ;;  %v1574_v28 = vmul.f32 %v4892_v13, %v4892_v13  ;;  %1438 = vst [vmem:[%s6154_s1 + $0x37] sm:$0x1] %v1437_v33  ;;  %1439 = vst [vmem:[%s6154_s1 + $0x58] sm:$0x1] %v1437_v33  ;;  %v1466_v31 = vadd.f32 %v1465_v56, %v1464_v6 }
 0x110   :  { %v1523_v49 = vadd.f32 %v1522_v27, %v1516_v23  ;;  %v1547_v46 = vmul.f32 %v5313_v14, %v4897_v48  ;;  %v1548_v12 = vmul.f32 %v5318_v63, %v4927_v15  ;;  %v1495_v22 = vadd.f32 %v1494_v58, %v1493_v24 }
 0x111   :  { %v1552_v25 = vadd.f32 %v1551_v17, %v1545_v45  ;;  %v1575_v2 = vmul.f32 %v4908_v40, %v4908_v40  ;;  %v1580_v10 = vadd.f32 %v1573_v38, %v1572_v29  ;;  %v1467_v43 = vrot.slane %v1466_v31, 1 }
 0x112   :  { %v1524_v51 = vadd.f32 %v1523_v49, %v1517_v53  ;;  %v1602_v18 = vmul.f32 %v4913_v9, %v4860_v39  ;;  %v1603_v23 = vmul.f32 %v4922_v42, %v4865_v61  ;;  %v1496_v6 = vrot.slane %v1495_v22, 2 }
 0x113   :  { %v1553_v33 = vadd.f32 %v1552_v25, %v1546_v41  ;;  %v1576_v48 = vmul.f32 %v4934_v36, %v4934_v36  ;;  %v1581_v15 = vadd.f32 %v1580_v10, %v1574_v28  ;;  %v1468_v24 = vadd.f32 %v1467_v43, %v1466_v31 }
 0x114   :  { %v1525_v17 = vrot.slane %v1524_v51, 4  ;;  %v1577_v45 = vmul.f32 %v4954_v7, %v4954_v7  ;;  %v1604_v29 = vmul.f32 %v4947_v16, %v4892_v13  ;;  %v1497_v38 = vadd.f32 %v1496_v6, %v1495_v22 }
 0x115   :  { %v1554_v56 = vadd.f32 %v1553_v33, %v1547_v46  ;;  %v1578_v53 = vmul.f32 %v4959_v4, %v4959_v4  ;;  %v1582_v27 = vadd.f32 %v1581_v15, %v1575_v2  ;;  %1469 = vst [vmem:[%s6154_s1 + $0x38] sm:$0x1] %v1468_v24  ;;  %1470 = vst [vmem:[%s6154_s1 + $0x64] sm:$0x1] %v1468_v24 }
 0x116   :  { %v1526_v43 = vadd.f32 %v1525_v17, %v1524_v51  ;;  %v1605_v58 = vmul.f32 %v4970_v11, %v4908_v40  ;;  %v1610_v41 = vadd.f32 %v1603_v23, %v1602_v18  ;;  %v1633_v28 = vmul.f32 %v4977_v57, %v4860_v39 }
 0x117   :  { %v1498_v31 = vrot.slane %v1497_v38, 1  ;;  %v1555_v49 = vadd.f32 %v1554_v56, %v1548_v12  ;;  %v1583_v46 = vadd.f32 %v1582_v27, %v1576_v48  ;;  %v1634_v22 = vmul.f32 %v4982_v1, %v4865_v61 }
 0x118   :  { %v1527_v25 = vrot.slane %v1526_v43, 2  ;;  %v1579_v2 = vmul.f32 %v5002_v5, %v5002_v5  ;;  %v1606_v51 = vmul.f32 %v4991_v54, %v4934_v36  ;;  %v1611_v10 = vadd.f32 %v1610_v41, %v1604_v29 }
 0x119   :  { %v1499_v6 = vadd.f32 %v1498_v31, %v1497_v38  ;;  %v1556_v33 = vrot.slane %v1555_v49, 4  ;;  %v1584_v18 = vadd.f32 %v1583_v46, %v1577_v45  ;;  %v1635_v23 = vmul.f32 %v5009_v44, %v4892_v13 }
 0x11a   :  { %v1528_v15 = vadd.f32 %v1527_v25, %v1526_v43  ;;  %v1607_v12 = vmul.f32 %v5014_v3, %v4954_v7  ;;  %v1608_v48 = vmul.f32 %v5023_v60, %v4959_v4  ;;  %v1612_v24 = vadd.f32 %v1611_v10, %v1605_v58 }
 0x11b   :  { %1500 = vst [vmem:[%s6154_s1 + $0x39] sm:$0x1] %v1499_v6  ;;  %1501 = vst [vmem:[%s6154_s1 + $0x70] sm:$0x1] %v1499_v6  ;;  %v1557_v17 = vadd.f32 %v1556_v33, %v1555_v49  ;;  %v1585_v45 = vadd.f32 %v1584_v18, %v1578_v53  ;;  %v1636_v29 = vmul.f32 %v5030_v0, %v4908_v40 }
 0x11c   :  { %v1641_v38 = vadd.f32 %v1634_v22, %v1633_v28  ;;  %v1529_v56 = vrot.slane %v1528_v15, 1  ;;  %v1613_v27 = vadd.f32 %v1612_v24, %v1606_v51  ;;  %v1664_v43 = vmul.f32 %v5046_v59, %v4860_v39 }
 0x11d   :  { %v1665_v58 = vmul.f32 %v5051_v34, %v4865_v61  ;;  %v1558_v41 = vrot.slane %v1557_v17, 2  ;;  %v1586_v31 = vadd.f32 %v1585_v45, %v1579_v2  ;;  %v1637_v46 = vmul.f32 %v5037_v8, %v4934_v36 }
 0x11e   :  { %v1642_v25 = vadd.f32 %v1641_v38, %v1635_v23  ;;  %v1530_v49 = vadd.f32 %v1529_v56, %v1528_v15  ;;  %v1609_v53 = vmul.f32 %v5062_v26, %v5002_v5  ;;  %v1614_v10 = vadd.f32 %v1613_v27, %v1607_v12 }
 0x11f   :  { %v1666_v28 = vmul.f32 %v5078_v20, %v4892_v13  ;;  %v1559_v22 = vadd.f32 %v1558_v41, %v1557_v17  ;;  %v1587_v51 = vrot.slane %v1586_v31, 4  ;;  %v1638_v6 = vmul.f32 %v5071_v30, %v4954_v7 }
 0x120   :  { %v1643_v33 = vadd.f32 %v1642_v25, %v1636_v29  ;;  %1531 = vst [vmem:[%s6154_s1 + $0x3a] sm:$0x1] %v1530_v49  ;;  %1532 = vst [vmem:[%s6154_s1 + $0x7c] sm:$0x1] %v1530_v49  ;;  %v1615_v2 = vadd.f32 %v1614_v10, %v1608_v48  ;;  %v1639_v18 = vmul.f32 %v5083_v50, %v4959_v4  ;;  %v6482_v48 = vld [vmem:[#allocation37_spill] sm:$0xff]  ;;  %v6483_v49 = vld [vmem:[#allocation36_spill] sm:$0xff] }
 0x121   :  { %v1667_v23 = vmul.f32 %v5099_v32, %v4908_v40  ;;  %v1672_v15 = vadd.f32 %v1665_v58, %v1664_v43  ;;  %v1560_v12 = vrot.slane %v1559_v22, 1  ;;  %v1588_v24 = vadd.f32 %v1587_v51, %v1586_v31  ;;  %v6484_v31 = vld [vmem:[#allocation38_spill] sm:$0xff] }
 0x122   :  { %v1644_v17 = vadd.f32 %v1643_v33, %v1637_v46  ;;  %v1668_v45 = vmul.f32 %v5128_v35, %v4934_v36  ;;  %v1616_v29 = vadd.f32 %v1615_v2, %v1609_v53  ;;  %v1695_v56 = vmul.f32 %v5108_v52, %v4860_v39  ;;  %v6485_v53 = vld [vmem:[#allocation40_spill] sm:$0xff] }
 0x123   :  { %v1673_v38 = vadd.f32 %v1672_v15, %v1666_v28  ;;  %v1696_v27 = vmul.f32 %v6482_v48, %v4865_v61  ;;  %v1561_v41 = vadd.f32 %v1560_v12, %v1559_v22  ;;  %v1589_v25 = vrot.slane %v1588_v24, 2 }
 0x124   :  { %v1640_v10 = vmul.f32 %v6483_v49, %v5002_v5  ;;  %v1645_v43 = vadd.f32 %v1644_v17, %v1638_v6  ;;  %v1617_v58 = vrot.slane %v1616_v29, 4  ;;  %v1669_v46 = vmul.f32 %v6484_v31, %v4954_v7  ;;  %v6486_v6 = vld [vmem:[#allocation42_spill] sm:$0xff]  ;;  %v6487_v17 = vld [vmem:[#allocation43_spill] sm:$0xff]  ;;  %v6488_v49 = vld [vmem:[#allocation44_spill] sm:$0xff] }
 0x125   :  { %v1674_v51 = vadd.f32 %v1673_v38, %v1667_v23  ;;  %v1697_v28 = vmul.f32 %v6485_v53, %v4892_v13  ;;  %1562 = vst [vmem:[%s6154_s1 + $0x3b] sm:$0x1] %v1561_v41  ;;  %1563 = vst [vmem:[%s6154_s1 + $0x88] sm:$0x1] %v1561_v41  ;;  %v1590_v22 = vadd.f32 %v1589_v25, %v1588_v24  ;;  %v6489_v24 = vld [vmem:[#allocation45_spill] sm:$0xff] }
 0x126   :  { %v1646_v33 = vadd.f32 %v1645_v43, %v1639_v18  ;;  %v1670_v2 = vmul.f32 %v6486_v6, %v4959_v4  ;;  %v1671_v15 = vmul.f32 %v5175_v21, %v5002_v5  ;;  %v1618_v23 = vadd.f32 %v1617_v58, %v1616_v29  ;;  %v6490_v43 = vld [vmem:[#allocation48_spill] sm:$0xff]  ;;  %v6491_v58 = vld [vmem:[#allocation47_spill] sm:$0xff] }
 0x127   :  { %v1675_v12 = vadd.f32 %v1674_v51, %v1668_v45  ;;  %v1698_v38 = vmul.f32 %v6487_v17, %v4908_v40  ;;  %v1703_v31 = vadd.f32 %v1696_v27, %v1695_v56  ;;  %v1591_v53 = vrot.slane %v1590_v22, 1  ;;  %v6492_v56 = vld [vmem:[#allocation46_spill] sm:$0xff] }
 0x128   :  { %v1647_v35 = vadd.f32 %v1646_v33, %v1640_v10  ;;  %v1726_v48 = vmul.f32 %v6488_v49, %v4860_v39  ;;  %v1727_v18 = vmul.f32 %v6489_v24, %v4865_v61  ;;  %v1619_v41 = vrot.slane %v1618_v23, 2  ;;  %v6493_v49 = vld [vmem:[#allocation50_spill] sm:$0xff] }
 0x129   :  { %v1676_v25 = vadd.f32 %v1675_v12, %v1669_v46  ;;  %v1699_v6 = vmul.f32 %v6490_v43, %v4934_v36  ;;  %v1704_v21 = vadd.f32 %v1703_v31, %v1697_v28  ;;  %v1592_v29 = vadd.f32 %v1591_v53, %v1590_v22  ;;  %v6494_v28 = vld [vmem:[#allocation51_spill] sm:$0xff] }
 0x12a   :  { %v1648_v45 = vrot.slane %v1647_v35, 4  ;;  %v1700_v51 = vmul.f32 %v6491_v58, %v4954_v7  ;;  %v1728_v27 = vmul.f32 %v6492_v56, %v4892_v13  ;;  %v1620_v10 = vadd.f32 %v1619_v41, %v1618_v23 }
 0x12b   :  { %v1677_v33 = vadd.f32 %v1676_v25, %v1670_v2  ;;  %v1701_v17 = vmul.f32 %v6493_v49, %v4959_v4  ;;  %v1705_v24 = vadd.f32 %v1704_v21, %v1698_v38  ;;  %1593 = vst [vmem:[%s6154_s1 + $0x41] sm:$0x1] %v1592_v29  ;;  %v1729_v31 = vmul.f32 %v5215_v62, %v4908_v40  ;;  %v6495_v2 = vld [vmem:[#allocation52_spill] sm:$0xff]  ;;  %v6496_v38 = vld [vmem:[#allocation53_spill] sm:$0xff] }
 0x12c   :  { %v1649_v46 = vadd.f32 %v1648_v45, %v1647_v35  ;;  %v1734_v53 = vadd.f32 %v1727_v18, %v1726_v48  ;;  %v1757_v22 = vmul.f32 %v6494_v28, %v4860_v39  ;;  %v1621_v12 = vrot.slane %v1620_v10, 1 }
 0x12d   :  { %v1678_v58 = vadd.f32 %v1677_v33, %v1671_v15  ;;  %v1706_v23 = vadd.f32 %v1705_v24, %v1699_v6  ;;  %v1758_v41 = vmul.f32 %v6495_v2, %v4865_v61  ;;  %v1702_v21 = vmul.f32 %v5247_v19, %v5002_v5 }
 0x12e   :  { %v1650_v25 = vrot.slane %v1649_v46, 2  ;;  %v1730_v35 = vmul.f32 %v6496_v38, %v4934_v36  ;;  %v1735_v29 = vadd.f32 %v1734_v53, %v1728_v27  ;;  %v1622_v45 = vadd.f32 %v1621_v12, %v1620_v10 }
 0x12f   :  { %v1679_v62 = vrot.slane %v1678_v58, 4  ;;  %v1707_v48 = vadd.f32 %v1706_v23, %v1700_v51  ;;  %v1759_v39 = vmul.f32 %v5254_v37, %v4892_v13  ;;  %v1731_v6 = vmul.f32 %v5259_v47, %v4954_v7  ;;  %v6497_v13 = vld [vmem:[#allocation54_spill] sm:$0xff] }
 0x130   :  { %v1651_v18 = vadd.f32 %v1650_v25, %v1649_v46  ;;  %v1732_v61 = vmul.f32 %v5268_v55, %v4959_v4  ;;  %v1736_v15 = vadd.f32 %v1735_v29, %v1729_v31  ;;  %1623 = vst [vmem:[%s6154_s1 + $0x42] sm:$0x1] %v1622_v45  ;;  %1624 = vst [vmem:[%s6154_s1 + $0x4d] sm:$0x1] %v1622_v45  ;;  %v6498_v25 = vld [vmem:[#allocation55_spill] sm:$0xff] }
 0x131   :  { %v1680_v24 = vadd.f32 %v1679_v62, %v1678_v58  ;;  %v1708_v51 = vadd.f32 %v1707_v48, %v1701_v17  ;;  %v1760_v27 = vmul.f32 %v6497_v13, %v4908_v40  ;;  %v1765_v10 = vadd.f32 %v1758_v41, %v1757_v22  ;;  %v6499_v17 = vld [vmem:[#allocation2_spill] sm:$0xff]  ;;  %v6500_v48 = vld [vmem:[#allocation3_spill] sm:$0xff] }
 0x132   :  { %v1652_v33 = vrot.slane %v1651_v18, 1  ;;  %v1737_v46 = vadd.f32 %v1736_v15, %v1730_v35  ;;  %v1788_v53 = vmul.f32 %v4913_v9, %v4913_v9  ;;  %v1789_v31 = vmul.f32 %v4922_v42, %v4922_v42 }
 0x133   :  { %v1681_v12 = vrot.slane %v1680_v24, 2  ;;  %v1709_v23 = vadd.f32 %v1708_v51, %v1702_v21  ;;  %v1761_v29 = vmul.f32 %v6498_v25, %v4934_v36  ;;  %v1766_v45 = vadd.f32 %v1765_v10, %v1759_v39 }
 0x134   :  { %v1653_v62 = vadd.f32 %v1652_v33, %v1651_v18  ;;  %v1733_v58 = vmul.f32 %v6499_v17, %v5002_v5  ;;  %v1738_v40 = vadd.f32 %v1737_v46, %v1731_v6  ;;  %v1790_v22 = vmul.f32 %v4947_v16, %v4947_v16 }
 0x135   :  { %v1682_v41 = vadd.f32 %v1681_v12, %v1680_v24  ;;  %v1710_v35 = vrot.slane %v1709_v23, 4  ;;  %v1762_v15 = vmul.f32 %v6500_v48, %v4954_v7  ;;  %v1767_v13 = vadd.f32 %v1766_v45, %v1760_v27 }
 0x136   :  { %1654 = vst [vmem:[%s6154_s1 + $0x43] sm:$0x1] %v1653_v62  ;;  %1655 = vst [vmem:[%s6154_s1 + $0x59] sm:$0x1] %v1653_v62  ;;  %v1739_v36 = vadd.f32 %v1738_v40, %v1732_v61  ;;  %v1763_v21 = vmul.f32 %v5313_v14, %v4959_v4  ;;  %v1791_v39 = vmul.f32 %v4970_v11, %v4970_v11 }
 0x137   :  { %v1796_v18 = vadd.f32 %v1789_v31, %v1788_v53  ;;  %v1683_v6 = vrot.slane %v1682_v41, 1  ;;  %v1711_v24 = vadd.f32 %v1710_v35, %v1709_v23  ;;  %v1768_v7 = vadd.f32 %v1767_v13, %v1761_v29 }
 0x138   :  { %v1792_v51 = vmul.f32 %v4991_v54, %v4991_v54  ;;  %v1740_v27 = vadd.f32 %v1739_v36, %v1733_v58  ;;  %v1818_v33 = vmul.f32 %v4977_v57, %v4913_v9  ;;  %v1819_v61 = vmul.f32 %v4982_v1, %v4922_v42 }
 0x139   :  { %v1797_v10 = vadd.f32 %v1796_v18, %v1790_v22  ;;  %v1684_v46 = vadd.f32 %v1683_v6, %v1682_v41  ;;  %v1712_v4 = vrot.slane %v1711_v24, 2  ;;  %v1764_v12 = vmul.f32 %v5318_v63, %v5002_v5 }
 0x13a   :  { %v1769_v53 = vadd.f32 %v1768_v7, %v1762_v15  ;;  %v1741_v31 = vrot.slane %v1740_v27, 4  ;;  %v1793_v13 = vmul.f32 %v5014_v3, %v5014_v3  ;;  %v1820_v29 = vmul.f32 %v5009_v44, %v4947_v16 }
 0x13b   :  { %v1798_v23 = vadd.f32 %v1797_v10, %v1791_v39  ;;  %1685 = vst [vmem:[%s6154_s1 + $0x44] sm:$0x1] %v1684_v46  ;;  %1686 = vst [vmem:[%s6154_s1 + $0x65] sm:$0x1] %v1684_v46  ;;  %v1713_v57 = vadd.f32 %v1712_v4, %v1711_v24  ;;  %v1794_v5 = vmul.f32 %v5023_v60, %v5023_v60  ;;  %v6501_v46 = vld [vmem:[#allocation37_spill] sm:$0xff] }
 0x13c   :  { %v1770_v1 = vadd.f32 %v1769_v53, %v1763_v21  ;;  %v1795_v45 = vmul.f32 %v5062_v26, %v5062_v26  ;;  %v1742_v62 = vadd.f32 %v1741_v31, %v1740_v27  ;;  %v1821_v44 = vmul.f32 %v5030_v0, %v4970_v11  ;;  %v6502_v53 = vld [vmem:[#allocation36_spill] sm:$0xff] }
 0x13d   :  { %v1799_v58 = vadd.f32 %v1798_v23, %v1792_v51  ;;  %v1826_v40 = vadd.f32 %v1819_v61, %v1818_v33  ;;  %v1714_v22 = vrot.slane %v1713_v57, 1  ;;  %v1849_v35 = vmul.f32 %v5046_v59, %v4913_v9 }
 0x13e   :  { %v1771_v41 = vadd.f32 %v1770_v1, %v1764_v12  ;;  %v1850_v15 = vmul.f32 %v5051_v34, %v4922_v42  ;;  %v1743_v36 = vrot.slane %v1742_v62, 2  ;;  %v1822_v39 = vmul.f32 %v5037_v8, %v4991_v54 }
 0x13f   :  { %v1800_v21 = vadd.f32 %v1799_v58, %v1793_v13  ;;  %v1827_v18 = vadd.f32 %v1826_v40, %v1820_v29  ;;  %v1715_v6 = vadd.f32 %v1714_v22, %v1713_v57  ;;  %v1823_v0 = vmul.f32 %v5071_v30, %v5014_v3  ;;  %v6503_v13 = vld [vmem:[#allocation39_spill] sm:$0xff] }
 0x140   :  { %v1772_v24 = vrot.slane %v1771_v41, 4  ;;  %v1851_v7 = vmul.f32 %v5078_v20, %v4947_v16  ;;  %v1744_v51 = vadd.f32 %v1743_v36, %v1742_v62  ;;  %v1824_v59 = vmul.f32 %v5083_v50, %v5023_v60 }
 0x141   :  { %v1801_v27 = vadd.f32 %v1800_v21, %v1794_v5  ;;  %v1828_v34 = vadd.f32 %v1827_v18, %v1821_v44  ;;  %1716 = vst [vmem:[%s6154_s1 + $0x45] sm:$0x1] %v1715_v6  ;;  %1717 = vst [vmem:[%s6154_s1 + $0x71] sm:$0x1] %v1715_v6  ;;  %v1852_v30 = vmul.f32 %v5099_v32, %v4970_v11  ;;  %v6504_v5 = vld [vmem:[#allocation40_spill] sm:$0xff]  ;;  %v6506_v44 = vld [vmem:[#allocation42_spill] sm:$0xff] }
 0x142   :  { %v1773_v8 = vadd.f32 %v1772_v24, %v1771_v41  ;;  %v1857_v10 = vadd.f32 %v1850_v15, %v1849_v35  ;;  %v1880_v20 = vmul.f32 %v5108_v52, %v4913_v9  ;;  %v1745_v33 = vrot.slane %v1744_v51, 1  ;;  %v6507_v15 = vld [vmem:[#allocation43_spill] sm:$0xff]  ;;  %v6508_v6 = vld [vmem:[#allocation44_spill] sm:$0xff] }
 0x143   :  { %v1802_v61 = vadd.f32 %v1801_v27, %v1795_v45  ;;  %v1829_v50 = vadd.f32 %v1828_v34, %v1822_v39  ;;  %v1881_v4 = vmul.f32 %v6501_v46, %v4922_v42  ;;  %v1825_v31 = vmul.f32 %v6502_v53, %v5062_v26  ;;  %v6505_v45 = vld [vmem:[#allocation38_spill] sm:$0xff]  ;;  %v6511_v46 = vld [vmem:[#allocation47_spill] sm:$0xff] }
 0x144   :  { %v1774_v12 = vrot.slane %v1773_v8, 2  ;;  %v1853_v23 = vmul.f32 %v6503_v13, %v4991_v54  ;;  %v1858_v29 = vadd.f32 %v1857_v10, %v1851_v7  ;;  %v1746_v57 = vadd.f32 %v1745_v33, %v1744_v51 }
 0x145   :  { %v1803_v32 = vrot.slane %v1802_v61, 4  ;;  %v1830_v1 = vadd.f32 %v1829_v50, %v1823_v0  ;;  %v1882_v52 = vmul.f32 %v6504_v5, %v4947_v16  ;;  %v1854_v58 = vmul.f32 %v6505_v45, %v5014_v3  ;;  %v6509_v0 = vld [vmem:[#allocation45_spill] sm:$0xff] }
 0x146   :  { %v1775_v62 = vadd.f32 %v1774_v12, %v1773_v8  ;;  %v1855_v40 = vmul.f32 %v6506_v44, %v5023_v60  ;;  %v1859_v22 = vadd.f32 %v1858_v29, %v1852_v30  ;;  %1747 = vst [vmem:[%s6154_s1 + $0x46] sm:$0x1] %v1746_v57  ;;  %1748 = vst [vmem:[%s6154_s1 + $0x7d] sm:$0x1] %v1746_v57 }
 0x147   :  { %v1804_v41 = vadd.f32 %v1803_v32, %v1802_v61  ;;  %v1831_v35 = vadd.f32 %v1830_v1, %v1824_v59  ;;  %v1883_v36 = vmul.f32 %v6507_v15, %v4970_v11  ;;  %v1888_v21 = vadd.f32 %v1881_v4, %v1880_v20  ;;  %v6510_v59 = vld [vmem:[#allocation41_spill] sm:$0xff] }
 0x148   :  { %v1776_v39 = vrot.slane %v1775_v62, 1  ;;  %v1860_v18 = vadd.f32 %v1859_v22, %v1853_v23  ;;  %v1911_v24 = vmul.f32 %v6508_v6, %v4913_v9  ;;  %v1912_v7 = vmul.f32 %v6509_v0, %v4922_v42 }
 0x149   :  { %v1805_v51 = vrot.slane %v1804_v41, 2  ;;  %v1832_v27 = vadd.f32 %v1831_v35, %v1825_v31  ;;  %v1884_v34 = vmul.f32 %v6490_v43, %v4991_v54  ;;  %v1889_v8 = vadd.f32 %v1888_v21, %v1882_v52  ;;  %v6513_v35 = vld [vmem:[#allocation54_spill] sm:$0xff]  ;;  %v5613_v21 = vld [vmem:[%s6153_s0 + $0x1d0] sm:$0xff] }
 0x14a   :  { %v1777_v30 = vadd.f32 %v1776_v39, %v1775_v62  ;;  %v1856_v10 = vmul.f32 %v6510_v59, %v5062_v26  ;;  %v1861_v33 = vadd.f32 %v1860_v18, %v1854_v58  ;;  %v1913_v20 = vmul.f32 %v6492_v56, %v4947_v16  ;;  %v6512_v56 = vld [vmem:[#allocation49_spill] sm:$0xff] }
 0x14b   :  { %v1806_v61 = vadd.f32 %v1805_v51, %v1804_v41  ;;  %v1833_v50 = vrot.slane %v1832_v27, 4  ;;  %v1885_v4 = vmul.f32 %v6511_v46, %v5014_v3  ;;  %v1890_v12 = vadd.f32 %v1889_v8, %v1883_v36  ;;  %v5629_v51 = vld [vmem:[%s6153_s0 + $0x200] sm:$0xff] }
 0x14c   :  { %1778 = vst [vmem:[%s6154_s1 + $0x47] sm:$0x1] %v1777_v30  ;;  %1779 = vst [vmem:[%s6154_s1 + $0x89] sm:$0x1] %v1777_v30  ;;  %v1862_v43 = vadd.f32 %v1861_v33, %v1855_v40  ;;  %v1886_v53 = vmul.f32 %v6493_v49, %v5023_v60  ;;  %v1914_v31 = vmul.f32 %v6512_v56, %v4970_v11 }
 0x14d   :  { %v1919_v13 = vadd.f32 %v1912_v7, %v1911_v24  ;;  %v1807_v23 = vrot.slane %v1806_v61, 1  ;;  %v1834_v29 = vadd.f32 %v1833_v50, %v1832_v27  ;;  %v1891_v57 = vadd.f32 %v1890_v12, %v1884_v34  ;;  %v5624_v7 = vld [vmem:[%s6153_s0 + $0x1d8] sm:$0xff]  ;;  %v5665_v12 = vld [vmem:[%s6153_s0 + $0x1e8] sm:$0xff] }
 0x14e   :  { %v1915_v32 = vmul.f32 %v6496_v38, %v4991_v54  ;;  %v1863_v1 = vadd.f32 %v1862_v43, %v1856_v10  ;;  %v1942_v52 = vmul.f32 %v6494_v28, %v4913_v9  ;;  %v1943_v62 = vmul.f32 %v6495_v2, %v4922_v42  ;;  %v5594_v9 = vld [vmem:[%s6153_s0 + $0x1c0] sm:$0xff]  ;;  %v5599_v42 = vld [vmem:[%s6153_s0 + $0x1c8] sm:$0xff]  ;;  %v5670_v43 = vld [vmem:[%s6153_s0 + $0x1f0] sm:$0xff] }
 0x14f   :  { %v1920_v5 = vadd.f32 %v1919_v13, %v1913_v20  ;;  %v1808_v45 = vadd.f32 %v1807_v23, %v1806_v61  ;;  %v1835_v49 = vrot.slane %v1834_v29, 2  ;;  %v1887_v58 = vmul.f32 %v5247_v19, %v5062_v26  ;;  %v5645_v20 = vld [vmem:[%s6153_s0 + $0x1e0] sm:$0xff] }
 0x150   :  { %v1892_v44 = vadd.f32 %v1891_v57, %v1885_v4  ;;  %v1864_v40 = vrot.slane %v1863_v1, 4  ;;  %v1916_v22 = vmul.f32 %v5259_v47, %v5014_v3  ;;  %v1944_v38 = vmul.f32 %v5254_v37, %v4947_v16 }
 0x151   :  { %v1921_v41 = vadd.f32 %v1920_v5, %v1914_v31  ;;  %1809 = vst [vmem:[%s6154_s1 + $0x4e] sm:$0x1] %v1808_v45  ;;  %v1836_v19 = vadd.f32 %v1835_v49, %v1834_v29  ;;  %v1917_v28 = vmul.f32 %v5268_v55, %v5023_v60  ;;  %v1918_v16 = vmul.f32 %v6499_v17, %v5062_v26  ;;  %v5681_v29 = vld [vmem:[%s6153_s0 + $0x218] sm:$0xff] }
 0x152   :  { %v1893_v47 = vadd.f32 %v1892_v44, %v1886_v53  ;;  %v1865_v37 = vadd.f32 %v1864_v40, %v1863_v1  ;;  %v1945_v15 = vmul.f32 %v6513_v35, %v4970_v11  ;;  %v1950_v36 = vadd.f32 %v1943_v62, %v1942_v52  ;;  %v5688_v52 = vld [vmem:[%s6153_s0 + $0x240] sm:$0xff] }
 0x153   :  { %v1922_v2 = vadd.f32 %v1921_v41, %v1915_v32  ;;  %v1837_v39 = vrot.slane %v1836_v19, 1  ;;  %v1973_v6 = vmul.f32 %v5594_v9, %v5594_v9  ;;  %v1974_v55 = vmul.f32 %v5599_v42, %v5599_v42 }
 0x154   :  { %v1894_v18 = vadd.f32 %v1893_v47, %v1887_v58  ;;  %v1866_v17 = vrot.slane %v1865_v37, 2  ;;  %v1946_v0 = vmul.f32 %v6498_v25, %v4991_v54  ;;  %v1951_v11 = vadd.f32 %v1950_v36, %v1944_v38  ;;  %v5638_v54 = vld [vmem:[%s6153_s0 + $0x208] sm:$0xff]  ;;  %v5702_v58 = vld [vmem:[%s6153_s0 + $0x220] sm:$0xff]  ;;  %v5734_v36 = vld [vmem:[%s6153_s0 + $0x230] sm:$0xff] }
 0x155   :  { %v1923_v24 = vadd.f32 %v1922_v2, %v1916_v22  ;;  %v1838_v27 = vadd.f32 %v1837_v39, %v1836_v19  ;;  %v1947_v8 = vmul.f32 %v6500_v48, %v5014_v3  ;;  %v1975_v30 = vmul.f32 %v5613_v21, %v5613_v21  ;;  %v5713_v22 = vld [vmem:[%s6153_s0 + $0x1f8] sm:$0xff]  ;;  %v5720_v19 = vld [vmem:[%s6153_s0 + $0x250] sm:$0xff] }
 0x156   :  { %v1895_v34 = vrot.slane %v1894_v18, 4  ;;  %v1867_v25 = vadd.f32 %v1866_v17, %v1865_v37  ;;  %v1948_v10 = vmul.f32 %v5313_v14, %v5023_v60  ;;  %v1952_v33 = vadd.f32 %v1951_v11, %v1945_v15  ;;  %v5658_v60 = vld [vmem:[%s6153_s0 + $0x210] sm:$0xff] }
 0x157   :  { %v1924_v59 = vadd.f32 %v1923_v24, %v1917_v28  ;;  %1839 = vst [vmem:[%s6154_s1 + $0x4f] sm:$0x1] %v1838_v27  ;;  %1840 = vst [vmem:[%s6154_s1 + $0x5a] sm:$0x1] %v1838_v27  ;;  %v1976_v48 = vmul.f32 %v5624_v7, %v5624_v7  ;;  %v1981_v61 = vadd.f32 %v1974_v55, %v1973_v6  ;;  %v5741_v6 = vld [vmem:[%s6153_s0 + $0x258] sm:$0xff] }
 0x158   :  { %v1896_v3 = vadd.f32 %v1895_v34, %v1894_v18  ;;  %v2003_v14 = vmul.f32 %v5629_v51, %v5594_v9  ;;  %v1868_v50 = vrot.slane %v1867_v25, 1  ;;  %v1953_v4 = vadd.f32 %v1952_v33, %v1946_v0  ;;  %v5748_v0 = vld [vmem:[%s6153_s0 + $0x260] sm:$0xff]  ;;  %v5773_v33 = vld [vmem:[%s6153_s0 + $0x238] sm:$0xff] }
 0x159   :  { %v1925_v46 = vadd.f32 %v1924_v59, %v1918_v16  ;;  %v2004_v53 = vmul.f32 %v5638_v54, %v5599_v42  ;;  %v1949_v31 = vmul.f32 %v5318_v63, %v5062_v26  ;;  %v1977_v13 = vmul.f32 %v5645_v20, %v5645_v20  ;;  %v5693_v26 = vld [vmem:[%s6153_s0 + $0x248] sm:$0xff] }
 0x15a   :  { %v1897_v56 = vrot.slane %v1896_v3, 2  ;;  %v1982_v23 = vadd.f32 %v1981_v61, %v1975_v30  ;;  %v1869_v57 = vadd.f32 %v1868_v50, %v1867_v25  ;;  %v1954_v1 = vadd.f32 %v1953_v4, %v1947_v8  ;;  %v5725_v16 = vld [vmem:[%s6153_s0 + $0x228] sm:$0xff]  ;;  %v5757_v25 = vld [vmem:[%s6153_s0 + $0x280] sm:$0xff] }
 0x15b   :  { %v1926_v32 = vrot.slane %v1925_v46, 4  ;;  %v2005_v5 = vmul.f32 %v5658_v60, %v5613_v21  ;;  %v1978_v62 = vmul.f32 %v5665_v12, %v5665_v12  ;;  %v1979_v45 = vmul.f32 %v5670_v43, %v5670_v43  ;;  %v5762_v59 = vld [vmem:[%s6153_s0 + $0x288] sm:$0xff] }
 0x15c   :  { %v1898_v63 = vadd.f32 %v1897_v56, %v1896_v3  ;;  %v1983_v49 = vadd.f32 %v1982_v23, %v1976_v48  ;;  %1870 = vst [vmem:[%s6154_s1 + $0x50] sm:$0x1] %v1869_v57  ;;  %1871 = vst [vmem:[%s6154_s1 + $0x66] sm:$0x1] %v1869_v57  ;;  %v1955_v40 = vadd.f32 %v1954_v1, %v1948_v10  ;;  %v5782_v4 = vld [vmem:[%s6153_s0 + $0x268] sm:$0xff]  ;;  %v5789_v56 = vld [vmem:[%s6153_s0 + $0x290] sm:$0xff] }
 0x15d   :  { %v1927_v44 = vadd.f32 %v1926_v32, %v1925_v46  ;;  %v2006_v41 = vmul.f32 %v5681_v29, %v5624_v7  ;;  %v2011_v38 = vadd.f32 %v2004_v53, %v2003_v14  ;;  %v2034_v37 = vmul.f32 %v5688_v52, %v5594_v9  ;;  %v5799_v23 = vld [vmem:[%s6153_s0 + $0x278] sm:$0xff] }
 0x15e   :  { %v1899_v47 = vrot.slane %v1898_v63, 1  ;;  %v1984_v28 = vadd.f32 %v1983_v49, %v1977_v13  ;;  %v2035_v2 = vmul.f32 %v5693_v26, %v5599_v42  ;;  %v1956_v15 = vadd.f32 %v1955_v40, %v1949_v31  ;;  %v5794_v13 = vld [vmem:[%s6153_s0 + $0x270] sm:$0xff]  ;;  %v5810_v49 = vld [vmem:[%s6153_s0 + $0x298] sm:$0xff] }
 0x15f   :  { %v1928_v35 = vrot.slane %v1927_v44, 2  ;;  %v2007_v39 = vmul.f32 %v5702_v58, %v5645_v20  ;;  %v2012_v18 = vadd.f32 %v2011_v38, %v2005_v5  ;;  %v1980_v17 = vmul.f32 %v5713_v22, %v5713_v22 }
 0x160   :  { %v1900_v55 = vadd.f32 %v1899_v47, %v1898_v63  ;;  %v1985_v24 = vadd.f32 %v1984_v28, %v1978_v62  ;;  %v2036_v11 = vmul.f32 %v5720_v19, %v5613_v21  ;;  %v1957_v34 = vrot.slane %v1956_v15, 4  ;;  %v5819_v47 = vld [vmem:[%s6153_s0 + $0x2c0] sm:$0xff]  ;;  %v5824_v28 = vld [vmem:[%s6153_s0 + $0x2c8] sm:$0xff] }
 0x161   :  { %v1929_v27 = vadd.f32 %v1928_v35, %v1927_v44  ;;  %v2008_v8 = vmul.f32 %v5725_v16, %v5665_v12  ;;  %v2013_v30 = vadd.f32 %v2012_v18, %v2006_v41  ;;  %v2009_v3 = vmul.f32 %v5734_v36, %v5670_v43 }
 0x162   :  { %1901 = vst [vmem:[%s6154_s1 + $0x51] sm:$0x1] %v1900_v55  ;;  %1902 = vst [vmem:[%s6154_s1 + $0x72] sm:$0x1] %v1900_v55  ;;  %v1986_v10 = vadd.f32 %v1985_v24, %v1979_v45  ;;  %v2037_v48 = vmul.f32 %v5741_v6, %v5624_v7  ;;  %v2042_v61 = vadd.f32 %v2035_v2, %v2034_v37 }
 0x163   :  { %v1930_v14 = vrot.slane %v1929_v27, 1  ;;  %v1958_v50 = vadd.f32 %v1957_v34, %v1956_v15  ;;  %v2014_v46 = vadd.f32 %v2013_v30, %v2007_v39  ;;  %v2038_v53 = vmul.f32 %v5748_v0, %v5645_v20  ;;  %v5839_v39 = vld [vmem:[%s6153_s0 + $0x2a0] sm:$0xff]  ;;  %v5856_v30 = vld [vmem:[%s6153_s0 + $0x2b0] sm:$0xff] }
 0x164   :  { %v1987_v31 = vadd.f32 %v1986_v10, %v1980_v17  ;;  %v2043_v57 = vadd.f32 %v2042_v61, %v2036_v11  ;;  %v2065_v32 = vmul.f32 %v5757_v25, %v5594_v9  ;;  %v2066_v1 = vmul.f32 %v5762_v59, %v5599_v42  ;;  %v5844_v17 = vld [vmem:[%s6153_s0 + $0x2a8] sm:$0xff] }
 0x165   :  { %v1931_v5 = vadd.f32 %v1930_v14, %v1929_v27  ;;  %v1959_v63 = vrot.slane %v1958_v50, 2  ;;  %v2010_v62 = vmul.f32 %v5773_v33, %v5713_v22  ;;  %v2015_v45 = vadd.f32 %v2014_v46, %v2008_v8  ;;  %v5851_v27 = vld [vmem:[%s6153_s0 + $0x2d0] sm:$0xff]  ;;  %v5867_v46 = vld [vmem:[%s6153_s0 + $0x2d8] sm:$0xff] }
 0x166   :  { %v1988_v44 = vrot.slane %v1987_v31, 4  ;;  %v2039_v40 = vmul.f32 %v5782_v4, %v5665_v12  ;;  %v2044_v41 = vadd.f32 %v2043_v57, %v2037_v48  ;;  %v2067_v38 = vmul.f32 %v5789_v56, %v5613_v21 }
 0x167   :  { %1932 = vst [vmem:[%s6154_s1 + $0x52] sm:$0x1] %v1931_v5  ;;  %1933 = vst [vmem:[%s6154_s1 + $0x7e] sm:$0x1] %v1931_v5  ;;  %v1960_v37 = vadd.f32 %v1959_v63, %v1958_v50  ;;  %v2016_v2 = vadd.f32 %v2015_v45, %v2009_v3  ;;  %v2040_v35 = vmul.f32 %v5794_v13, %v5670_v43 }
 0x168   :  { %v2041_v15 = vmul.f32 %v5799_v23, %v5713_v22  ;;  %v1989_v18 = vadd.f32 %v1988_v44, %v1987_v31  ;;  %v2045_v55 = vadd.f32 %v2044_v41, %v2038_v53  ;;  %v2068_v24 = vmul.f32 %v5810_v49, %v5624_v7 }
 0x169   :  { %v2073_v11 = vadd.f32 %v2066_v1, %v2065_v32  ;;  %v1961_v34 = vrot.slane %v1960_v37, 1  ;;  %v2017_v8 = vadd.f32 %v2016_v2, %v2010_v62  ;;  %v2096_v10 = vmul.f32 %v5819_v47, %v5594_v9  ;;  %v5876_v1 = vld [vmem:[%s6153_s0 + $0x2b8] sm:$0xff]  ;;  %v5883_v62 = vld [vmem:[%s6153_s0 + $0x2e0] sm:$0xff]  ;;  %v5898_v2 = vld [vmem:[%s6153_s0 + $0x2e8] sm:$0xff] }
 0x16a   :  { %v2097_v3 = vmul.f32 %v5824_v28, %v5599_v42  ;;  %v1990_v48 = vrot.slane %v1989_v18, 2  ;;  %v2046_v61 = vadd.f32 %v2045_v55, %v2039_v40  ;;  %v2069_v14 = vmul.f32 %v5839_v39, %v5645_v20 }
 0x16b   :  { %v2074_v50 = vadd.f32 %v2073_v11, %v2067_v38  ;;  %v1962_v53 = vadd.f32 %v1961_v34, %v1960_v37  ;;  %v2018_v31 = vrot.slane %v2017_v8, 4  ;;  %v2070_v57 = vmul.f32 %v5844_v17, %v5665_v12 }
 0x16c   :  { %v2098_v9 = vmul.f32 %v5851_v27, %v5613_v21  ;;  %v1991_v42 = vadd.f32 %v1990_v48, %v1989_v18  ;;  %v2047_v32 = vadd.f32 %v2046_v61, %v2040_v35  ;;  %v2071_v5 = vmul.f32 %v5856_v30, %v5670_v43  ;;  %v5903_v35 = vld [vmem:[%s6153_s0 + $0x2f0] sm:$0xff] }
 0x16d   :  { %v2075_v63 = vadd.f32 %v2074_v50, %v2068_v24  ;;  %1963 = vst [vmem:[%s6154_s1 + $0x53] sm:$0x1] %v1962_v53  ;;  %1964 = vst [vmem:[%s6154_s1 + $0x8a] sm:$0x1] %v1962_v53  ;;  %v2019_v21 = vadd.f32 %v2018_v31, %v2017_v8  ;;  %v2099_v45 = vmul.f32 %v5867_v46, %v5624_v7  ;;  %v5923_v53 = vld [vmem:[%s6153_s0 + $0x2f8] sm:$0xff] }
 0x16e   :  { %v2104_v44 = vadd.f32 %v2097_v3, %v2096_v10  ;;  %v2127_v40 = vmul.f32 %v5629_v51, %v5629_v51  ;;  %v1992_v41 = vrot.slane %v1991_v42, 1  ;;  %v2048_v38 = vadd.f32 %v2047_v32, %v2041_v15 }
 0x16f   :  { %v2076_v37 = vadd.f32 %v2075_v63, %v2069_v14  ;;  %v2128_v7 = vmul.f32 %v5638_v54, %v5638_v54  ;;  %v2020_v18 = vrot.slane %v2019_v21, 2  ;;  %v2072_v55 = vmul.f32 %v5876_v1, %v5713_v22 }
 0x170   :  { %v2100_v15 = vmul.f32 %v5883_v62, %v5645_v20  ;;  %v2105_v24 = vadd.f32 %v2104_v44, %v2098_v9  ;;  %v1993_v11 = vadd.f32 %v1992_v41, %v1991_v42  ;;  %v2049_v34 = vrot.slane %v2048_v38, 4 }
 0x171   :  { %v2077_v8 = vadd.f32 %v2076_v37, %v2070_v57  ;;  %v2129_v10 = vmul.f32 %v5658_v60, %v5658_v60  ;;  %v2021_v3 = vadd.f32 %v2020_v18, %v2019_v21  ;;  %v2101_v48 = vmul.f32 %v5898_v2, %v5665_v12 }
 0x172   :  { %v2102_v61 = vmul.f32 %v5903_v35, %v5670_v43  ;;  %v2106_v14 = vadd.f32 %v2105_v24, %v2099_v45  ;;  %1994 = vst [vmem:[%s6154_s1 + $0x5b] sm:$0x1] %v1993_v11  ;;  %v2050_v20 = vadd.f32 %v2049_v34, %v2048_v38  ;;  %v2130_v31 = vmul.f32 %v5681_v29, %v5681_v29 }
 0x173   :  { %v2078_v50 = vadd.f32 %v2077_v8, %v2071_v5  ;;  %v2135_v57 = vadd.f32 %v2128_v7, %v2127_v40  ;;  %v2022_v12 = vrot.slane %v2021_v3, 1  ;;  %v2157_v43 = vmul.f32 %v5688_v52, %v5629_v51 }
 0x174   :  { %v2107_v9 = vadd.f32 %v2106_v14, %v2100_v15  ;;  %v2158_v42 = vmul.f32 %v5693_v26, %v5638_v54  ;;  %v2051_v32 = vrot.slane %v2050_v20, 2  ;;  %v2131_v5 = vmul.f32 %v5702_v58, %v5702_v58 }
 0x175   :  { %v2079_v63 = vadd.f32 %v2078_v50, %v2072_v55  ;;  %v2136_v21 = vadd.f32 %v2135_v57, %v2129_v10  ;;  %v2023_v45 = vadd.f32 %v2022_v12, %v2021_v3  ;;  %v2103_v44 = vmul.f32 %v5923_v53, %v5713_v22 }
 0x176   :  { %v2108_v41 = vadd.f32 %v2107_v9, %v2101_v48  ;;  %v2159_v40 = vmul.f32 %v5720_v19, %v5658_v60  ;;  %v2052_v38 = vadd.f32 %v2051_v32, %v2050_v20  ;;  %v2132_v7 = vmul.f32 %v5725_v16, %v5725_v16 }
 0x177   :  { %v2080_v37 = vrot.slane %v2079_v63, 4  ;;  %v2137_v18 = vadd.f32 %v2136_v21, %v2130_v31  ;;  %2024 = vst [vmem:[%s6154_s1 + $0x5c] sm:$0x1] %v2023_v45  ;;  %2025 = vst [vmem:[%s6154_s1 + $0x67] sm:$0x1] %v2023_v45  ;;  %v2133_v22 = vmul.f32 %v5734_v36, %v5734_v36  ;;  %v2160_v15 = vmul.f32 %v5741_v6, %v5681_v29 }
 0x178   :  { %v2109_v55 = vadd.f32 %v2108_v41, %v2102_v61  ;;  %v2165_v24 = vadd.f32 %v2158_v42, %v2157_v43  ;;  %v2053_v11 = vrot.slane %v2052_v38, 1  ;;  %v2161_v10 = vmul.f32 %v5748_v0, %v5702_v58 }
 0x179   :  { %v2081_v34 = vadd.f32 %v2080_v37, %v2079_v63  ;;  %v2138_v8 = vadd.f32 %v2137_v18, %v2131_v5  ;;  %v2188_v14 = vmul.f32 %v5757_v25, %v5629_v51  ;;  %v2189_v61 = vmul.f32 %v5762_v59, %v5638_v54 }
 0x17a   :  { %v2110_v3 = vadd.f32 %v2109_v55, %v2103_v44  ;;  %v2166_v48 = vadd.f32 %v2165_v24, %v2159_v40  ;;  %v2054_v20 = vadd.f32 %v2053_v11, %v2052_v38  ;;  %v2134_v31 = vmul.f32 %v5773_v33, %v5773_v33 }
 0x17b   :  { %v2082_v50 = vrot.slane %v2081_v34, 2  ;;  %v2139_v57 = vadd.f32 %v2138_v8, %v2132_v7  ;;  %v2162_v9 = vmul.f32 %v5782_v4, %v5725_v16  ;;  %v2190_v42 = vmul.f32 %v5789_v56, %v5658_v60 }
 0x17c   :  { %v2111_v12 = vrot.slane %v2110_v3, 4  ;;  %v2167_v43 = vadd.f32 %v2166_v48, %v2160_v15  ;;  %2055 = vst [vmem:[%s6154_s1 + $0x5d] sm:$0x1] %v2054_v20  ;;  %2056 = vst [vmem:[%s6154_s1 + $0x73] sm:$0x1] %v2054_v20  ;;  %v2163_v5 = vmul.f32 %v5794_v13, %v5734_v36  ;;  %v2164_v21 = vmul.f32 %v5799_v23, %v5773_v33 }
 0x17d   :  { %v2083_v32 = vadd.f32 %v2082_v50, %v2081_v34  ;;  %v2140_v63 = vadd.f32 %v2139_v57, %v2133_v22  ;;  %v2191_v41 = vmul.f32 %v5810_v49, %v5681_v29  ;;  %v2196_v40 = vadd.f32 %v2189_v61, %v2188_v14 }
 0x17e   :  { %v2112_v45 = vadd.f32 %v2111_v12, %v2110_v3  ;;  %v2168_v44 = vadd.f32 %v2167_v43, %v2161_v10  ;;  %v2219_v7 = vmul.f32 %v5819_v47, %v5629_v51  ;;  %v2220_v18 = vmul.f32 %v5824_v28, %v5638_v54 }
 0x17f   :  { %v2084_v38 = vrot.slane %v2083_v32, 1  ;;  %v2141_v37 = vadd.f32 %v2140_v63, %v2134_v31  ;;  %v2192_v15 = vmul.f32 %v5839_v39, %v5702_v58  ;;  %v2197_v24 = vadd.f32 %v2196_v40, %v2190_v42 }
 0x180   :  { %v2113_v55 = vrot.slane %v2112_v45, 2  ;;  %v2169_v22 = vadd.f32 %v2168_v44, %v2162_v9  ;;  %v2193_v8 = vmul.f32 %v5844_v17, %v5725_v16  ;;  %v2221_v10 = vmul.f32 %v5851_v27, %v5658_v60 }
 0x181   :  { %v2085_v11 = vadd.f32 %v2084_v38, %v2083_v32  ;;  %v2142_v34 = vrot.slane %v2141_v37, 4  ;;  %v2194_v51 = vmul.f32 %v5856_v30, %v5734_v36  ;;  %v2198_v54 = vadd.f32 %v2197_v24, %v2191_v41 }
 0x182   :  { %v2114_v3 = vadd.f32 %v2113_v55, %v2112_v45  ;;  %v2170_v48 = vadd.f32 %v2169_v22, %v2163_v5  ;;  %v2222_v61 = vmul.f32 %v5867_v46, %v5681_v29  ;;  %v2227_v20 = vadd.f32 %v2220_v18, %v2219_v7 }
 0x183   :  { %2086 = vst [vmem:[%s6154_s1 + $0x5e] sm:$0x1] %v2085_v11  ;;  %2087 = vst [vmem:[%s6154_s1 + $0x7f] sm:$0x1] %v2085_v11  ;;  %v2143_v14 = vadd.f32 %v2142_v34, %v2141_v37  ;;  %v2250_v60 = vmul.f32 %v5688_v52, %v5688_v52  ;;  %v2199_v57 = vadd.f32 %v2198_v54, %v2192_v15 }
 0x184   :  { %v2115_v50 = vrot.slane %v2114_v3, 1  ;;  %v2171_v31 = vadd.f32 %v2170_v48, %v2164_v21  ;;  %v2251_v12 = vmul.f32 %v5693_v26, %v5693_v26  ;;  %v2195_v43 = vmul.f32 %v5876_v1, %v5773_v33 }
 0x185   :  { %v2144_v9 = vrot.slane %v2143_v14, 2  ;;  %v2223_v42 = vmul.f32 %v5883_v62, %v5702_v58  ;;  %v2228_v32 = vadd.f32 %v2227_v20, %v2221_v10  ;;  %v2200_v5 = vadd.f32 %v2199_v57, %v2193_v8 }
 0x186   :  { %v2116_v63 = vadd.f32 %v2115_v50, %v2114_v3  ;;  %v2172_v29 = vrot.slane %v2171_v31, 4  ;;  %v2252_v45 = vmul.f32 %v5720_v19, %v5720_v19  ;;  %v2224_v21 = vmul.f32 %v5898_v2, %v5725_v16 }
 0x187   :  { %v2145_v44 = vadd.f32 %v2144_v9, %v2143_v14  ;;  %v2225_v41 = vmul.f32 %v5903_v35, %v5734_v36  ;;  %v2229_v40 = vadd.f32 %v2228_v32, %v2222_v61  ;;  %v2201_v38 = vadd.f32 %v2200_v5, %v2194_v51 }
 0x188   :  { %2117 = vst [vmem:[%s6154_s1 + $0x5f] sm:$0x1] %v2116_v63  ;;  %2118 = vst [vmem:[%s6154_s1 + $0x8b] sm:$0x1] %v2116_v63  ;;  %v2173_v58 = vadd.f32 %v2172_v29, %v2171_v31  ;;  %v2253_v37 = vmul.f32 %v5741_v6, %v5741_v6  ;;  %v2258_v7 = vadd.f32 %v2251_v12, %v2250_v60 }
 0x189   :  { %v2146_v18 = vrot.slane %v2145_v44, 1  ;;  %v2230_v16 = vadd.f32 %v2229_v40, %v2223_v42  ;;  %v2280_v36 = vmul.f32 %v5757_v25, %v5688_v52  ;;  %v2281_v55 = vmul.f32 %v5762_v59, %v5693_v26 }
 0x18a   :  { %v2174_v22 = vrot.slane %v2173_v58, 2  ;;  %v2202_v15 = vadd.f32 %v2201_v38, %v2195_v43  ;;  %v2254_v24 = vmul.f32 %v5748_v0, %v5748_v0  ;;  %v2259_v11 = vadd.f32 %v2258_v7, %v2252_v45 }
 0x18b   :  { %v2147_v34 = vadd.f32 %v2146_v18, %v2145_v44  ;;  %v2226_v8 = vmul.f32 %v5923_v53, %v5773_v33  ;;  %v2231_v10 = vadd.f32 %v2230_v16, %v2224_v21  ;;  %v2282_v3 = vmul.f32 %v5789_v56, %v5720_v19 }
 0x18c   :  { %v2175_v48 = vadd.f32 %v2174_v22, %v2173_v58  ;;  %v2203_v51 = vrot.slane %v2202_v15, 4  ;;  %v2255_v54 = vmul.f32 %v5782_v4, %v5782_v4  ;;  %v2260_v14 = vadd.f32 %v2259_v11, %v2253_v37 }
 0x18d   :  { %2148 = vst [vmem:[%s6154_s1 + $0x68] sm:$0x1] %v2147_v34  ;;  %v2232_v61 = vadd.f32 %v2231_v10, %v2225_v41  ;;  %v2256_v20 = vmul.f32 %v5794_v13, %v5794_v13  ;;  %v2283_v33 = vmul.f32 %v5810_v49, %v5741_v6  ;;  %v2288_v60 = vadd.f32 %v2281_v55, %v2280_v36 }
 0x18e   :  { %v2176_v50 = vrot.slane %v2175_v48, 1  ;;  %v2204_v31 = vadd.f32 %v2203_v51, %v2202_v15  ;;  %v2261_v57 = vadd.f32 %v2260_v14, %v2254_v24  ;;  %v2284_v12 = vmul.f32 %v5839_v39, %v5748_v0 }
 0x18f   :  { %v2233_v9 = vadd.f32 %v2232_v61, %v2226_v8  ;;  %v2289_v43 = vadd.f32 %v2288_v60, %v2282_v3  ;;  %v2311_v42 = vmul.f32 %v5819_v47, %v5688_v52  ;;  %v2312_v32 = vmul.f32 %v5824_v28, %v5693_v26 }
 0x190   :  { %v2177_v63 = vadd.f32 %v2176_v50, %v2175_v48  ;;  %v2205_v29 = vrot.slane %v2204_v31, 2  ;;  %v2257_v5 = vmul.f32 %v5799_v23, %v5799_v23  ;;  %v2262_v45 = vadd.f32 %v2261_v57, %v2255_v54 }
 0x191   :  { %v2234_v44 = vrot.slane %v2233_v9, 4  ;;  %v2285_v21 = vmul.f32 %v5844_v17, %v5782_v4  ;;  %v2290_v41 = vadd.f32 %v2289_v43, %v2283_v33  ;;  %v2313_v40 = vmul.f32 %v5851_v27, %v5720_v19 }
 0x192   :  { %2178 = vst [vmem:[%s6154_s1 + $0x69] sm:$0x1] %v2177_v63  ;;  %2179 = vst [vmem:[%s6154_s1 + $0x74] sm:$0x1] %v2177_v63  ;;  %v2206_v52 = vadd.f32 %v2205_v29, %v2204_v31  ;;  %v2263_v26 = vadd.f32 %v2262_v45, %v2256_v20  ;;  %v2286_v58 = vmul.f32 %v5856_v30, %v5794_v13 }
 0x193   :  { %v2287_v38 = vmul.f32 %v5876_v1, %v5799_v23  ;;  %v2235_v37 = vadd.f32 %v2234_v44, %v2233_v9  ;;  %v2291_v7 = vadd.f32 %v2290_v41, %v2284_v12  ;;  %v2314_v19 = vmul.f32 %v5867_v46, %v5741_v6 }
 0x194   :  { %v2319_v18 = vadd.f32 %v2312_v32, %v2311_v42  ;;  %v2207_v16 = vrot.slane %v2206_v52, 1  ;;  %v2264_v36 = vadd.f32 %v2263_v26, %v2257_v5  ;;  %v2342_v55 = vmul.f32 %v5757_v25, %v5757_v25 }
 0x195   :  { %v2343_v22 = vmul.f32 %v5762_v59, %v5762_v59  ;;  %v2236_v15 = vrot.slane %v2235_v37, 2  ;;  %v2292_v24 = vadd.f32 %v2291_v7, %v2285_v21  ;;  %v2315_v11 = vmul.f32 %v5883_v62, %v5748_v0 }
 0x196   :  { %v2320_v34 = vadd.f32 %v2319_v18, %v2313_v40  ;;  %v2208_v8 = vadd.f32 %v2207_v16, %v2206_v52  ;;  %v2265_v10 = vrot.slane %v2264_v36, 4  ;;  %v2316_v6 = vmul.f32 %v5898_v2, %v5782_v4 }
 0x197   :  { %v2344_v3 = vmul.f32 %v5789_v56, %v5789_v56  ;;  %v2237_v48 = vadd.f32 %v2236_v15, %v2235_v37  ;;  %v2293_v51 = vadd.f32 %v2292_v24, %v2286_v58  ;;  %v2317_v54 = vmul.f32 %v5903_v35, %v5794_v13 }
 0x198   :  { %v2321_v14 = vadd.f32 %v2320_v34, %v2314_v19  ;;  %2209 = vst [vmem:[%s6154_s1 + $0x6a] sm:$0x1] %v2208_v8  ;;  %2210 = vst [vmem:[%s6154_s1 + $0x80] sm:$0x1] %v2208_v8  ;;  %v2266_v0 = vadd.f32 %v2265_v10, %v2264_v36  ;;  %v2345_v4 = vmul.f32 %v5810_v49, %v5810_v49 }
 0x199   :  { %v2350_v61 = vadd.f32 %v2343_v22, %v2342_v55  ;;  %v2372_v20 = vmul.f32 %v5819_v47, %v5757_v25  ;;  %v2238_v33 = vrot.slane %v2237_v48, 1  ;;  %v2294_v60 = vadd.f32 %v2293_v51, %v2287_v38 }
 0x19a   :  { %v2322_v13 = vadd.f32 %v2321_v14, %v2315_v11  ;;  %v2373_v50 = vmul.f32 %v5824_v28, %v5762_v59  ;;  %v2267_v31 = vrot.slane %v2266_v0, 2  ;;  %v2318_v57 = vmul.f32 %v5923_v53, %v5799_v23 }
 0x19b   :  { %v2346_v12 = vmul.f32 %v5839_v39, %v5839_v39  ;;  %v2351_v9 = vadd.f32 %v2350_v61, %v2344_v3  ;;  %v2239_v43 = vadd.f32 %v2238_v33, %v2237_v48  ;;  %v2295_v42 = vrot.slane %v2294_v60, 4 }
 0x19c   :  { %v2323_v32 = vadd.f32 %v2322_v13, %v2316_v6  ;;  %v2374_v25 = vmul.f32 %v5851_v27, %v5789_v56  ;;  %v2268_v63 = vadd.f32 %v2267_v31, %v2266_v0  ;;  %v2347_v29 = vmul.f32 %v5844_v17, %v5844_v17 }
 0x19d   :  { %v2348_v59 = vmul.f32 %v5856_v30, %v5856_v30  ;;  %v2352_v5 = vadd.f32 %v2351_v9, %v2345_v4  ;;  %2240 = vst [vmem:[%s6154_s1 + $0x6b] sm:$0x1] %v2239_v43  ;;  %2241 = vst [vmem:[%s6154_s1 + $0x8c] sm:$0x1] %v2239_v43  ;;  %v2296_v23 = vadd.f32 %v2295_v42, %v2294_v60 }
 0x19e   :  { %v2324_v45 = vadd.f32 %v2323_v32, %v2317_v54  ;;  %v2375_v56 = vmul.f32 %v5867_v46, %v5810_v49  ;;  %v2380_v44 = vadd.f32 %v2373_v50, %v2372_v20  ;;  %v2269_v21 = vrot.slane %v2268_v63, 1 }
 0x19f   :  { %v2353_v41 = vadd.f32 %v2352_v5, %v2346_v12  ;;  %v2403_v40 = vmul.f32 %v5819_v47, %v5819_v47  ;;  %v2404_v52 = vmul.f32 %v5824_v28, %v5824_v28  ;;  %v2297_v26 = vrot.slane %v2296_v23, 2 }
 0x1a0   :  { %v2325_v58 = vadd.f32 %v2324_v45, %v2318_v57  ;;  %v2376_v38 = vmul.f32 %v5883_v62, %v5839_v39  ;;  %v2381_v37 = vadd.f32 %v2380_v44, %v2374_v25  ;;  %v2270_v7 = vadd.f32 %v2269_v21, %v2268_v63 }
 0x1a1   :  { %v2349_v19 = vmul.f32 %v5876_v1, %v5876_v1  ;;  %v2354_v49 = vadd.f32 %v2353_v41, %v2347_v29  ;;  %v2405_v18 = vmul.f32 %v5851_v27, %v5851_v27  ;;  %v2298_v16 = vadd.f32 %v2297_v26, %v2296_v23 }
 0x1a2   :  { %v2326_v36 = vrot.slane %v2325_v58, 4  ;;  %v2377_v47 = vmul.f32 %v5898_v2, %v5844_v17  ;;  %v2382_v28 = vadd.f32 %v2381_v37, %v2375_v56  ;;  %2271 = vst [vmem:[%s6154_s1 + $0x75] sm:$0x1] %v2270_v7  ;;  %v2406_v55 = vmul.f32 %v5867_v46, %v5867_v46 }
 0x1a3   :  { %v2355_v39 = vadd.f32 %v2354_v49, %v2348_v59  ;;  %v2411_v22 = vadd.f32 %v2404_v52, %v2403_v40  ;;  %v2299_v15 = vrot.slane %v2298_v16, 1  ;;  %v2378_v27 = vmul.f32 %v5903_v35, %v5856_v30 }
 0x1a4   :  { %v2327_v24 = vadd.f32 %v2326_v36, %v2325_v58  ;;  %v2383_v11 = vadd.f32 %v2382_v28, %v2376_v38  ;;  %v2407_v17 = vmul.f32 %v5883_v62, %v5883_v62  ;;  %v2379_v3 = vmul.f32 %v5923_v53, %v5876_v1 }
 0x1a5   :  { %v2356_v34 = vadd.f32 %v2355_v39, %v2349_v19  ;;  %v2412_v8 = vadd.f32 %v2411_v22, %v2405_v18  ;;  %v2300_v10 = vadd.f32 %v2299_v15, %v2298_v16  ;;  %v2408_v46 = vmul.f32 %v5898_v2, %v5898_v2 }
 0x1a6   :  { %v2328_v6 = vrot.slane %v2327_v24, 2  ;;  %v2384_v48 = vadd.f32 %v2383_v11, %v2377_v47  ;;  %v2409_v1 = vmul.f32 %v5903_v35, %v5903_v35  ;;  %v2410_v2 = vmul.f32 %v5923_v53, %v5923_v53 }
 0x1a7   :  { %v2357_v51 = vrot.slane %v2356_v34, 4  ;;  %v2413_v54 = vadd.f32 %v2412_v8, %v2406_v55  ;;  %2301 = vst [vmem:[%s6154_s1 + $0x76] sm:$0x1] %v2300_v10  ;;  %2302 = vst [vmem:[%s6154_s1 + $0x81] sm:$0x1] %v2300_v10 }
 0x1a8   :  { %v2329_v30 = vadd.f32 %v2328_v6, %v2327_v24  ;;  %v2385_v62 = vadd.f32 %v2384_v48, %v2378_v27 }
 0x1a9   :  { %v2358_v14 = vadd.f32 %v2357_v51, %v2356_v34  ;;  %v2414_v0 = vadd.f32 %v2413_v54, %v2407_v17 }
 0x1aa   :  { %v2330_v4 = vrot.slane %v2329_v30, 1  ;;  %v2386_v61 = vadd.f32 %v2385_v62, %v2379_v3 }
 0x1ab   :  { %v2359_v20 = vrot.slane %v2358_v14, 2  ;;  %v2415_v33 = vadd.f32 %v2414_v0, %v2408_v46 }
 0x1ac   :  { %v2331_v60 = vadd.f32 %v2330_v4, %v2329_v30  ;;  %v2387_v13 = vrot.slane %v2386_v61, 4 }
 0x1ad   :  { %v2360_v50 = vadd.f32 %v2359_v20, %v2358_v14  ;;  %v2416_v31 = vadd.f32 %v2415_v33, %v2409_v1 }
 0x1ae   :  { %2332 = vst [vmem:[%s6154_s1 + $0x77] sm:$0x1] %v2331_v60  ;;  %2333 = vst [vmem:[%s6154_s1 + $0x8d] sm:$0x1] %v2331_v60  ;;  %v2388_v35 = vadd.f32 %v2387_v13, %v2386_v61 }
 0x1af   :  { %v2361_v57 = vrot.slane %v2360_v50, 1  ;;  %v2417_v12 = vadd.f32 %v2416_v31, %v2410_v2 }
 0x1b0   :  { %v2389_v9 = vrot.slane %v2388_v35, 2 }
 0x1b1   :  { %v2362_v43 = vadd.f32 %v2361_v57, %v2360_v50  ;;  %v2418_v42 = vrot.slane %v2417_v12, 4 }
 0x1b2   :  { %v2390_v53 = vadd.f32 %v2389_v9, %v2388_v35 }
 0x1b3   :  { %2363 = vst [vmem:[%s6154_s1 + $0x82] sm:$0x1] %v2362_v43  ;;  %v2419_v32 = vadd.f32 %v2418_v42, %v2417_v12 }
 0x1b4   :  { %v2391_v25 = vrot.slane %v2390_v53, 1 }
 0x1b5   :  { %v2420_v63 = vrot.slane %v2419_v32, 2 }
 0x1b6   :  { %v2392_v29 = vadd.f32 %v2391_v25, %v2390_v53 }
 0x1b7   :  { %v2421_v59 = vadd.f32 %v2420_v63, %v2419_v32 }
 0x1b8   :  { %2393 = vst [vmem:[%s6154_s1 + $0x83] sm:$0x1] %v2392_v29  ;;  %2394 = vst [vmem:[%s6154_s1 + $0x8e] sm:$0x1] %v2392_v29 }
 0x1b9   :  { %v2422_v5 = vrot.slane %v2421_v59, 1 }
 0x1bb   :  { %v2423_v23 = vadd.f32 %v2422_v5, %v2421_v59 }
 0x1bd   :  { %2424 = vst [vmem:[%s6154_s1 + $0x8f] sm:$0x1] %v2423_v23 }

// kernel: grnet_forward.5
= control target key start
LH: loop header
LB: loop body
LE: loop exit
PB: predicated region body
PF: predicated region fallthrough
CT: control target
= control target key end

     0   :  { %vm16_vm0 = vcmask 1043456   ;;  %v1154_v0 = vmov 0.0|0.0   ;;  %vm906_vm1 = vcmask 130048   ;;  %vm988_vm2 = vcmask 1041408   ;;  %s1618_s0 = inlined_call_operand.vmem [shape: f32[12,4,128], index: 0, kind: input, shape index: {}]   ;;  %s1619_s1 = inlined_call_operand.vmem [shape: f32[10,144], index: 1, kind: input, shape index: {}]   ;;  %s1620_s2 = inlined_call_operand.vmem [shape: f32[10,1], index: 2, kind: input, shape index: {}]   ;;  %s1621_s3 = inlined_call_operand.vmem [shape: f32[10,128], index: 3, kind: output, shape index: {}]  }
   0x1   :  { %1100 = vmatprep.subr.bf16.mxu0 %v1154_v0  ;;  %1127 = vmatprep.subr.bf16.mxu1 %v1154_v0  ;;  %v1181_v1 = vld [vmem:[%s1618_s0] sm:$0xf]  ;;  %v1021_v2 = vld [vmem:[%s1618_s0 + $0x4] sm:$0xf]  ;;  %v1022_v3 = vld [vmem:[%s1618_s0 + $0x8] sm:$0xf] }
   0x2   :  { %v15_v4 = vmul.f32 %v1181_v1, %v1181_v1  ;;  %v27_v5 = vmul.f32 %v1021_v2, %v1181_v1  ;;  %v39_v6 = vmul.f32 %v1022_v3, %v1181_v1  ;;  %v1023_v7 = vld [vmem:[%s1618_s0 + $0xc] sm:$0xf]  ;;  %v1024_v8 = vld [vmem:[%s1618_s0 + $0x10] sm:$0xf]  ;;  %v1025_v9 = vld [vmem:[%s1618_s0 + $0x14] sm:$0xf] }
   0x3   :  { %v51_v10 = vmul.f32 %v1023_v7, %v1181_v1  ;;  %v63_v11 = vmul.f32 %v1024_v8, %v1181_v1  ;;  %v75_v12 = vmul.f32 %v1025_v9, %v1181_v1  ;;  %v1026_v13 = vld [vmem:[%s1618_s0 + $0x18] sm:$0xf]  ;;  %v1027_v22 = vld [vmem:[%s1618_s0 + $0x1c] sm:$0xf]  ;;  %v1028_v55 = vld [vmem:[%s1618_s0 + $0x20] sm:$0xf] }
   0x4   :  { %v17_v14 = vsel %vm16_vm0, %v15_v4, 0.0  ;;  %v28_v15 = vsel %vm16_vm0, %v27_v5, 0.0  ;;  %v40_v16 = vsel %vm16_vm0, %v39_v6, 0.0  ;;  %v87_v17 = vmul.f32 %v1026_v13, %v1181_v1  ;;  %v1029_v60 = vld [vmem:[%s1618_s0 + $0x24] sm:$0xf] }
   0x5   :  { %v18_v18 = vrot.slane %v17_v14, 4  ;;  %v29_v19 = vrot.slane %v28_v15, 4  ;;  %v41_v20 = vrot.slane %v40_v16, 4  ;;  %v52_v21 = vsel %vm16_vm0, %v51_v10, 0.0  ;;  %v1030_v61 = vld [vmem:[%s1618_s0 + $0x28] sm:$0xf] }
   0x6   :  { %v53_v23 = vrot.slane %v52_v21, 4  ;;  %v64_v24 = vsel %vm16_vm0, %v63_v11, 0.0  ;;  %v76_v25 = vsel %vm16_vm0, %v75_v12, 0.0  ;;  %v88_v26 = vsel %vm16_vm0, %v87_v17, 0.0  ;;  %v1031_v4 = vld [vmem:[%s1618_s0 + $0x2c] sm:$0xf] }
   0x7   :  { %v19_v27 = vadd.f32 %v18_v18, %v17_v14  ;;  %v30_v28 = vadd.f32 %v29_v19, %v28_v15  ;;  %v42_v29 = vadd.f32 %v41_v20, %v40_v16  ;;  %v65_v30 = vrot.slane %v64_v24, 4  ;;  %v1236_v9 = vld [vmem:[%s1618_s0 + $0x4] sm:$0xf]  ;;  %v1033_v18 = vld [vmem:[%s1618_s0 + $0x8] sm:$0xf] }
   0x8   :  { %v54_v31 = vadd.f32 %v53_v23, %v52_v21  ;;  %v77_v32 = vrot.slane %v76_v25, 4  ;;  %v89_v33 = vrot.slane %v88_v26, 4  ;;  %v99_v34 = vmul.f32 %v1027_v22, %v1181_v1  ;;  %v1034_v19 = vld [vmem:[%s1618_s0 + $0xc] sm:$0xf] }
   0x9   :  { %v20_v35 = vrot.slane %v19_v27, 2  ;;  %v31_v36 = vrot.slane %v30_v28, 2  ;;  %v43_v37 = vrot.slane %v42_v29, 2  ;;  %v66_v38 = vadd.f32 %v65_v30, %v64_v24 }
   0xa   :  { %v55_v39 = vrot.slane %v54_v31, 2  ;;  %v78_v40 = vadd.f32 %v77_v32, %v76_v25  ;;  %v90_v41 = vadd.f32 %v89_v33, %v88_v26  ;;  %v100_v42 = vsel %vm16_vm0, %v99_v34, 0.0 }
   0xb   :  { %v21_v43 = vadd.f32 %v20_v35, %v19_v27  ;;  %v32_v44 = vadd.f32 %v31_v36, %v30_v28  ;;  %v44_v45 = vadd.f32 %v43_v37, %v42_v29  ;;  %v67_v46 = vrot.slane %v66_v38, 2  ;;  %v1035_v35 = vld [vmem:[%s1618_s0 + $0x10] sm:$0xf] }
   0xc   :  { %v56_v47 = vadd.f32 %v55_v39, %v54_v31  ;;  %v79_v48 = vrot.slane %v78_v40, 2  ;;  %v91_v49 = vrot.slane %v90_v41, 2  ;;  %v101_v50 = vrot.slane %v100_v42, 4 }
   0xd   :  { %v22_v51 = vrot.slane %v21_v43, 1  ;;  %v33_v52 = vrot.slane %v32_v44, 1  ;;  %v45_v53 = vrot.slane %v44_v45, 1  ;;  %v68_v54 = vadd.f32 %v67_v46, %v66_v38 }
   0xe   :  { %v57_v56 = vrot.slane %v56_v47, 1  ;;  %v80_v57 = vadd.f32 %v79_v48, %v78_v40  ;;  %v92_v58 = vadd.f32 %v91_v49, %v90_v41  ;;  %v102_v59 = vadd.f32 %v101_v50, %v100_v42 }
   0xf   :  { %v23_v62 = vadd.f32 %v22_v51, %v21_v43  ;;  %v34_v63 = vadd.f32 %v33_v52, %v32_v44  ;;  %v46_v2 = vadd.f32 %v45_v53, %v44_v45  ;;  %v69_v3 = vrot.slane %v68_v54, 1 }
  0x10   :  { %v58_v5 = vadd.f32 %v57_v56, %v56_v47  ;;  %v81_v6 = vrot.slane %v80_v57, 1  ;;  %v93_v7 = vrot.slane %v92_v58, 1  ;;  %v103_v8 = vrot.slane %v102_v59, 2 }
  0x11   :  { %24 = vst [vmem:[#allocation2] sm:$0x1] %v23_v62  ;;  %35 = vst [vmem:[#allocation2 + $0x1] sm:$0x1] %v34_v63  ;;  %v70_v10 = vadd.f32 %v69_v3, %v68_v54  ;;  %v111_v11 = vmul.f32 %v1028_v55, %v1181_v1  ;;  %v123_v12 = vmul.f32 %v1029_v60, %v1181_v1  ;;  %v1036_v60 = vld [vmem:[%s1618_s0 + $0x14] sm:$0xf] }
  0x12   :  { %36 = vst [vmem:[#allocation2 + $0xc] sm:$0x1] %v34_v63  ;;  %47 = vst [vmem:[#allocation2 + $0x2] sm:$0x1] %v46_v2  ;;  %v135_v13 = vmul.f32 %v1030_v61, %v1181_v1  ;;  %v82_v14 = vadd.f32 %v81_v6, %v80_v57  ;;  %v94_v15 = vadd.f32 %v93_v7, %v92_v58  ;;  %v1037_v3 = vld [vmem:[%s1618_s0 + $0x18] sm:$0xf] }
  0x13   :  { %48 = vst [vmem:[#allocation2 + $0x18] sm:$0x1] %v46_v2  ;;  %59 = vst [vmem:[#allocation2 + $0x3] sm:$0x1] %v58_v5  ;;  %v104_v16 = vadd.f32 %v103_v8, %v102_v59  ;;  %v147_v17 = vmul.f32 %v1031_v4, %v1181_v1  ;;  %v112_v20 = vsel %vm16_vm0, %v111_v11, 0.0  ;;  %v124_v21 = vsel %vm16_vm0, %v123_v12, 0.0 }
  0x14   :  { %60 = vst [vmem:[#allocation2 + $0x24] sm:$0x1] %v58_v5  ;;  %71 = vst [vmem:[#allocation2 + $0x4] sm:$0x1] %v70_v10  ;;  %v136_v22 = vsel %vm16_vm0, %v135_v13, 0.0  ;;  %v158_v23 = vmul.f32 %v1236_v9, %v1236_v9  ;;  %v113_v24 = vrot.slane %v112_v20, 4  ;;  %v168_v29 = vmul.f32 %v1033_v18, %v1236_v9 }
  0x15   :  { %72 = vst [vmem:[#allocation2 + $0x30] sm:$0x1] %v70_v10  ;;  %83 = vst [vmem:[#allocation2 + $0x5] sm:$0x1] %v82_v14  ;;  %v105_v1 = vrot.slane %v104_v16, 1  ;;  %v125_v25 = vrot.slane %v124_v21, 4  ;;  %v179_v30 = vmul.f32 %v1034_v19, %v1236_v9  ;;  %v190_v47 = vmul.f32 %v1035_v35, %v1236_v9 }
  0x16   :  { %95 = vst [vmem:[#allocation2 + $0x6] sm:$0x1] %v94_v15  ;;  %v137_v26 = vrot.slane %v136_v22, 4  ;;  %84 = vst [vmem:[#allocation2 + $0x3c] sm:$0x1] %v82_v14  ;;  %v148_v27 = vsel %vm16_vm0, %v147_v17, 0.0  ;;  %v114_v32 = vadd.f32 %v113_v24, %v112_v20 }
  0x17   :  { %96 = vst [vmem:[#allocation2 + $0x48] sm:$0x1] %v94_v15  ;;  %v159_v28 = vsel %vm16_vm0, %v158_v23, 0.0  ;;  %v106_v31 = vadd.f32 %v105_v1, %v104_v16  ;;  %v126_v33 = vadd.f32 %v125_v25, %v124_v21  ;;  %v149_v36 = vrot.slane %v148_v27, 4  ;;  %v1038_v4 = vld [vmem:[%s1618_s0 + $0x1c] sm:$0xf] }
  0x18   :  { %v138_v34 = vadd.f32 %v137_v26, %v136_v22  ;;  %v160_v37 = vrot.slane %v159_v28, 4  ;;  %v169_v38 = vsel %vm16_vm0, %v168_v29, 0.0  ;;  %v180_v39 = vsel %vm16_vm0, %v179_v30, 0.0  ;;  %v1039_v18 = vld [vmem:[%s1618_s0 + $0x20] sm:$0xf] }
  0x19   :  { %107 = vst [vmem:[#allocation2 + $0x7] sm:$0x1] %v106_v31  ;;  %v115_v40 = vrot.slane %v114_v32, 2  ;;  %v127_v41 = vrot.slane %v126_v33, 2  ;;  %v170_v43 = vrot.slane %v169_v38, 4  ;;  %v150_v44 = vadd.f32 %v149_v36, %v148_v27 }
  0x1a   :  { %v139_v42 = vrot.slane %v138_v34, 2  ;;  %108 = vst [vmem:[#allocation2 + $0x54] sm:$0x1] %v106_v31  ;;  %v161_v45 = vadd.f32 %v160_v37, %v159_v28  ;;  %v181_v46 = vrot.slane %v180_v39, 4  ;;  %v191_v55 = vsel %vm16_vm0, %v190_v47, 0.0 }
  0x1b   :  { %v116_v48 = vadd.f32 %v115_v40, %v114_v32  ;;  %v128_v49 = vadd.f32 %v127_v41, %v126_v33  ;;  %v171_v51 = vadd.f32 %v170_v43, %v169_v38  ;;  %v151_v52 = vrot.slane %v150_v44, 2  ;;  %v1040_v23 = vld [vmem:[%s1618_s0 + $0x24] sm:$0xf]  ;;  %v1041_v1 = vld [vmem:[%s1618_s0 + $0x28] sm:$0xf] }
  0x1c   :  { %v140_v50 = vadd.f32 %v139_v42, %v138_v34  ;;  %v162_v53 = vrot.slane %v161_v45, 2  ;;  %v182_v54 = vadd.f32 %v181_v46, %v180_v39  ;;  %v192_v2 = vrot.slane %v191_v55, 4  ;;  %v1042_v28 = vld [vmem:[%s1618_s0 + $0x2c] sm:$0xf] }
  0x1d   :  { %v117_v56 = vrot.slane %v116_v48, 1  ;;  %v129_v57 = vrot.slane %v128_v49, 1  ;;  %v172_v59 = vrot.slane %v171_v51, 2  ;;  %v152_v61 = vadd.f32 %v151_v52, %v150_v44 }
  0x1e   :  { %v141_v58 = vrot.slane %v140_v50, 1  ;;  %v163_v62 = vadd.f32 %v162_v53, %v161_v45  ;;  %v183_v63 = vrot.slane %v182_v54, 2  ;;  %v193_v13 = vadd.f32 %v192_v2, %v191_v55 }
  0x1f   :  { %v118_v5 = vadd.f32 %v117_v56, %v116_v48  ;;  %v130_v6 = vadd.f32 %v129_v57, %v128_v49  ;;  %v173_v8 = vadd.f32 %v172_v59, %v171_v51  ;;  %v153_v10 = vrot.slane %v152_v61, 1  ;;  %v1301_v49 = vld [vmem:[%s1618_s0 + $0x8] sm:$0xf] }
  0x20   :  { %v142_v7 = vadd.f32 %v141_v58, %v140_v50  ;;  %v164_v11 = vrot.slane %v163_v62, 1  ;;  %v184_v12 = vadd.f32 %v183_v63, %v182_v54  ;;  %v201_v15 = vmul.f32 %v1036_v60, %v1236_v9  ;;  %v876_v57 = vld [vmem:[#allocation2] sm:$0xff] }
  0x21   :  { %119 = vst [vmem:[#allocation2 + $0x8] sm:$0x1] %v118_v5  ;;  %131 = vst [vmem:[#allocation2 + $0x9] sm:$0x1] %v130_v6  ;;  %v174_v14 = vrot.slane %v173_v8, 1  ;;  %v212_v16 = vmul.f32 %v1037_v3, %v1236_v9  ;;  %v223_v17 = vmul.f32 %v1038_v4, %v1236_v9  ;;  %v154_v19 = vadd.f32 %v153_v10, %v152_v61 }
  0x22   :  { %143 = vst [vmem:[#allocation2 + $0xa] sm:$0x1] %v142_v7  ;;  %120 = vst [vmem:[#allocation2 + $0x60] sm:$0x1] %v118_v5  ;;  %v165_v20 = vadd.f32 %v164_v11, %v163_v62  ;;  %v185_v21 = vrot.slane %v184_v12, 1  ;;  %v194_v22 = vrot.slane %v193_v13, 2  ;;  %v234_v34 = vmul.f32 %v1039_v18, %v1236_v9 }
  0x23   :  { %132 = vst [vmem:[#allocation2 + $0x6c] sm:$0x1] %v130_v6  ;;  %144 = vst [vmem:[#allocation2 + $0x78] sm:$0x1] %v142_v7  ;;  %v175_v24 = vadd.f32 %v174_v14, %v173_v8  ;;  %v202_v25 = vsel %vm16_vm0, %v201_v15, 0.0  ;;  %v213_v26 = vsel %vm16_vm0, %v212_v16, 0.0  ;;  %v245_v35 = vmul.f32 %v1040_v23, %v1236_v9 }
  0x24   :  { %v224_v27 = vsel %vm16_vm0, %v223_v17, 0.0  ;;  %155 = vst [vmem:[#allocation2 + $0xb] sm:$0x1] %v154_v19  ;;  %166 = vst [vmem:[#allocation2 + $0xd] sm:$0x1] %v165_v20  ;;  %v186_v29 = vadd.f32 %v185_v21, %v184_v12  ;;  %v195_v30 = vadd.f32 %v194_v22, %v193_v13  ;;  %v203_v31 = vrot.slane %v202_v25, 4 }
  0x25   :  { %156 = vst [vmem:[#allocation2 + $0x84] sm:$0x1] %v154_v19  ;;  %v214_v32 = vrot.slane %v213_v26, 4  ;;  %176 = vst [vmem:[#allocation2 + $0xe] sm:$0x1] %v175_v24  ;;  %v225_v33 = vrot.slane %v224_v27, 4  ;;  %v256_v36 = vmul.f32 %v1041_v1, %v1236_v9  ;;  %v267_v40 = vmul.f32 %v1042_v28, %v1236_v9 }
  0x26   :  { %177 = vst [vmem:[#allocation2 + $0x19] sm:$0x1] %v175_v24  ;;  %187 = vst [vmem:[#allocation2 + $0xf] sm:$0x1] %v186_v29  ;;  %v196_v37 = vrot.slane %v195_v30, 1  ;;  %v204_v38 = vadd.f32 %v203_v31, %v202_v25  ;;  %v235_v42 = vsel %vm16_vm0, %v234_v34, 0.0  ;;  %v278_v61 = vmul.f32 %v1301_v49, %v1301_v49 }
  0x27   :  { %188 = vst [vmem:[#allocation2 + $0x25] sm:$0x1] %v186_v29  ;;  %v215_v39 = vadd.f32 %v214_v32, %v213_v26  ;;  %v226_v41 = vadd.f32 %v225_v33, %v224_v27  ;;  %v246_v43 = vsel %vm16_vm0, %v245_v35, 0.0  ;;  %v257_v44 = vsel %vm16_vm0, %v256_v36, 0.0  ;;  %v1044_v62 = vld [vmem:[%s1618_s0 + $0xc] sm:$0xf] }
  0x28   :  { %v197_v45 = vadd.f32 %v196_v37, %v195_v30  ;;  %v205_v46 = vrot.slane %v204_v38, 2  ;;  %v236_v48 = vrot.slane %v235_v42, 4  ;;  %v247_v51 = vrot.slane %v246_v43, 4  ;;  %v1045_v5 = vld [vmem:[%s1618_s0 + $0x10] sm:$0xf] }
  0x29   :  { %v216_v47 = vrot.slane %v215_v39, 2  ;;  %v227_v50 = vrot.slane %v226_v41, 2  ;;  %v258_v52 = vrot.slane %v257_v44, 4  ;;  %v268_v9 = vsel %vm16_vm0, %v267_v40, 0.0  ;;  %v1046_v16 = vld [vmem:[%s1618_s0 + $0x14] sm:$0xf] }
  0x2a   :  { %198 = vst [vmem:[#allocation2 + $0x10] sm:$0x1] %v197_v45  ;;  %v206_v53 = vadd.f32 %v205_v46, %v204_v38  ;;  %v237_v55 = vadd.f32 %v236_v48, %v235_v42  ;;  %v269_v56 = vrot.slane %v268_v9, 4  ;;  %199 = vst [vmem:[#allocation2 + $0x31] sm:$0x1] %v197_v45  ;;  %v248_v59 = vadd.f32 %v247_v51, %v246_v43 }
  0x2b   :  { %v217_v54 = vadd.f32 %v216_v47, %v215_v39  ;;  %v228_v58 = vadd.f32 %v227_v50, %v226_v41  ;;  %v259_v60 = vadd.f32 %v258_v52, %v257_v44  ;;  %v279_v11 = vsel %vm16_vm0, %v278_v61, 0.0  ;;  %v1047_v28 = vld [vmem:[%s1618_s0 + $0x18] sm:$0xf]  ;;  %v1048_v33 = vld [vmem:[%s1618_s0 + $0x1c] sm:$0xf] }
  0x2c   :  { %v207_v63 = vrot.slane %v206_v53, 1  ;;  %v238_v3 = vrot.slane %v237_v55, 2  ;;  %v270_v4 = vadd.f32 %v269_v56, %v268_v9  ;;  %v249_v8 = vrot.slane %v248_v59, 2  ;;  %v1049_v38 = vld [vmem:[%s1618_s0 + $0x20] sm:$0xf] }
  0x2d   :  { %v218_v2 = vrot.slane %v217_v54, 1  ;;  %v877_v6 = vld [vmem:[#allocation2 + $0x8] sm:$0xff]  ;;  %v229_v7 = vrot.slane %v228_v58, 1  ;;  %v260_v10 = vrot.slane %v259_v60, 2  ;;  %v280_v22 = vrot.slane %v279_v11, 4 }
  0x2e   :  { %v1101_v12 = vpack.c.bf16 %v877_v6, %v876_v57  ;;  %v208_v13 = vadd.f32 %v207_v63, %v206_v53  ;;  %v239_v15 = vadd.f32 %v238_v3, %v237_v55  ;;  %v250_v18 = vadd.f32 %v249_v8, %v248_v59  ;;  %v1050_v55 = vld [vmem:[%s1618_s0 + $0x24] sm:$0xf] }
  0x2f   :  { %v219_v14 = vadd.f32 %v218_v2, %v217_v54  ;;  %v230_v17 = vadd.f32 %v229_v7, %v228_v58  ;;  %v261_v19 = vadd.f32 %v260_v10, %v259_v60  ;;  %v271_v20 = vrot.slane %v270_v4, 2  ;;  %v1051_v2 = vld [vmem:[%s1618_s0 + $0x28] sm:$0xf] }
  0x30   :  { %1102 = vmatpush1.bf16.msra.mxu0 %v1101_v12  ;;  %1136 = vmatpush1.bf16.msra.mxu1 %v1101_v12  ;;  %209 = vst [vmem:[#allocation2 + $0x11] sm:$0x1] %v208_v13  ;;  %v240_v21 = vrot.slane %v239_v15, 1  ;;  %v288_v23 = vmul.f32 %v1044_v62, %v1301_v49  ;;  %v299_v1 = vmul.f32 %v1045_v5, %v1301_v49  ;;  %210 = vst [vmem:[#allocation2 + $0x3d] sm:$0x1] %v208_v13 }
  0x31   :  { %220 = vst [vmem:[#allocation2 + $0x12] sm:$0x1] %v219_v14  ;;  %221 = vst [vmem:[#allocation2 + $0x49] sm:$0x1] %v219_v14  ;;  %1103 = vmatprep.subr.bf16.mxu0 %v1154_v0  ;;  %1128 = vmatprep.subr.bf16.mxu1 %v1154_v0  ;;  %v251_v24 = vrot.slane %v250_v18, 1  ;;  %v262_v25 = vrot.slane %v261_v19, 1  ;;  %v272_v26 = vadd.f32 %v271_v20, %v270_v4 }
  0x32   :  { %231 = vst [vmem:[#allocation2 + $0x13] sm:$0x1] %v230_v17  ;;  %v310_v27 = vmul.f32 %v1046_v16, %v1301_v49  ;;  %232 = vst [vmem:[#allocation2 + $0x55] sm:$0x1] %v230_v17  ;;  %v241_v29 = vadd.f32 %v240_v21, %v239_v15  ;;  %v281_v30 = vadd.f32 %v280_v22, %v279_v11  ;;  %v289_v31 = vsel %vm16_vm0, %v288_v23, 0.0 }
  0x33   :  { %v300_v32 = vsel %vm16_vm0, %v299_v1, 0.0  ;;  %v252_v34 = vadd.f32 %v251_v24, %v250_v18  ;;  %v263_v35 = vadd.f32 %v262_v25, %v261_v19  ;;  %v273_v36 = vrot.slane %v272_v26, 1  ;;  %v1052_v20 = vld [vmem:[%s1618_s0 + $0x2c] sm:$0xf]  ;;  %v1054_v25 = vld [vmem:[%s1618_s0 + $0x10] sm:$0xf] }
  0x34   :  { %v290_v37 = vrot.slane %v289_v31, 4  ;;  %242 = vst [vmem:[#allocation2 + $0x14] sm:$0x1] %v241_v29  ;;  %v282_v39 = vrot.slane %v281_v30, 2  ;;  %v301_v40 = vrot.slane %v300_v32, 4  ;;  %v311_v41 = vsel %vm16_vm0, %v310_v27, 0.0 }
  0x35   :  { %v321_v42 = vmul.f32 %v1047_v28, %v1301_v49  ;;  %243 = vst [vmem:[#allocation2 + $0x61] sm:$0x1] %v241_v29  ;;  %253 = vst [vmem:[#allocation2 + $0x15] sm:$0x1] %v252_v34  ;;  %v274_v43 = vadd.f32 %v273_v36, %v272_v26  ;;  %v312_v45 = vrot.slane %v311_v41, 4  ;;  %v332_v46 = vmul.f32 %v1048_v33, %v1301_v49 }
  0x36   :  { %264 = vst [vmem:[#allocation2 + $0x16] sm:$0x1] %v263_v35  ;;  %v291_v44 = vadd.f32 %v290_v37, %v289_v31  ;;  %254 = vst [vmem:[#allocation2 + $0x6d] sm:$0x1] %v252_v34  ;;  %v283_v47 = vadd.f32 %v282_v39, %v281_v30  ;;  %v302_v48 = vadd.f32 %v301_v40, %v300_v32  ;;  %v1354_v21 = vld [vmem:[%s1618_s0 + $0xc] sm:$0xf] }
  0x37   :  { %265 = vst [vmem:[#allocation2 + $0x79] sm:$0x1] %v263_v35  ;;  %v322_v50 = vsel %vm16_vm0, %v321_v42, 0.0  ;;  %v343_v51 = vmul.f32 %v1049_v38, %v1301_v49  ;;  %275 = vst [vmem:[#allocation2 + $0x17] sm:$0x1] %v274_v43  ;;  %v313_v9 = vadd.f32 %v312_v45, %v311_v41  ;;  %v333_v54 = vsel %vm16_vm0, %v332_v46, 0.0 }
  0x38   :  { %v292_v52 = vrot.slane %v291_v44, 2  ;;  %v323_v53 = vrot.slane %v322_v50, 4  ;;  %276 = vst [vmem:[#allocation2 + $0x85] sm:$0x1] %v274_v43  ;;  %v284_v56 = vrot.slane %v283_v47, 1  ;;  %v303_v57 = vrot.slane %v302_v48, 2 }
  0x39   :  { %v334_v58 = vrot.slane %v333_v54, 4  ;;  %v344_v59 = vsel %vm16_vm0, %v343_v51, 0.0  ;;  %v314_v61 = vrot.slane %v313_v9, 2  ;;  %v354_v6 = vmul.f32 %v1050_v55, %v1301_v49  ;;  %v1055_v38 = vld [vmem:[%s1618_s0 + $0x14] sm:$0xf] }
  0x3a   :  { %v293_v60 = vadd.f32 %v292_v52, %v291_v44  ;;  %v324_v62 = vadd.f32 %v323_v53, %v322_v50  ;;  %v345_v63 = vrot.slane %v344_v59, 4  ;;  %v285_v3 = vadd.f32 %v284_v56, %v283_v47  ;;  %v1056_v39 = vld [vmem:[%s1618_s0 + $0x18] sm:$0xf]  ;;  %v1057_v47 = vld [vmem:[%s1618_s0 + $0x1c] sm:$0xf] }
  0x3b   :  { %v304_v4 = vadd.f32 %v303_v57, %v302_v48  ;;  %v335_v5 = vadd.f32 %v334_v58, %v333_v54  ;;  %v315_v8 = vadd.f32 %v314_v61, %v313_v9  ;;  %v355_v14 = vsel %vm16_vm0, %v354_v6, 0.0 }
  0x3c   :  { %v294_v7 = vrot.slane %v293_v60, 1  ;;  %v325_v10 = vrot.slane %v324_v62, 2  ;;  %v346_v11 = vadd.f32 %v345_v63, %v344_v59  ;;  %286 = vst [vmem:[#allocation2 + $0x1a] sm:$0x1] %v285_v3  ;;  %v365_v15 = vmul.f32 %v1051_v2, %v1301_v49  ;;  %v1058_v2 = vld [vmem:[%s1618_s0 + $0x20] sm:$0xf] }
  0x3d   :  { %v305_v12 = vrot.slane %v304_v4, 1  ;;  %v336_v13 = vrot.slane %v335_v5, 2  ;;  %v316_v17 = vrot.slane %v315_v8, 1  ;;  %v356_v1 = vrot.slane %v355_v14, 4 }
  0x3e   :  { %v295_v16 = vadd.f32 %v294_v7, %v293_v60  ;;  %v326_v18 = vadd.f32 %v325_v10, %v324_v62  ;;  %v347_v19 = vrot.slane %v346_v11, 2  ;;  %v366_v24 = vsel %vm16_vm0, %v365_v15, 0.0  ;;  %v1059_v7 = vld [vmem:[%s1618_s0 + $0x24] sm:$0xf] }
  0x3f   :  { %v306_v22 = vadd.f32 %v305_v12, %v304_v4  ;;  %v337_v23 = vadd.f32 %v336_v13, %v335_v5  ;;  %v317_v26 = vadd.f32 %v316_v17, %v315_v8  ;;  %v367_v29 = vrot.slane %v366_v24, 4  ;;  %v878_v8 = vld [vmem:[#allocation2 + $0x10] sm:$0xff] }
  0x40   :  { %296 = vst [vmem:[#allocation2 + $0x1b] sm:$0x1] %v295_v16  ;;  %v327_v27 = vrot.slane %v326_v18, 1  ;;  %297 = vst [vmem:[#allocation2 + $0x26] sm:$0x1] %v295_v16  ;;  %v348_v28 = vadd.f32 %v347_v19, %v346_v11  ;;  %v357_v31 = vadd.f32 %v356_v1, %v355_v14  ;;  %v376_v32 = vmul.f32 %v1052_v20, %v1301_v49 }
  0x41   :  { %307 = vst [vmem:[#allocation2 + $0x1c] sm:$0x1] %v306_v22  ;;  %v338_v30 = vrot.slane %v337_v23, 1  ;;  %308 = vst [vmem:[#allocation2 + $0x32] sm:$0x1] %v306_v22  ;;  %v387_v33 = vmul.f32 %v1354_v21, %v1354_v21  ;;  %v368_v36 = vadd.f32 %v367_v29, %v366_v24  ;;  %v397_v37 = vmul.f32 %v1054_v25, %v1354_v21 }
  0x42   :  { %318 = vst [vmem:[#allocation2 + $0x1d] sm:$0x1] %v317_v26  ;;  %v328_v34 = vadd.f32 %v327_v27, %v326_v18  ;;  %319 = vst [vmem:[#allocation2 + $0x3e] sm:$0x1] %v317_v26  ;;  %v349_v35 = vrot.slane %v348_v28, 1  ;;  %v358_v49 = vrot.slane %v357_v31, 2  ;;  %v408_v51 = vmul.f32 %v1055_v38, %v1354_v21 }
  0x43   :  { %v339_v40 = vadd.f32 %v338_v30, %v337_v23  ;;  %v377_v41 = vsel %vm16_vm0, %v376_v32, 0.0  ;;  %v388_v42 = vsel %vm16_vm0, %v387_v33, 0.0  ;;  %v369_v44 = vrot.slane %v368_v36, 2  ;;  %v1060_v27 = vld [vmem:[%s1618_s0 + $0x28] sm:$0xf] }
  0x44   :  { %329 = vst [vmem:[#allocation2 + $0x1e] sm:$0x1] %v328_v34  ;;  %330 = vst [vmem:[#allocation2 + $0x4a] sm:$0x1] %v328_v34  ;;  %v350_v43 = vadd.f32 %v349_v35, %v348_v28  ;;  %v378_v45 = vrot.slane %v377_v41, 4  ;;  %v389_v46 = vrot.slane %v388_v42, 4  ;;  %v359_v48 = vadd.f32 %v358_v49, %v357_v31 }
  0x45   :  { %340 = vst [vmem:[#allocation2 + $0x1f] sm:$0x1] %v339_v40  ;;  %341 = vst [vmem:[#allocation2 + $0x56] sm:$0x1] %v339_v40  ;;  %v398_v50 = vsel %vm16_vm0, %v397_v37, 0.0  ;;  %v419_v52 = vmul.f32 %v1056_v39, %v1354_v21  ;;  %v370_v9 = vadd.f32 %v369_v44, %v368_v36  ;;  %v409_v57 = vsel %vm16_vm0, %v408_v51, 0.0 }
  0x46   :  { %351 = vst [vmem:[#allocation2 + $0x20] sm:$0x1] %v350_v43  ;;  %v379_v53 = vadd.f32 %v378_v45, %v377_v41  ;;  %v390_v54 = vadd.f32 %v389_v46, %v388_v42  ;;  %v399_v55 = vrot.slane %v398_v50, 4  ;;  %352 = vst [vmem:[#allocation2 + $0x62] sm:$0x1] %v350_v43  ;;  %v360_v56 = vrot.slane %v359_v48, 1 }
  0x47   :  { %v420_v58 = vsel %vm16_vm0, %v419_v52, 0.0  ;;  %v430_v59 = vmul.f32 %v1057_v47, %v1354_v21  ;;  %v371_v60 = vrot.slane %v370_v9, 1  ;;  %v410_v4 = vrot.slane %v409_v57, 4  ;;  %v1061_v28 = vld [vmem:[%s1618_s0 + $0x2c] sm:$0xf] }
  0x48   :  { %v380_v61 = vrot.slane %v379_v53, 2  ;;  %v391_v62 = vrot.slane %v390_v54, 2  ;;  %v400_v63 = vadd.f32 %v399_v55, %v398_v50  ;;  %v361_v3 = vadd.f32 %v360_v56, %v359_v48  ;;  %v1400_v37 = vld [vmem:[%s1618_s0 + $0x10] sm:$0xf]  ;;  %v1063_v50 = vld [vmem:[%s1618_s0 + $0x14] sm:$0xf] }
  0x49   :  { %v421_v5 = vrot.slane %v420_v58, 4  ;;  %v431_v6 = vsel %vm16_vm0, %v430_v59, 0.0  ;;  %v372_v10 = vadd.f32 %v371_v60, %v370_v9  ;;  %v411_v14 = vadd.f32 %v410_v4, %v409_v57 }
  0x4a   :  { %v381_v11 = vadd.f32 %v380_v61, %v379_v53  ;;  %v392_v12 = vadd.f32 %v391_v62, %v390_v54  ;;  %v401_v13 = vrot.slane %v400_v63, 2  ;;  %362 = vst [vmem:[#allocation2 + $0x21] sm:$0x1] %v361_v3  ;;  %v432_v16 = vrot.slane %v431_v6, 4  ;;  %363 = vst [vmem:[#allocation2 + $0x6e] sm:$0x1] %v361_v3 }
  0x4b   :  { %v422_v15 = vadd.f32 %v421_v5, %v420_v58  ;;  %v441_v17 = vmul.f32 %v1058_v2, %v1354_v21  ;;  %373 = vst [vmem:[#allocation2 + $0x22] sm:$0x1] %v372_v10  ;;  %v452_v23 = vmul.f32 %v1059_v7, %v1354_v21  ;;  %374 = vst [vmem:[#allocation2 + $0x7a] sm:$0x1] %v372_v10  ;;  %v412_v24 = vrot.slane %v411_v14, 2 }
  0x4c   :  { %v879_v18 = vld [vmem:[#allocation2 + $0x18] sm:$0xff]  ;;  %v382_v19 = vrot.slane %v381_v11, 1  ;;  %v393_v20 = vrot.slane %v392_v12, 1  ;;  %v402_v22 = vadd.f32 %v401_v13, %v400_v63  ;;  %v433_v26 = vadd.f32 %v432_v16, %v431_v6 }
  0x4d   :  { %v1104_v1 = vpack.c.bf16 %v879_v18, %v878_v8  ;;  %v423_v25 = vrot.slane %v422_v15, 2  ;;  %v442_v32 = vsel %vm16_vm0, %v441_v17, 0.0  ;;  %v413_v33 = vadd.f32 %v412_v24, %v411_v14  ;;  %v1064_v53 = vld [vmem:[%s1618_s0 + $0x18] sm:$0xf]  ;;  %v1065_v58 = vld [vmem:[%s1618_s0 + $0x1c] sm:$0xf] }
  0x4e   :  { %v383_v29 = vadd.f32 %v382_v19, %v381_v11  ;;  %v394_v30 = vadd.f32 %v393_v20, %v392_v12  ;;  %v403_v31 = vrot.slane %v402_v22, 1  ;;  %v434_v35 = vrot.slane %v433_v26, 2  ;;  %v1066_v14 = vld [vmem:[%s1618_s0 + $0x20] sm:$0xf] }
  0x4f   :  { %1105 = vmatpush1.bf16.msra.mxu0 %v1104_v1  ;;  %1137 = vmatpush1.bf16.msra.mxu1 %v1104_v1  ;;  %v424_v34 = vadd.f32 %v423_v25, %v422_v15  ;;  %v443_v36 = vrot.slane %v442_v32, 4  ;;  %v453_v39 = vsel %vm16_vm0, %v452_v23, 0.0  ;;  %v463_v40 = vmul.f32 %v1060_v27, %v1354_v21 }
  0x50   :  { %1106 = vmatprep.subr.bf16.mxu0 %v1154_v0  ;;  %1129 = vmatprep.subr.bf16.mxu1 %v1154_v0  ;;  %384 = vst [vmem:[#allocation2 + $0x23] sm:$0x1] %v383_v29  ;;  %395 = vst [vmem:[#allocation2 + $0x27] sm:$0x1] %v394_v30  ;;  %v404_v38 = vadd.f32 %v403_v31, %v402_v22  ;;  %v474_v49 = vmul.f32 %v1061_v28, %v1354_v21  ;;  %v414_v41 = vrot.slane %v413_v33, 1 }
  0x51   :  { %385 = vst [vmem:[#allocation2 + $0x86] sm:$0x1] %v383_v29  ;;  %v425_v42 = vrot.slane %v424_v34, 1  ;;  %v435_v43 = vadd.f32 %v434_v35, %v433_v26  ;;  %v444_v44 = vadd.f32 %v443_v36, %v442_v32  ;;  %v454_v45 = vrot.slane %v453_v39, 4  ;;  %v1067_v31 = vld [vmem:[%s1618_s0 + $0x24] sm:$0xf] }
  0x52   :  { %405 = vst [vmem:[#allocation2 + $0x28] sm:$0x1] %v404_v38  ;;  %v464_v46 = vsel %vm16_vm0, %v463_v40, 0.0  ;;  %v475_v47 = vsel %vm16_vm0, %v474_v49, 0.0  ;;  %406 = vst [vmem:[#allocation2 + $0x33] sm:$0x1] %v404_v38  ;;  %v485_v48 = vmul.f32 %v1400_v37, %v1400_v37  ;;  %v415_v21 = vadd.f32 %v414_v41, %v413_v33 }
  0x53   :  { %v426_v51 = vadd.f32 %v425_v42, %v424_v34  ;;  %v436_v52 = vrot.slane %v435_v43, 1  ;;  %v445_v9 = vrot.slane %v444_v44, 2  ;;  %v455_v54 = vadd.f32 %v454_v45, %v453_v39  ;;  %v1068_v36 = vld [vmem:[%s1618_s0 + $0x28] sm:$0xf]  ;;  %v1069_v38 = vld [vmem:[%s1618_s0 + $0x2c] sm:$0xf] }
  0x54   :  { %v465_v55 = vrot.slane %v464_v46, 4  ;;  %v476_v56 = vrot.slane %v475_v47, 4  ;;  %v486_v57 = vsel %vm16_vm0, %v485_v48, 0.0  ;;  %416 = vst [vmem:[#allocation2 + $0x29] sm:$0x1] %v415_v21  ;;  %v495_v62 = vmul.f32 %v1063_v50, %v1400_v37 }
  0x55   :  { %427 = vst [vmem:[#allocation2 + $0x2a] sm:$0x1] %v426_v51  ;;  %v437_v59 = vadd.f32 %v436_v52, %v435_v43  ;;  %v446_v60 = vadd.f32 %v445_v9, %v444_v44  ;;  %417 = vst [vmem:[#allocation2 + $0x3f] sm:$0x1] %v415_v21  ;;  %v487_v61 = vrot.slane %v486_v57, 4  ;;  %v456_v63 = vrot.slane %v455_v54, 2 }
  0x56   :  { %428 = vst [vmem:[#allocation2 + $0x4b] sm:$0x1] %v426_v51  ;;  %v466_v2 = vadd.f32 %v465_v55, %v464_v46  ;;  %v477_v3 = vadd.f32 %v476_v56, %v475_v47  ;;  %v506_v4 = vmul.f32 %v1064_v53, %v1400_v37  ;;  %v496_v7 = vsel %vm16_vm0, %v495_v62, 0.0  ;;  %v1444_v42 = vld [vmem:[%s1618_s0 + $0x14] sm:$0xf] }
  0x57   :  { %438 = vst [vmem:[#allocation2 + $0x2b] sm:$0x1] %v437_v59  ;;  %v447_v5 = vrot.slane %v446_v60, 1  ;;  %439 = vst [vmem:[#allocation2 + $0x57] sm:$0x1] %v437_v59  ;;  %v488_v6 = vadd.f32 %v487_v61, %v486_v57  ;;  %v517_v8 = vmul.f32 %v1065_v58, %v1400_v37  ;;  %v457_v10 = vadd.f32 %v456_v63, %v455_v54 }
  0x58   :  { %v467_v11 = vrot.slane %v466_v2, 2  ;;  %v478_v12 = vrot.slane %v477_v3, 2  ;;  %v497_v13 = vrot.slane %v496_v7, 4  ;;  %v507_v17 = vsel %vm16_vm0, %v506_v4, 0.0  ;;  %v1072_v4 = vld [vmem:[%s1618_s0 + $0x1c] sm:$0xf] }
  0x59   :  { %v448_v15 = vadd.f32 %v447_v5, %v446_v60  ;;  %v489_v16 = vrot.slane %v488_v6, 2  ;;  %v518_v18 = vsel %vm16_vm0, %v517_v8, 0.0  ;;  %v458_v19 = vrot.slane %v457_v10, 1  ;;  %v1073_v5 = vld [vmem:[%s1618_s0 + $0x20] sm:$0xf] }
  0x5a   :  { %v468_v20 = vadd.f32 %v467_v11, %v466_v2  ;;  %v479_v22 = vadd.f32 %v478_v12, %v477_v3  ;;  %v498_v23 = vadd.f32 %v497_v13, %v496_v7  ;;  %v508_v24 = vrot.slane %v507_v17, 4 }
  0x5b   :  { %449 = vst [vmem:[#allocation2 + $0x2c] sm:$0x1] %v448_v15  ;;  %450 = vst [vmem:[#allocation2 + $0x63] sm:$0x1] %v448_v15  ;;  %v490_v1 = vadd.f32 %v489_v16, %v488_v6  ;;  %v519_v25 = vrot.slane %v518_v18, 4  ;;  %v528_v26 = vmul.f32 %v1066_v14, %v1400_v37  ;;  %v459_v27 = vadd.f32 %v458_v19, %v457_v10  ;;  %v880_v6 = vld [vmem:[#allocation2 + $0x20] sm:$0xff] }
  0x5c   :  { %v469_v28 = vrot.slane %v468_v20, 1  ;;  %v480_v29 = vrot.slane %v479_v22, 1  ;;  %v499_v30 = vrot.slane %v498_v23, 2  ;;  %v509_v33 = vadd.f32 %v508_v24, %v507_v17 }
  0x5d   :  { %v491_v32 = vrot.slane %v490_v1, 1  ;;  %v520_v34 = vadd.f32 %v519_v25, %v518_v18  ;;  %v529_v35 = vsel %vm16_vm0, %v528_v26, 0.0  ;;  %460 = vst [vmem:[#allocation2 + $0x2d] sm:$0x1] %v459_v27  ;;  %461 = vst [vmem:[#allocation2 + $0x6f] sm:$0x1] %v459_v27  ;;  %v539_v46 = vmul.f32 %v1067_v31, %v1400_v37 }
  0x5e   :  { %v470_v39 = vadd.f32 %v469_v28, %v468_v20  ;;  %v481_v40 = vadd.f32 %v480_v29, %v479_v22  ;;  %v500_v49 = vadd.f32 %v499_v30, %v498_v23  ;;  %v530_v41 = vrot.slane %v529_v35, 4  ;;  %v1074_v25 = vld [vmem:[%s1618_s0 + $0x24] sm:$0xf] }
  0x5f   :  { %v492_v43 = vadd.f32 %v491_v32, %v490_v1  ;;  %v510_v44 = vrot.slane %v509_v33, 2  ;;  %v521_v45 = vrot.slane %v520_v34, 2  ;;  %v550_v50 = vmul.f32 %v1068_v36, %v1400_v37 }
  0x60   :  { %471 = vst [vmem:[#allocation2 + $0x2e] sm:$0x1] %v470_v39  ;;  %482 = vst [vmem:[#allocation2 + $0x2f] sm:$0x1] %v481_v40  ;;  %v501_v47 = vrot.slane %v500_v49, 1  ;;  %v531_v48 = vadd.f32 %v530_v41, %v529_v35  ;;  %v561_v21 = vmul.f32 %v1069_v38, %v1400_v37  ;;  %v540_v9 = vsel %vm16_vm0, %v539_v46, 0.0 }
  0x61   :  { %472 = vst [vmem:[#allocation2 + $0x7b] sm:$0x1] %v470_v39  ;;  %483 = vst [vmem:[#allocation2 + $0x87] sm:$0x1] %v481_v40  ;;  %v511_v51 = vadd.f32 %v510_v44, %v509_v33  ;;  %v522_v52 = vadd.f32 %v521_v45, %v520_v34  ;;  %v572_v53 = vmul.f32 %v1444_v42, %v1444_v42  ;;  %v541_v56 = vrot.slane %v540_v9, 4 }
  0x62   :  { %493 = vst [vmem:[#allocation2 + $0x34] sm:$0x1] %v492_v43  ;;  %v502_v54 = vadd.f32 %v501_v47, %v500_v49  ;;  %v532_v55 = vrot.slane %v531_v48, 2  ;;  %v551_v57 = vsel %vm16_vm0, %v550_v50, 0.0  ;;  %v562_v61 = vsel %vm16_vm0, %v561_v21, 0.0 }
  0x63   :  { %v512_v58 = vrot.slane %v511_v51, 1  ;;  %v523_v59 = vrot.slane %v522_v52, 1  ;;  %v552_v60 = vrot.slane %v551_v57, 4  ;;  %v1071_v37 = vld [vmem:[%s1618_s0 + $0x18] sm:$0xf]  ;;  %v542_v63 = vadd.f32 %v541_v56, %v540_v9 }
  0x64   :  { %503 = vst [vmem:[#allocation2 + $0x35] sm:$0x1] %v502_v54  ;;  %v533_v62 = vadd.f32 %v532_v55, %v531_v48  ;;  %v563_v2 = vrot.slane %v562_v61, 4  ;;  %504 = vst [vmem:[#allocation2 + $0x40] sm:$0x1] %v502_v54  ;;  %v573_v3 = vsel %vm16_vm0, %v572_v53, 0.0  ;;  %v582_v15 = vmul.f32 %v1071_v37, %v1444_v42 }
  0x65   :  { %v513_v7 = vadd.f32 %v512_v58, %v511_v51  ;;  %v524_v8 = vadd.f32 %v523_v59, %v522_v52  ;;  %v553_v10 = vadd.f32 %v552_v60, %v551_v57  ;;  %v574_v11 = vrot.slane %v573_v3, 4  ;;  %v1075_v43 = vld [vmem:[%s1618_s0 + $0x28] sm:$0xf]  ;;  %v1076_v44 = vld [vmem:[%s1618_s0 + $0x2c] sm:$0xf] }
  0x66   :  { %v534_v12 = vrot.slane %v533_v62, 1  ;;  %v543_v13 = vrot.slane %v542_v63, 2  ;;  %v564_v14 = vadd.f32 %v563_v2, %v562_v61  ;;  %v593_v19 = vmul.f32 %v1072_v4, %v1444_v42  ;;  %v1486_v50 = vld [vmem:[%s1618_s0 + $0x18] sm:$0xf]  ;;  %v1078_v53 = vld [vmem:[%s1618_s0 + $0x1c] sm:$0xf] }
  0x67   :  { %v881_v16 = vld [vmem:[#allocation2 + $0x28] sm:$0xff]  ;;  %514 = vst [vmem:[#allocation2 + $0x36] sm:$0x1] %v513_v7  ;;  %525 = vst [vmem:[#allocation2 + $0x37] sm:$0x1] %v524_v8  ;;  %v554_v17 = vrot.slane %v553_v10, 2  ;;  %v575_v18 = vadd.f32 %v574_v11, %v573_v3  ;;  %v604_v20 = vmul.f32 %v1073_v5, %v1444_v42  ;;  %v615_v38 = vmul.f32 %v1074_v25, %v1444_v42 }
  0x68   :  { %515 = vst [vmem:[#allocation2 + $0x4c] sm:$0x1] %v513_v7  ;;  %526 = vst [vmem:[#allocation2 + $0x58] sm:$0x1] %v524_v8  ;;  %v1107_v22 = vpack.c.bf16 %v881_v16, %v880_v6  ;;  %v535_v23 = vadd.f32 %v534_v12, %v533_v62  ;;  %v544_v1 = vadd.f32 %v543_v13, %v542_v63  ;;  %v565_v24 = vrot.slane %v564_v14, 2 }
  0x69   :  { %v555_v26 = vadd.f32 %v554_v17, %v553_v10  ;;  %v576_v27 = vrot.slane %v575_v18, 2  ;;  %v583_v28 = vsel %vm16_vm0, %v582_v15, 0.0  ;;  %v594_v29 = vsel %vm16_vm0, %v593_v19, 0.0  ;;  %v1079_v6 = vld [vmem:[%s1618_s0 + $0x20] sm:$0xf] }
  0x6a   :  { %1108 = vmatpush1.bf16.msra.mxu0 %v1107_v22  ;;  %1138 = vmatpush1.bf16.msra.mxu1 %v1107_v22  ;;  %536 = vst [vmem:[#allocation2 + $0x38] sm:$0x1] %v535_v23  ;;  %v545_v30 = vrot.slane %v544_v1, 1  ;;  %v566_v31 = vadd.f32 %v565_v24, %v564_v14  ;;  %537 = vst [vmem:[#allocation2 + $0x64] sm:$0x1] %v535_v23  ;;  %v584_v32 = vrot.slane %v583_v28, 4 }
  0x6b   :  { %v595_v33 = vrot.slane %v594_v29, 4  ;;  %1109 = vmatprep.subr.bf16.mxu0 %v1154_v0  ;;  %1130 = vmatprep.subr.bf16.mxu1 %v1154_v0  ;;  %v556_v34 = vrot.slane %v555_v26, 1  ;;  %v577_v35 = vadd.f32 %v576_v27, %v575_v18  ;;  %v605_v36 = vsel %vm16_vm0, %v604_v20, 0.0  ;;  %v1080_v12 = vld [vmem:[%s1618_s0 + $0x24] sm:$0xf] }
  0x6c   :  { %v546_v39 = vadd.f32 %v545_v30, %v544_v1  ;;  %v567_v40 = vrot.slane %v566_v31, 1  ;;  %v585_v49 = vadd.f32 %v584_v32, %v583_v28  ;;  %v606_v47 = vrot.slane %v605_v36, 4  ;;  %v1082_v32 = vld [vmem:[%s1618_s0 + $0x2c] sm:$0xf] }
  0x6d   :  { %v596_v41 = vadd.f32 %v595_v33, %v594_v29  ;;  %v557_v45 = vadd.f32 %v556_v34, %v555_v26  ;;  %v578_v46 = vrot.slane %v577_v35, 1  ;;  %v616_v48 = vsel %vm16_vm0, %v615_v38, 0.0 }
  0x6e   :  { %547 = vst [vmem:[#allocation2 + $0x39] sm:$0x1] %v546_v39  ;;  %v568_v21 = vadd.f32 %v567_v40, %v566_v31  ;;  %548 = vst [vmem:[#allocation2 + $0x70] sm:$0x1] %v546_v39  ;;  %v586_v51 = vrot.slane %v585_v49, 2  ;;  %v617_v9 = vrot.slane %v616_v48, 4  ;;  %v607_v55 = vadd.f32 %v606_v47, %v605_v36 }
  0x6f   :  { %v597_v52 = vrot.slane %v596_v41, 2  ;;  %558 = vst [vmem:[#allocation2 + $0x3a] sm:$0x1] %v557_v45  ;;  %559 = vst [vmem:[#allocation2 + $0x7c] sm:$0x1] %v557_v45  ;;  %v579_v54 = vadd.f32 %v578_v46, %v577_v35  ;;  %v626_v56 = vmul.f32 %v1075_v43, %v1444_v42  ;;  %v637_v57 = vmul.f32 %v1076_v44, %v1444_v42  ;;  %v882_v17 = vld [vmem:[#allocation2 + $0x30] sm:$0xff] }
  0x70   :  { %569 = vst [vmem:[#allocation2 + $0x3b] sm:$0x1] %v568_v21  ;;  %570 = vst [vmem:[#allocation2 + $0x88] sm:$0x1] %v568_v21  ;;  %v587_v58 = vadd.f32 %v586_v51, %v585_v49  ;;  %v618_v60 = vadd.f32 %v617_v9, %v616_v48  ;;  %v648_v61 = vmul.f32 %v1486_v50, %v1486_v50  ;;  %v608_v37 = vrot.slane %v607_v55, 2 }
  0x71   :  { %v598_v59 = vadd.f32 %v597_v52, %v596_v41  ;;  %580 = vst [vmem:[#allocation2 + $0x41] sm:$0x1] %v579_v54  ;;  %v627_v62 = vsel %vm16_vm0, %v626_v56, 0.0  ;;  %v638_v63 = vsel %vm16_vm0, %v637_v57, 0.0  ;;  %v658_v2 = vmul.f32 %v1078_v53, %v1486_v50  ;;  %v1081_v31 = vld [vmem:[%s1618_s0 + $0x28] sm:$0xf] }
  0x72   :  { %v588_v3 = vrot.slane %v587_v58, 1  ;;  %v619_v5 = vrot.slane %v618_v60, 2  ;;  %v628_v42 = vrot.slane %v627_v62, 4  ;;  %v609_v7 = vadd.f32 %v608_v37, %v607_v55  ;;  %v1083_v51 = vld [vmem:[%s1618_s0 + $0x1c] sm:$0xf] }
  0x73   :  { %v599_v4 = vrot.slane %v598_v59, 1  ;;  %v639_v8 = vrot.slane %v638_v63, 4  ;;  %v649_v10 = vsel %vm16_vm0, %v648_v61, 0.0  ;;  %v659_v11 = vsel %vm16_vm0, %v658_v2, 0.0 }
  0x74   :  { %v589_v13 = vadd.f32 %v588_v3, %v587_v58  ;;  %v620_v15 = vadd.f32 %v619_v5, %v618_v60  ;;  %v629_v16 = vadd.f32 %v628_v42, %v627_v62  ;;  %v610_v18 = vrot.slane %v609_v7, 1  ;;  %v1085_v62 = vld [vmem:[%s1618_s0 + $0x24] sm:$0xf] }
  0x75   :  { %v600_v14 = vadd.f32 %v599_v4, %v598_v59  ;;  %v640_v19 = vadd.f32 %v639_v8, %v638_v63  ;;  %v650_v20 = vrot.slane %v649_v10, 4  ;;  %v660_v22 = vrot.slane %v659_v11, 4  ;;  %v1086_v8 = vld [vmem:[%s1618_s0 + $0x28] sm:$0xf] }
  0x76   :  { %590 = vst [vmem:[#allocation2 + $0x42] sm:$0x1] %v589_v13  ;;  %591 = vst [vmem:[#allocation2 + $0x4d] sm:$0x1] %v589_v13  ;;  %v621_v23 = vrot.slane %v620_v15, 1  ;;  %v630_v1 = vrot.slane %v629_v16, 2  ;;  %v669_v24 = vmul.f32 %v1079_v6, %v1486_v50  ;;  %v680_v25 = vmul.f32 %v1080_v12, %v1486_v50 }
  0x77   :  { %601 = vst [vmem:[#allocation2 + $0x43] sm:$0x1] %v600_v14  ;;  %602 = vst [vmem:[#allocation2 + $0x59] sm:$0x1] %v600_v14  ;;  %v883_v26 = vld [vmem:[#allocation2 + $0x38] sm:$0xff]  ;;  %v611_v27 = vadd.f32 %v610_v18, %v609_v7  ;;  %v641_v28 = vrot.slane %v640_v19, 2  ;;  %v651_v29 = vadd.f32 %v650_v20, %v649_v10  ;;  %v661_v30 = vadd.f32 %v660_v22, %v659_v11 }
  0x78   :  { %v1110_v33 = vpack.c.bf16 %v883_v26, %v882_v17  ;;  %v622_v34 = vadd.f32 %v621_v23, %v620_v15  ;;  %v631_v35 = vadd.f32 %v630_v1, %v629_v16  ;;  %v670_v36 = vsel %vm16_vm0, %v669_v24, 0.0  ;;  %v1087_v18 = vld [vmem:[%s1618_s0 + $0x2c] sm:$0xf] }
  0x79   :  { %612 = vst [vmem:[#allocation2 + $0x44] sm:$0x1] %v611_v27  ;;  %v642_v38 = vadd.f32 %v641_v28, %v640_v19  ;;  %v652_v39 = vrot.slane %v651_v29, 2  ;;  %v662_v40 = vrot.slane %v661_v30, 2  ;;  %613 = vst [vmem:[#allocation2 + $0x65] sm:$0x1] %v611_v27  ;;  %v691_v44 = vmul.f32 %v1081_v31, %v1486_v50 }
  0x7a   :  { %v671_v49 = vrot.slane %v670_v36, 4  ;;  %1111 = vmatpush1.bf16.msra.mxu0 %v1110_v33  ;;  %1139 = vmatpush1.bf16.msra.mxu1 %v1110_v33  ;;  %623 = vst [vmem:[#allocation2 + $0x45] sm:$0x1] %v622_v34  ;;  %v632_v41 = vrot.slane %v631_v35, 1  ;;  %624 = vst [vmem:[#allocation2 + $0x71] sm:$0x1] %v622_v34  ;;  %v702_v45 = vmul.f32 %v1082_v32, %v1486_v50 }
  0x7b   :  { %v681_v43 = vsel %vm16_vm0, %v680_v25, 0.0  ;;  %1112 = vmatprep.subr.bf16.mxu0 %v1154_v0  ;;  %1131 = vmatprep.subr.bf16.mxu1 %v1154_v0  ;;  %v643_v46 = vrot.slane %v642_v38, 1  ;;  %v653_v47 = vadd.f32 %v652_v39, %v651_v29  ;;  %v663_v48 = vadd.f32 %v662_v40, %v661_v30  ;;  %v1084_v50 = vld [vmem:[%s1618_s0 + $0x20] sm:$0xf] }
  0x7c   :  { %v672_v21 = vadd.f32 %v671_v49, %v670_v36  ;;  %v633_v52 = vadd.f32 %v632_v41, %v631_v35  ;;  %v682_v9 = vrot.slane %v681_v43, 4  ;;  %v692_v53 = vsel %vm16_vm0, %v691_v44, 0.0  ;;  %v1088_v49 = vld [vmem:[%s1618_s0 + $0x20] sm:$0xf]  ;;  %v1089_v41 = vld [vmem:[%s1618_s0 + $0x24] sm:$0xf] }
  0x7d   :  { %v703_v54 = vsel %vm16_vm0, %v702_v45, 0.0  ;;  %v644_v55 = vadd.f32 %v643_v46, %v642_v38  ;;  %v654_v56 = vrot.slane %v653_v47, 1  ;;  %v664_v57 = vrot.slane %v663_v48, 1 }
  0x7e   :  { %v673_v58 = vrot.slane %v672_v21, 2  ;;  %634 = vst [vmem:[#allocation2 + $0x46] sm:$0x1] %v633_v52  ;;  %635 = vst [vmem:[#allocation2 + $0x7d] sm:$0x1] %v633_v52  ;;  %v683_v59 = vadd.f32 %v682_v9, %v681_v43  ;;  %v693_v60 = vrot.slane %v692_v53, 4  ;;  %v713_v37 = vmul.f32 %v1083_v51, %v1083_v51 }
  0x7f   :  { %v704_v61 = vrot.slane %v703_v54, 4  ;;  %645 = vst [vmem:[#allocation2 + $0x47] sm:$0x1] %v644_v55  ;;  %v655_v63 = vadd.f32 %v654_v56, %v653_v47  ;;  %v665_v2 = vadd.f32 %v664_v57, %v663_v48  ;;  %646 = vst [vmem:[#allocation2 + $0x89] sm:$0x1] %v644_v55  ;;  %v723_v4 = vmul.f32 %v1084_v50, %v1083_v51 }
  0x80   :  { %v674_v3 = vadd.f32 %v673_v58, %v672_v21  ;;  %v684_v5 = vrot.slane %v683_v59, 2  ;;  %v694_v42 = vadd.f32 %v693_v60, %v692_v53  ;;  %v714_v7 = vsel %vm16_vm0, %v713_v37, 0.0  ;;  %v1090_v48 = vld [vmem:[%s1618_s0 + $0x28] sm:$0xf]  ;;  %v1091_v60 = vld [vmem:[%s1618_s0 + $0x2c] sm:$0xf] }
  0x81   :  { %v705_v6 = vadd.f32 %v704_v61, %v703_v54  ;;  %656 = vst [vmem:[#allocation2 + $0x4e] sm:$0x1] %v655_v63  ;;  %666 = vst [vmem:[#allocation2 + $0x4f] sm:$0x1] %v665_v2  ;;  %v715_v11 = vrot.slane %v714_v7, 4  ;;  %v724_v12 = vsel %vm16_vm0, %v723_v4, 0.0  ;;  %v734_v13 = vmul.f32 %v1085_v62, %v1083_v51 }
  0x82   :  { %667 = vst [vmem:[#allocation2 + $0x5a] sm:$0x1] %v665_v2  ;;  %v675_v10 = vrot.slane %v674_v3, 1  ;;  %v685_v14 = vadd.f32 %v684_v5, %v683_v59  ;;  %v695_v15 = vrot.slane %v694_v42, 2  ;;  %v725_v17 = vrot.slane %v724_v12, 4 }
  0x83   :  { %v706_v16 = vrot.slane %v705_v6, 2  ;;  %v716_v20 = vadd.f32 %v715_v11, %v714_v7  ;;  %v735_v22 = vsel %vm16_vm0, %v734_v13, 0.0  ;;  %v745_v23 = vmul.f32 %v1086_v8, %v1083_v51  ;;  %v1092_v61 = vld [vmem:[%s1618_s0 + $0x24] sm:$0xf] }
  0x84   :  { %v676_v19 = vadd.f32 %v675_v10, %v674_v3  ;;  %v686_v1 = vrot.slane %v685_v14, 1  ;;  %v696_v24 = vadd.f32 %v695_v15, %v694_v42  ;;  %v726_v26 = vadd.f32 %v725_v17, %v724_v12  ;;  %v1093_v15 = vld [vmem:[%s1618_s0 + $0x28] sm:$0xf] }
  0x85   :  { %v707_v25 = vadd.f32 %v706_v16, %v705_v6  ;;  %v717_v27 = vrot.slane %v716_v20, 2  ;;  %v736_v28 = vrot.slane %v735_v22, 4  ;;  %v746_v29 = vsel %vm16_vm0, %v745_v23, 0.0 }
  0x86   :  { %677 = vst [vmem:[#allocation2 + $0x50] sm:$0x1] %v676_v19  ;;  %v756_v30 = vmul.f32 %v1087_v18, %v1083_v51  ;;  %678 = vst [vmem:[#allocation2 + $0x66] sm:$0x1] %v676_v19  ;;  %v884_v31 = vld [vmem:[#allocation2 + $0x40] sm:$0xff]  ;;  %v687_v32 = vadd.f32 %v686_v1, %v685_v14  ;;  %v697_v33 = vrot.slane %v696_v24, 1  ;;  %v767_v50 = vmul.f32 %v1088_v49, %v1088_v49 }
  0x87   :  { %v708_v34 = vrot.slane %v707_v25, 1  ;;  %v727_v35 = vrot.slane %v726_v26, 2  ;;  %v718_v36 = vadd.f32 %v717_v27, %v716_v20  ;;  %v737_v38 = vadd.f32 %v736_v28, %v735_v22  ;;  %v1094_v20 = vld [vmem:[%s1618_s0 + $0x2c] sm:$0xf] }
  0x88   :  { %v747_v39 = vrot.slane %v746_v29, 4  ;;  %v757_v40 = vsel %vm16_vm0, %v756_v30, 0.0  ;;  %v885_v43 = vld [vmem:[#allocation2 + $0x48] sm:$0xff]  ;;  %688 = vst [vmem:[#allocation2 + $0x51] sm:$0x1] %v687_v32  ;;  %v698_v44 = vadd.f32 %v697_v33, %v696_v24  ;;  %v777_v55 = vmul.f32 %v1089_v41, %v1088_v49 }
  0x89   :  { %v709_v45 = vadd.f32 %v708_v34, %v707_v25  ;;  %v728_v46 = vadd.f32 %v727_v35, %v726_v26  ;;  %v758_v47 = vrot.slane %v757_v40, 4  ;;  %689 = vst [vmem:[#allocation2 + $0x72] sm:$0x1] %v687_v32  ;;  %v1113_v21 = vpack.c.bf16 %v885_v43, %v884_v31  ;;  %v1095_v25 = vld [vmem:[%s1618_s0 + $0x28] sm:$0xf] }
  0x8a   :  { %v719_v51 = vrot.slane %v718_v36, 1  ;;  %v738_v52 = vrot.slane %v737_v38, 2  ;;  %v748_v9 = vadd.f32 %v747_v39, %v746_v29  ;;  %699 = vst [vmem:[#allocation2 + $0x52] sm:$0x1] %v698_v44  ;;  %700 = vst [vmem:[#allocation2 + $0x7e] sm:$0x1] %v698_v44  ;;  %v788_v59 = vmul.f32 %v1090_v48, %v1088_v49 }
  0x8b   :  { %710 = vst [vmem:[#allocation2 + $0x53] sm:$0x1] %v709_v45  ;;  %v729_v53 = vrot.slane %v728_v46, 1  ;;  %v759_v54 = vadd.f32 %v758_v47, %v757_v40  ;;  %711 = vst [vmem:[#allocation2 + $0x8a] sm:$0x1] %v709_v45  ;;  %1114 = vmatpush1.bf16.msra.mxu0 %v1113_v21  ;;  %1140 = vmatpush1.bf16.msra.mxu1 %v1113_v21  ;;  %v768_v63 = vsel %vm16_vm0, %v767_v50, 0.0 }
  0x8c   :  { %v720_v56 = vadd.f32 %v719_v51, %v718_v36  ;;  %v739_v57 = vadd.f32 %v738_v52, %v737_v38  ;;  %v749_v58 = vrot.slane %v748_v9, 2  ;;  %1115 = vmatprep.subr.bf16.mxu0 %v1154_v0  ;;  %1132 = vmatprep.subr.bf16.mxu1 %v1154_v0  ;;  %v778_v2 = vsel %vm16_vm0, %v777_v55, 0.0  ;;  %v1096_v43 = vld [vmem:[%s1618_s0 + $0x2c] sm:$0xf] }
  0x8d   :  { %v730_v37 = vadd.f32 %v729_v53, %v728_v46  ;;  %v760_v62 = vrot.slane %v759_v54, 2  ;;  %v769_v5 = vrot.slane %v768_v63, 4  ;;  %v779_v42 = vrot.slane %v778_v2, 4  ;;  %v1097_v48 = vld [vmem:[%s1618_s0 + $0x2c] sm:$0xf] }
  0x8e   :  { %721 = vst [vmem:[#allocation2 + $0x5b] sm:$0x1] %v720_v56  ;;  %v740_v3 = vrot.slane %v739_v57, 1  ;;  %v750_v4 = vadd.f32 %v749_v58, %v748_v9  ;;  %v789_v7 = vsel %vm16_vm0, %v788_v59, 0.0  ;;  %v799_v8 = vmul.f32 %v1091_v60, %v1088_v49 }
  0x8f   :  { %731 = vst [vmem:[#allocation2 + $0x5c] sm:$0x1] %v730_v37  ;;  %v761_v6 = vadd.f32 %v760_v62, %v759_v54  ;;  %732 = vst [vmem:[#allocation2 + $0x67] sm:$0x1] %v730_v37  ;;  %v810_v10 = vmul.f32 %v1092_v61, %v1092_v61  ;;  %v770_v13 = vadd.f32 %v769_v5, %v768_v63  ;;  %v790_v17 = vrot.slane %v789_v7, 4 }
  0x90   :  { %v741_v11 = vadd.f32 %v740_v3, %v739_v57  ;;  %v751_v12 = vrot.slane %v750_v4, 1  ;;  %v780_v14 = vadd.f32 %v779_v42, %v778_v2  ;;  %v800_v18 = vsel %vm16_vm0, %v799_v8, 0.0 }
  0x91   :  { %v762_v16 = vrot.slane %v761_v6, 1  ;;  %v811_v19 = vsel %vm16_vm0, %v810_v10, 0.0  ;;  %v771_v23 = vrot.slane %v770_v13, 2  ;;  %v801_v24 = vrot.slane %v800_v18, 4 }
  0x92   :  { %742 = vst [vmem:[#allocation2 + $0x5d] sm:$0x1] %v741_v11  ;;  %v752_v22 = vadd.f32 %v751_v12, %v750_v4  ;;  %743 = vst [vmem:[#allocation2 + $0x73] sm:$0x1] %v741_v11  ;;  %v781_v1 = vrot.slane %v780_v14, 2  ;;  %v791_v27 = vadd.f32 %v790_v17, %v789_v7  ;;  %v812_v28 = vrot.slane %v811_v19, 4 }
  0x93   :  { %v763_v26 = vadd.f32 %v762_v16, %v761_v6  ;;  %v820_v29 = vmul.f32 %v1093_v15, %v1092_v61  ;;  %v772_v30 = vadd.f32 %v771_v23, %v770_v13  ;;  %v802_v32 = vadd.f32 %v801_v24, %v800_v18  ;;  %v886_v56 = vld [vmem:[#allocation2 + $0x50] sm:$0xff]  ;;  %v873_v11 = vld [vmem:[%s1619_s1 + $0x8] sm:$0xff]  ;;  %v875_v15 = vld [vmem:[%s1619_s1 + $0x18] sm:$0x3] }
  0x94   :  { %753 = vst [vmem:[#allocation2 + $0x5e] sm:$0x1] %v752_v22  ;;  %754 = vst [vmem:[#allocation2 + $0x7f] sm:$0x1] %v752_v22  ;;  %v782_v31 = vadd.f32 %v781_v1, %v780_v14  ;;  %v831_v33 = vmul.f32 %v1094_v20, %v1092_v61  ;;  %v792_v34 = vrot.slane %v791_v27, 2  ;;  %v813_v35 = vadd.f32 %v812_v28, %v811_v19 }
  0x95   :  { %764 = vst [vmem:[#allocation2 + $0x5f] sm:$0x1] %v763_v26  ;;  %765 = vst [vmem:[#allocation2 + $0x8b] sm:$0x1] %v763_v26  ;;  %v821_v36 = vsel %vm16_vm0, %v820_v29, 0.0  ;;  %v842_v38 = vmul.f32 %v1095_v25, %v1095_v25  ;;  %v773_v39 = vrot.slane %v772_v30, 1  ;;  %v852_v59 = vmul.f32 %v1096_v43, %v1095_v25  ;;  %1098 = vmatprep.mubr.msk.f32.mxu0 %vm906_vm1, %v873_v11 }
  0x96   :  { %v783_v40 = vrot.slane %v782_v31, 1  ;;  %v803_v49 = vrot.slane %v802_v32, 2  ;;  %v822_v41 = vrot.slane %v821_v36, 4  ;;  %v793_v44 = vadd.f32 %v792_v34, %v791_v27  ;;  %v895_v22 = vld [vmem:[%s1620_s2 + $0x8] sm:$0x3]  ;;  %1099 = vmatprep.mubr.msk.f32.mxu1 %vm906_vm1, %v875_v15  ;;  %v888_v27 = vld [vmem:[#allocation2 + $0x60] sm:$0xff] }
  0x97   :  { %v814_v45 = vrot.slane %v813_v35, 2  ;;  %v832_v46 = vsel %vm16_vm0, %v831_v33, 0.0  ;;  %v843_v47 = vsel %vm16_vm0, %v842_v38, 0.0  ;;  %v774_v21 = vadd.f32 %v773_v39, %v772_v30 }
  0x98   :  { %v784_v51 = vadd.f32 %v783_v40, %v782_v31  ;;  %v804_v52 = vadd.f32 %v803_v49, %v802_v32  ;;  %v823_v9 = vadd.f32 %v822_v41, %v821_v36  ;;  %v794_v53 = vrot.slane %v793_v44, 1  ;;  %v894_v32 = vld [vmem:[%s1620_s2] sm:$0xff] }
  0x99   :  { %v815_v54 = vadd.f32 %v814_v45, %v813_v35  ;;  %v833_v50 = vrot.slane %v832_v46, 4  ;;  %v844_v55 = vrot.slane %v843_v47, 4  ;;  %775 = vst [vmem:[#allocation2 + $0x68] sm:$0x1] %v774_v21  ;;  %v863_v60 = vmul.f32 %v1097_v48, %v1097_v48 }
  0x9a   :  { %785 = vst [vmem:[#allocation2 + $0x69] sm:$0x1] %v784_v51  ;;  %v805_v57 = vrot.slane %v804_v52, 1  ;;  %786 = vst [vmem:[#allocation2 + $0x74] sm:$0x1] %v784_v51  ;;  %v824_v58 = vrot.slane %v823_v9, 2  ;;  %v795_v61 = vadd.f32 %v794_v53, %v793_v44 }
  0x9b   :  { %v816_v37 = vrot.slane %v815_v54, 1  ;;  %v834_v62 = vadd.f32 %v833_v50, %v832_v46  ;;  %v845_v63 = vadd.f32 %v844_v55, %v843_v47  ;;  %v853_v5 = vsel %vm16_vm0, %v852_v59, 0.0  ;;  %v891_v40 = vld [vmem:[#allocation2 + $0x78] sm:$0xff]  ;;  %v872_v46 = vld [vmem:[%s1619_s1] sm:$0xff]  ;;  %v874_v47 = vld [vmem:[%s1619_s1 + $0x10] sm:$0x3] }
  0x9c   :  { %v887_v2 = vld [vmem:[#allocation2 + $0x58] sm:$0xff]  ;;  %v806_v3 = vadd.f32 %v805_v57, %v804_v52  ;;  %v825_v4 = vadd.f32 %v824_v58, %v823_v9  ;;  %v864_v42 = vsel %vm16_vm0, %v863_v60, 0.0  ;;  %796 = vst [vmem:[#allocation2 + $0x6a] sm:$0x1] %v795_v61  ;;  %797 = vst [vmem:[#allocation2 + $0x80] sm:$0x1] %v795_v61 }
  0x9d   :  { %v1116_v6 = vpack.c.bf16 %v887_v2, %v886_v56  ;;  %v817_v7 = vadd.f32 %v816_v37, %v815_v54  ;;  %v835_v8 = vrot.slane %v834_v62, 2  ;;  %v846_v10 = vrot.slane %v845_v63, 2 }
  0x9e   :  { %807 = vst [vmem:[#allocation2 + $0x6b] sm:$0x1] %v806_v3  ;;  %808 = vst [vmem:[#allocation2 + $0x8c] sm:$0x1] %v806_v3  ;;  %v826_v12 = vrot.slane %v825_v4, 1  ;;  %v854_v13 = vrot.slane %v853_v5, 4 }
  0x9f   :  { %v865_v14 = vrot.slane %v864_v42, 4  ;;  %1117 = vmatpush1.bf16.msra.mxu0 %v1116_v6  ;;  %1141 = vmatpush1.bf16.msra.mxu1 %v1116_v6  ;;  %818 = vst [vmem:[#allocation2 + $0x75] sm:$0x1] %v817_v7  ;;  %v836_v16 = vadd.f32 %v835_v8, %v834_v62  ;;  %v847_v17 = vadd.f32 %v846_v10, %v845_v63  ;;  %v1155_v26 = vmov 0  }
  0xa0   :  { %1118 = vmatprep.subr.bf16.mxu0 %v1154_v0  ;;  %1133 = vmatprep.subr.bf16.mxu1 %v1154_v0  ;;  %v827_v18 = vadd.f32 %v826_v12, %v825_v4  ;;  %v855_v19 = vadd.f32 %v854_v13, %v853_v5 }
  0xa1   :  { %v866_v20 = vadd.f32 %v865_v14, %v864_v42  ;;  %v837_v23 = vrot.slane %v836_v16, 1  ;;  %v848_v1 = vrot.slane %v847_v17, 1  ;;  %1147 = vset.pattern.permute.xlu0 %v1155_v26 }
  0xa2   :  { %828 = vst [vmem:[#allocation2 + $0x76] sm:$0x1] %v827_v18  ;;  %829 = vst [vmem:[#allocation2 + $0x81] sm:$0x1] %v827_v18  ;;  %v856_v24 = vrot.slane %v855_v19, 2  ;;  %903 = vperm.xlu0 %1147, %v895_v22  }
  0xa3   :  { %v867_v25 = vrot.slane %v866_v20, 2  ;;  %v838_v28 = vadd.f32 %v837_v23, %v836_v16  ;;  %v849_v29 = vadd.f32 %v848_v1, %v847_v17 }
  0xa4   :  { %v857_v30 = vadd.f32 %v856_v24, %v855_v19 }
  0xa5   :  { %v868_v31 = vadd.f32 %v867_v25, %v866_v20  ;;  %v889_v33 = vld [vmem:[#allocation2 + $0x68] sm:$0xff]  ;;  %839 = vst [vmem:[#allocation2 + $0x77] sm:$0x1] %v838_v28  ;;  %840 = vst [vmem:[#allocation2 + $0x8d] sm:$0x1] %v838_v28 }
  0xa6   :  { %850 = vst [vmem:[#allocation2 + $0x82] sm:$0x1] %v849_v29  ;;  %v1119_v34 = vpack.c.bf16 %v889_v33, %v888_v27  ;;  %v858_v35 = vrot.slane %v857_v30, 1  ;;  %898 = vperm.xlu0 %1147, %v894_v32  }
  0xa7   :  { %v869_v36 = vrot.slane %v868_v31, 1 }
  0xa8   :  { %1120 = vmatpush1.bf16.msra.mxu0 %v1119_v34  ;;  %1142 = vmatpush1.bf16.msra.mxu1 %v1119_v34  ;;  %v859_v38 = vadd.f32 %v858_v35, %v857_v30 }
  0xa9   :  { %v870_v39 = vadd.f32 %v869_v36, %v868_v31  ;;  %1121 = vmatprep.subr.bf16.mxu0 %v1154_v0  ;;  %1134 = vmatprep.subr.bf16.mxu1 %v1154_v0 }
  0xaa   :  { %860 = vst [vmem:[#allocation2 + $0x83] sm:$0x1] %v859_v38  ;;  %861 = vst [vmem:[#allocation2 + $0x8e] sm:$0x1] %v859_v38 }
  0xab   :  { %871 = vst [vmem:[#allocation2 + $0x8f] sm:$0x1] %v870_v39 }
  0xac   :  { %v890_v49 = vld [vmem:[#allocation2 + $0x70] sm:$0xff] }
  0xad   :  { %v1122_v41 = vpack.c.bf16 %v891_v40, %v890_v49 }
  0xaf   :  { %1123 = vmatpush1.bf16.msra.mxu0 %v1122_v41  ;;  %1143 = vmatpush1.bf16.msra.mxu1 %v1122_v41 }
  0xb0   :  { %1124 = vmatprep.subr.bf16.mxu0 %v1154_v0  ;;  %1135 = vmatprep.subr.bf16.mxu1 %v1154_v0 }
  0xb1   :  { %v892_v43 = vld [vmem:[#allocation2 + $0x80] sm:$0xff] }
  0xb2   :  { %v893_v44 = vld [vmem:[#allocation2 + $0x88] sm:$0xff] }
  0xb3   :  { %v1125_v45 = vpack.c.bf16 %v893_v44, %v892_v43 }
  0xb5   :  { %1126 = vmatpush1.bf16.msra.mxu0 %v1125_v45  ;;  %1144 = vmatpush1.bf16.msra.mxu1 %v1125_v45 }
  0xb8   :  { %978 = vmatmul.mubr.f32.vlgmr.msra.gmra.mrb[0].mxu0 %v872_v46  ;;  %983 = vmatmul.mubr.f32.vlgmr.msra.gmra.mrb[0].mxu1 %v874_v47 }
 0x121   :  { %v904_v48 = vpop.permute.xlu0 %903 }
 0x125   :  { %v899_v21 = vpop.permute.xlu0 %898 }
 0x18b   :  { %v979_v51 = vpop.f32.mrb[0].mxu0  ;;  %v984_v52 = vpop.f32.mrb[0].mxu1 }
 0x18c   :  { %v980_v0 = vadd.f32 %v979_v51, %v899_v21  ;;  %v985_v9 = vadd.f32 %v984_v52, %v904_v48  ;;  %v981_v53 = vpop.f32.mrb[1].mxu0  ;;  %v986_v54 = vpop.f32.mrb[1].mxu1 }
 0x18e   :  { %v989_v50 = vsel %vm988_vm2, %v985_v9, -inf }
 0x18f   :  { %v990_v55 = vmax.f32 %v980_v0, %v989_v50 }
 0x191   :  { %v991_v56 = vrot.slane %v990_v55, 4 }
 0x193   :  { %v992_v57 = vmax.f32 %v990_v55, %v991_v56 }
 0x195   :  { %v993_v58 = vrot.slane %v992_v57, 2 }
 0x197   :  { %v994_v59 = vmax.f32 %v992_v57, %v993_v58 }
 0x199   :  { %v995_v60 = vrot.slane %v994_v59, 1 }
 0x19b   :  { %v996_v61 = vmax.f32 %v994_v59, %v995_v60 }
 0x19d   :  { %v997_v37 = vsub.f32 %v980_v0, %v996_v61  ;;  %v998_v62 = vsub.f32 %v985_v9, %v996_v61 }
 0x19f   :  { %v999_v63 = vmul.f32 1.442695, %v997_v37  ;;  %v1001_v2 = vmul.f32 1.442695, %v998_v62 }
 0x1a1   :  { %1148 = vpow2.f32 %v999_v63 }
 0x1a2   :  { %1150 = vpow2.f32 %v1001_v2 }
 0x1ab   :  { %v1149_v3 = vpop.eup %1148 }
 0x1ac   :  { %v1151_v4 = vpop.eup %1150 }
 0x1ad   :  { %v1003_v5 = vsel %vm988_vm2, %v1151_v4, 0.0 }
 0x1ae   :  { %v1004_v42 = vadd.f32 %v1149_v3, %v1003_v5 }
 0x1b0   :  { %v1005_v6 = vrot.slane %v1004_v42, 4 }
 0x1b2   :  { %v1006_v7 = vadd.f32 %v1005_v6, %v1004_v42 }
 0x1b4   :  { %v1007_v8 = vrot.slane %v1006_v7, 2 }
 0x1b6   :  { %v1008_v10 = vadd.f32 %v1007_v8, %v1006_v7 }
 0x1b8   :  { %v1009_v11 = vrot.slane %v1008_v10, 1 }
 0x1ba   :  { %v1010_v12 = vadd.f32 %v1009_v11, %v1008_v10 }
 0x1bc   :  { %1152 = vlog2.f32 %v1010_v12 }
 0x1c6   :  { %v1153_v13 = vpop.eup %1152 }
 0x1c7   :  { %v1012_v14 = vmul.f32 0.6931472, %v1153_v13 }
 0x1c9   :  { %v1013_v15 = vsub.f32 %v997_v37, %v1012_v14  ;;  %v1014_v16 = vsub.f32 %v998_v62, %v1012_v14 }
 0x1cb   :  { %1015 = vst [vmem:[%s1621_s3] sm:$0xff] %v1013_v15  ;;  %1016 = vst [vmem:[%s1621_s3 + $0x8] sm:$0x3] %v1014_v16 }

</bundles_post_ra>
